<compile_context>
chip_gen: v7x
topology: tpu7x:2x2x1
jax: 0.10.0
libtpu: 0.0.40
codegen_flags: <defaults>
</compile_context>

<pallas_src>
import functools

import numpy as np
import jax
import jax.numpy as jnp
from jax.experimental import pallas as pl
from jax.experimental.pallas import tpu as pltpu


def _round_up(x, m):
    return ((x + m - 1) // m) * m


def _toeplitz_7x7(k77, H, W):
    """(HW, HW) matrix T with T[p, q] = k77[dh+3, dw+3] for q = p + dh*W + dw and the
    neighbor inside the image (i.e. a padding=3 'same' cross-correlation)."""
    HW = H * W
    T = np.zeros((HW, HW), np.float32)
    for r in range(H):
        for c in range(W):
            p = r * W + c
            for dh in range(-3, 4):
                rr = r + dh
                if rr < 0 or rr >= H:
                    continue
                for dw in range(-3, 4):
                    cc = c + dw
                    if cc < 0 or cc >= W:
                        continue
                    T[p, rr * W + cc] = k77[dh + 3, dw + 3]
    return T


# ----------------------------------------------------------------------------
# The fused kernel (one batch element per grid step)
# ----------------------------------------------------------------------------

def _refusion_kernel(rgb_ref, evt_ref,
                     w0r_ref, b0r_ref, w0e_ref, b0e_ref,
                     cgw1_ref, cgb1_ref, cgw2_ref, cgb2_ref,
                     tmax_ref, tmean_ref,
                     w1_ref, b1_ref, wf_ref, bf_ref,
                     out_ref, sp3_ref,
                     *, H, W, C, PAD3):
    HW = H * W
    f32 = jnp.float32
    bf16 = jnp.bfloat16

    # Halo-only zeroing (top/bottom PAD3 row bands).  The body [PAD3:PAD3+HW] is fully
    # rewritten before any tap reads it; per-step so it is correct with per-core
    # scratches under "parallel" grid semantics.
    zhalo = jnp.zeros((PAD3, 2 * C), f32)
    sp3_ref[0:PAD3, :] = zhalo
    sp3_ref[PAD3 + HW:, :] = zhalo

    # Column index of each flattened pixel; hoisted masks for the horizontal 3x3 taps.
    col = jax.lax.broadcasted_iota(jnp.int32, (HW, 1), 0) % W
    ok_m1 = col >= 1          # tap dw = -1 stays inside the image
    ok_p1 = col <= W - 2      # tap dw = +1 stays inside the image

    def sigmoid(x):
        return pl.reciprocal(1.0 + jnp.exp(-x), approx=True)

    # ---- conv0_rgb / conv0_evt (1x1 conv == matmul + bias) ----
    rgb0 = jnp.dot(rgb_ref[...], w0r_ref[...], preferred_element_type=f32) + b0r_ref[...]
    evt0 = jnp.dot(evt_ref[...], w0e_ref[...], preferred_element_type=f32) + b0e_ref[...]

    # ---- mul / add fusion ----
    m = rgb0 * evt0
    rm = rgb0 + m
    em = evt0 + m

    # ---- ChannelGate: both streams through ONE block-diagonal (2C->2h->2C) MLP ----
    inv_hw = 1.0 / HW
    avg2 = jnp.concatenate([jnp.sum(rm, axis=0, keepdims=True),
                            jnp.sum(em, axis=0, keepdims=True)], axis=1) * inv_hw
    max2 = jnp.concatenate([jnp.max(rm, axis=0, keepdims=True),
                            jnp.max(em, axis=0, keepdims=True)], axis=1)
    pooled = jnp.concatenate([avg2, max2], axis=0)                          # (2, 2C)
    hid = jnp.maximum(
        jnp.dot(pooled, cgw1_ref[...], preferred_element_type=f32) + cgb1_ref[...], 0.0)
    att = jnp.dot(hid, cgw2_ref[...], preferred_element_type=f32) + cgb2_ref[...]
    scale2 = sigmoid(jnp.sum(att, axis=0, keepdims=True))                    # (1, 2C)
    scale_r = scale2[:, :C]
    scale_e = scale2[:, C:]

    # cross channel attention
    r1 = rm * (1.0 + em * scale_e)
    e1 = em * (1.0 + rm * scale_r)

    # ---- SpatialGate: ChannelPool (max | mean over C) + shared 7x7 conv expressed as
    #      two Toeplitz MXU matmuls (boundary zero-padding baked into the matrices) ----
    inv_c = 1.0 / C
    xmax = jnp.concatenate([jnp.max(r1, axis=1, keepdims=True),
                            jnp.max(e1, axis=1, keepdims=True)], axis=1)             # (HW, 2)
    xmean = jnp.concatenate([jnp.sum(r1, axis=1, keepdims=True),
                             jnp.sum(e1, axis=1, keepdims=True)], axis=1) * inv_c    # (HW, 2)
    g2 = (jnp.dot(tmax_ref[...], xmax.astype(bf16), preferred_element_type=f32) +
          jnp.dot(tmean_ref[...], xmean.astype(bf16), preferred_element_type=f32))   # (HW, 2)
    sg2 = sigmoid(g2)
    sg_r = sg2[:, 0:1]
    sg_e = sg2[:, 1:2]

    # cross spatial attention
    r12 = r1 * (1.0 + e1 * sg_e)
    e12 = e1 * (1.0 + r1 * sg_r)

    # ---- in-kernel 3x3 conv via zero-halo scratch + 9 unrolled MXU taps ----
    def conv3x3(w_tap_ref, n_out):
        acc = jnp.zeros((HW, n_out), f32)
        for dh in range(-1, 2):
            for dw in range(-1, 2):
                t = (dh + 1) * 3 + (dw + 1)
                s = PAD3 + dh * W + dw
                v = sp3_ref[s:s + HW, :]
                if dw == -1:
                    v = jnp.where(ok_m1, v, 0.0)
                elif dw == 1:
                    v = jnp.where(ok_p1, v, 0.0)
                acc = acc + jnp.dot(v, w_tap_ref[t], preferred_element_type=f32)
        return acc

    # conv1_rgb / conv1_evt (block-diagonal 2C->2C conv, BN folded) + ReLU; the two
    # stream halves are written straight into the scratch columns (no concat temp).
    sp3_ref[PAD3:PAD3 + HW, 0:C] = r12
    sp3_ref[PAD3:PAD3 + HW, C:2 * C] = e12
    y2 = jnp.maximum(conv3x3(w1_ref, 2 * C) + b1_ref[...], 0.0)
    rgb2 = y2[:, :C]
    evt2 = y2[:, C:]

    # mul / max merge + final 3x3 conv (2C -> C, BN folded) + ReLU
    sp3_ref[PAD3:PAD3 + HW, 0:C] = rgb2 * evt2
    sp3_ref[PAD3:PAD3 + HW, C:2 * C] = jnp.maximum(rgb2, evt2)
    out = jnp.maximum(conv3x3(wf_ref, C) + bf_ref[...], 0.0)
    out_ref[...] = out.astype(out_ref.dtype)


# ----------------------------------------------------------------------------
# Wrapper
# ----------------------------------------------------------------------------

def refusion_forward(rgb, evt, p):
    """rgb, evt: (B, H, W, C) NHWC.  Returns (B, H, W, C)."""
    B, H, W, C = rgb.shape
    HW = H * W
    h2 = p["cg_w1"].shape[1]          # 2 * (C // 16)
    PAD3 = _round_up(W + 1, 8)        # halo rows for 3x3 taps (|dh*W + dw| <= W+1)

    def batch_spec():
        return pl.BlockSpec((None, HW, C), lambda b: (b, 0, 0))

    def full(shape):
        nd = len(shape)
        return pl.BlockSpec(shape, lambda b, nd=nd: (0,) * nd)

    kernel = functools.partial(_refusion_kernel, H=H, W=W, C=C, PAD3=PAD3)
    out = pl.pallas_call(
        kernel,
        out_shape=jax.ShapeDtypeStruct((B, HW, C), jnp.float32),
        grid=(B,),
        in_specs=[
            batch_spec(), batch_spec(),
            full((C, C)), full((1, C)), full((C, C)), full((1, C)),
            full((2 * C, h2)), full((1, h2)), full((h2, 2 * C)), full((1, 2 * C)),
            full((HW, HW)), full((HW, HW)),
            full((9, 2 * C, 2 * C)), full((1, 2 * C)),
            full((9, 2 * C, C)), full((1, C)),
        ],
        out_specs=batch_spec(),
        scratch_shapes=[
            pltpu.VMEM((HW + 2 * PAD3, 2 * C), jnp.float32),   # 3x3 conv halo buffer
        ],
        compiler_params=pltpu.CompilerParams(dimension_semantics=("parallel",)),
    )(rgb.reshape(B, HW, C), evt.reshape(B, HW, C),
      p["w0r"], p["b0r"], p["w0e"], p["b0e"],
      p["cg_w1"], p["cg_b1"], p["cg_w2"], p["cg_b2"],
      p["tmax"], p["tmean"],
      p["w1bd"], p["b1bd"], p["wf"], p["bf"])
    return out.reshape(B, H, W, C)


# ----------------------------------------------------------------------------
# Parameters (deterministic synthetic init; BN folded, eval mode; kernel layouts)
# ----------------------------------------------------------------------------

def init_params(key, C, H, W):
    h = max(C // 16, 1)
    keys = iter(jax.random.split(key, 24))

    def w(shape):
        return jax.random.normal(next(keys), shape, jnp.float32) * 0.1

    bn = float(1.0 / np.sqrt(1.0 + 1e-5))  # gamma=1, var=1, mean=0, beta=0 (eval mode)

    p = {}
    # conv0_rgb / conv0_evt: 1x1 conv with bias
    p["w0r"], p["b0r"] = w((C, C)), w((1, C))
    p["w0e"], p["b0e"] = w((C, C)), w((1, C))

    # ChannelGate MLPs (Linear(C, C//16) -> ReLU -> Linear(C//16, C)), both streams
    # merged block-diagonally into one (2C -> 2h -> 2C) pass.
    cgr_w1, cgr_b1, cgr_w2, cgr_b2 = w((C, h)), w((1, h)), w((h, C)), w((1, C))
    cge_w1, cge_b1, cge_w2, cge_b2 = w((C, h)), w((1, h)), w((h, C)), w((1, C))
    z_ch = jnp.zeros((C, h), jnp.float32)
    z_hc = jnp.zeros((h, C), jnp.float32)
    p["cg_w1"] = jnp.concatenate([jnp.concatenate([cgr_w1, z_ch], axis=1),
                                  jnp.concatenate([z_ch, cge_w1], axis=1)], axis=0)
    p["cg_b1"] = jnp.concatenate([cgr_b1, cge_b1], axis=1)
    p["cg_w2"] = jnp.concatenate([jnp.concatenate([cgr_w2, z_hc], axis=1),
                                  jnp.concatenate([z_hc, cge_w2], axis=1)], axis=0)
    p["cg_b2"] = jnp.concatenate([cgr_b2, cge_b2], axis=1)

    # SpatialGate: Conv2d(2, 1, 7, pad=3, bias=False) + BN(1), shared by both streams.
    # Folded (with BN scale) into two (HW, HW) bf16 Toeplitz matrices, one per
    # ChannelPool plane (0 = max, 1 = mean).
    wsp = np.asarray(w((7, 7, 2))) * bn
    p["tmax"] = jnp.asarray(_toeplitz_7x7(wsp[:, :, 0], H, W), jnp.bfloat16)
    p["tmean"] = jnp.asarray(_toeplitz_7x7(wsp[:, :, 1], H, W), jnp.bfloat16)

    # conv1_rgb / conv1_evt: Conv2d(C, C, 3, pad=1, bias=True) + BN + ReLU, packed
    # block-diagonally so both streams run as one (2C -> 2C) conv.
    w1r = w((3, 3, C, C)) * bn
    w1e = w((3, 3, C, C)) * bn
    z = jnp.zeros((3, 3, C, C), jnp.float32)
    w1bd = jnp.concatenate([jnp.concatenate([w1r, z], axis=3),
                            jnp.concatenate([z, w1e], axis=3)], axis=2)
    p["w1bd"] = w1bd.reshape(9, 2 * C, 2 * C)
    p["b1bd"] = jnp.concatenate([w((1, C)), w((1, C))], axis=1) * bn

    # final conv: Conv2d(2C, C, 3, pad=1, bias=True) + BN + ReLU
    p["wf"] = (w((3, 3, 2 * C, C)) * bn).reshape(9, 2 * C, C)
    p["bf"] = w((1, C)) * bn
    return p


# ----------------------------------------------------------------------------
# Main
# ----------------------------------------------------------------------------

if __name__ == "__main__":
    B, C, H, W = 2, 32, 16, 16  # out_planes = 32 (reduction_ratio 16 -> hidden 2)

    key = jax.random.PRNGKey(0)
    k1, k2 = jax.random.split(key)
    # layout: NHWC (PyTorch reference uses NCHW (B, C, H, W) = (2, 32, 16, 16))
    rgb = jax.random.normal(k1, (B, H, W, C), jnp.float32)
    evt = jax.random.normal(k2, (B, H, W, C), jnp.float32)

    params = init_params(jax.random.PRNGKey(42), C, H, W)

    out = jax.jit(refusion_forward)(rgb, evt, params)
    out = jax.block_until_ready(out)
    assert out.shape == (B, H, W, C)
    assert bool(jnp.all(jnp.isfinite(out)))
    print("KERNEL_OK")
</pallas_src>

<mosaic_0001>
module attributes {stable_mosaic.version = 11 : i64} {
  func.func @_refusion_kernel(%arg0: i32, %arg1: memref<1x256x32xf32, #tpu.memory_space<vmem>>, %arg2: memref<1x256x32xf32, #tpu.memory_space<vmem>>, %arg3: memref<32x32xf32, #tpu.memory_space<vmem>>, %arg4: memref<1x32xf32, #tpu.memory_space<vmem>>, %arg5: memref<32x32xf32, #tpu.memory_space<vmem>>, %arg6: memref<1x32xf32, #tpu.memory_space<vmem>>, %arg7: memref<64x4xf32, #tpu.memory_space<vmem>>, %arg8: memref<1x4xf32, #tpu.memory_space<vmem>>, %arg9: memref<4x64xf32, #tpu.memory_space<vmem>>, %arg10: memref<1x64xf32, #tpu.memory_space<vmem>>, %arg11: memref<256x256xbf16, #tpu.memory_space<vmem>>, %arg12: memref<256x256xbf16, #tpu.memory_space<vmem>>, %arg13: memref<9x64x64xf32, #tpu.memory_space<vmem>>, %arg14: memref<1x64xf32, #tpu.memory_space<vmem>>, %arg15: memref<9x64x32xf32, #tpu.memory_space<vmem>>, %arg16: memref<1x32xf32, #tpu.memory_space<vmem>>, %arg17: memref<1x256x32xf32, #tpu.memory_space<vmem>>, %arg18: memref<304x64xf32, #tpu.memory_space<vmem>>) attributes {dimension_semantics = [#tpu.dimension_semantics<parallel>], iteration_bounds = array<i64: 2>, scalar_prefetch = 0 : i64, scratch_operands = 1 : i64, tpu.core_type = #tpu.core_type<tc>, window_params = [{transform_indices = @transform_0, window_bounds = array<i64: 1, 256, 32>}, {transform_indices = @transform_1, window_bounds = array<i64: 1, 256, 32>}, {pipeline_mode = #tpu.pipeline_mode<synchronous>, transform_indices = @transform_2, window_bounds = array<i64: 32, 32>}, {pipeline_mode = #tpu.pipeline_mode<synchronous>, transform_indices = @transform_3, window_bounds = array<i64: 1, 32>}, {pipeline_mode = #tpu.pipeline_mode<synchronous>, transform_indices = @transform_4, window_bounds = array<i64: 32, 32>}, {pipeline_mode = #tpu.pipeline_mode<synchronous>, transform_indices = @transform_5, window_bounds = array<i64: 1, 32>}, {pipeline_mode = #tpu.pipeline_mode<synchronous>, transform_indices = @transform_6, window_bounds = array<i64: 64, 4>}, {pipeline_mode = #tpu.pipeline_mode<synchronous>, transform_indices = @transform_7, window_bounds = array<i64: 1, 4>}, {pipeline_mode = #tpu.pipeline_mode<synchronous>, transform_indices = @transform_8, window_bounds = array<i64: 4, 64>}, {pipeline_mode = #tpu.pipeline_mode<synchronous>, transform_indices = @transform_9, window_bounds = array<i64: 1, 64>}, {pipeline_mode = #tpu.pipeline_mode<synchronous>, transform_indices = @transform_10, window_bounds = array<i64: 256, 256>}, {pipeline_mode = #tpu.pipeline_mode<synchronous>, transform_indices = @transform_11, window_bounds = array<i64: 256, 256>}, {pipeline_mode = #tpu.pipeline_mode<synchronous>, transform_indices = @transform_12, window_bounds = array<i64: 9, 64, 64>}, {pipeline_mode = #tpu.pipeline_mode<synchronous>, transform_indices = @transform_13, window_bounds = array<i64: 1, 64>}, {pipeline_mode = #tpu.pipeline_mode<synchronous>, transform_indices = @transform_14, window_bounds = array<i64: 9, 64, 32>}, {pipeline_mode = #tpu.pipeline_mode<synchronous>, transform_indices = @transform_15, window_bounds = array<i64: 1, 32>}, {transform_indices = @transform_16, window_bounds = array<i64: 1, 256, 32>}]} {
    %cst = arith.constant 0.000000e+00 : f32
    %0 = vector.broadcast %cst : f32 to vector<24x64xf32>
    %c0 = arith.constant 0 : index
    %c0_0 = arith.constant 0 : index
    %1 = vector.load %arg18[%c0, %c0_0] : memref<304x64xf32, #tpu.memory_space<vmem>>, vector<24x64xf32>
    tpu.vector_store %arg18[%c0, %c0_0], %0 {strides = array<i32>} : memref<304x64xf32, #tpu.memory_space<vmem>>, vector<24x64xf32>,
    %c280 = arith.constant 280 : index
    %c0_1 = arith.constant 0 : index
    %2 = vector.load %arg18[%c280, %c0_1] : memref<304x64xf32, #tpu.memory_space<vmem>>, vector<24x64xf32>
    tpu.vector_store %arg18[%c280, %c0_1], %0 {strides = array<i32>} : memref<304x64xf32, #tpu.memory_space<vmem>>, vector<24x64xf32>,
    %3 = tpu.iota {dimensions = array<i32: 0>} : vector<256x1xi32>
    %c16_i32 = arith.constant 16 : i32
    %c0_i32 = arith.constant 0 : i32
    %4 = arith.cmpi eq, %c16_i32, %c0_i32 : i32
    %c1_i32 = arith.constant 1 : i32
    %5 = arith.select %4, %c1_i32, %c16_i32 : i32
    %6 = vector.broadcast %5 : i32 to vector<256x1xi32>
    %7 = arith.remsi %3, %6 : vector<256x1xi32>
    %c0_i32_2 = arith.constant 0 : i32
    %8 = vector.broadcast %c0_i32_2 : i32 to vector<256x1xi32>
    %9 = arith.cmpi ne, %7, %8 : vector<256x1xi32>
    %c0_i32_3 = arith.constant 0 : i32
    %10 = vector.broadcast %c0_i32_3 : i32 to vector<256x1xi32>
    %11 = arith.cmpi slt, %7, %10 : vector<256x1xi32>
    %c0_i32_4 = arith.constant 0 : i32
    %12 = arith.cmpi slt, %5, %c0_i32_4 : i32
    %13 = vector.broadcast %12 : i1 to vector<256x1xi1>
    %14 = vector.broadcast %13 : vector<256x1xi1> to vector<256x1xi1>
    %15 = arith.xori %11, %14 : vector<256x1xi1>
    %16 = arith.andi %15, %9 : vector<256x1xi1>
    %17 = vector.broadcast %5 : i32 to vector<256x1xi32>
    %18 = arith.addi %7, %17 : vector<256x1xi32>
    %19 = arith.select %16, %18, %7 : vector<256x1xi1>, vector<256x1xi32>
    %c1_i32_5 = arith.constant 1 : i32
    %20 = vector.broadcast %c1_i32_5 : i32 to vector<256x1xi32>
    %21 = arith.cmpi sge, %19, %20 : vector<256x1xi32>
    %c14_i32 = arith.constant 14 : i32
    %22 = vector.broadcast %c14_i32 : i32 to vector<256x1xi32>
    %23 = arith.cmpi sle, %19, %22 : vector<256x1xi32>
    %c0_6 = arith.constant 0 : index
    %c0_7 = arith.constant 0 : index
    %c0_8 = arith.constant 0 : index
    %24 = vector.load %arg1[%c0_6, %c0_7, %c0_8] : memref<1x256x32xf32, #tpu.memory_space<vmem>>, vector<1x256x32xf32>
    %25 = vector.shape_cast %24 : vector<1x256x32xf32> to vector<256x32xf32>
    %c0_9 = arith.constant 0 : index
    %c0_10 = arith.constant 0 : index
    %26 = vector.load %arg3[%c0_9, %c0_10] : memref<32x32xf32, #tpu.memory_space<vmem>>, vector<32x32xf32>
    %cst_11 = arith.constant dense<0.000000e+00> : vector<256x32xf32>
    %27 = tpu.matmul %25, %26, %cst_11 {dimension_numbers = #tpu.dot_dimension_numbers<[1], [0], [0], [1], [0, 0, 1, 1], [], []>} : vector<256x32xf32>, vector<32x32xf32>, vector<256x32xf32> -> vector<256x32xf32>
    %c0_12 = arith.constant 0 : index
    %c0_13 = arith.constant 0 : index
    %28 = vector.load %arg4[%c0_12, %c0_13] : memref<1x32xf32, #tpu.memory_space<vmem>>, vector<1x32xf32>
    %29 = vector.broadcast %28 : vector<1x32xf32> to vector<256x32xf32>
    %30 = arith.addf %27, %29 : vector<256x32xf32>
    %c0_14 = arith.constant 0 : index
    %c0_15 = arith.constant 0 : index
    %c0_16 = arith.constant 0 : index
    %31 = vector.load %arg2[%c0_14, %c0_15, %c0_16] : memref<1x256x32xf32, #tpu.memory_space<vmem>>, vector<1x256x32xf32>
    %32 = vector.shape_cast %31 : vector<1x256x32xf32> to vector<256x32xf32>
    %c0_17 = arith.constant 0 : index
    %c0_18 = arith.constant 0 : index
    %33 = vector.load %arg5[%c0_17, %c0_18] : memref<32x32xf32, #tpu.memory_space<vmem>>, vector<32x32xf32>
    %cst_19 = arith.constant dense<0.000000e+00> : vector<256x32xf32>
    %34 = tpu.matmul %32, %33, %cst_19 {dimension_numbers = #tpu.dot_dimension_numbers<[1], [0], [0], [1], [0, 0, 1, 1], [], []>} : vector<256x32xf32>, vector<32x32xf32>, vector<256x32xf32> -> vector<256x32xf32>
    %c0_20 = arith.constant 0 : index
    %c0_21 = arith.constant 0 : index
    %35 = vector.load %arg6[%c0_20, %c0_21] : memref<1x32xf32, #tpu.memory_space<vmem>>, vector<1x32xf32>
    %36 = vector.broadcast %35 : vector<1x32xf32> to vector<256x32xf32>
    %37 = arith.addf %34, %36 : vector<256x32xf32>
    %38 = arith.mulf %30, %37 : vector<256x32xf32>
    %39 = arith.addf %30, %38 : vector<256x32xf32>
    %40 = arith.addf %37, %38 : vector<256x32xf32>
    %cst_22 = arith.constant dense<0.000000e+00> : vector<32xf32>
    %41 = vector.multi_reduction <add>, %39, %cst_22 [0] : vector<256x32xf32> to vector<32xf32>
    %42 = vector.shape_cast %41 : vector<32xf32> to vector<1x32xf32>
    %cst_23 = arith.constant dense<0.000000e+00> : vector<32xf32>
    %43 = vector.multi_reduction <add>, %40, %cst_23 [0] : vector<256x32xf32> to vector<32xf32>
    %44 = vector.shape_cast %43 : vector<32xf32> to vector<1x32xf32>
    %45 = tpu.concatenate %42, %44 in 1 : vector<1x32xf32>, vector<1x32xf32> -> vector<1x64xf32>
    %cst_24 = arith.constant 3.906250e-03 : f32
    %46 = vector.broadcast %cst_24 : f32 to vector<1x64xf32>
    %47 = arith.mulf %45, %46 : vector<1x64xf32>
    %cst_25 = arith.constant dense<0xFF800000> : vector<32xf32>
    %48 = vector.multi_reduction <maximumf>, %39, %cst_25 [0] : vector<256x32xf32> to vector<32xf32>
    %49 = vector.shape_cast %48 : vector<32xf32> to vector<1x32xf32>
    %cst_26 = arith.constant dense<0xFF800000> : vector<32xf32>
    %50 = vector.multi_reduction <maximumf>, %40, %cst_26 [0] : vector<256x32xf32> to vector<32xf32>
    %51 = vector.shape_cast %50 : vector<32xf32> to vector<1x32xf32>
    %52 = tpu.concatenate %49, %51 in 1 : vector<1x32xf32>, vector<1x32xf32> -> vector<1x64xf32>
    %53 = tpu.concatenate %47, %52 in 0 : vector<1x64xf32>, vector<1x64xf32> -> vector<2x64xf32>
    %c0_27 = arith.constant 0 : index
    %c0_28 = arith.constant 0 : index
    %54 = vector.load %arg7[%c0_27, %c0_28] : memref<64x4xf32, #tpu.memory_space<vmem>>, vector<64x4xf32>
    %cst_29 = arith.constant dense<0.000000e+00> : vector<2x4xf32>
    %55 = tpu.matmul %53, %54, %cst_29 {dimension_numbers = #tpu.dot_dimension_numbers<[1], [0], [0], [1], [0, 0, 1, 1], [], []>} : vector<2x64xf32>, vector<64x4xf32>, vector<2x4xf32> -> vector<2x4xf32>
    %c0_30 = arith.constant 0 : index
    %c0_31 = arith.constant 0 : index
    %56 = vector.load %arg8[%c0_30, %c0_31] : memref<1x4xf32, #tpu.memory_space<vmem>>, vector<1x4xf32>
    %57 = vector.broadcast %56 : vector<1x4xf32> to vector<2x4xf32>
    %58 = arith.addf %55, %57 : vector<2x4xf32>
    %cst_32 = arith.constant 0.000000e+00 : f32
    %59 = vector.broadcast %cst_32 : f32 to vector<2x4xf32>
    %60 = arith.maximumf %58, %59 : vector<2x4xf32>
    %c0_33 = arith.constant 0 : index
    %c0_34 = arith.constant 0 : index
    %61 = vector.load %arg9[%c0_33, %c0_34] : memref<4x64xf32, #tpu.memory_space<vmem>>, vector<4x64xf32>
    %cst_35 = arith.constant dense<0.000000e+00> : vector<2x64xf32>
    %62 = tpu.matmul %60, %61, %cst_35 {dimension_numbers = #tpu.dot_dimension_numbers<[1], [0], [0], [1], [0, 0, 1, 1], [], []>} : vector<2x4xf32>, vector<4x64xf32>, vector<2x64xf32> -> vector<2x64xf32>
    %c0_36 = arith.constant 0 : index
    %c0_37 = arith.constant 0 : index
    %63 = vector.load %arg10[%c0_36, %c0_37] : memref<1x64xf32, #tpu.memory_space<vmem>>, vector<1x64xf32>
    %64 = vector.broadcast %63 : vector<1x64xf32> to vector<2x64xf32>
    %65 = arith.addf %62, %64 : vector<2x64xf32>
    %cst_38 = arith.constant dense<0.000000e+00> : vector<64xf32>
    %66 = vector.multi_reduction <add>, %65, %cst_38 [0] : vector<2x64xf32> to vector<64xf32>
    %67 = vector.shape_cast %66 : vector<64xf32> to vector<1x64xf32>
    %cst_39 = arith.constant 0.000000e+00 : f32
    %68 = vector.broadcast %cst_39 : f32 to vector<1x64xf32>
    %69 = arith.subf %68, %67 : vector<1x64xf32>
    %70 = math.exp %69 : vector<1x64xf32>
    %cst_40 = arith.constant 1.000000e+00 : f32
    %71 = vector.broadcast %cst_40 : f32 to vector<1x64xf32>
    %72 = arith.addf %71, %70 : vector<1x64xf32>
    %73 = tpu.reciprocal %72 {approx = true} : vector<1x64xf32> -> vector<1x64xf32>
    %74 = vector.extract_strided_slice %73 {offsets = [0, 0], sizes = [1, 32], strides = [1, 1]} : vector<1x64xf32> to vector<1x32xf32>
    %75 = vector.extract_strided_slice %73 {offsets = [0, 32], sizes = [1, 32], strides = [1, 1]} : vector<1x64xf32> to vector<1x32xf32>
    %76 = vector.broadcast %75 : vector<1x32xf32> to vector<256x32xf32>
    %77 = arith.mulf %40, %76 : vector<256x32xf32>
    %cst_41 = arith.constant 1.000000e+00 : f32
    %78 = vector.broadcast %cst_41 : f32 to vector<256x32xf32>
    %79 = arith.addf %78, %77 : vector<256x32xf32>
    %80 = arith.mulf %39, %79 : vector<256x32xf32>
    %81 = vector.broadcast %74 : vector<1x32xf32> to vector<256x32xf32>
    %82 = arith.mulf %39, %81 : vector<256x32xf32>
    %cst_42 = arith.constant 1.000000e+00 : f32
    %83 = vector.broadcast %cst_42 : f32 to vector<256x32xf32>
    %84 = arith.addf %83, %82 : vector<256x32xf32>
    %85 = arith.mulf %40, %84 : vector<256x32xf32>
    %cst_43 = arith.constant dense<0xFF800000> : vector<256xf32>
    %86 = vector.multi_reduction <maximumf>, %80, %cst_43 [1] : vector<256x32xf32> to vector<256xf32>
    %87 = vector.shape_cast %86 : vector<256xf32> to vector<256x1xf32>
    %cst_44 = arith.constant dense<0xFF800000> : vector<256xf32>
    %88 = vector.multi_reduction <maximumf>, %85, %cst_44 [1] : vector<256x32xf32> to vector<256xf32>
    %89 = vector.shape_cast %88 : vector<256xf32> to vector<256x1xf32>
    %90 = tpu.concatenate %87, %89 in 1 : vector<256x1xf32>, vector<256x1xf32> -> vector<256x2xf32>
    %cst_45 = arith.constant dense<0.000000e+00> : vector<256xf32>
    %91 = vector.multi_reduction <add>, %80, %cst_45 [1] : vector<256x32xf32> to vector<256xf32>
    %92 = vector.shape_cast %91 : vector<256xf32> to vector<256x1xf32>
    %cst_46 = arith.constant dense<0.000000e+00> : vector<256xf32>
    %93 = vector.multi_reduction <add>, %85, %cst_46 [1] : vector<256x32xf32> to vector<256xf32>
    %94 = vector.shape_cast %93 : vector<256xf32> to vector<256x1xf32>
    %95 = tpu.concatenate %92, %94 in 1 : vector<256x1xf32>, vector<256x1xf32> -> vector<256x2xf32>
    %cst_47 = arith.constant 3.125000e-02 : f32
    %96 = vector.broadcast %cst_47 : f32 to vector<256x2xf32>
    %97 = arith.mulf %95, %96 : vector<256x2xf32>
    %c0_48 = arith.constant 0 : index
    %c0_49 = arith.constant 0 : index
    %98 = vector.load %arg11[%c0_48, %c0_49] : memref<256x256xbf16, #tpu.memory_space<vmem>>, vector<256x256xbf16>
    %99 = arith.truncf %90 : vector<256x2xf32> to vector<256x2xbf16>
    %cst_50 = arith.constant dense<0.000000e+00> : vector<256x2xf32>
    %100 = tpu.matmul %98, %99, %cst_50 {dimension_numbers = #tpu.dot_dimension_numbers<[1], [0], [0], [1], [0, 0, 1, 1], [], []>} : vector<256x256xbf16>, vector<256x2xbf16>, vector<256x2xf32> -> vector<256x2xf32>
    %c0_51 = arith.constant 0 : index
    %c0_52 = arith.constant 0 : index
    %101 = vector.load %arg12[%c0_51, %c0_52] : memref<256x256xbf16, #tpu.memory_space<vmem>>, vector<256x256xbf16>
    %102 = arith.truncf %97 : vector<256x2xf32> to vector<256x2xbf16>
    %cst_53 = arith.constant dense<0.000000e+00> : vector<256x2xf32>
    %103 = tpu.matmul %101, %102, %cst_53 {dimension_numbers = #tpu.dot_dimension_numbers<[1], [0], [0], [1], [0, 0, 1, 1], [], []>} : vector<256x256xbf16>, vector<256x2xbf16>, vector<256x2xf32> -> vector<256x2xf32>
    %104 = arith.addf %100, %103 : vector<256x2xf32>
    %cst_54 = arith.constant 0.000000e+00 : f32
    %105 = vector.broadcast %cst_54 : f32 to vector<256x2xf32>
    %106 = arith.subf %105, %104 : vector<256x2xf32>
    %107 = math.exp %106 : vector<256x2xf32>
    %cst_55 = arith.constant 1.000000e+00 : f32
    %108 = vector.broadcast %cst_55 : f32 to vector<256x2xf32>
    %109 = arith.addf %108, %107 : vector<256x2xf32>
    %110 = tpu.reciprocal %109 {approx = true} : vector<256x2xf32> -> vector<256x2xf32>
    %111 = vector.extract_strided_slice %110 {offsets = [0, 0], sizes = [256, 1], strides = [1, 1]} : vector<256x2xf32> to vector<256x1xf32>
    %112 = vector.extract_strided_slice %110 {offsets = [0, 1], sizes = [256, 1], strides = [1, 1]} : vector<256x2xf32> to vector<256x1xf32>
    %113 = vector.broadcast %112 : vector<256x1xf32> to vector<256x32xf32>
    %114 = arith.mulf %85, %113 : vector<256x32xf32>
    %cst_56 = arith.constant 1.000000e+00 : f32
    %115 = vector.broadcast %cst_56 : f32 to vector<256x32xf32>
    %116 = arith.addf %115, %114 : vector<256x32xf32>
    %117 = arith.mulf %80, %116 : vector<256x32xf32>
    %118 = vector.broadcast %111 : vector<256x1xf32> to vector<256x32xf32>
    %119 = arith.mulf %80, %118 : vector<256x32xf32>
    %cst_57 = arith.constant 1.000000e+00 : f32
    %120 = vector.broadcast %cst_57 : f32 to vector<256x32xf32>
    %121 = arith.addf %120, %119 : vector<256x32xf32>
    %122 = arith.mulf %85, %121 : vector<256x32xf32>
    %c24 = arith.constant 24 : index
    %c0_58 = arith.constant 0 : index
    %123 = vector.load %arg18[%c24, %c0_58] : memref<304x64xf32, #tpu.memory_space<vmem>>, vector<256x32xf32>
    tpu.vector_store %arg18[%c24, %c0_58], %117 {strides = array<i32>} : memref<304x64xf32, #tpu.memory_space<vmem>>, vector<256x32xf32>,
    %c24_59 = arith.constant 24 : index
    %c32 = arith.constant 32 : index
    %124 = vector.load %arg18[%c24_59, %c32] : memref<304x64xf32, #tpu.memory_space<vmem>>, vector<256x32xf32>
    tpu.vector_store %arg18[%c24_59, %c32], %122 {strides = array<i32>} : memref<304x64xf32, #tpu.memory_space<vmem>>, vector<256x32xf32>,
    %cst_60 = arith.constant 0.000000e+00 : f32
    %125 = vector.broadcast %cst_60 : f32 to vector<256x64xf32>
    %c7 = arith.constant 7 : index
    %c0_61 = arith.constant 0 : index
    %126 = vector.load %arg18[%c7, %c0_61] : memref<304x64xf32, #tpu.memory_space<vmem>>, vector<256x64xf32>
    %cst_62 = arith.constant 0.000000e+00 : f32
    %127 = vector.shape_cast %21 : vector<256x1xi1> to vector<256x1xi1>
    %128 = vector.broadcast %127 : vector<256x1xi1> to vector<256x64xi1>
    %129 = vector.broadcast %cst_62 : f32 to vector<256x64xf32>
    %130 = arith.select %128, %126, %129 : vector<256x64xi1>, vector<256x64xf32>
    %c0_63 = arith.constant 0 : index
    %c0_64 = arith.constant 0 : index
    %c0_65 = arith.constant 0 : index
    %131 = vector.load %arg13[%c0_63, %c0_64, %c0_65] : memref<9x64x64xf32, #tpu.memory_space<vmem>>, vector<1x64x64xf32>
    %132 = vector.shape_cast %131 : vector<1x64x64xf32> to vector<64x64xf32>
    %cst_66 = arith.constant dense<0.000000e+00> : vector<256x64xf32>
    %133 = tpu.matmul %130, %132, %cst_66 {dimension_numbers = #tpu.dot_dimension_numbers<[1], [0], [0], [1], [0, 0, 1, 1], [], []>} : vector<256x64xf32>, vector<64x64xf32>, vector<256x64xf32> -> vector<256x64xf32>
    %134 = arith.addf %125, %133 : vector<256x64xf32>
    %c8 = arith.constant 8 : index
    %c0_67 = arith.constant 0 : index
    %135 = vector.load %arg18[%c8, %c0_67] : memref<304x64xf32, #tpu.memory_space<vmem>>, vector<256x64xf32>
    %c1 = arith.constant 1 : index
    %c0_68 = arith.constant 0 : index
    %c0_69 = arith.constant 0 : index
    %136 = vector.load %arg13[%c1, %c0_68, %c0_69] : memref<9x64x64xf32, #tpu.memory_space<vmem>>, vector<1x64x64xf32>
    %137 = vector.shape_cast %136 : vector<1x64x64xf32> to vector<64x64xf32>
    %cst_70 = arith.constant dense<0.000000e+00> : vector<256x64xf32>
    %138 = tpu.matmul %135, %137, %cst_70 {dimension_numbers = #tpu.dot_dimension_numbers<[1], [0], [0], [1], [0, 0, 1, 1], [], []>} : vector<256x64xf32>, vector<64x64xf32>, vector<256x64xf32> -> vector<256x64xf32>
    %139 = arith.addf %134, %138 : vector<256x64xf32>
    %c9 = arith.constant 9 : index
    %c0_71 = arith.constant 0 : index
    %140 = vector.load %arg18[%c9, %c0_71] : memref<304x64xf32, #tpu.memory_space<vmem>>, vector<256x64xf32>
    %cst_72 = arith.constant 0.000000e+00 : f32
    %141 = vector.shape_cast %23 : vector<256x1xi1> to vector<256x1xi1>
    %142 = vector.broadcast %141 : vector<256x1xi1> to vector<256x64xi1>
    %143 = vector.broadcast %cst_72 : f32 to vector<256x64xf32>
    %144 = arith.select %142, %140, %143 : vector<256x64xi1>, vector<256x64xf32>
    %c2 = arith.constant 2 : index
    %c0_73 = arith.constant 0 : index
    %c0_74 = arith.constant 0 : index
    %145 = vector.load %arg13[%c2, %c0_73, %c0_74] : memref<9x64x64xf32, #tpu.memory_space<vmem>>, vector<1x64x64xf32>
    %146 = vector.shape_cast %145 : vector<1x64x64xf32> to vector<64x64xf32>
    %cst_75 = arith.constant dense<0.000000e+00> : vector<256x64xf32>
    %147 = tpu.matmul %144, %146, %cst_75 {dimension_numbers = #tpu.dot_dimension_numbers<[1], [0], [0], [1], [0, 0, 1, 1], [], []>} : vector<256x64xf32>, vector<64x64xf32>, vector<256x64xf32> -> vector<256x64xf32>
    %148 = arith.addf %139, %147 : vector<256x64xf32>
    %c23 = arith.constant 23 : index
    %c0_76 = arith.constant 0 : index
    %149 = vector.load %arg18[%c23, %c0_76] : memref<304x64xf32, #tpu.memory_space<vmem>>, vector<256x64xf32>
    %cst_77 = arith.constant 0.000000e+00 : f32
    %150 = vector.shape_cast %21 : vector<256x1xi1> to vector<256x1xi1>
    %151 = vector.broadcast %150 : vector<256x1xi1> to vector<256x64xi1>
    %152 = vector.broadcast %cst_77 : f32 to vector<256x64xf32>
    %153 = arith.select %151, %149, %152 : vector<256x64xi1>, vector<256x64xf32>
    %c3 = arith.constant 3 : index
    %c0_78 = arith.constant 0 : index
    %c0_79 = arith.constant 0 : index
    %154 = vector.load %arg13[%c3, %c0_78, %c0_79] : memref<9x64x64xf32, #tpu.memory_space<vmem>>, vector<1x64x64xf32>
    %155 = vector.shape_cast %154 : vector<1x64x64xf32> to vector<64x64xf32>
    %cst_80 = arith.constant dense<0.000000e+00> : vector<256x64xf32>
    %156 = tpu.matmul %153, %155, %cst_80 {dimension_numbers = #tpu.dot_dimension_numbers<[1], [0], [0], [1], [0, 0, 1, 1], [], []>} : vector<256x64xf32>, vector<64x64xf32>, vector<256x64xf32> -> vector<256x64xf32>
    %157 = arith.addf %148, %156 : vector<256x64xf32>
    %c24_81 = arith.constant 24 : index
    %c0_82 = arith.constant 0 : index
    %158 = vector.load %arg18[%c24_81, %c0_82] : memref<304x64xf32, #tpu.memory_space<vmem>>, vector<256x64xf32>
    %c4 = arith.constant 4 : index
    %c0_83 = arith.constant 0 : index
    %c0_84 = arith.constant 0 : index
    %159 = vector.load %arg13[%c4, %c0_83, %c0_84] : memref<9x64x64xf32, #tpu.memory_space<vmem>>, vector<1x64x64xf32>
    %160 = vector.shape_cast %159 : vector<1x64x64xf32> to vector<64x64xf32>
    %cst_85 = arith.constant dense<0.000000e+00> : vector<256x64xf32>
    %161 = tpu.matmul %158, %160, %cst_85 {dimension_numbers = #tpu.dot_dimension_numbers<[1], [0], [0], [1], [0, 0, 1, 1], [], []>} : vector<256x64xf32>, vector<64x64xf32>, vector<256x64xf32> -> vector<256x64xf32>
    %162 = arith.addf %157, %161 : vector<256x64xf32>
    %c25 = arith.constant 25 : index
    %c0_86 = arith.constant 0 : index
    %163 = vector.load %arg18[%c25, %c0_86] : memref<304x64xf32, #tpu.memory_space<vmem>>, vector<256x64xf32>
    %cst_87 = arith.constant 0.000000e+00 : f32
    %164 = vector.shape_cast %23 : vector<256x1xi1> to vector<256x1xi1>
    %165 = vector.broadcast %164 : vector<256x1xi1> to vector<256x64xi1>
    %166 = vector.broadcast %cst_87 : f32 to vector<256x64xf32>
    %167 = arith.select %165, %163, %166 : vector<256x64xi1>, vector<256x64xf32>
    %c5 = arith.constant 5 : index
    %c0_88 = arith.constant 0 : index
    %c0_89 = arith.constant 0 : index
    %168 = vector.load %arg13[%c5, %c0_88, %c0_89] : memref<9x64x64xf32, #tpu.memory_space<vmem>>, vector<1x64x64xf32>
    %169 = vector.shape_cast %168 : vector<1x64x64xf32> to vector<64x64xf32>
    %cst_90 = arith.constant dense<0.000000e+00> : vector<256x64xf32>
    %170 = tpu.matmul %167, %169, %cst_90 {dimension_numbers = #tpu.dot_dimension_numbers<[1], [0], [0], [1], [0, 0, 1, 1], [], []>} : vector<256x64xf32>, vector<64x64xf32>, vector<256x64xf32> -> vector<256x64xf32>
    %171 = arith.addf %162, %170 : vector<256x64xf32>
    %c39 = arith.constant 39 : index
    %c0_91 = arith.constant 0 : index
    %172 = vector.load %arg18[%c39, %c0_91] : memref<304x64xf32, #tpu.memory_space<vmem>>, vector<256x64xf32>
    %cst_92 = arith.constant 0.000000e+00 : f32
    %173 = vector.shape_cast %21 : vector<256x1xi1> to vector<256x1xi1>
    %174 = vector.broadcast %173 : vector<256x1xi1> to vector<256x64xi1>
    %175 = vector.broadcast %cst_92 : f32 to vector<256x64xf32>
    %176 = arith.select %174, %172, %175 : vector<256x64xi1>, vector<256x64xf32>
    %c6 = arith.constant 6 : index
    %c0_93 = arith.constant 0 : index
    %c0_94 = arith.constant 0 : index
    %177 = vector.load %arg13[%c6, %c0_93, %c0_94] : memref<9x64x64xf32, #tpu.memory_space<vmem>>, vector<1x64x64xf32>
    %178 = vector.shape_cast %177 : vector<1x64x64xf32> to vector<64x64xf32>
    %cst_95 = arith.constant dense<0.000000e+00> : vector<256x64xf32>
    %179 = tpu.matmul %176, %178, %cst_95 {dimension_numbers = #tpu.dot_dimension_numbers<[1], [0], [0], [1], [0, 0, 1, 1], [], []>} : vector<256x64xf32>, vector<64x64xf32>, vector<256x64xf32> -> vector<256x64xf32>
    %180 = arith.addf %171, %179 : vector<256x64xf32>
    %c40 = arith.constant 40 : index
    %c0_96 = arith.constant 0 : index
    %181 = vector.load %arg18[%c40, %c0_96] : memref<304x64xf32, #tpu.memory_space<vmem>>, vector<256x64xf32>
    %c7_97 = arith.constant 7 : index
    %c0_98 = arith.constant 0 : index
    %c0_99 = arith.constant 0 : index
    %182 = vector.load %arg13[%c7_97, %c0_98, %c0_99] : memref<9x64x64xf32, #tpu.memory_space<vmem>>, vector<1x64x64xf32>
    %183 = vector.shape_cast %182 : vector<1x64x64xf32> to vector<64x64xf32>
    %cst_100 = arith.constant dense<0.000000e+00> : vector<256x64xf32>
    %184 = tpu.matmul %181, %183, %cst_100 {dimension_numbers = #tpu.dot_dimension_numbers<[1], [0], [0], [1], [0, 0, 1, 1], [], []>} : vector<256x64xf32>, vector<64x64xf32>, vector<256x64xf32> -> vector<256x64xf32>
    %185 = arith.addf %180, %184 : vector<256x64xf32>
    %c41 = arith.constant 41 : index
    %c0_101 = arith.constant 0 : index
    %186 = vector.load %arg18[%c41, %c0_101] : memref<304x64xf32, #tpu.memory_space<vmem>>, vector<256x64xf32>
    %cst_102 = arith.constant 0.000000e+00 : f32
    %187 = vector.shape_cast %23 : vector<256x1xi1> to vector<256x1xi1>
    %188 = vector.broadcast %187 : vector<256x1xi1> to vector<256x64xi1>
    %189 = vector.broadcast %cst_102 : f32 to vector<256x64xf32>
    %190 = arith.select %188, %186, %189 : vector<256x64xi1>, vector<256x64xf32>
    %c8_103 = arith.constant 8 : index
    %c0_104 = arith.constant 0 : index
    %c0_105 = arith.constant 0 : index
    %191 = vector.load %arg13[%c8_103, %c0_104, %c0_105] : memref<9x64x64xf32, #tpu.memory_space<vmem>>, vector<1x64x64xf32>
    %192 = vector.shape_cast %191 : vector<1x64x64xf32> to vector<64x64xf32>
    %cst_106 = arith.constant dense<0.000000e+00> : vector<256x64xf32>
    %193 = tpu.matmul %190, %192, %cst_106 {dimension_numbers = #tpu.dot_dimension_numbers<[1], [0], [0], [1], [0, 0, 1, 1], [], []>} : vector<256x64xf32>, vector<64x64xf32>, vector<256x64xf32> -> vector<256x64xf32>
    %194 = arith.addf %185, %193 : vector<256x64xf32>
    %c0_107 = arith.constant 0 : index
    %c0_108 = arith.constant 0 : index
    %195 = vector.load %arg14[%c0_107, %c0_108] : memref<1x64xf32, #tpu.memory_space<vmem>>, vector<1x64xf32>
    %196 = vector.broadcast %195 : vector<1x64xf32> to vector<256x64xf32>
    %197 = arith.addf %194, %196 : vector<256x64xf32>
    %cst_109 = arith.constant 0.000000e+00 : f32
    %198 = vector.broadcast %cst_109 : f32 to vector<256x64xf32>
    %199 = arith.maximumf %197, %198 : vector<256x64xf32>
    %200 = vector.extract_strided_slice %199 {offsets = [0, 0], sizes = [256, 32], strides = [1, 1]} : vector<256x64xf32> to vector<256x32xf32>
    %201 = vector.extract_strided_slice %199 {offsets = [0, 32], sizes = [256, 32], strides = [1, 1]} : vector<256x64xf32> to vector<256x32xf32>
    %202 = arith.mulf %200, %201 : vector<256x32xf32>
    %c24_110 = arith.constant 24 : index
    %c0_111 = arith.constant 0 : index
    %203 = vector.load %arg18[%c24_110, %c0_111] : memref<304x64xf32, #tpu.memory_space<vmem>>, vector<256x32xf32>
    tpu.vector_store %arg18[%c24_110, %c0_111], %202 {strides = array<i32>} : memref<304x64xf32, #tpu.memory_space<vmem>>, vector<256x32xf32>,
    %204 = arith.maximumf %200, %201 : vector<256x32xf32>
    %c24_112 = arith.constant 24 : index
    %c32_113 = arith.constant 32 : index
    %205 = vector.load %arg18[%c24_112, %c32_113] : memref<304x64xf32, #tpu.memory_space<vmem>>, vector<256x32xf32>
    tpu.vector_store %arg18[%c24_112, %c32_113], %204 {strides = array<i32>} : memref<304x64xf32, #tpu.memory_space<vmem>>, vector<256x32xf32>,
    %cst_114 = arith.constant 0.000000e+00 : f32
    %206 = vector.broadcast %cst_114 : f32 to vector<256x32xf32>
    %c7_115 = arith.constant 7 : index
    %c0_116 = arith.constant 0 : index
    %207 = vector.load %arg18[%c7_115, %c0_116] : memref<304x64xf32, #tpu.memory_space<vmem>>, vector<256x64xf32>
    %cst_117 = arith.constant 0.000000e+00 : f32
    %208 = vector.shape_cast %21 : vector<256x1xi1> to vector<256x1xi1>
    %209 = vector.broadcast %208 : vector<256x1xi1> to vector<256x64xi1>
    %210 = vector.broadcast %cst_117 : f32 to vector<256x64xf32>
    %211 = arith.select %209, %207, %210 : vector<256x64xi1>, vector<256x64xf32>
    %c0_118 = arith.constant 0 : index
    %c0_119 = arith.constant 0 : index
    %c0_120 = arith.constant 0 : index
    %212 = vector.load %arg15[%c0_118, %c0_119, %c0_120] : memref<9x64x32xf32, #tpu.memory_space<vmem>>, vector<1x64x32xf32>
    %213 = vector.shape_cast %212 : vector<1x64x32xf32> to vector<64x32xf32>
    %cst_121 = arith.constant dense<0.000000e+00> : vector<256x32xf32>
    %214 = tpu.matmul %211, %213, %cst_121 {dimension_numbers = #tpu.dot_dimension_numbers<[1], [0], [0], [1], [0, 0, 1, 1], [], []>} : vector<256x64xf32>, vector<64x32xf32>, vector<256x32xf32> -> vector<256x32xf32>
    %215 = arith.addf %206, %214 : vector<256x32xf32>
    %c8_122 = arith.constant 8 : index
    %c0_123 = arith.constant 0 : index
    %216 = vector.load %arg18[%c8_122, %c0_123] : memref<304x64xf32, #tpu.memory_space<vmem>>, vector<256x64xf32>
    %c1_124 = arith.constant 1 : index
    %c0_125 = arith.constant 0 : index
    %c0_126 = arith.constant 0 : index
    %217 = vector.load %arg15[%c1_124, %c0_125, %c0_126] : memref<9x64x32xf32, #tpu.memory_space<vmem>>, vector<1x64x32xf32>
    %218 = vector.shape_cast %217 : vector<1x64x32xf32> to vector<64x32xf32>
    %cst_127 = arith.constant dense<0.000000e+00> : vector<256x32xf32>
    %219 = tpu.matmul %216, %218, %cst_127 {dimension_numbers = #tpu.dot_dimension_numbers<[1], [0], [0], [1], [0, 0, 1, 1], [], []>} : vector<256x64xf32>, vector<64x32xf32>, vector<256x32xf32> -> vector<256x32xf32>
    %220 = arith.addf %215, %219 : vector<256x32xf32>
    %c9_128 = arith.constant 9 : index
    %c0_129 = arith.constant 0 : index
    %221 = vector.load %arg18[%c9_128, %c0_129] : memref<304x64xf32, #tpu.memory_space<vmem>>, vector<256x64xf32>
    %cst_130 = arith.constant 0.000000e+00 : f32
    %222 = vector.shape_cast %23 : vector<256x1xi1> to vector<256x1xi1>
    %223 = vector.broadcast %222 : vector<256x1xi1> to vector<256x64xi1>
    %224 = vector.broadcast %cst_130 : f32 to vector<256x64xf32>
    %225 = arith.select %223, %221, %224 : vector<256x64xi1>, vector<256x64xf32>
    %c2_131 = arith.constant 2 : index
    %c0_132 = arith.constant 0 : index
    %c0_133 = arith.constant 0 : index
    %226 = vector.load %arg15[%c2_131, %c0_132, %c0_133] : memref<9x64x32xf32, #tpu.memory_space<vmem>>, vector<1x64x32xf32>
    %227 = vector.shape_cast %226 : vector<1x64x32xf32> to vector<64x32xf32>
    %cst_134 = arith.constant dense<0.000000e+00> : vector<256x32xf32>
    %228 = tpu.matmul %225, %227, %cst_134 {dimension_numbers = #tpu.dot_dimension_numbers<[1], [0], [0], [1], [0, 0, 1, 1], [], []>} : vector<256x64xf32>, vector<64x32xf32>, vector<256x32xf32> -> vector<256x32xf32>
    %229 = arith.addf %220, %228 : vector<256x32xf32>
    %c23_135 = arith.constant 23 : index
    %c0_136 = arith.constant 0 : index
    %230 = vector.load %arg18[%c23_135, %c0_136] : memref<304x64xf32, #tpu.memory_space<vmem>>, vector<256x64xf32>
    %cst_137 = arith.constant 0.000000e+00 : f32
    %231 = vector.shape_cast %21 : vector<256x1xi1> to vector<256x1xi1>
    %232 = vector.broadcast %231 : vector<256x1xi1> to vector<256x64xi1>
    %233 = vector.broadcast %cst_137 : f32 to vector<256x64xf32>
    %234 = arith.select %232, %230, %233 : vector<256x64xi1>, vector<256x64xf32>
    %c3_138 = arith.constant 3 : index
    %c0_139 = arith.constant 0 : index
    %c0_140 = arith.constant 0 : index
    %235 = vector.load %arg15[%c3_138, %c0_139, %c0_140] : memref<9x64x32xf32, #tpu.memory_space<vmem>>, vector<1x64x32xf32>
    %236 = vector.shape_cast %235 : vector<1x64x32xf32> to vector<64x32xf32>
    %cst_141 = arith.constant dense<0.000000e+00> : vector<256x32xf32>
    %237 = tpu.matmul %234, %236, %cst_141 {dimension_numbers = #tpu.dot_dimension_numbers<[1], [0], [0], [1], [0, 0, 1, 1], [], []>} : vector<256x64xf32>, vector<64x32xf32>, vector<256x32xf32> -> vector<256x32xf32>
    %238 = arith.addf %229, %237 : vector<256x32xf32>
    %c24_142 = arith.constant 24 : index
    %c0_143 = arith.constant 0 : index
    %239 = vector.load %arg18[%c24_142, %c0_143] : memref<304x64xf32, #tpu.memory_space<vmem>>, vector<256x64xf32>
    %c4_144 = arith.constant 4 : index
    %c0_145 = arith.constant 0 : index
    %c0_146 = arith.constant 0 : index
    %240 = vector.load %arg15[%c4_144, %c0_145, %c0_146] : memref<9x64x32xf32, #tpu.memory_space<vmem>>, vector<1x64x32xf32>
    %241 = vector.shape_cast %240 : vector<1x64x32xf32> to vector<64x32xf32>
    %cst_147 = arith.constant dense<0.000000e+00> : vector<256x32xf32>
    %242 = tpu.matmul %239, %241, %cst_147 {dimension_numbers = #tpu.dot_dimension_numbers<[1], [0], [0], [1], [0, 0, 1, 1], [], []>} : vector<256x64xf32>, vector<64x32xf32>, vector<256x32xf32> -> vector<256x32xf32>
    %243 = arith.addf %238, %242 : vector<256x32xf32>
    %c25_148 = arith.constant 25 : index
    %c0_149 = arith.constant 0 : index
    %244 = vector.load %arg18[%c25_148, %c0_149] : memref<304x64xf32, #tpu.memory_space<vmem>>, vector<256x64xf32>
    %cst_150 = arith.constant 0.000000e+00 : f32
    %245 = vector.shape_cast %23 : vector<256x1xi1> to vector<256x1xi1>
    %246 = vector.broadcast %245 : vector<256x1xi1> to vector<256x64xi1>
    %247 = vector.broadcast %cst_150 : f32 to vector<256x64xf32>
    %248 = arith.select %246, %244, %247 : vector<256x64xi1>, vector<256x64xf32>
    %c5_151 = arith.constant 5 : index
    %c0_152 = arith.constant 0 : index
    %c0_153 = arith.constant 0 : index
    %249 = vector.load %arg15[%c5_151, %c0_152, %c0_153] : memref<9x64x32xf32, #tpu.memory_space<vmem>>, vector<1x64x32xf32>
    %250 = vector.shape_cast %249 : vector<1x64x32xf32> to vector<64x32xf32>
    %cst_154 = arith.constant dense<0.000000e+00> : vector<256x32xf32>
    %251 = tpu.matmul %248, %250, %cst_154 {dimension_numbers = #tpu.dot_dimension_numbers<[1], [0], [0], [1], [0, 0, 1, 1], [], []>} : vector<256x64xf32>, vector<64x32xf32>, vector<256x32xf32> -> vector<256x32xf32>
    %252 = arith.addf %243, %251 : vector<256x32xf32>
    %c39_155 = arith.constant 39 : index
    %c0_156 = arith.constant 0 : index
    %253 = vector.load %arg18[%c39_155, %c0_156] : memref<304x64xf32, #tpu.memory_space<vmem>>, vector<256x64xf32>
    %cst_157 = arith.constant 0.000000e+00 : f32
    %254 = vector.shape_cast %21 : vector<256x1xi1> to vector<256x1xi1>
    %255 = vector.broadcast %254 : vector<256x1xi1> to vector<256x64xi1>
    %256 = vector.broadcast %cst_157 : f32 to vector<256x64xf32>
    %257 = arith.select %255, %253, %256 : vector<256x64xi1>, vector<256x64xf32>
    %c6_158 = arith.constant 6 : index
    %c0_159 = arith.constant 0 : index
    %c0_160 = arith.constant 0 : index
    %258 = vector.load %arg15[%c6_158, %c0_159, %c0_160] : memref<9x64x32xf32, #tpu.memory_space<vmem>>, vector<1x64x32xf32>
    %259 = vector.shape_cast %258 : vector<1x64x32xf32> to vector<64x32xf32>
    %cst_161 = arith.constant dense<0.000000e+00> : vector<256x32xf32>
    %260 = tpu.matmul %257, %259, %cst_161 {dimension_numbers = #tpu.dot_dimension_numbers<[1], [0], [0], [1], [0, 0, 1, 1], [], []>} : vector<256x64xf32>, vector<64x32xf32>, vector<256x32xf32> -> vector<256x32xf32>
    %261 = arith.addf %252, %260 : vector<256x32xf32>
    %c40_162 = arith.constant 40 : index
    %c0_163 = arith.constant 0 : index
    %262 = vector.load %arg18[%c40_162, %c0_163] : memref<304x64xf32, #tpu.memory_space<vmem>>, vector<256x64xf32>
    %c7_164 = arith.constant 7 : index
    %c0_165 = arith.constant 0 : index
    %c0_166 = arith.constant 0 : index
    %263 = vector.load %arg15[%c7_164, %c0_165, %c0_166] : memref<9x64x32xf32, #tpu.memory_space<vmem>>, vector<1x64x32xf32>
    %264 = vector.shape_cast %263 : vector<1x64x32xf32> to vector<64x32xf32>
    %cst_167 = arith.constant dense<0.000000e+00> : vector<256x32xf32>
    %265 = tpu.matmul %262, %264, %cst_167 {dimension_numbers = #tpu.dot_dimension_numbers<[1], [0], [0], [1], [0, 0, 1, 1], [], []>} : vector<256x64xf32>, vector<64x32xf32>, vector<256x32xf32> -> vector<256x32xf32>
    %266 = arith.addf %261, %265 : vector<256x32xf32>
    %c41_168 = arith.constant 41 : index
    %c0_169 = arith.constant 0 : index
    %267 = vector.load %arg18[%c41_168, %c0_169] : memref<304x64xf32, #tpu.memory_space<vmem>>, vector<256x64xf32>
    %cst_170 = arith.constant 0.000000e+00 : f32
    %268 = vector.shape_cast %23 : vector<256x1xi1> to vector<256x1xi1>
    %269 = vector.broadcast %268 : vector<256x1xi1> to vector<256x64xi1>
    %270 = vector.broadcast %cst_170 : f32 to vector<256x64xf32>
    %271 = arith.select %269, %267, %270 : vector<256x64xi1>, vector<256x64xf32>
    %c8_171 = arith.constant 8 : index
    %c0_172 = arith.constant 0 : index
    %c0_173 = arith.constant 0 : index
    %272 = vector.load %arg15[%c8_171, %c0_172, %c0_173] : memref<9x64x32xf32, #tpu.memory_space<vmem>>, vector<1x64x32xf32>
    %273 = vector.shape_cast %272 : vector<1x64x32xf32> to vector<64x32xf32>
    %cst_174 = arith.constant dense<0.000000e+00> : vector<256x32xf32>
    %274 = tpu.matmul %271, %273, %cst_174 {dimension_numbers = #tpu.dot_dimension_numbers<[1], [0], [0], [1], [0, 0, 1, 1], [], []>} : vector<256x64xf32>, vector<64x32xf32>, vector<256x32xf32> -> vector<256x32xf32>
    %275 = arith.addf %266, %274 : vector<256x32xf32>
    %c0_175 = arith.constant 0 : index
    %c0_176 = arith.constant 0 : index
    %276 = vector.load %arg16[%c0_175, %c0_176] : memref<1x32xf32, #tpu.memory_space<vmem>>, vector<1x32xf32>
    %277 = vector.broadcast %276 : vector<1x32xf32> to vector<256x32xf32>
    %278 = arith.addf %275, %277 : vector<256x32xf32>
    %cst_177 = arith.constant 0.000000e+00 : f32
    %279 = vector.broadcast %cst_177 : f32 to vector<256x32xf32>
    %280 = arith.maximumf %278, %279 : vector<256x32xf32>
    %c0_178 = arith.constant 0 : index
    %c0_179 = arith.constant 0 : index
    %c0_180 = arith.constant 0 : index
    %281 = vector.load %arg17[%c0_178, %c0_179, %c0_180] : memref<1x256x32xf32, #tpu.memory_space<vmem>>, vector<1x256x32xf32>
    %282 = vector.shape_cast %281 : vector<1x256x32xf32> to vector<256x32xf32>
    %283 = vector.shape_cast %280 : vector<256x32xf32> to vector<1x256x32xf32>
    tpu.vector_store %arg17[%c0_178, %c0_179, %c0_180], %283 {strides = array<i32>} : memref<1x256x32xf32, #tpu.memory_space<vmem>>, vector<1x256x32xf32>,
    return
  }
  func.func @transform_0(%arg0: i32) -> (i32, i32, i32) {
    %c0_i32 = arith.constant 0 : i32
    %c0_i32_0 = arith.constant 0 : i32
    %c0_i32_1 = arith.constant 0 : i32
    return %arg0, %c0_i32, %c0_i32_0 : i32, i32, i32
  }
  func.func @transform_1(%arg0: i32) -> (i32, i32, i32) {
    %c0_i32 = arith.constant 0 : i32
    %c0_i32_0 = arith.constant 0 : i32
    %c0_i32_1 = arith.constant 0 : i32
    return %arg0, %c0_i32, %c0_i32_0 : i32, i32, i32
  }
  func.func @transform_2(%arg0: i32) -> (i32, i32) {
    %c0_i32 = arith.constant 0 : i32
    %c0_i32_0 = arith.constant 0 : i32
    %c0_i32_1 = arith.constant 0 : i32
    return %c0_i32, %c0_i32_0 : i32, i32
  }
  func.func @transform_3(%arg0: i32) -> (i32, i32) {
    %c0_i32 = arith.constant 0 : i32
    %c0_i32_0 = arith.constant 0 : i32
    %c0_i32_1 = arith.constant 0 : i32
    return %c0_i32, %c0_i32_0 : i32, i32
  }
  func.func @transform_4(%arg0: i32) -> (i32, i32) {
    %c0_i32 = arith.constant 0 : i32
    %c0_i32_0 = arith.constant 0 : i32
    %c0_i32_1 = arith.constant 0 : i32
    return %c0_i32, %c0_i32_0 : i32, i32
  }
  func.func @transform_5(%arg0: i32) -> (i32, i32) {
    %c0_i32 = arith.constant 0 : i32
    %c0_i32_0 = arith.constant 0 : i32
    %c0_i32_1 = arith.constant 0 : i32
    return %c0_i32, %c0_i32_0 : i32, i32
  }
  func.func @transform_6(%arg0: i32) -> (i32, i32) {
    %c0_i32 = arith.constant 0 : i32
    %c0_i32_0 = arith.constant 0 : i32
    %c0_i32_1 = arith.constant 0 : i32
    return %c0_i32, %c0_i32_0 : i32, i32
  }
  func.func @transform_7(%arg0: i32) -> (i32, i32) {
    %c0_i32 = arith.constant 0 : i32
    %c0_i32_0 = arith.constant 0 : i32
    %c0_i32_1 = arith.constant 0 : i32
    return %c0_i32, %c0_i32_0 : i32, i32
  }
  func.func @transform_8(%arg0: i32) -> (i32, i32) {
    %c0_i32 = arith.constant 0 : i32
    %c0_i32_0 = arith.constant 0 : i32
    %c0_i32_1 = arith.constant 0 : i32
    return %c0_i32, %c0_i32_0 : i32, i32
  }
  func.func @transform_9(%arg0: i32) -> (i32, i32) {
    %c0_i32 = arith.constant 0 : i32
    %c0_i32_0 = arith.constant 0 : i32
    %c0_i32_1 = arith.constant 0 : i32
    return %c0_i32, %c0_i32_0 : i32, i32
  }
  func.func @transform_10(%arg0: i32) -> (i32, i32) {
    %c0_i32 = arith.constant 0 : i32
    %c0_i32_0 = arith.constant 0 : i32
    %c0_i32_1 = arith.constant 0 : i32
    return %c0_i32, %c0_i32_0 : i32, i32
  }
  func.func @transform_11(%arg0: i32) -> (i32, i32) {
    %c0_i32 = arith.constant 0 : i32
    %c0_i32_0 = arith.constant 0 : i32
    %c0_i32_1 = arith.constant 0 : i32
    return %c0_i32, %c0_i32_0 : i32, i32
  }
  func.func @transform_12(%arg0: i32) -> (i32, i32, i32) {
    %c0_i32 = arith.constant 0 : i32
    %c0_i32_0 = arith.constant 0 : i32
    %c0_i32_1 = arith.constant 0 : i32
    %c0_i32_2 = arith.constant 0 : i32
    return %c0_i32, %c0_i32_0, %c0_i32_1 : i32, i32, i32
  }
  func.func @transform_13(%arg0: i32) -> (i32, i32) {
    %c0_i32 = arith.constant 0 : i32
    %c0_i32_0 = arith.constant 0 : i32
    %c0_i32_1 = arith.constant 0 : i32
    return %c0_i32, %c0_i32_0 : i32, i32
  }
  func.func @transform_14(%arg0: i32) -> (i32, i32, i32) {
    %c0_i32 = arith.constant 0 : i32
    %c0_i32_0 = arith.constant 0 : i32
    %c0_i32_1 = arith.constant 0 : i32
    %c0_i32_2 = arith.constant 0 : i32
    return %c0_i32, %c0_i32_0, %c0_i32_1 : i32, i32, i32
  }
  func.func @transform_15(%arg0: i32) -> (i32, i32) {
    %c0_i32 = arith.constant 0 : i32
    %c0_i32_0 = arith.constant 0 : i32
    %c0_i32_1 = arith.constant 0 : i32
    return %c0_i32, %c0_i32_0 : i32, i32
  }
  func.func @transform_16(%arg0: i32) -> (i32, i32, i32) {
    %c0_i32 = arith.constant 0 : i32
    %c0_i32_0 = arith.constant 0 : i32
    %c0_i32_1 = arith.constant 0 : i32
    return %arg0, %c0_i32, %c0_i32_0 : i32, i32, i32
  }
}

</mosaic_0001>

<bundles_post_ra>
// kernel: refusion_forward.1
= control target key start
LH: loop header
LB: loop body
LE: loop exit
PB: predicated region body
PF: predicated region fallthrough
CT: control target
= control target key end

     0   :  { %s22476_s0 = inlined_call_operand.hbm [shape: f32[2,256,32], index: 0, kind: input, shape index: {}]   ;;  %s22477_s1 = inlined_call_operand.hbm [shape: f32[2,256,32], index: 1, kind: input, shape index: {}]   ;;  %s22478_s2 = inlined_call_operand.vmem [shape: f32[32,32], index: 2, kind: input, shape index: {}]   ;;  %s22479_s3 = inlined_call_operand.vmem [shape: f32[1,32], index: 3, kind: input, shape index: {}]   ;;  %s22480_s4 = inlined_call_operand.vmem [shape: f32[32,32], index: 4, kind: input, shape index: {}]   ;;  %s22481_s5 = inlined_call_operand.vmem [shape: f32[1,32], index: 5, kind: input, shape index: {}]   ;;  %s22482_s6 = inlined_call_operand.vmem [shape: f32[64,4], index: 6, kind: input, shape index: {}]   ;;  %s22483_s7 = inlined_call_operand.vmem [shape: f32[1,4], index: 7, kind: input, shape index: {}]   ;;  %s22484_s8 = inlined_call_operand.vmem [shape: f32[4,64], index: 8, kind: input, shape index: {}]   ;;  %s22485_s9 = inlined_call_operand.vmem [shape: f32[1,64], index: 9, kind: input, shape index: {}]   ;;  %s22486_s10 = inlined_call_operand.vmem [shape: bf16[256,256], index: 10, kind: input, shape index: {}]   ;;  %s22487_s11 = inlined_call_operand.hbm [shape: bf16[256,256], index: 11, kind: input, shape index: {}]   ;;  %s22488_s12 = inlined_call_operand.vmem [shape: f32[9,64,64], index: 12, kind: input, shape index: {}]   ;;  %s22489_s13 = inlined_call_operand.vmem [shape: f32[1,64], index: 13, kind: input, shape index: {}]   ;;  %s22490_s14 = inlined_call_operand.vmem [shape: f32[9,64,32], index: 14, kind: input, shape index: {}]   ;;  %s22491_s15 = inlined_call_operand.vmem [shape: f32[1,32], index: 15, kind: input, shape index: {}]   ;;  %s22492_s16 = inlined_call_operand.hbm [shape: f32[2,256,32], index: 16, kind: output, shape index: {}]  }
   0x1   :  { %22903 = sst [smem:[#allocation102_spill]] %s22476_s0 }
   0x2   :  { %22904 = sst [smem:[#allocation103_spill]] %s22485_s9 }
   0x3   :  { %22905 = sst [smem:[#allocation104_spill]] %s22486_s10 }
   0x4   :  { %22906 = sst [smem:[#allocation105_spill]] %s22487_s11 }
   0x5   :  { %22907 = sst [smem:[#allocation106_spill]] %s22488_s12 }
   0x6   :  { %22908 = sst [smem:[#allocation107_spill]] %s22489_s13 }
   0x7   :  { %22909 = sst [smem:[#allocation108_spill]] %s22490_s14 }
   0x8   :  { %22910 = sst [smem:[#allocation109_spill]] %s22491_s15 }
   0x9   :  { %22911 = sst [smem:[#allocation110_spill]] %s22492_s16 }
   0xa   :  { %21 = vsyncpa [#allocation4], 0 }
   0xb   :  { %23 = vsyncpa [#allocation4 + $0x1], 0 }
   0xc   :  { %24 = vsyncpa [#allocation7], 0 }
   0xd   :  { %26 = vsyncpa [#allocation7 + $0x1], 0 }
   0xe   :  { %27 = vsyncpa [#allocation5], 0 }
   0xf   :  { %29 = vsyncpa [#allocation5 + $0x1], 0  ;;  %s17408_s21 = smov 0   ;;  %s17410_s22 = smov 0  }
  0x10   :  { %s17412_s23 = smov 0   ;;  %s17414_s24 = smov 0  }
  0x11 LB: > { %22912 = sst [smem:[#allocation14_spill]] %s17294_s21  ;;  %s17429_s25 = sadd.s32 4294967295, %s17306_s24   ;;  %s17306_s24 = sphi %s17414_s24, %s23932_s24   ;;  %s17302_s23 = sphi %s17412_s23, %s23934_s23   ;;  %s17298_s22 = sphi %s17410_s22, %s23936_s22   ;;  %s17294_s21 = sphi %s17408_s21, %s23935_s21  }
  0x12   : > { %22913 = sst [smem:[#allocation15_spill]] %s17302_s23  ;;  %s12787_s26 = sadd.s32 4294967294, %s17306_s24  }
  0x13   : > { %p55_p0 = scmp.ne.s32.totalorder %s17298_s22, %s17294_s21  ;;  %p22499_p1 = scmp.eq.s32.totalorder %s17429_s25, 0 }
  0x14   : > { %p405_p3 = scmp.eq.s32.totalorder %s12787_s26, 1  ;;  %p12788_p5 = scmp.ge.s32.totalorder %s17306_s24, 1 }
  0x15   : > { %p17438_p4 = por %p22499_p1, %p55_p0  ;;  %p412_p7 = scmp.lt.s32.totalorder %s17306_s24, 3 }
  0x16   : > { %p17443_p6 = por %p405_p3, %p55_p0  ;;  %s17308_s30 = smov [#allocation8]  }
  0x17   : > { %s22914_s27 = scalar_select %p17438_p4, 1, 0 }
  0x18   : > { %s22915_s28 = scalar_select %p17443_p6, 1, 0 }
  0x19   : > { %p17448_p8 = pnand %p12788_p5, %p412_p7  ;;  %s451_s0 = sshll.u32 %s17308_s30, 4  ;;  %s17452_s0 = int_to_ptr.vmem [resolvable:$true] %s451_s0 }
  0x1a   : > { %22916 = sst [smem:[#allocation16_spill]] %s22915_s28  ;;  %s17464_s18 = sadd.s32 1, %s17306_s24  }
  0x1b   : > { %s22917_s29 = scalar_select %p17448_p8, 1, 0 }
  0x1c   : > { %p16804_p9 = pneg %p17448_p8  ;;  %22919 = sst [smem:[#allocation17_spill]] %s17464_s18 }
  0x1d   : > { %s42_s19 = sadd.s32 1, %s17302_s23  ;;  %s39_s20 = ssub.s32 %s17306_s24, %s17464_s18 }
  0x1e   : > { %p17459_p11 = pnand %p16804_p9, %p22499_p1  ;;  %s22920_s11 = sld [smem:[#allocation105_spill]] }
  0x20   : > { %p17146_p13 = pneg %p17459_p11 }
  0x24   : > { %s17144_s30 = scalar_lea.hbm %s22920_s11, 4096 }
  0x25   : > { %p17145_p12 = scmp.ne.s32.totalorder %s22920_s11, %s17144_s30  ;;  %p17151_p5 = scmp.lt.u32.totalorder %s17144_s30, %s22920_s11 }
  0x27   : > { %p17147_p0 = pnand %p17146_p13, %p17145_p12 }
  0x29   : > { %p17148_p3 = pneg %p17147_p0 }
  0x2b   : > { %p17153_p7 = pnand %p17151_p5, %p17148_p3 }
  0x2d   : > { %17156 = shalt.err (!%p17153_p7)
}
  0x2e   : > { %s17157_s18 = scalar_lea.vmem %s17452_s0, 4096  ;;  %p17165_p2 = scmp.lt.s32.totalorder %s17452_s0, %s17452_s0 }
  0x2f   : > { %p17158_p9 = scmp.ne.s32.totalorder %s17452_s0, %s17157_s18  ;;  %p17166_p6 = scmp.lt.s32.totalorder %s17157_s18, %s17157_s18 }
  0x31   : > { %p17160_p10 = pnand %p17158_p9, %p17146_p13  ;;  %p17167_p4 = por %p17166_p6, %p17165_p2 }
  0x33   : > { %p17161_p1 = pneg %p17160_p10 }
  0x35   : > { %p17168_p8 = pnand %p17167_p4, %p17161_p1 }
  0x37   : > { %17171 = shalt.err (!%p17168_p8)
}
  0x38   : > { %s22504_s16 = smov 128   ;;  %s22506_s13 = smov 8  }
  0x39   : > { %16807 = dma.hbm_to_vmem [thread:$0]  (!%p17459_p11), %s22920_s11, 4096, %s17452_s0, [#allocation7], %s22504_s16, %s22504_s16, %s22506_s13  }
  0x3a   : > { %p40_p1 = scmp.eq.s32.totalorder %s39_s20, 0  ;;  %p49_p2 = scmp.ne.s32.totalorder %s17302_s23, %s17298_s22 }
  0x3b   : > { %p50_p4 = scmp.eq.s32.totalorder %s17306_s24, 0  ;;  %p16820_p6 = scmp.lt.s32.totalorder %s17306_s24, 2 }
  0x3c   : > { %s17498_s28 = scalar_select %p40_p1, %s17302_s23, %s42_s19  }
  0x3d   : > { %p51_p8 = por %p50_p4, %p49_p2  ;;  %p22922_p10 = scmp.eq.s32.totalorder %s17429_s25, 1 }
  0x3e   : > { %22921 = sst [smem:[#allocation18_spill]] %s17498_s28  ;;  %s477_s17 = sand.u32 1, %s17302_s23  }
  0x3f   : > { %p17502_p12 = por %p22922_p10, %p49_p2  ;;  %s13648_s26 = sshll.u32 %s17306_s24, 12 }
  0x40   : > { %s17508_s30 = sshll.u32 %s477_s17, 8  ;;  %s22925_s15 = sld [smem:[#allocation102_spill]] }
  0x41   : > { %s22923_s18 = scalar_select %p17502_p12, 1, 0 }
  0x42   : > { %s481_s19 = scalar_lea.vmem [#allocation3], %s17508_s30  ;;  %p17516_p11 = pnand %p16820_p6, %p51_p8 }
  0x43   : > { %22924 = sst [smem:[#allocation19_spill]] %s22923_s18  ;;  %s488_s20 = sshll.u32 %s481_s19, 4  ;;  %s17520_s20 = int_to_ptr.vmem [resolvable:$true] %s488_s20 }
  0x44   : > { %s17525_s12 = scalar_lea.hbm %s22477_s1, %s13648_s26  ;;  %s17527_s14 = scalar_lea.sflag [#allocation4], %s477_s17 }
  0x45   : > { %p17174_p0 = pneg %p17516_p11 }
  0x46   : > { %s17513_s0 = scalar_lea.hbm %s22925_s15, %s13648_s26  ;;  %s17177_s23 = scalar_lea.hbm %s22925_s15, 8192 }
  0x47   : > { %s17172_s11 = scalar_lea.hbm %s17513_s0, 4096  ;;  %p17178_p7 = scmp.lt.u32.totalorder %s17513_s0, %s22925_s15 }
  0x48   : > { %p17173_p13 = scmp.ne.s32.totalorder %s17513_s0, %s17172_s11  ;;  %p17179_p9 = scmp.lt.u32.totalorder %s17177_s23, %s17172_s11 }
  0x49   : > { %p17181_p2 = scmp.lt.u32.totalorder %s17172_s11, %s17513_s0 }
  0x4a   : > { %p17175_p3 = pnand %p17174_p0, %p17173_p13  ;;  %p17180_p1 = por %p17179_p9, %p17178_p7 }
  0x4c   : > { %p17176_p5 = pneg %p17175_p3  ;;  %p17182_p4 = por %p17181_p2, %p17180_p1 }
  0x4e   : > { %p17183_p6 = pnand %p17182_p4, %p17176_p5 }
  0x50   : > { %17186 = shalt.err (!%p17183_p6)
}
  0x51   : > { %s17187_s16 = scalar_lea.vmem %s17520_s20, 4096  ;;  %s17311_s13 = smov [#allocation3]  }
  0x52   : > { %p17188_p8 = scmp.ne.s32.totalorder %s17520_s20, %s17187_s16  ;;  %s17192_s28 = sshll.u32 %s17311_s13, 4  ;;  %s17193_s28 = int_to_ptr.vmem [resolvable:$false] %s17192_s28 }
  0x53   : > { %s17194_s10 = scalar_lea.vmem %s17193_s28, 8192  ;;  %p17195_p3 = scmp.lt.s32.totalorder %s17520_s20, %s17193_s28 }
  0x54   : > { %p17190_p10 = pnand %p17188_p8, %p17174_p0  ;;  %p17196_p7 = scmp.lt.s32.totalorder %s17194_s10, %s17187_s16 }
  0x56   : > { %p17191_p13 = pneg %p17190_p10  ;;  %p17197_p9 = por %p17196_p7, %p17195_p3 }
  0x58   : > { %p17198_p1 = pnand %p17197_p9, %p17191_p13 }
  0x5a   : > { %17201 = shalt.err (!%p17198_p1)
}
  0x5b   : > { %s22927_s11 = smov 8   ;;  %s22928_s23 = smov 128  }
  0x5c   : > { %16811 = dma.hbm_to_vmem [thread:$0]  (!%p17516_p11), %s17513_s0, 4096, %s17520_s20, %s17527_s14, %s22928_s23, %s22928_s23, %s22927_s11  }
  0x5d   : > { %s502_s18 = scalar_lea.vmem [#allocation6], %s17508_s30  ;;  %s498_s26 = sand.u32 1, %s17306_s24  }
  0x5e   : > { %s509_s17 = sshll.u32 %s502_s18, 4  ;;  %s17562_s19 = scalar_lea.sflag [#allocation7], %s498_s26  ;;  %s17560_s17 = int_to_ptr.vmem [resolvable:$true] %s509_s17 }
  0x5f   : > { %s17202_s16 = scalar_lea.hbm %s17525_s12, 4096  ;;  %s17207_s10 = scalar_lea.hbm %s22477_s1, 8192 }
  0x60   : > { %p17203_p5 = scmp.ne.s32.totalorder %s17525_s12, %s17202_s16  ;;  %p17208_p6 = scmp.lt.u32.totalorder %s17525_s12, %s22477_s1 }
  0x61   : > { %p17209_p8 = scmp.lt.u32.totalorder %s17207_s10, %s17202_s16  ;;  %p17211_p13 = scmp.lt.u32.totalorder %s17202_s16, %s17525_s12 }
  0x62   : > { %p17205_p2 = pnand %p17203_p5, %p17174_p0 }
  0x63   : > { %p17210_p10 = por %p17209_p8, %p17208_p6 }
  0x64   : > { %p17206_p4 = pneg %p17205_p2 }
  0x65   : > { %p17212_p3 = por %p17211_p13, %p17210_p10 }
  0x67   : > { %p17213_p7 = pnand %p17212_p3, %p17206_p4 }
  0x69   : > { %17216 = shalt.err (!%p17213_p7)
}
  0x6a   : > { %s17217_s30 = scalar_lea.vmem %s17560_s17, 4096  ;;  %s17312_s0 = smov [#allocation6]  }
  0x6b   : > { %p17218_p9 = scmp.ne.s32.totalorder %s17560_s17, %s17217_s30  ;;  %s17222_s20 = sshll.u32 %s17312_s0, 4  ;;  %s17223_s20 = int_to_ptr.vmem [resolvable:$false] %s17222_s20 }
  0x6c   : > { %s17224_s9 = scalar_lea.vmem %s17223_s20, 8192  ;;  %p17225_p2 = scmp.lt.s32.totalorder %s17560_s17, %s17223_s20 }
  0x6d   : > { %p17220_p1 = pnand %p17218_p9, %p17174_p0  ;;  %p17226_p6 = scmp.lt.s32.totalorder %s17224_s9, %s17217_s30 }
  0x6f   : > { %p17221_p5 = pneg %p17220_p1  ;;  %p17227_p8 = por %p17226_p6, %p17225_p2 }
  0x71   : > { %p17228_p10 = pnand %p17227_p8, %p17221_p5 }
  0x73   : > { %17231 = shalt.err (!%p17228_p10)
}
  0x74   : > { %16814 = dma.hbm_to_vmem [thread:$0]  (!%p17516_p11), %s17525_s12, 4096, %s17560_s17, %s17562_s19, %s22928_s23, %s22928_s23, %s22927_s11  }
  0x75   : > { %p22929_p0 = scmp.ne.s32.totalorder %s22917_s29, 0 }
  0x77   : > { %521 = sbr.rel (%p22929_p0) target bundleno = 3871 (0xf1f), region = 84 }
  0x7e   : > { %s17594_s15 = sand.u32 1, %s17298_s22   ;;  %p22930_p4 = scmp.ne.s32.totalorder %s22914_s27, 0 }
  0x7f   : > { %s17597_s14 = sshll.u32 %s17594_s15, 8  ;;  %s524_s21 = scalar_lea.sflag [#allocation4], %s17594_s15 }
  0x80   : > { %s17601_s18 = scalar_lea.vmem [#allocation3], %s17597_s14 }
  0x81   : > { %17277 = dma.done.wait (%p22930_p4), %s524_s21, 4096  }
  0x82   : > { %17279 = vsyncadd (%p22930_p4), %s524_s21, 4294963200  ;;  %s532_s29 = sand.u32 1, %s17429_s25   ;;  %s17609_s11 = scalar_lea.vmem [#allocation6], %s17597_s14 }
  0x83   : > { %s533_s12 = scalar_lea.sflag [#allocation7], %s532_s29 }
  0x84   : > { %17281 = dma.done.wait (%p22930_p4), %s533_s12, 4096  }
  0x85   : > { %17283 = vsyncadd (%p22930_p4), %s533_s12, 4294963200  ;;  %p22931_p11 = scmp.eq.s32.totalorder %s17429_s25, 0 }
  0x87   : > { %17285 = dma.done.wait (%p22931_p11), [#allocation7], 4096   ;;  %p22932_p13 = pmov %p22931_p11 }
  0x88   : > { %v1115_v0 = vld [vmem:[%s22478_s2] sm:$0xff]  ;;  %v1116_v1 = vld [vmem:[%s22478_s2 + $0x8] sm:$0xff]  ;;  %vm22711_vm0 = vcmask 261120   ;;  %v1117_v5 = vld [vmem:[%s22478_s2 + $0x10] sm:$0xff]  ;;  %vm22833_vm1 = vcmask 523264   ;;  %vm2301_vm2 = vcmask 1043456  }
  0x89   : > { %17287 = vsyncadd (%p22932_p13), [#allocation7], 4294963200  ;;  %v1480_v2 = vld [vmem:[%s22480_s4] sm:$0xff]  ;;  %v15966_v3 = vpack.c.bf16 %v1116_v1, %v1115_v0  ;;  %v1481_v4 = vld [vmem:[%s22480_s4 + $0x8] sm:$0xff]  ;;  %vm17315_vm3 = vmmov 0   ;;  %s17316_s16 = smov 32  }
  0x8a   : > { %v1118_v6 = vld [vmem:[%s22478_s2 + $0x18] sm:$0xff]  ;;  %v15974_v7 = vpack.c.bf16 %v1481_v4, %v1480_v2  ;;  %v1482_v9 = vld [vmem:[%s22480_s4 + $0x10] sm:$0xff]  ;;  %v1085_v16 = vld [vmem:[%s17601_s18 + $0x10] sm:$0xff]  ;;  %vm2198_vm4 = vcmask 1040384   ;;  %vm2297_vm5 = vcmask 31744   ;;  %s22993_s28 = sld [smem:[#allocation103_spill]] }
  0x8b   : > { %v15970_v8 = vpack.c.bf16 %v1118_v6, %v1117_v5  ;;  %v1483_v10 = vld [vmem:[%s22480_s4 + $0x18] sm:$0xff]  ;;  %v1083_v11 = vld [vmem:[%s17601_s18] sm:$0xff]  ;;  %15967 = vmatprep.subr.bf16.mxu0 %v15966_v3  ;;  %v1450_v17 = vld [vmem:[%s17609_s11 + $0x10] sm:$0xff]  ;;  %vm2375_vm6 = vcmask 517120   ;;  %s17317_s10 = smov 96   ;;  %vm2776_vm7 = vcmask 7168  }
  0x8c   : > { %v15978_v12 = vpack.c.bf16 %v1483_v10, %v1482_v9  ;;  %14686 = vmatprep.mubr.msk.f32.mxu0 %vm22711_vm0, %v1083_v11  ;;  %v1448_v13 = vld [vmem:[%s17609_s11] sm:$0xff]  ;;  %15975 = vmatprep.subr.bf16.mxu1 %v15974_v7  ;;  %v1084_v14 = vld [vmem:[%s17601_s18 + $0x8] sm:$0xff]  ;;  %v1086_v18 = vld [vmem:[%s17601_s18 + $0x18] sm:$0xff]  ;;  %s23117_s20 = sld [smem:[#allocation104_spill]]  ;;  %s23136_s23 = sld [smem:[#allocation106_spill]]  ;;  %vm22712_vm8 = vcmask 523520  }
  0x8d   : > { %15969 = vmatpush3.bf16.msra.mxu0 %v15966_v3  ;;  %15977 = vmatpush3.bf16.msra.mxu1 %v15974_v7  ;;  %v1449_v15 = vld [vmem:[%s17609_s11 + $0x8] sm:$0xff]  ;;  %v1451_v19 = vld [vmem:[%s17609_s11 + $0x18] sm:$0xff]  ;;  %v1087_v20 = vld [vmem:[%s17601_s18 + $0x20] sm:$0xff]  ;;  %s23401_s9 = sld [smem:[#allocation107_spill]]  ;;  %s23894_s30 = sld [smem:[#allocation109_spill]] }
  0x8e   : > { %15971 = vmatprep.subr.bf16.mxu0 %v15970_v8  ;;  %15979 = vmatprep.subr.bf16.mxu1 %v15978_v12  ;;  %v1452_v21 = vld [vmem:[%s17609_s11 + $0x20] sm:$0xff]  ;;  %v1088_v22 = vld [vmem:[%s17601_s18 + $0x28] sm:$0xff]  ;;  %v1089_v24 = vld [vmem:[%s17601_s18 + $0x30] sm:$0xff]  ;;  %s22329_s0 = scalar_lea.vmem [#allocation9], %s17597_s14  ;;  %s13650_s14 = sshll.u32 %s17429_s25, 12 }
  0x8f   : > { %14742 = vmatprep.mubr.msk.f32.mxu1 %vm22711_vm0, %v1448_v13  ;;  %v1453_v23 = vld [vmem:[%s17609_s11 + $0x28] sm:$0xff]  ;;  %v1454_v25 = vld [vmem:[%s17609_s11 + $0x30] sm:$0xff]  ;;  %v1090_v26 = vld [vmem:[%s17601_s18 + $0x38] sm:$0xff]  ;;  %s23925_s12 = sld [smem:[#allocation110_spill]]  ;;  %s12669_s25 = scalar_lea.sflag [#allocation5], %s17594_s15 }
  0x90   : > { %v1455_v27 = vld [vmem:[%s17609_s11 + $0x38] sm:$0xff]  ;;  %v1091_v28 = vld [vmem:[%s17601_s18 + $0x40] sm:$0xff]  ;;  %v1092_v30 = vld [vmem:[%s17601_s18 + $0x48] sm:$0xff]  ;;  %s17320_s19 = smov [#allocation9]  }
  0x91   : > { %15973 = vmatpush3.bf16.msra.mxu0 %v15970_v8  ;;  %15981 = vmatpush3.bf16.msra.mxu1 %v15978_v12  ;;  %v1456_v29 = vld [vmem:[%s17609_s11 + $0x40] sm:$0xff]  ;;  %v1457_v31 = vld [vmem:[%s17609_s11 + $0x48] sm:$0xff]  ;;  %v1093_v32 = vld [vmem:[%s17601_s18 + $0x50] sm:$0xff] }
  0x92   : > { %v1458_v33 = vld [vmem:[%s17609_s11 + $0x50] sm:$0xff]  ;;  %v1094_v34 = vld [vmem:[%s17601_s18 + $0x58] sm:$0xff]  ;;  %v1095_v36 = vld [vmem:[%s17601_s18 + $0x60] sm:$0xff]  ;;  %s23137_s17 = smov %s23136_s23 }
  0x93   : > { %v1459_v35 = vld [vmem:[%s17609_s11 + $0x58] sm:$0xff]  ;;  %v1460_v37 = vld [vmem:[%s17609_s11 + $0x60] sm:$0xff]  ;;  %v1096_v38 = vld [vmem:[%s17601_s18 + $0x68] sm:$0xff] }
  0x94   : > { %14687 = vmatmul.mubr.msk.f32.vlgmr.msra.gmra.mrb[0].mxu0 %vm22711_vm0, %v1084_v14  ;;  %14743 = vmatmul.mubr.msk.f32.vlgmr.msra.gmra.mrb[0].mxu1 %vm22711_vm0, %v1449_v15  ;;  %v1461_v39 = vld [vmem:[%s17609_s11 + $0x68] sm:$0xff]  ;;  %v1097_v40 = vld [vmem:[%s17601_s18 + $0x70] sm:$0xff]  ;;  %v1098_v42 = vld [vmem:[%s17601_s18 + $0x78] sm:$0xff] }
  0x95   : > { %14689 = vmatprep.mubr.msk.f32.mxu0 %vm22711_vm0, %v1085_v16  ;;  %14745 = vmatprep.mubr.msk.f32.mxu1 %vm22711_vm0, %v1450_v17  ;;  %v1462_v41 = vld [vmem:[%s17609_s11 + $0x70] sm:$0xff]  ;;  %v1463_v43 = vld [vmem:[%s17609_s11 + $0x78] sm:$0xff]  ;;  %v1099_v44 = vld [vmem:[%s17601_s18 + $0x80] sm:$0xff] }
  0x96   : > { %v1464_v45 = vld [vmem:[%s17609_s11 + $0x80] sm:$0xff]  ;;  %v1100_v46 = vld [vmem:[%s17601_s18 + $0x88] sm:$0xff]  ;;  %v1101_v48 = vld [vmem:[%s17601_s18 + $0x90] sm:$0xff] }
  0x97   : > { %v1465_v47 = vld [vmem:[%s17609_s11 + $0x88] sm:$0xff]  ;;  %v1466_v49 = vld [vmem:[%s17609_s11 + $0x90] sm:$0xff]  ;;  %v1102_v50 = vld [vmem:[%s17601_s18 + $0x98] sm:$0xff] }
  0x98   : > { %14690 = vmatmul.mubr.msk.f32.gmra.mrb[2].mxu0 %vm22711_vm0, %v1086_v18  ;;  %14746 = vmatmul.mubr.msk.f32.gmra.mrb[2].mxu1 %vm22711_vm0, %v1451_v19  ;;  %v1467_v51 = vld [vmem:[%s17609_s11 + $0x98] sm:$0xff]  ;;  %v1103_v52 = vld [vmem:[%s17601_s18 + $0xa0] sm:$0xff]  ;;  %v1104_v54 = vld [vmem:[%s17601_s18 + $0xa8] sm:$0xff]  ;;  %v17313_v18 = vmov 0.0|0.0  }
  0x99   : > { %14692 = vmatprep.mubr.msk.f32.mxu0 %vm22711_vm0, %v1087_v20  ;;  %14748 = vmatprep.mubr.msk.f32.mxu1 %vm22711_vm0, %v1452_v21  ;;  %v1468_v53 = vld [vmem:[%s17609_s11 + $0xa0] sm:$0xff]  ;;  %v1469_v55 = vld [vmem:[%s17609_s11 + $0xa8] sm:$0xff]  ;;  %v1105_v56 = vld [vmem:[%s17601_s18 + $0xb0] sm:$0xff] }
  0x9a   : > { %v1470_v57 = vld [vmem:[%s17609_s11 + $0xb0] sm:$0xff]  ;;  %v1106_v58 = vld [vmem:[%s17601_s18 + $0xb8] sm:$0xff]  ;;  %v1107_v60 = vld [vmem:[%s17601_s18 + $0xc0] sm:$0xff]  ;;  %15982 = vmatprep.subr.bf16.mxu0 %v17313_v18 }
  0x9b   : > { %v1471_v59 = vld [vmem:[%s17609_s11 + $0xb8] sm:$0xff]  ;;  %v1472_v61 = vld [vmem:[%s17609_s11 + $0xc0] sm:$0xff]  ;;  %v1108_v62 = vld [vmem:[%s17601_s18 + $0xc8] sm:$0xff] }
  0x9c   : > { %14693 = vmatmul.mubr.msk.f32.gmra.mrb[4].mxu0 %vm22711_vm0, %v1088_v22  ;;  %14749 = vmatmul.mubr.msk.f32.gmra.mrb[4].mxu1 %vm22711_vm0, %v1453_v23  ;;  %v1473_v63 = vld [vmem:[%s17609_s11 + $0xc8] sm:$0xff]  ;;  %v1109_v0 = vld [vmem:[%s17601_s18 + $0xd0] sm:$0xff]  ;;  %v1110_v2 = vld [vmem:[%s17601_s18 + $0xd8] sm:$0xff] }
  0x9d   : > { %14695 = vmatprep.mubr.msk.f32.mxu0 %vm22711_vm0, %v1089_v24  ;;  %14751 = vmatprep.mubr.msk.f32.mxu1 %vm22711_vm0, %v1454_v25  ;;  %v1474_v1 = vld [vmem:[%s17609_s11 + $0xd0] sm:$0xff]  ;;  %v1475_v3 = vld [vmem:[%s17609_s11 + $0xd8] sm:$0xff]  ;;  %v1111_v4 = vld [vmem:[%s17601_s18 + $0xe0] sm:$0xff] }
  0x9e   : > { %v1476_v5 = vld [vmem:[%s17609_s11 + $0xe0] sm:$0xff]  ;;  %v1112_v6 = vld [vmem:[%s17601_s18 + $0xe8] sm:$0xff]  ;;  %v1113_v8 = vld [vmem:[%s17601_s18 + $0xf0] sm:$0xff] }
  0x9f   : > { %v1477_v7 = vld [vmem:[%s17609_s11 + $0xe8] sm:$0xff]  ;;  %v1478_v9 = vld [vmem:[%s17609_s11 + $0xf0] sm:$0xff]  ;;  %v1114_v10 = vld [vmem:[%s17601_s18 + $0xf8] sm:$0xff] }
  0xa0   : > { %14696 = vmatmul.mubr.msk.f32.gmra.mrb[6].mxu0 %vm22711_vm0, %v1090_v26  ;;  %14752 = vmatmul.mubr.msk.f32.gmra.mrb[6].mxu1 %vm22711_vm0, %v1455_v27  ;;  %v1479_v11 = vld [vmem:[%s17609_s11 + $0xf8] sm:$0xff]  ;;  %v17774_v12 = vld [vmem:[%s22479_s3] ss:$0 sm:$0xff]  ;;  %v2202_v16 = vld [vmem:[%s22482_s6 + $0x10] sm:$0xff]  ;;  %s23400_s11 = sld [smem:[#allocation108_spill]] }
  0xa1   : > { %14698 = vmatprep.mubr.msk.f32.mxu0 %vm22711_vm0, %v1091_v28  ;;  %14754 = vmatprep.mubr.msk.f32.mxu1 %vm22711_vm0, %v1456_v29  ;;  %v17779_v13 = vld [vmem:[%s22481_s5] ss:$0 sm:$0xff]  ;;  %v2201_v15 = vld [vmem:[%s22482_s6 + $0x8] sm:$0xff]  ;;  %v2203_v20 = vld [vmem:[%s22482_s6 + $0x18] sm:$0xff] }
  0xa2   : > { %v2200_v14 = vld [vmem:[%s22482_s6] sm:$0xff]  ;;  %v15986_v27 = vpack.c.bf16 %v2203_v20, %v2202_v16  ;;  %v2205_v29 = vld [vmem:[%s22482_s6 + $0x28] sm:$0xff] }
  0xa3   : > { %v15983_v19 = vpack.c.bf16 %v2201_v15, %v2200_v14  ;;  %v2204_v28 = vld [vmem:[%s22482_s6 + $0x20] sm:$0xff] }
  0xa4   : > { %14699 = vmatmul.mubr.msk.f32.gmra.mrb[8].mxu0 %vm22711_vm0, %v1092_v30  ;;  %14755 = vmatmul.mubr.msk.f32.gmra.mrb[8].mxu1 %vm22711_vm0, %v1457_v31 }
  0xa5   : > { %14701 = vmatprep.mubr.msk.f32.mxu0 %vm22711_vm0, %v1093_v32  ;;  %14757 = vmatprep.mubr.msk.f32.mxu1 %vm22711_vm0, %v1458_v33 }
  0xa6   : > { %15984 = vmatpush3.bf16.msra.mxu0 %v15983_v19 }
  0xa7   : > { %15985 = vmatprep.subr.bf16.mxu0 %v17313_v18 }
  0xa8   : > { %14702 = vmatmul.mubr.msk.f32.gmra.mrb[10].mxu0 %vm22711_vm0, %v1094_v34  ;;  %14758 = vmatmul.mubr.msk.f32.gmra.mrb[10].mxu1 %vm22711_vm0, %v1459_v35 }
  0xa9   : > { %14704 = vmatprep.mubr.msk.f32.mxu0 %vm22711_vm0, %v1095_v36  ;;  %14760 = vmatprep.mubr.msk.f32.mxu1 %vm22711_vm0, %v1460_v37  ;;  %v15989_v37 = vpack.c.bf16 %v2205_v29, %v2204_v28 }
  0xaa   : > { %15987 = vmatpush3.bf16.msra.mxu0 %v15986_v27 }
  0xab   : > { %15988 = vmatprep.subr.bf16.mxu0 %v17313_v18 }
  0xac   : > { %14705 = vmatmul.mubr.msk.f32.gmra.mrb[12].mxu0 %vm22711_vm0, %v1096_v38  ;;  %14761 = vmatmul.mubr.msk.f32.gmra.mrb[12].mxu1 %vm22711_vm0, %v1461_v39 }
  0xad   : > { %14707 = vmatprep.mubr.msk.f32.mxu0 %vm22711_vm0, %v1097_v40  ;;  %14763 = vmatprep.mubr.msk.f32.mxu1 %vm22711_vm0, %v1462_v41 }
  0xae   : > { %15990 = vmatpush3.bf16.msra.mxu0 %v15989_v37 }
  0xaf   : > { %15991 = vmatprep.subr.bf16.mxu0 %v17313_v18 }
  0xb0   : > { %14708 = vmatmul.mubr.msk.f32.gmra.mrb[14].mxu0 %vm22711_vm0, %v1098_v42  ;;  %14764 = vmatmul.mubr.msk.f32.gmra.mrb[14].mxu1 %vm22711_vm0, %v1463_v43  ;;  %v2206_v43 = vld [vmem:[%s22482_s6 + $0x30] sm:$0xff] }
  0xb1   : > { %14710 = vmatprep.mubr.msk.f32.mxu0 %vm22711_vm0, %v1099_v44  ;;  %14766 = vmatprep.mubr.msk.f32.mxu1 %vm22711_vm0, %v1464_v45  ;;  %v2207_v44 = vld [vmem:[%s22482_s6 + $0x38] sm:$0xff] }
  0xb4   : > { %14711 = vmatmul.mubr.msk.f32.gmra.mrb[16].mxu0 %vm22711_vm0, %v1100_v46  ;;  %14767 = vmatmul.mubr.msk.f32.gmra.mrb[16].mxu1 %vm22711_vm0, %v1465_v47 }
  0xb5   : > { %14713 = vmatprep.mubr.msk.f32.mxu0 %vm22711_vm0, %v1101_v48  ;;  %14769 = vmatprep.mubr.msk.f32.mxu1 %vm22711_vm0, %v1466_v49 }
  0xb8   : > { %14714 = vmatmul.mubr.msk.f32.gmra.mrb[18].mxu0 %vm22711_vm0, %v1102_v50  ;;  %14770 = vmatmul.mubr.msk.f32.gmra.mrb[18].mxu1 %vm22711_vm0, %v1467_v51  ;;  %v15992_v51 = vpack.c.bf16 %v2207_v44, %v2206_v43 }
  0xb9   : > { %14716 = vmatprep.mubr.msk.f32.mxu0 %vm22711_vm0, %v1103_v52  ;;  %14772 = vmatprep.mubr.msk.f32.mxu1 %vm22711_vm0, %v1468_v53 }
  0xba   : > { %15993 = vmatpush3.bf16.msra.mxu0 %v15992_v51 }
  0xbc   : > { %14717 = vmatmul.mubr.msk.f32.gmra.mrb[20].mxu0 %vm22711_vm0, %v1104_v54  ;;  %14773 = vmatmul.mubr.msk.f32.gmra.mrb[20].mxu1 %vm22711_vm0, %v1469_v55 }
  0xbd   : > { %14719 = vmatprep.mubr.msk.f32.mxu0 %vm22711_vm0, %v1105_v56  ;;  %14775 = vmatprep.mubr.msk.f32.mxu1 %vm22711_vm0, %v1470_v57 }
  0xc0   : > { %14720 = vmatmul.mubr.msk.f32.gmra.mrb[22].mxu0 %vm22711_vm0, %v1106_v58  ;;  %14776 = vmatmul.mubr.msk.f32.gmra.mrb[22].mxu1 %vm22711_vm0, %v1471_v59 }
  0xc1   : > { %14722 = vmatprep.mubr.msk.f32.mxu0 %vm22711_vm0, %v1107_v60  ;;  %14778 = vmatprep.mubr.msk.f32.mxu1 %vm22711_vm0, %v1472_v61 }
  0xc4   : > { %14723 = vmatmul.mubr.msk.f32.gmra.mrb[24].mxu0 %vm22711_vm0, %v1108_v62  ;;  %14779 = vmatmul.mubr.msk.f32.gmra.mrb[24].mxu1 %vm22711_vm0, %v1473_v63 }
  0xc5   : > { %14725 = vmatprep.mubr.msk.f32.mxu0 %vm22711_vm0, %v1109_v0  ;;  %14781 = vmatprep.mubr.msk.f32.mxu1 %vm22711_vm0, %v1474_v1 }
  0xc8   : > { %14726 = vmatmul.mubr.msk.f32.gmra.mrb[26].mxu0 %vm22711_vm0, %v1110_v2  ;;  %14782 = vmatmul.mubr.msk.f32.gmra.mrb[26].mxu1 %vm22711_vm0, %v1475_v3 }
  0xc9   : > { %14728 = vmatprep.mubr.msk.f32.mxu0 %vm22711_vm0, %v1111_v4  ;;  %14784 = vmatprep.mubr.msk.f32.mxu1 %vm22711_vm0, %v1476_v5 }
  0xcc   : > { %14729 = vmatmul.mubr.msk.f32.gmra.mrb[28].mxu0 %vm22711_vm0, %v1112_v6  ;;  %14785 = vmatmul.mubr.msk.f32.gmra.mrb[28].mxu1 %vm22711_vm0, %v1477_v7 }
  0xcd   : > { %14731 = vmatprep.mubr.msk.f32.mxu0 %vm22711_vm0, %v1113_v8  ;;  %14787 = vmatprep.mubr.msk.f32.mxu1 %vm22711_vm0, %v1478_v9 }
  0xd0   : > { %14732 = vmatmul.mubr.msk.f32.gmra.mrb[30].mxu0 %vm22711_vm0, %v1114_v10  ;;  %14788 = vmatmul.mubr.msk.f32.gmra.mrb[30].mxu1 %vm22711_vm0, %v1479_v11 }
 0x167   : > { %v14688_v17 = vpop.f32.mrb[0].mxu0  ;;  %v14744_v22 = vpop.f32.mrb[0].mxu1 }
 0x168   : > { %v1295_v21 = vadd.f32 %v14688_v17, %v17774_v12  ;;  %v1289_v23 = vpop.f32.mrb[1].mxu0  ;;  %v1659_v24 = vadd.f32 %v14744_v22, %v17779_v13  ;;  %v1653_v26 = vpop.f32.mrb[1].mxu1 }
 0x169   : > { %v1290_v25 = vadd.f32 %v17774_v12, %v1289_v23  ;;  %v1654_v30 = vadd.f32 %v17779_v13, %v1653_v26 }
 0x16a   : > { %v1813_v31 = vmul.f32 %v1659_v24, %v1295_v21 }
 0x16b   : > { %v14691_v32 = vpop.f32.mrb[2].mxu0  ;;  %v1812_v33 = vmul.f32 %v1654_v30, %v1290_v25  ;;  %v14747_v35 = vpop.f32.mrb[2].mxu1 }
 0x16c   : > { %v1305_v34 = vadd.f32 %v14691_v32, %v17774_v12  ;;  %v1299_v36 = vpop.f32.mrb[3].mxu0  ;;  %v17804_v38 = vadd.f32 %v1813_v31, %v1295_v21  ;;  %v17806_v39 = vadd.f32 %v1813_v31, %v1659_v24  ;;  %v1669_v40 = vadd.f32 %v14747_v35, %v17779_v13  ;;  %v1663_v42 = vpop.f32.mrb[3].mxu1 }
 0x16d   : > { %v1300_v41 = vadd.f32 %v17774_v12, %v1299_v36  ;;  %v17816_v45 = vadd.f32 %v1812_v33, %v1290_v25  ;;  %v17818_v46 = vadd.f32 %v1812_v33, %v1654_v30  ;;  %v1664_v47 = vadd.f32 %v17779_v13, %v1663_v42 }
 0x16e   : > { %22933 = vst [vmem:[#allocation20_spill] sm:$0xff] %v17806_v39  ;;  %v1978_v52 = vsel %vm22711_vm0, %v17806_v39, 0.0  ;;  %v1815_v54 = vmul.f32 %v1669_v40, %v1305_v34 }
 0x16f   : > { %22934 = vst [vmem:[#allocation21_spill] sm:$0xff] %v17818_v46  ;;  %v14694_v48 = vpop.f32.mrb[4].mxu0  ;;  %v14750_v49 = vpop.f32.mrb[4].mxu1  ;;  %v1977_v53 = vsel %vm22711_vm0, %v17818_v46, 0.0  ;;  %v1814_v55 = vmul.f32 %v1664_v47, %v1300_v41 }
 0x170   : > { %v1309_v50 = vpop.f32.mrb[5].mxu0  ;;  %v1673_v56 = vpop.f32.mrb[5].mxu1  ;;  %v1315_v57 = vadd.f32 %v14694_v48, %v17774_v12  ;;  %v1679_v58 = vadd.f32 %v14750_v49, %v17779_v13  ;;  %v17829_v61 = vadd.f32 %v1815_v54, %v1305_v34  ;;  %v17831_v62 = vadd.f32 %v1815_v54, %v1669_v40 }
 0x171   : > { %v1310_v59 = vadd.f32 %v17774_v12, %v1309_v50  ;;  %v1674_v60 = vadd.f32 %v17779_v13, %v1673_v56  ;;  %v17833_v63 = vadd.f32 %v1814_v55, %v1300_v41  ;;  %v17835_v0 = vadd.f32 %v1814_v55, %v1664_v47 }
 0x172   : > { %22935 = vst [vmem:[#allocation22_spill] sm:$0xff] %v17831_v62  ;;  %v1817_v2 = vmul.f32 %v1679_v58, %v1315_v57  ;;  %v1979_v6 = vadd.f32 %v1978_v52, %v1977_v53  ;;  %v1982_v22 = vsel %vm22711_vm0, %v17831_v62, 0.0 }
 0x173   : > { %22936 = vst [vmem:[#allocation23_spill] sm:$0xff] %v17833_v63  ;;  %v14697_v1 = vpop.f32.mrb[6].mxu0  ;;  %v1816_v3 = vmul.f32 %v1674_v60, %v1310_v59  ;;  %v14753_v4 = vpop.f32.mrb[6].mxu1  ;;  %v1980_v8 = vsel %vm22711_vm0, %v17835_v0, 0.0 }
 0x174   : > { %v1319_v5 = vpop.f32.mrb[7].mxu0  ;;  %v1683_v7 = vpop.f32.mrb[7].mxu1  ;;  %v1981_v9 = vadd.f32 %v1980_v8, %v1979_v6  ;;  %v17839_v10 = vadd.f32 %v1817_v2, %v1315_v57  ;;  %v17841_v11 = vadd.f32 %v1817_v2, %v1679_v58  ;;  %v1325_v17 = vadd.f32 %v14697_v1, %v17774_v12 }
 0x175   : > { %v17843_v15 = vadd.f32 %v1816_v3, %v1310_v59  ;;  %v17845_v16 = vadd.f32 %v1816_v3, %v1674_v60  ;;  %v1689_v18 = vadd.f32 %v14753_v4, %v17779_v13  ;;  %v1320_v25 = vadd.f32 %v17774_v12, %v1319_v5 }
 0x176   : > { %22937 = vst [vmem:[#allocation24_spill] sm:$0xff] %v17839_v10  ;;  %22938 = vst [vmem:[#allocation25_spill] sm:$0xff] %v17841_v11  ;;  %v1983_v23 = vadd.f32 %v1982_v22, %v1981_v9  ;;  %v1684_v31 = vadd.f32 %v17779_v13, %v1683_v7  ;;  %v1986_v40 = vsel %vm22711_vm0, %v17841_v11, 0.0 }
 0x177   : > { %v14700_v14 = vpop.f32.mrb[8].mxu0  ;;  %v14756_v19 = vpop.f32.mrb[8].mxu1  ;;  %v1984_v24 = vsel %vm22711_vm0, %v17845_v16, 0.0  ;;  %v1819_v27 = vmul.f32 %v1689_v18, %v1325_v17 }
 0x178   : > { %v1329_v20 = vpop.f32.mrb[9].mxu0  ;;  %v1693_v21 = vpop.f32.mrb[9].mxu1  ;;  %v1985_v30 = vadd.f32 %v1984_v24, %v1983_v23  ;;  %v1335_v32 = vadd.f32 %v14700_v14, %v17774_v12  ;;  %v1699_v33 = vadd.f32 %v14756_v19, %v17779_v13  ;;  %v1818_v41 = vmul.f32 %v1684_v31, %v1320_v25 }
 0x179   : > { %v17857_v35 = vadd.f32 %v1819_v27, %v1325_v17  ;;  %v17859_v36 = vadd.f32 %v1819_v27, %v1689_v18  ;;  %v1330_v37 = vadd.f32 %v17774_v12, %v1329_v20  ;;  %v1694_v43 = vadd.f32 %v17779_v13, %v1693_v21 }
 0x17a   : > { %v1821_v42 = vmul.f32 %v1699_v33, %v1335_v32  ;;  %v1987_v47 = vadd.f32 %v1986_v40, %v1985_v30  ;;  %v17865_v50 = vadd.f32 %v1818_v41, %v1320_v25  ;;  %v17867_v51 = vadd.f32 %v1818_v41, %v1684_v31 }
 0x17b   : > { %v14703_v26 = vpop.f32.mrb[10].mxu0  ;;  %v14759_v28 = vpop.f32.mrb[10].mxu1  ;;  %22939 = vst [vmem:[#allocation26_spill] sm:$0xff] %v17857_v35  ;;  %22940 = vst [vmem:[#allocation27_spill] sm:$0xff] %v17859_v36  ;;  %v1820_v55 = vmul.f32 %v1694_v43, %v1330_v37  ;;  %v1990_v2 = vsel %vm22711_vm0, %v17859_v36, 0.0 }
 0x17c   : > { %v1339_v29 = vpop.f32.mrb[11].mxu0  ;;  %v1703_v34 = vpop.f32.mrb[11].mxu1  ;;  %22941 = vst [vmem:[#allocation28_spill] sm:$0xff] %v17865_v50  ;;  %v17869_v53 = vadd.f32 %v1821_v42, %v1335_v32  ;;  %v17871_v54 = vadd.f32 %v1821_v42, %v1699_v33  ;;  %v1988_v56 = vsel %vm22711_vm0, %v17867_v51, 0.0  ;;  %v1345_v5 = vadd.f32 %v14703_v26, %v17774_v12 }
 0x17d   : > { %v1989_v58 = vadd.f32 %v1988_v56, %v1987_v47  ;;  %v17877_v3 = vadd.f32 %v1820_v55, %v1330_v37  ;;  %v17879_v4 = vadd.f32 %v1820_v55, %v1694_v43  ;;  %v1709_v7 = vadd.f32 %v14759_v28, %v17779_v13 }
 0x17e   : > { %22942 = vst [vmem:[#allocation29_spill] sm:$0xff] %v17869_v53  ;;  %22943 = vst [vmem:[#allocation30_spill] sm:$0xff] %v17871_v54  ;;  %v1340_v14 = vadd.f32 %v17774_v12, %v1339_v29  ;;  %v1704_v22 = vadd.f32 %v17779_v13, %v1703_v34  ;;  %v1994_v34 = vsel %vm22711_vm0, %v17871_v54, 0.0 }
 0x17f   : > { %v14706_v44 = vpop.f32.mrb[12].mxu0  ;;  %v14762_v48 = vpop.f32.mrb[12].mxu1  ;;  %22944 = vst [vmem:[#allocation31_spill] sm:$0xff] %v17877_v3  ;;  %v1991_v6 = vadd.f32 %v1990_v2, %v1989_v58  ;;  %v1992_v9 = vsel %vm22711_vm0, %v17879_v4, 0.0  ;;  %v1823_v21 = vmul.f32 %v1709_v7, %v1345_v5 }
 0x180   : > { %v1349_v49 = vpop.f32.mrb[13].mxu0  ;;  %v1713_v52 = vpop.f32.mrb[13].mxu1  ;;  %v1355_v23 = vadd.f32 %v14706_v44, %v17774_v12  ;;  %v1719_v24 = vadd.f32 %v14762_v48, %v17779_v13  ;;  %v1822_v30 = vmul.f32 %v1704_v22, %v1340_v14 }
 0x181   : > { %v1993_v19 = vadd.f32 %v1992_v9, %v1991_v6  ;;  %v1350_v25 = vadd.f32 %v17774_v12, %v1349_v49  ;;  %v1714_v26 = vadd.f32 %v17779_v13, %v1713_v52  ;;  %v17893_v28 = vadd.f32 %v1823_v21, %v1345_v5 }
 0x182   : > { %v17895_v29 = vadd.f32 %v1823_v21, %v1709_v7  ;;  %v1825_v31 = vmul.f32 %v1719_v24, %v1355_v23  ;;  %v17905_v42 = vadd.f32 %v1822_v30, %v1340_v14  ;;  %v17907_v43 = vadd.f32 %v1822_v30, %v1704_v22 }
 0x183   : > { %v14709_v57 = vpop.f32.mrb[14].mxu0  ;;  %v14765_v59 = vpop.f32.mrb[14].mxu1  ;;  %22945 = vst [vmem:[#allocation32_spill] sm:$0xff] %v17893_v28  ;;  %v1824_v37 = vmul.f32 %v1714_v26, %v1350_v25  ;;  %v1995_v41 = vadd.f32 %v1994_v34, %v1993_v19 }
 0x184   : > { %v1359_v60 = vpop.f32.mrb[15].mxu0  ;;  %v1723_v1 = vpop.f32.mrb[15].mxu1  ;;  %22946 = vst [vmem:[#allocation33_spill] sm:$0xff] %v17895_v29  ;;  %22947 = vst [vmem:[#allocation34_spill] sm:$0xff] %v17905_v42  ;;  %v17911_v47 = vadd.f32 %v1825_v31, %v1355_v23  ;;  %v17913_v48 = vadd.f32 %v1825_v31, %v1719_v24  ;;  %v1996_v58 = vsel %vm22711_vm0, %v17907_v43, 0.0  ;;  %v1365_v6 = vadd.f32 %v14709_v57, %v17774_v12 }
 0x185   : > { %22948 = vst [vmem:[#allocation35_spill] sm:$0xff] %v17907_v43  ;;  %v17915_v49 = vadd.f32 %v1824_v37, %v1350_v25  ;;  %v17917_v52 = vadd.f32 %v1824_v37, %v1714_v26  ;;  %v1997_v5 = vadd.f32 %v1996_v58, %v1995_v41  ;;  %v1729_v7 = vadd.f32 %v14765_v59, %v17779_v13 }
 0x186   : > { %22949 = vst [vmem:[#allocation36_spill] sm:$0xff] %v17911_v47  ;;  %22950 = vst [vmem:[#allocation37_spill] sm:$0xff] %v17913_v48  ;;  %v1998_v14 = vsel %vm22711_vm0, %v17895_v29, 0.0  ;;  %v1360_v24 = vadd.f32 %v17774_v12, %v1359_v60  ;;  %v1724_v59 = vadd.f32 %v17779_v13, %v1723_v1 }
 0x187   : > { %v14712_v8 = vpop.f32.mrb[16].mxu0  ;;  %v14768_v17 = vpop.f32.mrb[16].mxu1  ;;  %22951 = vst [vmem:[#allocation38_spill] sm:$0xff] %v17915_v49  ;;  %22952 = vst [vmem:[#allocation39_spill] sm:$0xff] %v17917_v52  ;;  %v1999_v22 = vadd.f32 %v1998_v14, %v1997_v5  ;;  %v2000_v23 = vsel %vm22711_vm0, %v17917_v52, 0.0  ;;  %v1827_v57 = vmul.f32 %v1729_v7, %v1365_v6  ;;  %v2002_v14 = vsel %vm22711_vm0, %v17913_v48, 0.0 }
 0x188   : > { %v1369_v18 = vpop.f32.mrb[17].mxu0  ;;  %v1733_v20 = vpop.f32.mrb[17].mxu1  ;;  %v1375_v30 = vadd.f32 %v14712_v8, %v17774_v12  ;;  %v1739_v31 = vadd.f32 %v14768_v17, %v17779_v13  ;;  %v1826_v1 = vmul.f32 %v1724_v59, %v1360_v24 }
 0x189   : > { %v2001_v26 = vadd.f32 %v2000_v23, %v1999_v22  ;;  %v17941_v37 = vadd.f32 %v1827_v57, %v1365_v6  ;;  %v17943_v41 = vadd.f32 %v1827_v57, %v1729_v7  ;;  %v1370_v58 = vadd.f32 %v17774_v12, %v1369_v18 }
 0x18a   : > { %v1829_v22 = vmul.f32 %v1739_v31, %v1375_v30  ;;  %v1734_v8 = vadd.f32 %v17779_v13, %v1733_v20  ;;  %v17955_v6 = vadd.f32 %v1826_v1, %v1360_v24  ;;  %v17957_v7 = vadd.f32 %v1826_v1, %v1724_v59 }
 0x18b   : > { %v17891_v27 = vpop.f32.mrb[18].mxu0  ;;  %v17897_v32 = vpop.f32.mrb[18].mxu1  ;;  %22953 = vst [vmem:[#allocation40_spill] sm:$0xff] %v17941_v37  ;;  %22954 = vst [vmem:[#allocation41_spill] sm:$0xff] %v17943_v41  ;;  %v2003_v23 = vadd.f32 %v2002_v14, %v2001_v26  ;;  %v2006_v59 = vsel %vm22711_vm0, %v17943_v41, 0.0 }
 0x18c   : > { %v17899_v33 = vpop.f32.mrb[19].mxu0  ;;  %v17903_v40 = vpop.f32.mrb[19].mxu1  ;;  %22955 = vst [vmem:[#allocation42_spill] sm:$0xff] %v17955_v6  ;;  %22956 = vst [vmem:[#allocation43_spill] sm:$0xff] %v17957_v7  ;;  %v17961_v18 = vadd.f32 %v1829_v22, %v1375_v30  ;;  %v17963_v37 = vadd.f32 %v1829_v22, %v1739_v31  ;;  %v1828_v47 = vmul.f32 %v1734_v8, %v1370_v58  ;;  %v2004_v20 = vsel %vm22711_vm0, %v17957_v7, 0.0 }
 0x18d   : > { %v2005_v24 = vadd.f32 %v2004_v20, %v2003_v23  ;;  %v1385_v14 = vadd.f32 %v17891_v27, %v17774_v12  ;;  %v1749_v23 = vadd.f32 %v17897_v32, %v17779_v13 }
 0x18e   : > { %22957 = vst [vmem:[#allocation44_spill] sm:$0xff] %v17961_v18  ;;  %v17977_v30 = vadd.f32 %v1828_v47, %v1370_v58  ;;  %v17979_v31 = vadd.f32 %v1828_v47, %v1734_v8  ;;  %v1380_v47 = vadd.f32 %v17774_v12, %v17899_v33 }
 0x18f   : > { %v17909_v44 = vpop.f32.mrb[20].mxu0  ;;  %v14774_v55 = vpop.f32.mrb[20].mxu1  ;;  %v2007_v18 = vadd.f32 %v2006_v59, %v2005_v24  ;;  %v1831_v27 = vmul.f32 %v1749_v23, %v1385_v14 }
 0x190   : > { %v1389_v56 = vpop.f32.mrb[21].mxu0  ;;  %v1753_v2 = vpop.f32.mrb[21].mxu1  ;;  %22958 = vst [vmem:[#allocation45_spill] sm:$0xff] %v17977_v30  ;;  %v2008_v6 = vsel %vm22711_vm0, %v17979_v31, 0.0  ;;  %v1744_v30 = vadd.f32 %v17779_v13, %v17903_v40  ;;  %v1395_v24 = vadd.f32 %v17909_v44, %v17774_v12  ;;  %v1759_v32 = vadd.f32 %v14774_v55, %v17779_v13 }
 0x191   : > { %v2009_v58 = vadd.f32 %v2008_v6, %v2007_v18  ;;  %v1390_v3 = vadd.f32 %v17774_v12, %v1389_v56  ;;  %v1754_v33 = vadd.f32 %v17779_v13, %v1753_v2  ;;  %v18010_v18 = vadd.f32 %v1831_v27, %v1385_v14 }
 0x192   : > { %v18012_v35 = vadd.f32 %v1831_v27, %v1749_v23  ;;  %v1830_v40 = vmul.f32 %v1744_v30, %v1380_v47  ;;  %v1833_v50 = vmul.f32 %v1759_v32, %v1395_v24  ;;  %v2010_v44 = vsel %vm22711_vm0, %v17963_v37, 0.0 }
 0x193   : > { %v17923_v9 = vpop.f32.mrb[22].mxu0  ;;  %v17927_v19 = vpop.f32.mrb[22].mxu1  ;;  %22962 = vst [vmem:[#allocation49_spill] sm:$0xff] %v18010_v18  ;;  %v1832_v55 = vmul.f32 %v1754_v33, %v1390_v3  ;;  %v2011_v10 = vadd.f32 %v2010_v44, %v2009_v58  ;;  %v1911_v58 = vsel %vm22711_vm0, %v17833_v63, 0.0 }
 0x194   : > { %v17929_v21 = vpop.f32.mrb[23].mxu0  ;;  %v17934_v25 = vpop.f32.mrb[23].mxu1  ;;  %v18020_v56 = vadd.f32 %v1833_v50, %v1395_v24  ;;  %v18022_v2 = vadd.f32 %v1833_v50, %v1759_v32  ;;  %v1405_v18 = vadd.f32 %v17923_v9, %v17774_v12  ;;  %v1908_v50 = vsel %vm22711_vm0, %v17816_v45, 0.0 }
 0x195   : > { %v18026_v14 = vadd.f32 %v1832_v55, %v1754_v33  ;;  %v1400_v9 = vadd.f32 %v17774_v12, %v17929_v21  ;;  %v1764_v44 = vadd.f32 %v17779_v13, %v17934_v25 }
 0x197   : > { %v17939_v34 = vpop.f32.mrb[24].mxu0  ;;  %v17946_v5 = vpop.f32.mrb[24].mxu1 }
 0x198   : > { %v17948_v60 = vpop.f32.mrb[25].mxu0  ;;  %v17953_v17 = vpop.f32.mrb[25].mxu1 }
 0x199   : > { %v1410_v21 = vadd.f32 %v17774_v12, %v17948_v60  ;;  %v1774_v25 = vadd.f32 %v17779_v13, %v17953_v17  ;;  %v2124_v60 = vsel %vm22711_vm0, %v17831_v62, -inf  ;;  %v2131_v17 = vsel %vm22711_vm0, %v17859_v36, -inf }
 0x19b   : > { %v17959_v57 = vpop.f32.mrb[26].mxu0  ;;  %v17965_v49 = vpop.f32.mrb[26].mxu1 }
 0x19c   : > { %v17967_v28 = vpop.f32.mrb[27].mxu0  ;;  %v17971_v42 = vpop.f32.mrb[27].mxu1 }
 0x19f   : > { %v17973_v26 = vpop.f32.mrb[28].mxu0  ;;  %v17983_v1 = vpop.f32.mrb[28].mxu1 }
 0x1a0   : > { %v17985_v22 = vpop.f32.mrb[29].mxu0  ;;  %v17989_v20 = vpop.f32.mrb[29].mxu1 }
 0x1a3   : > { %v17995_v8 = vpop.f32.mrb[30].mxu0  ;;  %v18002_v59 = vpop.f32.mrb[30].mxu1 }
 0x1a4   : > { %22959 = vst [vmem:[#allocation46_spill] sm:$0xff] %v18002_v59  ;;  %v18004_v53 = vpop.f32.mrb[31].mxu0  ;;  %v18008_v6 = vpop.f32.mrb[31].mxu1  ;;  %v18016_v59 = vadd.f32 %v1830_v40, %v1380_v47  ;;  %v1769_v47 = vadd.f32 %v17927_v19, %v17779_v13  ;;  %v2122_v19 = vsel %vm22711_vm0, %v17806_v39, -inf }
 0x1a5   : > { %22960 = vst [vmem:[#allocation47_spill] sm:$0xff] %v18004_v53  ;;  %22961 = vst [vmem:[#allocation48_spill] sm:$0xff] %v18008_v6  ;;  %v18018_v53 = vadd.f32 %v1830_v40, %v1744_v30  ;;  %v18024_v6 = vadd.f32 %v1832_v55, %v1390_v3  ;;  %v1909_v30 = vsel %vm22711_vm0, %v17804_v38, 0.0  ;;  %v2014_v3 = vsel %vm22711_vm0, %v18012_v35, 0.0 }
 0x1a6   : > { %v1910_v32 = vadd.f32 %v1909_v30, %v1908_v50  ;;  %v1835_v33 = vmul.f32 %v1769_v47, %v1405_v18  ;;  %v1415_v55 = vadd.f32 %v17939_v34, %v17774_v12  ;;  %v2018_v30 = vsel %vm22711_vm0, %v18022_v2, 0.0 }
 0x1a7   : > { %v2012_v23 = vsel %vm22711_vm0, %v18018_v53, 0.0  ;;  %v1834_v50 = vmul.f32 %v1764_v44, %v1400_v9  ;;  %v2121_v34 = vsel %vm22711_vm0, %v17818_v46, -inf  ;;  %v1836_v46 = vmul.f32 %v1774_v25, %v1410_v21 }
 0x1a8   : > { %v2013_v27 = vadd.f32 %v2012_v23, %v2011_v10  ;;  %v2016_v10 = vsel %vm22711_vm0, %v18026_v14, 0.0  ;;  %v1779_v23 = vadd.f32 %v17946_v5, %v17779_v13  ;;  %v18056_v63 = vadd.f32 %v1835_v33, %v1769_v47 }
 0x1a9   : > { %v1913_v5 = vsel %vm22711_vm0, %v17829_v61, 0.0 }
 0x1aa   : > { %v2015_v24 = vadd.f32 %v2014_v3, %v2013_v27  ;;  %v1912_v27 = vadd.f32 %v1911_v58, %v1910_v32  ;;  %v18054_v3 = vadd.f32 %v1835_v33, %v1405_v18  ;;  %22963 = vst [vmem:[#allocation50_spill] sm:$0xff] %v18056_v63  ;;  %v2127_v18 = vsel %vm22711_vm0, %v17841_v11, -inf }
 0x1ab   : > { %v2125_v58 = vsel %vm22711_vm0, %v17845_v16, -inf  ;;  %v18076_v32 = vadd.f32 %v1834_v50, %v1764_v44  ;;  %v2129_v44 = vsel %vm22711_vm0, %v17867_v51, -inf }
 0x1ac   : > { %v2017_v40 = vadd.f32 %v2016_v10, %v2015_v24  ;;  %v1837_v24 = vmul.f32 %v1779_v23, %v1415_v55  ;;  %v18074_v10 = vadd.f32 %v1834_v50, %v1400_v9  ;;  %v18086_v11 = vadd.f32 %v1913_v5, %v1912_v27 }
 0x1ad   : > { %v2020_v9 = vsel %vm22711_vm0, %v18076_v32, 0.0  ;;  %v2126_v62 = vmax.f32 %v2121_v34, %v2125_v58  ;;  %v2137_v27 = vsel %vm22711_vm0, %v17907_v43, -inf  ;;  %v2022_v34 = vsel %vm22711_vm0, %v18056_v63, 0.0 }
 0x1ae   : > { %v2019_v47 = vadd.f32 %v2018_v30, %v2017_v40  ;;  %v18080_v33 = vadd.f32 %v1837_v24, %v1415_v55  ;;  %v18082_v39 = vadd.f32 %v1837_v24, %v1779_v23  ;;  %v2123_v40 = vsel %vm22711_vm0, %v17835_v0, -inf }
 0x1af   : > { %v2128_v30 = vmax.f32 %v2122_v19, %v2127_v18  ;;  %v2135_v55 = vsel %vm22711_vm0, %v17871_v54, -inf  ;;  %v2132_v23 = vmax.f32 %v2124_v60, %v2131_v17  ;;  %v2133_v24 = vsel %vm22711_vm0, %v17879_v4, -inf }
 0x1b0   : > { %22964 = vst [vmem:[#allocation51_spill] sm:$0xff] %v18082_v39  ;;  %v2021_v50 = vadd.f32 %v2020_v9, %v2019_v47  ;;  %v2139_v19 = vsel %vm22711_vm0, %v17895_v29, -inf  ;;  %v18102_v5 = vadd.f32 %v1836_v46, %v1410_v21  ;;  %v18104_v18 = vadd.f32 %v1836_v46, %v1774_v25 }
 0x1b1   : > { %v1425_v47 = vadd.f32 %v17959_v57, %v17774_v12  ;;  %v2130_v60 = vmax.f32 %v2123_v40, %v2129_v44  ;;  %v2136_v58 = vmax.f32 %v2128_v30, %v2135_v55  ;;  %v1789_v9 = vadd.f32 %v17965_v49, %v17779_v13 }
 0x1b2   : > { %v2023_v17 = vadd.f32 %v2022_v34, %v2021_v50  ;;  %v2134_v29 = vmax.f32 %v2126_v62, %v2133_v24  ;;  %v2140_v54 = vmax.f32 %v2132_v23, %v2139_v19  ;;  %v2024_v43 = vsel %vm22711_vm0, %v18104_v18, 0.0 }
 0x1b3   : > { %v1420_v21 = vadd.f32 %v17774_v12, %v17967_v28  ;;  %v2138_v36 = vmax.f32 %v2130_v60, %v2137_v27  ;;  %v2143_v46 = vsel %vm22711_vm0, %v17913_v48, -inf  ;;  %v2141_v57 = vsel %vm22711_vm0, %v17917_v52, -inf }
 0x1b4   : > { %v2025_v25 = vadd.f32 %v2024_v43, %v2023_v17  ;;  %v1839_v40 = vmul.f32 %v1789_v9, %v1425_v47  ;;  %v1784_v49 = vadd.f32 %v17779_v13, %v17971_v42  ;;  %v1435_v62 = vadd.f32 %v17973_v26, %v17774_v12 }
 0x1b5   : > { %v1799_v30 = vadd.f32 %v17983_v1, %v17779_v13  ;;  %v2147_v28 = vsel %vm22711_vm0, %v17943_v41, -inf  ;;  %v2145_v44 = vsel %vm22711_vm0, %v17957_v7, -inf  ;;  %v1430_v55 = vadd.f32 %v17774_v12, %v17985_v22 }
 0x1b6   : > { %v1794_v43 = vadd.f32 %v17779_v13, %v17989_v20  ;;  %v18132_v50 = vadd.f32 %v1839_v40, %v1425_v47  ;;  %v18134_v42 = vadd.f32 %v1839_v40, %v1789_v9  ;;  %v1838_v26 = vmul.f32 %v1784_v49, %v1420_v21 }
 0x1b7   : > { %v1841_v23 = vmul.f32 %v1799_v30, %v1435_v62  ;;  %v1915_v1 = vsel %vm22711_vm0, %v17843_v15, 0.0  ;;  %v2144_v24 = vmax.f32 %v2136_v58, %v2143_v46  ;;  %v2026_v19 = vsel %vm22711_vm0, %v18082_v39, 0.0 }
 0x1b8   : > { %22965 = vst [vmem:[#allocation52_spill] sm:$0xff] %v18132_v50  ;;  %22966 = vst [vmem:[#allocation53_spill] sm:$0xff] %v18134_v42  ;;  %v1840_v27 = vmul.f32 %v1794_v43, %v1430_v55  ;;  %v2142_v34 = vmax.f32 %v2134_v29, %v2141_v57  ;;  %v2148_v60 = vmax.f32 %v2140_v54, %v2147_v28  ;;  %v2151_v20 = vsel %vm22711_vm0, %v17963_v37, -inf }
 0x1b9   : > { %v2146_v22 = vmax.f32 %v2138_v36, %v2145_v44  ;;  %v2027_v17 = vadd.f32 %v2026_v19, %v2025_v25  ;;  %v2149_v47 = vsel %vm22711_vm0, %v17979_v31, -inf  ;;  %v18144_v9 = vadd.f32 %v1838_v26, %v1420_v21 }
 0x1ba   : > { %v18146_v40 = vadd.f32 %v1838_v26, %v1784_v49  ;;  %v18148_v41 = vadd.f32 %v1841_v23, %v1435_v62  ;;  %v18150_v58 = vadd.f32 %v1841_v23, %v1799_v30  ;;  %v18152_v46 = vadd.f32 %v1840_v27, %v1430_v55  ;;  %v22972_v30 = vld [vmem:[#allocation46_spill] sm:$0xff] }
 0x1bb   : > { %v18154_v29 = vadd.f32 %v1840_v27, %v1794_v43  ;;  %v2155_v36 = vsel %vm22711_vm0, %v18012_v35, -inf  ;;  %v2153_v54 = vsel %vm22711_vm0, %v18018_v53, -inf  ;;  %v2159_v21 = vsel %vm22711_vm0, %v18022_v2, -inf }
 0x1bc   : > { %22967 = vst [vmem:[#allocation54_spill] sm:$0xff] %v18146_v40  ;;  %22968 = vst [vmem:[#allocation55_spill] sm:$0xff] %v18148_v41  ;;  %v2028_v57 = vsel %vm22711_vm0, %v18146_v40, 0.0  ;;  %v2152_v25 = vmax.f32 %v2144_v24, %v2151_v20  ;;  %v1445_v62 = vadd.f32 %v17995_v8, %v17774_v12  ;;  %v1809_v28 = vadd.f32 %v22972_v30, %v17779_v13  ;;  %v22973_v20 = vld [vmem:[#allocation47_spill] sm:$0xff] }
 0x1bd   : > { %22969 = vst [vmem:[#allocation56_spill] sm:$0xff] %v18150_v58  ;;  %22970 = vst [vmem:[#allocation57_spill] sm:$0xff] %v18152_v46  ;;  %v2029_v49 = vadd.f32 %v2028_v57, %v2027_v17  ;;  %v2150_v44 = vmax.f32 %v2142_v34, %v2149_v47  ;;  %v2157_v55 = vsel %vm22711_vm0, %v18026_v14, -inf  ;;  %v2163_v43 = vsel %vm22711_vm0, %v18056_v63, -inf }
 0x1be   : > { %22971 = vst [vmem:[#allocation58_spill] sm:$0xff] %v18154_v29  ;;  %v2161_v26 = vsel %vm22711_vm0, %v18076_v32, -inf  ;;  %v2156_v23 = vmax.f32 %v2148_v60, %v2155_v36  ;;  %v2154_v19 = vmax.f32 %v2146_v22, %v2153_v54  ;;  %v2160_v24 = vmax.f32 %v2152_v25, %v2159_v21  ;;  %v22974_v54 = vld [vmem:[#allocation48_spill] sm:$0xff] }
 0x1bf   : > { %v2030_v27 = vsel %vm22711_vm0, %v18134_v42, 0.0  ;;  %v2167_v8 = vsel %vm22711_vm0, %v18082_v39, -inf  ;;  %v2032_v34 = vsel %vm22711_vm0, %v18154_v29, 0.0  ;;  %v1440_v47 = vadd.f32 %v17774_v12, %v22973_v20 }
 0x1c0   : > { %v2031_v17 = vadd.f32 %v2030_v27, %v2029_v49  ;;  %v2158_v57 = vmax.f32 %v2150_v44, %v2157_v55  ;;  %v2164_v30 = vmax.f32 %v2156_v23, %v2163_v43  ;;  %v2162_v48 = vmax.f32 %v2154_v19, %v2161_v26 }
 0x1c1   : > { %v1843_v7 = vmul.f32 %v1809_v28, %v1445_v62  ;;  %v2165_v60 = vsel %vm22711_vm0, %v18104_v18, -inf  ;;  %v2171_v22 = vsel %vm22711_vm0, %v18134_v42, -inf  ;;  %v1804_v21 = vadd.f32 %v17779_v13, %v22974_v54 }
 0x1c2   : > { %v2033_v36 = vadd.f32 %v2032_v34, %v2031_v17  ;;  %v2168_v25 = vmax.f32 %v2160_v24, %v2167_v8  ;;  %v2169_v49 = vsel %vm22711_vm0, %v18146_v40, -inf  ;;  %v2034_v44 = vsel %vm22711_vm0, %v18150_v58, 0.0 }
 0x1c3   : > { %v18190_v27 = vadd.f32 %v1843_v7, %v1445_v62  ;;  %v18192_v12 = vadd.f32 %v1843_v7, %v1809_v28  ;;  %v2175_v55 = vsel %vm22711_vm0, %v18150_v58, -inf  ;;  %v2173_v43 = vsel %vm22711_vm0, %v18154_v29, -inf }
 0x1c4   : > { %v1842_v26 = vmul.f32 %v1804_v21, %v1440_v47  ;;  %v2166_v23 = vmax.f32 %v2158_v57, %v2165_v60  ;;  %v2172_v13 = vmax.f32 %v2164_v30, %v2171_v22  ;;  %v2035_v24 = vadd.f32 %v2034_v44, %v2033_v36  ;;  %v22978_v22 = vld [vmem:[#allocation24_spill] sm:$0xff] }
 0x1c5   : > { %22975 = vst [vmem:[#allocation46_spill] sm:$0xff] %v18192_v12  ;;  %v2179_v19 = vsel %vm22711_vm0, %v18192_v12, -inf  ;;  %v1916_v62 = vadd.f32 %v1915_v1, %v18086_v11  ;;  %v2170_v8 = vmax.f32 %v2162_v48, %v2169_v49  ;;  %v2176_v17 = vmax.f32 %v2168_v25, %v2175_v55  ;;  %v22979_v25 = vld [vmem:[#allocation28_spill] sm:$0xff] }
 0x1c6   : > { %v18203_v7 = vadd.f32 %v1842_v26, %v1440_v47  ;;  %v18205_v28 = vadd.f32 %v1842_v26, %v1804_v21  ;;  %v2174_v34 = vmax.f32 %v2166_v23, %v2173_v43  ;;  %v2180_v20 = vmax.f32 %v2172_v13, %v2179_v19 }
 0x1c7   : > { %v1917_v36 = vsel %vm22711_vm0, %v22978_v22, 0.0  ;;  %v2038_v11 = vsel %vm22711_vm0, %v18192_v12, 0.0  ;;  %v1919_v49 = vsel %vm22711_vm0, %v22979_v25, 0.0  ;;  %v2055_v58 = vsel %vm22711_vm0, %v17829_v61, -inf }
 0x1c8   : > { %22976 = vst [vmem:[#allocation47_spill] sm:$0xff] %v18203_v7  ;;  %22977 = vst [vmem:[#allocation48_spill] sm:$0xff] %v18205_v28  ;;  %v2177_v54 = vsel %vm22711_vm0, %v18205_v28, -inf  ;;  %v2036_v57 = vsel %vm22711_vm0, %v18205_v28, 0.0  ;;  %v1918_v1 = vadd.f32 %v1917_v36, %v1916_v62  ;;  %v2181_v48 = vmax.f32 %v2174_v34, %v2176_v17  ;;  %v2289_v62 = vld [vmem:[%s22484_s8] sm:$0xf] }
 0x1c9   : > { %v2178_v30 = vmax.f32 %v2170_v8, %v2177_v54  ;;  %v2037_v60 = vadd.f32 %v2036_v57, %v2035_v24  ;;  %v22980_v24 = vld [vmem:[#allocation26_spill] sm:$0xff]  ;;  %v22981_v17 = vld [vmem:[#allocation31_spill] sm:$0xff] }
 0x1ca   : > { %v1920_v43 = vadd.f32 %v1919_v49, %v1918_v1  ;;  %v1921_v8 = vsel %vm22711_vm0, %v22980_v24, 0.0  ;;  %v1923_v34 = vsel %vm22711_vm0, %v22981_v17, 0.0  ;;  %v22982_v1 = vld [vmem:[#allocation29_spill] sm:$0xff]  ;;  %v22983_v49 = vld [vmem:[#allocation34_spill] sm:$0xff]  ;;  %v22992_v28 = vld [vmem:[#allocation23_spill] sm:$0xff] }
 0x1cb   : > { %v2039_v47 = vadd.f32 %v2038_v11, %v2037_v60  ;;  %v2182_v21 = vmax.f32 %v2178_v30, %v2180_v20  ;;  %v17314_v60 = vmov 0.0   ;;  %v2054_v42 = vsel %vm22711_vm0, %v22992_v28, -inf }
 0x1cc   : > { %v1922_v54 = vadd.f32 %v1921_v8, %v1920_v43  ;;  %598 = vst.msk [vmem:[#allocation2 + $0x10] sm:$0xff] %vm22833_vm1, %v17314_v60  ;;  %14806 = vmatprep.mubr.msk.f32.mxu0 %vm17315_vm3, %v17314_v60  ;;  %596 = vst.msk [vmem:[#allocation2] sm:$0xff] %vm22833_vm1, %v17314_v60  ;;  %14809 = vmatprep.subr.mxu1 %v17314_v60  ;;  %v22984_v43 = vld [vmem:[#allocation32_spill] sm:$0xff]  ;;  %v2068_v29 = vsel %vm22711_vm0, %v22983_v49, -inf }
 0x1cd   : > { %v2040_v44 = vrot.slane %v2039_v47, 4  ;;  %v2183_v55 = vmax.f32 %v2181_v48, %v2182_v21  ;;  %597 = vst.msk [vmem:[#allocation2 + $0x8] sm:$0xff] %vm22833_vm1, %v17314_v60  ;;  %599 = vst.msk [vmem:[#allocation2 + $0x118] sm:$0xff] %vm22833_vm1, %v17314_v60  ;;  %14810 = vmatpush3.msk.msra.mxu1 %vm2301_vm2, %v2289_v62  ;;  %14811 = vmatprep.mubr.msk.f32.mxu1 %vm17315_vm3, %v17314_v60  ;;  %v2070_v52 = vsel %vm22711_vm0, %v22984_v43, -inf }
 0x1ce   : > { %600 = vst.msk [vmem:[#allocation2 + $0x120] sm:$0xff] %vm22833_vm1, %v17314_v60  ;;  %601 = vst.msk [vmem:[#allocation2 + $0x128] sm:$0xff] %vm22833_vm1, %v17314_v60  ;;  %v1924_v11 = vadd.f32 %v1923_v34, %v1922_v54  ;;  %v22986_v54 = vld [vmem:[#allocation36_spill] sm:$0xff]  ;;  %v22987_v34 = vld [vmem:[#allocation42_spill] sm:$0xff] }
 0x1cf   : > { %v2041_v26 = vadd.f32 %v2040_v44, %v2039_v47  ;;  %v2184_v23 = vrot.slane %v2183_v55, 4  ;;  %v1925_v47 = vsel %vm22711_vm0, %v22982_v1, 0.0  ;;  %v1927_v44 = vsel %vm22711_vm0, %v22983_v49, 0.0  ;;  %v22988_v60 = vld [vmem:[#allocation40_spill] sm:$0xff] }
 0x1d0   : > { %v1926_v21 = vadd.f32 %v1925_v47, %v1924_v11  ;;  %v22989_v11 = vld [vmem:[#allocation45_spill] sm:$0xff] }
 0x1d1   : > { %v2042_v13 = vrot.slane %v2041_v26, 2  ;;  %v2185_v19 = vmax.f32 %v2183_v55, %v2184_v23  ;;  %v1939_v47 = vsel %vm22711_vm0, %v22989_v11, 0.0 }
 0x1d2   : > { %v1928_v55 = vadd.f32 %v1927_v44, %v1926_v21  ;;  %v22990_v21 = vld [vmem:[#allocation44_spill] sm:$0xff] }
 0x1d3   : > { %v2043_v57 = vadd.f32 %v2042_v13, %v2041_v26  ;;  %v2186_v12 = vrot.slane %v2185_v19, 2  ;;  %v1929_v26 = vsel %vm22711_vm0, %v22984_v43, 0.0  ;;  %v22985_v13 = vld [vmem:[#allocation38_spill] sm:$0xff]  ;;  %v1941_v44 = vsel %vm22711_vm0, %v22990_v21, 0.0 }
 0x1d4   : > { %v1930_v23 = vadd.f32 %v1929_v26, %v1928_v55  ;;  %v1943_v26 = vsel %vm22711_vm0, %v18016_v59, 0.0 }
 0x1d5   : > { %v2044_v20 = vrot.slane %v2043_v57, 1  ;;  %v2187_v30 = vmax.f32 %v2185_v19, %v2186_v12  ;;  %v1931_v19 = vsel %vm22711_vm0, %v22985_v13, 0.0 }
 0x1d6   : > { %v1932_v8 = vadd.f32 %v1931_v19, %v1930_v23  ;;  %v22991_v19 = vld [vmem:[#allocation49_spill] sm:$0xff] }
 0x1d7   : > { %v2045_v36 = vadd.f32 %v2044_v20, %v2043_v57  ;;  %v2188_v12 = vrot.slane %v2187_v30, 1  ;;  %v1933_v57 = vsel %vm22711_vm0, %v22986_v54, 0.0  ;;  %v1935_v20 = vsel %vm22711_vm0, %v22987_v34, 0.0 }
 0x1d8   : > { %v1934_v62 = vadd.f32 %v1933_v57, %v1932_v8  ;;  %v1945_v8 = vsel %vm22711_vm0, %v22991_v19, 0.0 }
 0x1d9   : > { %2047 = vrot.lane.b32.xlu0 %v2045_v36, %s17316_s16  ;;  %v2189_v48 = vmax.f32 %v2187_v30, %v2188_v12  ;;  %v1937_v36 = vsel %vm22711_vm0, %v22988_v60, 0.0 }
 0x1da   : > { %v1936_v30 = vadd.f32 %v1935_v20, %v1934_v62  ;;  %v1947_v62 = vsel %vm22711_vm0, %v18024_v6, 0.0 }
 0x1dc   : > { %v1938_v12 = vadd.f32 %v1937_v36, %v1936_v30  ;;  %v1949_v30 = vsel %vm22711_vm0, %v18020_v56, 0.0 }
 0x1dd   : > { %2191 = vrot.lane.b32.xlu0 %v2189_v48, %s17316_s16 }
 0x1de   : > { %v1940_v48 = vadd.f32 %v1939_v47, %v1938_v12  ;;  %v1951_v12 = vsel %vm22711_vm0, %v18074_v10, 0.0 }
 0x1e0   : > { %v1942_v55 = vadd.f32 %v1941_v44, %v1940_v48  ;;  %v1953_v48 = vsel %vm22711_vm0, %v18054_v3, 0.0 }
 0x1e2   : > { %v1944_v23 = vadd.f32 %v1943_v26, %v1942_v55  ;;  %v1955_v55 = vsel %vm22711_vm0, %v18102_v5, 0.0 }
 0x1e4   : > { %v1946_v57 = vadd.f32 %v1945_v8, %v1944_v23  ;;  %v1957_v23 = vsel %vm22711_vm0, %v18080_v33, 0.0 }
 0x1e6   : > { %v1948_v20 = vadd.f32 %v1947_v62, %v1946_v57  ;;  %v2058_v57 = vsel %vm22711_vm0, %v22978_v22, -inf  ;;  %v2056_v62 = vsel %vm22711_vm0, %v17843_v15, -inf }
 0x1e8   : > { %v1950_v36 = vadd.f32 %v1949_v30, %v1948_v20  ;;  %v1959_v20 = vsel %vm22711_vm0, %v18144_v9, 0.0  ;;  %v2053_v30 = vsel %vm22711_vm0, %v17804_v38, -inf }
 0x1ea   : > { %v1952_v47 = vadd.f32 %v1951_v12, %v1950_v36  ;;  %v2052_v36 = vsel %vm22711_vm0, %v17816_v45, -inf  ;;  %v2062_v12 = vsel %vm22711_vm0, %v22980_v24, -inf }
 0x1eb   : > { %v2063_v39 = vmax.f32 %v2055_v58, %v2062_v12  ;;  %v2072_v58 = vsel %vm22711_vm0, %v22985_v13, -inf  ;;  %v2082_v12 = vsel %vm22711_vm0, %v22990_v21, -inf }
 0x1ec   : > { %v1954_v44 = vadd.f32 %v1953_v48, %v1952_v47  ;;  %v2060_v47 = vsel %vm22711_vm0, %v22979_v25, -inf  ;;  %v2066_v48 = vsel %vm22711_vm0, %v22982_v1, -inf }
 0x1ed   : > { %v2061_v1 = vmax.f32 %v2054_v42, %v2060_v47  ;;  %v2086_v47 = vsel %vm22711_vm0, %v22991_v19, -inf }
 0x1ee   : > { %v1956_v26 = vadd.f32 %v1955_v55, %v1954_v44  ;;  %v2064_v44 = vsel %vm22711_vm0, %v22981_v17, -inf  ;;  %v2059_v55 = vmax.f32 %v2053_v30, %v2058_v57  ;;  %v2074_v57 = vsel %vm22711_vm0, %v22986_v54, -inf }
 0x1ef   : > { %v2071_v30 = vmax.f32 %v2063_v39, %v2070_v52  ;;  %v2080_v52 = vsel %vm22711_vm0, %v22989_v11, -inf }
 0x1f0   : > { %v1958_v8 = vadd.f32 %v1957_v23, %v1956_v26  ;;  %v2057_v26 = vmax.f32 %v2052_v36, %v2056_v62  ;;  %v2067_v40 = vmax.f32 %v2059_v55, %v2066_v48  ;;  %v2076_v62 = vsel %vm22711_vm0, %v22987_v34, -inf }
 0x1f1   : > { %v2069_v36 = vmax.f32 %v2061_v1, %v2068_v29  ;;  %v2084_v48 = vsel %vm22711_vm0, %v18016_v59, -inf  ;;  %v2090_v1 = vsel %vm22711_vm0, %v18020_v56, -inf }
 0x1f2   : > { %v1960_v23 = vadd.f32 %v1959_v20, %v1958_v8  ;;  %v2065_v63 = vmax.f32 %v2057_v26, %v2064_v44  ;;  %v2078_v8 = vsel %vm22711_vm0, %v22988_v60, -inf  ;;  %v1961_v20 = vsel %vm22711_vm0, %v18132_v50, 0.0 }
 0x1f3   : > { %v1963_v44 = vsel %vm22711_vm0, %v18152_v46, 0.0  ;;  %v2075_v55 = vmax.f32 %v2067_v40, %v2074_v57  ;;  %v2079_v26 = vmax.f32 %v2071_v30, %v2078_v8  ;;  %v2077_v39 = vmax.f32 %v2069_v36, %v2076_v62 }
 0x1f4   : > { %v1962_v42 = vadd.f32 %v1961_v20, %v1960_v23  ;;  %v2073_v29 = vmax.f32 %v2065_v63, %v2072_v58  ;;  %v2094_v23 = vsel %vm22711_vm0, %v18054_v3, -inf  ;;  %v2092_v20 = vsel %vm22711_vm0, %v18074_v10, -inf }
 0x1f5   : > { %v2083_v60 = vmax.f32 %v2075_v55, %v2082_v12  ;;  %v2087_v54 = vmax.f32 %v2079_v26, %v2086_v47  ;;  %v2085_v34 = vmax.f32 %v2077_v39, %v2084_v48  ;;  %v2088_v57 = vsel %vm22711_vm0, %v18024_v6, -inf }
 0x1f6   : > { %v1964_v43 = vadd.f32 %v1963_v44, %v1962_v42  ;;  %v2081_v40 = vmax.f32 %v2073_v29, %v2080_v52  ;;  %v2102_v63 = vsel %vm22711_vm0, %v18132_v50, -inf  ;;  %v2100_v8 = vsel %vm22711_vm0, %v18144_v9, -inf }
 0x1f7   : > { %v2091_v62 = vmax.f32 %v2083_v60, %v2090_v1  ;;  %v2095_v30 = vmax.f32 %v2087_v54, %v2094_v23  ;;  %v2093_v36 = vmax.f32 %v2085_v34, %v2092_v20  ;;  %v2098_v58 = vsel %vm22711_vm0, %v18080_v33, -inf }
 0x1f8   : > { %v2096_v12 = vsel %vm22711_vm0, %v18102_v5, -inf  ;;  %v1965_v42 = vsel %vm22711_vm0, %v18148_v41, 0.0  ;;  %v2110_v47 = vsel %vm22711_vm0, %v18190_v27, -inf  ;;  %v2108_v48 = vsel %vm22711_vm0, %v18203_v7, -inf }
 0x1f9   : > { %v2089_v44 = vmax.f32 %v2081_v40, %v2088_v57  ;;  %v2103_v55 = vmax.f32 %v2095_v30, %v2102_v63  ;;  %v2101_v60 = vmax.f32 %v2093_v36, %v2100_v8  ;;  %v1966_v54 = vadd.f32 %v1965_v42, %v1964_v43 }
 0x1fa   : > { %v2106_v34 = vsel %vm22711_vm0, %v18148_v41, -inf  ;;  %v2104_v26 = vsel %vm22711_vm0, %v18152_v46, -inf  ;;  %v1967_v39 = vsel %vm22711_vm0, %v18203_v7, 0.0  ;;  %v2099_v52 = vmax.f32 %v2091_v62, %v2098_v58 }
 0x1fb   : > { %v2097_v29 = vmax.f32 %v2089_v44, %v2096_v12  ;;  %v2111_v1 = vmax.f32 %v2103_v55, %v2110_v47  ;;  %v2109_v23 = vmax.f32 %v2101_v60, %v2108_v48  ;;  %v1968_v13 = vadd.f32 %v1967_v39, %v1966_v54 }
 0x1fc   : > { %v2107_v20 = vmax.f32 %v2099_v52, %v2106_v34  ;;  %v1969_v43 = vsel %vm22711_vm0, %v18190_v27, 0.0 }
 0x1fd   : > { %v2105_v50 = vmax.f32 %v2097_v29, %v2104_v26  ;;  %v2113_v40 = vmax.f32 %v2109_v23, %v2111_v1  ;;  %v1970_v57 = vadd.f32 %v1969_v43, %v1968_v13  ;;  %v12870_v29 = vld [vmem:[%s22993_s28] ss:$0 sm:$0xff] }
 0x1ff   : > { %v2112_v63 = vmax.f32 %v2105_v50, %v2107_v20  ;;  %v1971_v30 = vrot.slane %v1970_v57, 4 }
 0x201   : > { %v2114_v8 = vmax.f32 %v2112_v63, %v2113_v40  ;;  %v1972_v42 = vadd.f32 %v1971_v30, %v1970_v57 }
 0x203   : > { %v2115_v36 = vrot.slane %v2114_v8, 4  ;;  %v1973_v46 = vrot.slane %v1972_v42, 2 }
 0x205   : > { %v2116_v41 = vmax.f32 %v2114_v8, %v2115_v36  ;;  %v1974_v62 = vadd.f32 %v1973_v46, %v1972_v42 }
 0x207   : > { %v2117_v7 = vrot.slane %v2116_v41, 2  ;;  %v1975_v12 = vrot.slane %v1974_v62, 1 }
 0x209   : > { %v2118_v58 = vmax.f32 %v2116_v41, %v2117_v7  ;;  %v1976_v44 = vadd.f32 %v1975_v12, %v1974_v62  ;;  %v12868_v41 = vld [vmem:[%s22483_s7] ss:$0 sm:$0xff] }
 0x20b   : > { %v2119_v47 = vrot.slane %v2118_v58, 1 }
 0x20d   : > { %v2120_v60 = vmax.f32 %v2118_v58, %v2119_v47 }
 0x24b   : > { %v2048_v48 = vpop.permute.xlu0 %2047 }
 0x24c   : > { %v2050_v55 = vsel %vm22711_vm0, %v1976_v44, %v2048_v48 }
 0x24d   : > { %v2051_v13 = vmul.f32 0.00390625, %v2050_v55 }
 0x24f   : > { %v2192_v54 = vpop.permute.xlu0 %2191 }
 0x250   : > { %v2194_v50 = vsel %vm22711_vm0, %v2120_v60, %v2192_v54 }
 0x251   : > { %v2196_v34 = vrot.slane %v2194_v50, 7 }
 0x253   : > { %v2199_v26 = vsel %vm2198_vm4, %v2051_v13, %v2196_v34  ;;  %v22995_v13 = vld [vmem:[#allocation21_spill] sm:$0xff] }
 0x254   : > { %14807 = vmatmul.mubr.msk.f32.vlgmr.msra.gmra.mrb[32].mxu0 %vm22833_vm1, %v2199_v26 }
 0x327   : > { %v2284_v46 = vpop.f32.mrb[32].mxu0 }
 0x328   : > { %v2285_v7 = vadd.f32 %v12868_v41, %v2284_v46  ;;  %v14808_v39 = vpop.f32.mrb[33].mxu0 }
 0x32a   : > { %v2288_v52 = vmax.f32 %v2285_v7, 0.0 }
 0x32c   : > { %14812 = vmatmul.mubr.msk.f32.vlgmr.msra.gmra.mrb[32].mxu1 %vm2297_vm5, %v2288_v52 }
 0x3ff   : > { %v2371_v1 = vpop.f32.mrb[32].mxu1 }
 0x400   : > { %v2372_v23 = vadd.f32 %v12870_v29, %v2371_v1  ;;  %v14813_v20 = vpop.f32.mrb[33].mxu1 }
 0x402   : > { %v2376_v40 = vsel %vm2375_vm6, %v2372_v23, 0.0 }
 0x403   : > { %v2377_v43 = vrot.slane %v2376_v40, 4 }
 0x405   : > { %v2378_v57 = vadd.f32 %v2377_v43, %v2376_v40 }
 0x407   : > { %v2379_v63 = vrot.slane %v2378_v57, 2 }
 0x409   : > { %v2380_v8 = vadd.f32 %v2379_v63, %v2378_v57 }
 0x40b   : > { %v2381_v30 = vrot.slane %v2380_v8, 1 }
 0x40d   : > { %v2382_v36 = vadd.f32 %v2381_v30, %v2380_v8 }
 0x40f   : > { %v2383_v42 = vsub.f32 0.0, %v2382_v36 }
 0x411   : > { %v2384_v62 = vmul.f32 1.442695, %v2383_v42 }
 0x413   : > { %17012 = vpow2.f32 %v2384_v62 }
 0x41d   : > { %v17013_v58 = vpop.eup %17012 }
 0x41e   : > { %v2386_v12 = vadd.f32 1.0, %v17013_v58 }
 0x420   : > { %17014 = vrcp.f32 %v2386_v12 }
 0x42a   : > { %v18351_v47 = vpop.eup %17014 }
 0x42b   : > { %2389 = vrot.lane.b32.xlu1 %v18351_v47, %s17317_s10  ;;  %v2504_v48 = vmul.f32 %v18351_v47, %v22989_v11  ;;  %v2488_v44 = vmul.f32 %v18351_v47, %v17816_v45  ;;  %v2506_v41 = vmul.f32 %v18351_v47, %v18016_v59  ;;  %v2490_v39 = vmul.f32 %v18351_v47, %v22992_v28 }
 0x42c   : > { %v2505_v40 = vmul.f32 %v18351_v47, %v22990_v21  ;;  %v2508_v57 = vmul.f32 %v18351_v47, %v18024_v6  ;;  %v2489_v8 = vmul.f32 %v18351_v47, %v17804_v38  ;;  %v2492_v42 = vmul.f32 %v18351_v47, %v17843_v15 }
 0x42d   : > { %v2536_v55 = vadd.f32 1.0, %v2504_v48  ;;  %v2520_v60 = vadd.f32 1.0, %v2488_v44  ;;  %v2538_v7 = vadd.f32 1.0, %v2506_v41  ;;  %v2522_v1 = vadd.f32 1.0, %v2490_v39 }
 0x42e   : > { %v2537_v63 = vadd.f32 1.0, %v2505_v40  ;;  %v2540_v36 = vadd.f32 1.0, %v2508_v57  ;;  %v2521_v58 = vadd.f32 1.0, %v2489_v8  ;;  %v2524_v44 = vadd.f32 1.0, %v2492_v42 }
 0x42f   : > { %v18360_v54 = vmul.f32 %v2536_v55, %v17979_v31  ;;  %v18365_v34 = vmul.f32 %v2520_v60, %v22995_v13  ;;  %v18378_v29 = vmul.f32 %v2538_v7, %v18018_v53  ;;  %v18383_v20 = vmul.f32 %v2522_v1, %v17835_v0  ;;  %v23001_v60 = vld [vmem:[#allocation20_spill] sm:$0xff] }
 0x430   : > { %v18398_v62 = vmul.f32 %v2537_v63, %v17963_v37  ;;  %v18403_v48 = vmul.f32 %v2540_v36, %v18026_v14  ;;  %v18413_v41 = vmul.f32 %v2524_v44, %v17845_v16  ;;  %v2507_v7 = vmul.f32 %v18351_v47, %v22991_v19 }
 0x431   : > { %22994 = vst [vmem:[#allocation24_spill] sm:$0xff] %v18360_v54  ;;  %v2953_v50 = vsel %vm22711_vm0, %v18360_v54, 0.0  ;;  %22996 = vst [vmem:[#allocation28_spill] sm:$0xff] %v18365_v34  ;;  %v2905_v26 = vsel %vm22711_vm0, %v18365_v34, 0.0  ;;  %v2728_v46 = vsel %vm22711_vm0, %v18360_v54, -inf  ;;  %v2680_v52 = vsel %vm22711_vm0, %v18365_v34, -inf }
 0x432   : > { %2954 = vadd.xlane.f32.xlu0 %v2953_v50  ;;  %22997 = vst [vmem:[#allocation26_spill] sm:$0xff] %v18378_v29  ;;  %v2959_v23 = vsel %vm22711_vm0, %v18378_v29, 0.0  ;;  %22998 = vst [vmem:[#allocation31_spill] sm:$0xff] %v18383_v20  ;;  %v2911_v43 = vsel %vm22711_vm0, %v18383_v20, 0.0  ;;  %v2734_v30 = vsel %vm22711_vm0, %v18378_v29, -inf  ;;  %v2686_v12 = vsel %vm22711_vm0, %v18383_v20, -inf }
 0x433   : > { %22999 = vst [vmem:[#allocation34_spill] sm:$0xff] %v18398_v62  ;;  %23000 = vst [vmem:[#allocation45_spill] sm:$0xff] %v18403_v48  ;;  %v2956_v55 = vsel %vm22711_vm0, %v18398_v62, 0.0  ;;  %v18408_v50 = vmul.f32 %v2521_v58, %v23001_v60  ;;  %v2917_v39 = vsel %vm22711_vm0, %v18413_v41, 0.0  ;;  %v2731_v1 = vsel %vm22711_vm0, %v18398_v62, -inf  ;;  %v23023_v54 = vld [vmem:[#allocation29_spill] sm:$0xff] }
 0x434   : > { %23003 = vst [vmem:[#allocation49_spill] sm:$0xff] %v18413_v41  ;;  %v2491_v40 = vmul.f32 %v18351_v47, %v17829_v61  ;;  %v2494_v63 = vmul.f32 %v18351_v47, %v22979_v25  ;;  %v2692_v42 = vsel %vm22711_vm0, %v18413_v41, -inf  ;;  %v23035_v34 = vld [vmem:[#allocation32_spill] sm:$0xff] }
 0x435   : > { %23002 = vst [vmem:[#allocation44_spill] sm:$0xff] %v18408_v50  ;;  %v2683_v8 = vsel %vm22711_vm0, %v18408_v50, -inf }
 0x436   : > { %2906 = vadd.xlane.f32.xlu0 %v2905_v26  ;;  %v2965_v26 = vsel %vm22711_vm0, %v18403_v48, 0.0  ;;  %v2523_v36 = vadd.f32 1.0, %v2491_v40 }
 0x43a   : > { %2729 = vmax.xlane.f32.xlu0 %v2728_v46  ;;  %v2908_v46 = vsel %vm22711_vm0, %v18408_v50, 0.0 }
 0x43e   : > { %2681 = vmax.xlane.f32.xlu0 %v2680_v52  ;;  %v2510_v52 = vmul.f32 %v18351_v47, %v18074_v10 }
 0x440   : > { %v2542_v57 = vadd.f32 1.0, %v2510_v52  ;;  %v2509_v52 = vmul.f32 %v18351_v47, %v18020_v56 }
 0x442   : > { %2960 = vadd.xlane.f32.xlu0 %v2959_v23  ;;  %v2539_v23 = vadd.f32 1.0, %v2507_v7  ;;  %v18439_v58 = vmul.f32 %v2542_v57, %v18076_v32  ;;  %v2493_v57 = vmul.f32 %v18351_v47, %v22978_v22 }
 0x444   : > { %23005 = vst [vmem:[#allocation21_spill] sm:$0xff] %v18439_v58 }
 0x446   : > { %2912 = vadd.xlane.f32.xlu0 %v2911_v43  ;;  %v2740_v43 = vsel %vm22711_vm0, %v18403_v48, -inf }
 0x44a   : > { %2735 = vmax.xlane.f32.xlu0 %v2734_v30  ;;  %v18434_v30 = vmul.f32 %v2539_v23, %v18012_v35  ;;  %v2512_v23 = vmul.f32 %v18351_v47, %v18102_v5 }
 0x44c   : > { %23004 = vst [vmem:[#allocation23_spill] sm:$0xff] %v18434_v30  ;;  %v2962_v44 = vsel %vm22711_vm0, %v18434_v30, 0.0  ;;  %v2737_v40 = vsel %vm22711_vm0, %v18434_v30, -inf }
 0x44e   : > { %2687 = vmax.xlane.f32.xlu0 %v2686_v12  ;;  %v2526_v12 = vadd.f32 1.0, %v2494_v63  ;;  %v2746_v63 = vsel %vm22711_vm0, %v18439_v58, -inf }
 0x44f   : > { %2957 = vadd.xlane.f32.xlu1 %v2956_v55  ;;  %v23006_v55 = vld [vmem:[#allocation22_spill] sm:$0xff] }
 0x450   : > { %v18449_v7 = vmul.f32 %v2526_v12, %v17867_v51 }
 0x452   : > { %2966 = vadd.xlane.f32.xlu0 %v2965_v26  ;;  %v18444_v26 = vmul.f32 %v2523_v36, %v23006_v55  ;;  %23008 = vst [vmem:[#allocation22_spill] sm:$0xff] %v18449_v7  ;;  %v2496_v36 = vmul.f32 %v18351_v47, %v22981_v17 }
 0x453   : > { %2909 = vadd.xlane.f32.xlu1 %v2908_v46  ;;  %v2971_v46 = vsel %vm22711_vm0, %v18439_v58, 0.0 }
 0x454   : > { %23007 = vst [vmem:[#allocation20_spill] sm:$0xff] %v18444_v26 }
 0x456   : > { %2918 = vadd.xlane.f32.xlu0 %v2917_v39  ;;  %v2914_v39 = vsel %vm22711_vm0, %v18444_v26, 0.0 }
 0x457   : > { %2732 = vmax.xlane.f32.xlu1 %v2731_v1  ;;  %v2923_v1 = vsel %vm22711_vm0, %v18449_v7, 0.0 }
 0x45a   : > { %2741 = vmax.xlane.f32.xlu0 %v2740_v43  ;;  %v2541_v43 = vadd.f32 1.0, %v2509_v52  ;;  %v2528_v52 = vadd.f32 1.0, %v2496_v36 }
 0x45b   : > { %2684 = vmax.xlane.f32.xlu1 %v2683_v8  ;;  %v2544_v8 = vadd.f32 1.0, %v2512_v23  ;;  %v23011_v23 = vld [vmem:[#allocation25_spill] sm:$0xff] }
 0x45c   : > { %v18470_v12 = vmul.f32 %v2541_v43, %v18022_v2 }
 0x45e   : > { %2693 = vmax.xlane.f32.xlu0 %v2692_v42  ;;  %v2689_v42 = vsel %vm22711_vm0, %v18444_v26, -inf  ;;  %23009 = vst [vmem:[#allocation59_spill] sm:$0xff] %v18470_v12 }
 0x45f   : > { %2963 = vadd.xlane.f32.xlu1 %v2962_v44  ;;  %v2525_v44 = vadd.f32 1.0, %v2493_v57  ;;  %v18485_v57 = vmul.f32 %v2528_v52, %v17879_v4  ;;  %v2495_v52 = vmul.f32 %v18351_v47, %v22980_v24 }
 0x461   : > { %23013 = vst [vmem:[#allocation61_spill] sm:$0xff] %v18485_v57  ;;  %v2929_v36 = vsel %vm22711_vm0, %v18485_v57, 0.0 }
 0x462   : > { %2972 = vadd.xlane.f32.xlu0 %v2971_v46  ;;  %v2698_v46 = vsel %vm22711_vm0, %v18449_v7, -inf }
 0x463   : > { %2915 = vadd.xlane.f32.xlu1 %v2914_v39  ;;  %v18475_v39 = vmul.f32 %v2544_v8, %v18104_v18  ;;  %v2511_v8 = vmul.f32 %v18351_v47, %v18054_v3 }
 0x465   : > { %23010 = vst [vmem:[#allocation60_spill] sm:$0xff] %v18475_v39  ;;  %v2977_v43 = vsel %vm22711_vm0, %v18475_v39, 0.0 }
 0x466   : > { %2924 = vadd.xlane.f32.xlu0 %v2923_v1  ;;  %v2968_v1 = vsel %vm22711_vm0, %v18470_v12, 0.0 }
 0x467   : > { %2738 = vmax.xlane.f32.xlu1 %v2737_v40  ;;  %v18480_v40 = vmul.f32 %v2525_v44, %v23011_v23  ;;  %v2743_v44 = vsel %vm22711_vm0, %v18470_v12, -inf  ;;  %v2527_v12 = vadd.f32 1.0, %v2495_v52  ;;  %v23020_v52 = vld [vmem:[#allocation35_spill] sm:$0xff] }
 0x469   : > { %23012 = vst [vmem:[#allocation25_spill] sm:$0xff] %v18480_v40  ;;  %v2695_v58 = vsel %vm22711_vm0, %v18480_v40, -inf }
 0x46a   : > { %2747 = vmax.xlane.f32.xlu0 %v2746_v63  ;;  %v2920_v63 = vsel %vm22711_vm0, %v18480_v40, 0.0 }
 0x46b   : > { %2690 = vmax.xlane.f32.xlu1 %v2689_v42  ;;  %v2514_v42 = vmul.f32 %v18351_v47, %v18144_v9 }
 0x46e   : > { %2699 = vmax.xlane.f32.xlu0 %v2698_v46  ;;  %v2543_v46 = vadd.f32 1.0, %v2511_v8  ;;  %v2704_v8 = vsel %vm22711_vm0, %v18485_v57, -inf }
 0x46f   : > { %2969 = vadd.xlane.f32.xlu1 %v2968_v1  ;;  %v2752_v1 = vsel %vm22711_vm0, %v18475_v39, -inf }
 0x472   : > { %2978 = vadd.xlane.f32.xlu0 %v2977_v43  ;;  %v2546_v43 = vadd.f32 1.0, %v2514_v42 }
 0x473   : > { %2921 = vadd.xlane.f32.xlu1 %v2920_v63  ;;  %v2498_v63 = vmul.f32 %v18351_v47, %v22983_v49 }
 0x475   : > { %v2530_v39 = vadd.f32 1.0, %v2498_v63  ;;  %v2513_v63 = vmul.f32 %v18351_v47, %v18080_v33 }
 0x476   : > { %2930 = vadd.xlane.f32.xlu0 %v2929_v36  ;;  %v23014_v36 = vld [vmem:[#allocation50_spill] sm:$0xff] }
 0x477   : > { %2744 = vmax.xlane.f32.xlu1 %v2743_v44  ;;  %v18506_v48 = vmul.f32 %v2543_v46, %v23014_v36  ;;  %v23016_v44 = vld [vmem:[#allocation54_spill] sm:$0xff] }
 0x478   : > { %v18511_v30 = vmul.f32 %v2546_v43, %v23016_v44 }
 0x479   : > { %23015 = vst [vmem:[#allocation50_spill] sm:$0xff] %v18506_v48  ;;  %v2974_v42 = vsel %vm22711_vm0, %v18506_v48, 0.0  ;;  %v2749_v62 = vsel %vm22711_vm0, %v18506_v48, -inf }
 0x47a   : > { %2753 = vmax.xlane.f32.xlu0 %v2752_v1  ;;  %23017 = vst [vmem:[#allocation54_spill] sm:$0xff] %v18511_v30  ;;  %v23018_v1 = vld [vmem:[#allocation27_spill] sm:$0xff]  ;;  %v2983_v46 = vsel %vm22711_vm0, %v18511_v30, 0.0  ;;  %v2758_v40 = vsel %vm22711_vm0, %v18511_v30, -inf }
 0x47b   : > { %2696 = vmax.xlane.f32.xlu1 %v2695_v58  ;;  %v18516_v29 = vmul.f32 %v2527_v12, %v23018_v1  ;;  %v18521_v58 = vmul.f32 %v2530_v39, %v23020_v52  ;;  %v23022_v12 = vld [vmem:[#allocation57_spill] sm:$0xff]  ;;  %v2545_v39 = vadd.f32 1.0, %v2513_v63 }
 0x47d   : > { %23019 = vst [vmem:[#allocation27_spill] sm:$0xff] %v18516_v29  ;;  %23021 = vst [vmem:[#allocation35_spill] sm:$0xff] %v18521_v58  ;;  %v2926_v43 = vsel %vm22711_vm0, %v18516_v29, 0.0  ;;  %v2701_v26 = vsel %vm22711_vm0, %v18516_v29, -inf  ;;  %v2710_v63 = vsel %vm22711_vm0, %v18521_v58, -inf  ;;  %v23033_v29 = vld [vmem:[#allocation52_spill] sm:$0xff] }
 0x47e   : > { %2705 = vmax.xlane.f32.xlu0 %v2704_v8  ;;  %v2935_v8 = vsel %vm22711_vm0, %v18521_v58, 0.0 }
 0x47f   : > { %2975 = vadd.xlane.f32.xlu1 %v2974_v42  ;;  %v2516_v42 = vmul.f32 %v18351_v47, %v23022_v12 }
 0x481   : > { %v2548_v57 = vadd.f32 1.0, %v2516_v42 }
 0x482   : > { %2984 = vadd.xlane.f32.xlu0 %v2983_v46  ;;  %v2497_v46 = vmul.f32 %v18351_v47, %v23023_v54 }
 0x483   : > { %2927 = vadd.xlane.f32.xlu1 %v2926_v43  ;;  %v23024_v43 = vld [vmem:[#allocation38_spill] sm:$0xff] }
 0x484   : > { %v2500_v7 = vmul.f32 %v18351_v47, %v23024_v43  ;;  %v2529_v48 = vadd.f32 1.0, %v2497_v46  ;;  %v23031_v46 = vld [vmem:[#allocation39_spill] sm:$0xff] }
 0x486   : > { %2936 = vadd.xlane.f32.xlu0 %v2935_v8  ;;  %v23025_v8 = vld [vmem:[#allocation51_spill] sm:$0xff]  ;;  %v2532_v30 = vadd.f32 1.0, %v2500_v7  ;;  %v2515_v7 = vmul.f32 %v18351_v47, %v23033_v29 }
 0x487   : > { %2750 = vmax.xlane.f32.xlu1 %v2749_v62  ;;  %v18542_v41 = vmul.f32 %v2545_v39, %v23025_v8  ;;  %v23027_v62 = vld [vmem:[#allocation58_spill] sm:$0xff] }
 0x488   : > { %v18547_v20 = vmul.f32 %v2548_v57, %v23027_v62 }
 0x489   : > { %23026 = vst [vmem:[#allocation51_spill] sm:$0xff] %v18542_v41  ;;  %v2980_v42 = vsel %vm22711_vm0, %v18542_v41, 0.0  ;;  %v2755_v58 = vsel %vm22711_vm0, %v18542_v41, -inf }
 0x48a   : > { %2759 = vmax.xlane.f32.xlu0 %v2758_v40  ;;  %23028 = vst [vmem:[#allocation58_spill] sm:$0xff] %v18547_v20  ;;  %v23029_v40 = vld [vmem:[#allocation30_spill] sm:$0xff]  ;;  %v2989_v39 = vsel %vm22711_vm0, %v18547_v20, 0.0  ;;  %v2764_v43 = vsel %vm22711_vm0, %v18547_v20, -inf }
 0x48b   : > { %2702 = vmax.xlane.f32.xlu1 %v2701_v26  ;;  %v18552_v50 = vmul.f32 %v2529_v48, %v23029_v40  ;;  %v18557_v26 = vmul.f32 %v2532_v30, %v23031_v46  ;;  %v23034_v48 = vld [vmem:[#allocation47_spill] sm:$0xff]  ;;  %v2547_v30 = vadd.f32 1.0, %v2515_v7 }
 0x48d   : > { %23030 = vst [vmem:[#allocation30_spill] sm:$0xff] %v18552_v50  ;;  %23032 = vst [vmem:[#allocation39_spill] sm:$0xff] %v18557_v26  ;;  %v2932_v57 = vsel %vm22711_vm0, %v18552_v50, 0.0  ;;  %v2716_v7 = vsel %vm22711_vm0, %v18557_v26, -inf }
 0x48e   : > { %2711 = vmax.xlane.f32.xlu0 %v2710_v63  ;;  %v2941_v63 = vsel %vm22711_vm0, %v18557_v26, 0.0 }
 0x48f   : > { %2981 = vadd.xlane.f32.xlu1 %v2980_v42  ;;  %v2518_v42 = vmul.f32 %v18351_v47, %v23034_v48  ;;  %v2707_v48 = vsel %vm22711_vm0, %v18552_v50, -inf }
 0x491   : > { %v2550_v29 = vadd.f32 1.0, %v2518_v42 }
 0x492   : > { %2990 = vadd.xlane.f32.xlu0 %v2989_v39  ;;  %v2499_v39 = vmul.f32 %v18351_v47, %v23035_v34 }
 0x493   : > { %2933 = vadd.xlane.f32.xlu1 %v2932_v57  ;;  %v23036_v57 = vld [vmem:[#allocation42_spill] sm:$0xff] }
 0x494   : > { %v2502_v54 = vmul.f32 %v18351_v47, %v23036_v57  ;;  %v2531_v41 = vadd.f32 1.0, %v2499_v39  ;;  %v23041_v57 = vld [vmem:[#allocation33_spill] sm:$0xff] }
 0x496   : > { %2942 = vadd.xlane.f32.xlu0 %v2941_v63  ;;  %v23037_v63 = vld [vmem:[#allocation53_spill] sm:$0xff]  ;;  %v2534_v20 = vadd.f32 1.0, %v2502_v54  ;;  %v18590_v50 = vmul.f32 %v2531_v41, %v23041_v57 }
 0x497   : > { %2756 = vmax.xlane.f32.xlu1 %v2755_v58  ;;  %v18578_v12 = vmul.f32 %v2547_v30, %v23037_v63  ;;  %v23039_v58 = vld [vmem:[#allocation48_spill] sm:$0xff]  ;;  %v23043_v30 = vld [vmem:[#allocation43_spill] sm:$0xff] }
 0x498   : > { %v18583_v34 = vmul.f32 %v2550_v29, %v23039_v58  ;;  %23042 = vst [vmem:[#allocation62_spill] sm:$0xff] %v18590_v50  ;;  %v18595_v39 = vmul.f32 %v2534_v20, %v23043_v30  ;;  %v2938_v54 = vsel %vm22711_vm0, %v18590_v50, 0.0 }
 0x499   : > { %23038 = vst [vmem:[#allocation53_spill] sm:$0xff] %v18578_v12  ;;  %v2761_v20 = vsel %vm22711_vm0, %v18578_v12, -inf }
 0x49a   : > { %2765 = vmax.xlane.f32.xlu0 %v2764_v43  ;;  %23040 = vst [vmem:[#allocation48_spill] sm:$0xff] %v18583_v34  ;;  %v2986_v43 = vsel %vm22711_vm0, %v18578_v12, 0.0  ;;  %23044 = vst [vmem:[#allocation63_spill] sm:$0xff] %v18595_v39  ;;  %v2947_v41 = vsel %vm22711_vm0, %v18595_v39, 0.0 }
 0x49b   : > { %2708 = vmax.xlane.f32.xlu1 %v2707_v48  ;;  %v2995_v48 = vsel %vm22711_vm0, %v18583_v34, 0.0 }
 0x49d   : > { %v18585_v42 = vpop.permute.xlu1 %2389 }
 0x49e   : > { %2717 = vmax.xlane.f32.xlu0 %v2716_v7  ;;  %v2409_v29 = vmul.f32 %v18585_v42, %v17963_v37  ;;  %v23045_v7 = vld [vmem:[#allocation55_spill] sm:$0xff]  ;;  %v2392_v57 = vmul.f32 %v18585_v42, %v22995_v13  ;;  %v2713_v13 = vsel %vm22711_vm0, %v18590_v50, -inf }
 0x49f   : > { %2987 = vadd.xlane.f32.xlu1 %v2986_v43  ;;  %v2517_v26 = vmul.f32 %v18351_v47, %v23045_v7  ;;  %v2770_v7 = vsel %vm22711_vm0, %v18583_v34, -inf }
 0x4a0   : > { %v2441_v43 = vadd.f32 1.0, %v2409_v29  ;;  %v2424_v39 = vadd.f32 1.0, %v2392_v57  ;;  %v2408_v29 = vmul.f32 %v18585_v42, %v17979_v31  ;;  %v23051_v57 = vld [vmem:[#allocation37_spill] sm:$0xff] }
 0x4a1   : > { %v2549_v37 = vadd.f32 1.0, %v2517_v26 }
 0x4a2   : > { %2996 = vadd.xlane.f32.xlu0 %v2995_v48  ;;  %v23046_v48 = vld [vmem:[#allocation36_spill] sm:$0xff]  ;;  %v18626_v34 = vmul.f32 %v2424_v39, %v17816_v45  ;;  %v2519_v39 = vmul.f32 %v18351_v47, %v18190_v27 }
 0x4a3   : > { %2939 = vadd.xlane.f32.xlu1 %v2938_v54  ;;  %v2501_v30 = vmul.f32 %v18351_v47, %v23046_v48  ;;  %v18614_v54 = vmul.f32 %v2441_v43, %v22990_v21  ;;  %v2440_v21 = vadd.f32 1.0, %v2408_v29 }
 0x4a4   : > { %23050 = vst [vmem:[#allocation64_spill] sm:$0xff] %v18626_v34  ;;  %v2809_v43 = vsel %vm22711_vm0, %v18626_v34, 0.0 }
 0x4a5   : > { %23047 = vst [vmem:[#allocation36_spill] sm:$0xff] %v18614_v54  ;;  %v2533_v12 = vadd.f32 1.0, %v2501_v30  ;;  %v18636_v30 = vmul.f32 %v2440_v21, %v22989_v11 }
 0x4a6   : > { %2948 = vadd.xlane.f32.xlu0 %v2947_v41  ;;  %v23048_v41 = vld [vmem:[#allocation56_spill] sm:$0xff] }
 0x4a7   : > { %2762 = vmax.xlane.f32.xlu1 %v2761_v20  ;;  %v18621_v26 = vmul.f32 %v2549_v37, %v23048_v41  ;;  %v2860_v20 = vsel %vm22711_vm0, %v18614_v54, 0.0  ;;  %23053 = vst [vmem:[#allocation65_spill] sm:$0xff] %v18636_v30  ;;  %v2410_v37 = vmul.f32 %v18585_v42, %v18018_v53  ;;  %v2551_v53 = vadd.f32 1.0, %v2519_v39 }
 0x4a9   : > { %23049 = vst [vmem:[#allocation56_spill] sm:$0xff] %v18621_v26  ;;  %v2992_v31 = vsel %vm22711_vm0, %v18621_v26, 0.0  ;;  %v2442_v29 = vadd.f32 1.0, %v2410_v37  ;;  %v2767_v11 = vsel %vm22711_vm0, %v18621_v26, -inf  ;;  %v23056_v37 = vld [vmem:[#allocation46_spill] sm:$0xff] }
 0x4aa   : > { %2771 = vmax.xlane.f32.xlu0 %v2770_v7  ;;  %v18631_v7 = vmul.f32 %v2533_v12, %v23051_v57  ;;  %v2632_v12 = vsel %vm22711_vm0, %v18636_v30, -inf }
 0x4ab   : > { %2714 = vmax.xlane.f32.xlu1 %v2713_v13  ;;  %v2394_v13 = vmul.f32 %v18585_v42, %v17835_v0 }
 0x4ac   : > { %23052 = vst [vmem:[#allocation37_spill] sm:$0xff] %v18631_v7  ;;  %v2944_v45 = vsel %vm22711_vm0, %v18631_v7, 0.0  ;;  %v2719_v0 = vsel %vm22711_vm0, %v18631_v7, -inf }
 0x4ae   : > { %2861 = vadd.xlane.f32.xlu0 %v2860_v20  ;;  %v23054_v20 = vld [vmem:[#allocation40_spill] sm:$0xff] }
 0x4af   : > { %2993 = vadd.xlane.f32.xlu1 %v2992_v31  ;;  %v2503_v21 = vmul.f32 %v18351_v47, %v23054_v20  ;;  %v2584_v31 = vsel %vm22711_vm0, %v18626_v34, -inf }
 0x4b1   : > { %v2535_v26 = vadd.f32 1.0, %v2503_v21  ;;  %v2412_v21 = vmul.f32 %v18585_v42, %v18026_v14 }
 0x4b2   : > { %2810 = vadd.xlane.f32.xlu0 %v2809_v43  ;;  %v18655_v43 = vmul.f32 %v2442_v29, %v18016_v59  ;;  %v23059_v29 = vld [vmem:[#allocation41_spill] sm:$0xff] }
 0x4b3   : > { %2945 = vadd.xlane.f32.xlu1 %v2944_v45  ;;  %v2426_v45 = vadd.f32 1.0, %v2394_v13  ;;  %v18670_v13 = vmul.f32 %v2535_v26, %v23059_v29 }
 0x4b4   : > { %23055 = vst [vmem:[#allocation40_spill] sm:$0xff] %v18655_v43  ;;  %v2863_v47 = vsel %vm22711_vm0, %v18655_v43, 0.0  ;;  %v2638_v26 = vsel %vm22711_vm0, %v18655_v43, -inf }
 0x4b5   : > { %v18665_v39 = vmul.f32 %v2426_v45, %v22992_v28  ;;  %23060 = vst [vmem:[#allocation41_spill] sm:$0xff] %v18670_v13  ;;  %v2950_v28 = vsel %vm22711_vm0, %v18670_v13, 0.0 }
 0x4b6   : > { %2633 = vmax.xlane.f32.xlu0 %v2632_v12  ;;  %v18660_v12 = vmul.f32 %v2551_v53, %v23056_v37 }
 0x4b7   : > { %2768 = vmax.xlane.f32.xlu1 %v2767_v11  ;;  %23058 = vst [vmem:[#allocation66_spill] sm:$0xff] %v18665_v39  ;;  %v2815_v53 = vsel %vm22711_vm0, %v18665_v39, 0.0 }
 0x4b8   : > { %23057 = vst [vmem:[#allocation46_spill] sm:$0xff] %v18660_v12  ;;  %v2998_v59 = vsel %vm22711_vm0, %v18660_v12, 0.0  ;;  %v2773_v14 = vsel %vm22711_vm0, %v18660_v12, -inf }
 0x4ba   : > { %2585 = vmax.xlane.f32.xlu0 %v2584_v31  ;;  %v2393_v31 = vmul.f32 %v18585_v42, %v23001_v60  ;;  %v2590_v60 = vsel %vm22711_vm0, %v18665_v39, -inf }
 0x4bb   : > { %2720 = vmax.xlane.f32.xlu1 %v2719_v0  ;;  %v2444_v0 = vadd.f32 1.0, %v2412_v21  ;;  %v2857_v21 = vsel %vm22711_vm0, %v18636_v30, 0.0 }
 0x4be   : > { %2864 = vadd.xlane.f32.xlu0 %v2863_v47  ;;  %v2396_v47 = vmul.f32 %v18585_v42, %v17845_v16 }
 0x4bf   : > { %v18672_v11 = vpop.xlane.xlu0 %2954  ;;  %2999 = vadd.xlane.f32.xlu1 %v2998_v59  ;;  %v2425_v59 = vadd.f32 1.0, %v2393_v31 }
 0x4c0   : > { %v2428_v7 = vadd.f32 1.0, %v2396_v47 }
 0x4c1   : > { %v18700_v16 = vmul.f32 %v2425_v59, %v17804_v38  ;;  %v2414_v59 = vmul.f32 %v18585_v42, %v18076_v32 }
 0x4c2   : > { %2816 = vadd.xlane.f32.xlu0 %v2815_v53 }
 0x4c3   : > { %2951 = vadd.xlane.f32.xlu1 %v2950_v28  ;;  %v18682_v45 = vpop.xlane.xlu0 %2906  ;;  %v18695_v28 = vmul.f32 %v2444_v0, %v18024_v6  ;;  %23062 = vst [vmem:[#allocation68_spill] sm:$0xff] %v18700_v16  ;;  %v2812_v6 = vsel %vm22711_vm0, %v18700_v16, 0.0  ;;  %v2411_v0 = vmul.f32 %v18585_v42, %v18012_v35  ;;  %v2587_v32 = vsel %vm22711_vm0, %v18700_v16, -inf }
 0x4c5   : > { %23061 = vst [vmem:[#allocation67_spill] sm:$0xff] %v18695_v28  ;;  %v2869_v31 = vsel %vm22711_vm0, %v18695_v28, 0.0  ;;  %v2644_v35 = vsel %vm22711_vm0, %v18695_v28, -inf }
 0x4c6   : > { %2639 = vmax.xlane.f32.xlu0 %v2638_v26 }
 0x4c7   : > { %2774 = vmax.xlane.f32.xlu1 %v2773_v14  ;;  %v18690_v53 = vpop.xlane.xlu0 %2729  ;;  %v18707_v14 = vmul.f32 %v2428_v7, %v17843_v15  ;;  %v2635_v15 = vsel %vm22711_vm0, %v18614_v54, -inf  ;;  %v2443_v7 = vadd.f32 1.0, %v2411_v0 }
 0x4c9   : > { %23063 = vst [vmem:[#allocation69_spill] sm:$0xff] %v18707_v14  ;;  %v2821_v38 = vsel %vm22711_vm0, %v18707_v14, 0.0 }
 0x4ca   : > { %2591 = vmax.xlane.f32.xlu0 %v2590_v60  ;;  %v2395_v60 = vmul.f32 %v18585_v42, %v23006_v55 }
 0x4cb   : > { %2858 = vadd.xlane.f32.xlu1 %v2857_v21  ;;  %v18702_v26 = vpop.xlane.xlu0 %2681 }
 0x4cc   : > { %v2427_v0 = vadd.f32 1.0, %v2395_v60 }
 0x4ce   : > { %2870 = vadd.xlane.f32.xlu0 %v2869_v31  ;;  %v2446_v31 = vadd.f32 1.0, %v2414_v59 }
 0x4cf   : > { %2813 = vadd.xlane.f32.xlu1 %v2812_v6  ;;  %v18713_v47 = vpop.xlane.xlu0 %2960  ;;  %v2398_v6 = vmul.f32 %v18585_v42, %v17867_v51 }
 0x4d0   : > { %v18739_v12 = vmul.f32 %v2446_v31, %v18074_v10  ;;  %v2413_v31 = vmul.f32 %v18585_v42, %v18022_v2 }
 0x4d1   : > { %v2430_v59 = vadd.f32 1.0, %v2398_v6 }
 0x4d2   : > { %2822 = vadd.xlane.f32.xlu0 %v2821_v38  ;;  %v18732_v38 = vmul.f32 %v2443_v7, %v22991_v19  ;;  %23065 = vst [vmem:[#allocation71_spill] sm:$0xff] %v18739_v12  ;;  %v2875_v60 = vsel %vm22711_vm0, %v18739_v12, 0.0 }
 0x4d3   : > { %2636 = vmax.xlane.f32.xlu1 %v2635_v15  ;;  %v18723_v21 = vpop.xlane.xlu0 %2912  ;;  %v2596_v15 = vsel %vm22711_vm0, %v18707_v14, -inf  ;;  %v23084_v14 = vld [vmem:[#allocation43_spill] sm:$0xff] }
 0x4d4   : > { %23064 = vst [vmem:[#allocation70_spill] sm:$0xff] %v18732_v38  ;;  %v2866_v51 = vsel %vm22711_vm0, %v18732_v38, 0.0 }
 0x4d6   : > { %2645 = vmax.xlane.f32.xlu0 %v2644_v35  ;;  %v18744_v35 = vmul.f32 %v2427_v0, %v17829_v61 }
 0x4d7   : > { %2588 = vmax.xlane.f32.xlu1 %v2587_v32  ;;  %v18734_v55 = vpop.xlane.xlu0 %2735  ;;  %v18753_v32 = vmul.f32 %v2430_v59, %v22979_v25  ;;  %v2641_v25 = vsel %vm22711_vm0, %v18732_v38, -inf  ;;  %v2445_v59 = vadd.f32 1.0, %v2413_v31 }
 0x4d8   : > { %23066 = vst [vmem:[#allocation72_spill] sm:$0xff] %v18744_v35  ;;  %v2818_v10 = vsel %vm22711_vm0, %v18744_v35, 0.0 }
 0x4d9   : > { %23067 = vst [vmem:[#allocation73_spill] sm:$0xff] %v18753_v32  ;;  %v2827_v0 = vsel %vm22711_vm0, %v18753_v32, 0.0  ;;  %v18782_v31 = vmul.f32 %v2445_v59, %v18020_v56 }
 0x4da   : > { %2597 = vmax.xlane.f32.xlu0 %v2596_v15  ;;  %v2416_v15 = vmul.f32 %v18585_v42, %v18104_v18  ;;  %v2400_v18 = vmul.f32 %v18585_v42, %v17879_v4 }
 0x4db   : > { %2867 = vadd.xlane.f32.xlu1 %v2866_v51  ;;  %v18746_v19 = vpop.xlane.xlu0 %2687  ;;  %v2397_v51 = vmul.f32 %v18585_v42, %v23011_v23  ;;  %23068 = vst [vmem:[#allocation74_spill] sm:$0xff] %v18782_v31 }
 0x4dc   : > { %v18748_v7 = vpop.xlane.xlu1 %2957  ;;  %v2448_v28 = vadd.f32 1.0, %v2416_v15  ;;  %v2432_v4 = vadd.f32 1.0, %v2400_v18 }
 0x4dd   : > { %v2429_v23 = vadd.f32 1.0, %v2397_v51 }
 0x4de   : > { %2876 = vadd.xlane.f32.xlu0 %v2875_v60  ;;  %v18791_v15 = vmul.f32 %v2448_v28, %v18102_v5  ;;  %v18805_v43 = vmul.f32 %v2432_v4, %v22981_v17  ;;  %v2647_v17 = vsel %vm22711_vm0, %v18782_v31, -inf }
 0x4df   : > { %2819 = vadd.xlane.f32.xlu1 %v2818_v10  ;;  %v18759_v61 = vpop.xlane.xlu0 %2966  ;;  %v2650_v10 = vsel %vm22711_vm0, %v18739_v12, -inf  ;;  %v2602_v12 = vsel %vm22711_vm0, %v18753_v32, -inf  ;;  %v18796_v56 = vmul.f32 %v2429_v23, %v22978_v22  ;;  %v2418_v23 = vmul.f32 %v18585_v42, %v23016_v44 }
 0x4e0   : > { %v18761_v6 = vpop.xlane.xlu1 %2909  ;;  %23069 = vst [vmem:[#allocation75_spill] sm:$0xff] %v18791_v15  ;;  %23071 = vst [vmem:[#allocation77_spill] sm:$0xff] %v18805_v43  ;;  %v2833_v18 = vsel %vm22711_vm0, %v18805_v43, 0.0  ;;  %v2402_v44 = vmul.f32 %v18585_v42, %v23020_v52 }
 0x4e1   : > { %23070 = vst [vmem:[#allocation76_spill] sm:$0xff] %v18796_v56  ;;  %v2824_v5 = vsel %vm22711_vm0, %v18796_v56, 0.0  ;;  %v2450_v54 = vadd.f32 1.0, %v2418_v23 }
 0x4e2   : > { %2828 = vadd.xlane.f32.xlu0 %v2827_v0  ;;  %v2593_v0 = vsel %vm22711_vm0, %v18744_v35, -inf  ;;  %v2434_v52 = vadd.f32 1.0, %v2402_v44 }
 0x4e3   : > { %2642 = vmax.xlane.f32.xlu1 %v2641_v25  ;;  %v18771_v2 = vpop.xlane.xlu0 %2918  ;;  %v18843_v23 = vmul.f32 %v2450_v54, %v18144_v9  ;;  %v2417_v54 = vmul.f32 %v18585_v42, %v23025_v8 }
 0x4e4   : > { %v18773_v60 = vpop.xlane.xlu1 %2732  ;;  %v18857_v30 = vmul.f32 %v2434_v52, %v22983_v49 }
 0x4e5   : > { %23073 = vst [vmem:[#allocation79_spill] sm:$0xff] %v18843_v23  ;;  %v2449_v52 = vadd.f32 1.0, %v2417_v54 }
 0x4e6   : > { %2651 = vmax.xlane.f32.xlu0 %v2650_v10  ;;  %v2872_v10 = vsel %vm22711_vm0, %v18782_v31, 0.0  ;;  %23075 = vst [vmem:[#allocation81_spill] sm:$0xff] %v18857_v30  ;;  %v2839_v44 = vsel %vm22711_vm0, %v18857_v30, 0.0 }
 0x4e7   : > { %2594 = vmax.xlane.f32.xlu1 %v2593_v0  ;;  %v18784_v25 = vpop.xlane.xlu0 %2741  ;;  %v2881_v0 = vsel %vm22711_vm0, %v18791_v15, 0.0  ;;  %v18886_v54 = vmul.f32 %v2449_v52, %v18080_v33 }
 0x4e8   : > { %v18786_v38 = vpop.xlane.xlu1 %2684 }
 0x4e9   : > { %23076 = vst [vmem:[#allocation82_spill] sm:$0xff] %v18886_v54 }
 0x4ea   : > { %2603 = vmax.xlane.f32.xlu0 %v2602_v12  ;;  %v2415_v12 = vmul.f32 %v18585_v42, %v23014_v36 }
 0x4eb   : > { %2873 = vadd.xlane.f32.xlu1 %v2872_v10  ;;  %v18798_v59 = vpop.xlane.xlu0 %2693  ;;  %v2399_v10 = vmul.f32 %v18585_v42, %v23018_v1 }
 0x4ec   : > { %v18800_v51 = vpop.xlane.xlu1 %2963  ;;  %v2447_v4 = vadd.f32 1.0, %v2415_v12 }
 0x4ed   : > { %v2431_v1 = vadd.f32 1.0, %v2399_v10 }
 0x4ee   : > { %2882 = vadd.xlane.f32.xlu0 %v2881_v0  ;;  %v18834_v12 = vmul.f32 %v2447_v4, %v18054_v3 }
 0x4ef   : > { %2825 = vadd.xlane.f32.xlu1 %v2824_v5  ;;  %v18811_v22 = vpop.xlane.xlu0 %2972  ;;  %v2656_v5 = vsel %vm22711_vm0, %v18791_v15, -inf  ;;  %v2608_v15 = vsel %vm22711_vm0, %v18805_v43, -inf  ;;  %v18848_v3 = vmul.f32 %v2431_v1, %v22980_v24  ;;  %v2420_v1 = vmul.f32 %v18585_v42, %v23027_v62 }
 0x4f0   : > { %v18813_v28 = vpop.xlane.xlu1 %2915  ;;  %23072 = vst [vmem:[#allocation78_spill] sm:$0xff] %v18834_v12  ;;  %v2653_v49 = vsel %vm22711_vm0, %v18834_v12, -inf  ;;  %v2404_v62 = vmul.f32 %v18585_v42, %v23031_v46 }
 0x4f1   : > { %23074 = vst [vmem:[#allocation80_spill] sm:$0xff] %v18848_v3  ;;  %v2830_v9 = vsel %vm22711_vm0, %v18848_v3, 0.0  ;;  %v2452_v50 = vadd.f32 1.0, %v2420_v1  ;;  %v23077_v1 = vld [vmem:[#allocation57_spill] sm:$0xff] }
 0x4f2   : > { %2834 = vadd.xlane.f32.xlu0 %v2833_v18  ;;  %v2599_v18 = vsel %vm22711_vm0, %v18796_v56, -inf  ;;  %v2436_v46 = vadd.f32 1.0, %v2404_v62 }
 0x4f3   : > { %2648 = vmax.xlane.f32.xlu1 %v2647_v17  ;;  %v18823_v36 = vpop.xlane.xlu0 %2924  ;;  %v18895_v43 = vmul.f32 %v2452_v50, %v23077_v1  ;;  %v2422_v1 = vmul.f32 %v18585_v42, %v23039_v58  ;;  %v2406_v58 = vmul.f32 %v18585_v42, %v23084_v14 }
 0x4f4   : > { %v18825_v0 = vpop.xlane.xlu1 %2738 }
 0x4f5   : > { %23078 = vst [vmem:[#allocation57_spill] sm:$0xff] %v18895_v43  ;;  %v2668_v32 = vsel %vm22711_vm0, %v18895_v43, -inf  ;;  %v2454_v35 = vadd.f32 1.0, %v2422_v1  ;;  %v23088_v1 = vld [vmem:[#allocation47_spill] sm:$0xff]  ;;  %v2438_v14 = vadd.f32 1.0, %v2406_v58 }
 0x4f6   : > { %2657 = vmax.xlane.f32.xlu0 %v2656_v5  ;;  %v2878_v5 = vsel %vm22711_vm0, %v18834_v12, 0.0 }
 0x4f7   : > { %2600 = vmax.xlane.f32.xlu1 %v2599_v18  ;;  %v18836_v17 = vpop.xlane.xlu0 %2747  ;;  %v2887_v18 = vsel %vm22711_vm0, %v18843_v23, 0.0  ;;  %v18947_v16 = vmul.f32 %v2454_v35, %v23088_v1  ;;  %v2421_v35 = vmul.f32 %v18585_v42, %v23048_v41 }
 0x4f8   : > { %v18838_v31 = vpop.xlane.xlu1 %2690 }
 0x4f9   : > { %v2453_v1 = vadd.f32 1.0, %v2421_v35 }
 0x4fa   : > { %2609 = vmax.xlane.f32.xlu0 %v2608_v15 }
 0x4fb   : > { %2879 = vadd.xlane.f32.xlu1 %v2878_v5  ;;  %v18850_v4 = vpop.xlane.xlu0 %2699  ;;  %v2401_v5 = vmul.f32 %v18585_v42, %v23029_v40 }
 0x4fc   : > { %v18852_v10 = vpop.xlane.xlu1 %2969 }
 0x4fd   : > { %v2433_v40 = vadd.f32 1.0, %v2401_v5 }
 0x4fe   : > { %2888 = vadd.xlane.f32.xlu0 %v2887_v18 }
 0x4ff   : > { %2831 = vadd.xlane.f32.xlu1 %v2830_v9  ;;  %v18863_v24 = vpop.xlane.xlu0 %2978  ;;  %v2662_v9 = vsel %vm22711_vm0, %v18843_v23, -inf  ;;  %v2614_v23 = vsel %vm22711_vm0, %v18857_v30, -inf  ;;  %v23081_v30 = vld [vmem:[#allocation38_spill] sm:$0xff] }
 0x500   : > { %v18865_v15 = vpop.xlane.xlu1 %2921  ;;  %v18909_v56 = vmul.f32 %v2436_v46, %v23081_v30  ;;  %v2659_v30 = vsel %vm22711_vm0, %v18886_v54, -inf }
 0x502   : > { %2840 = vadd.xlane.f32.xlu0 %v2839_v44  ;;  %v2605_v44 = vsel %vm22711_vm0, %v18848_v3, -inf  ;;  %v23079_v3 = vld [vmem:[#allocation29_spill] sm:$0xff]  ;;  %23082 = vst [vmem:[#allocation38_spill] sm:$0xff] %v18909_v56 }
 0x503   : > { %2654 = vmax.xlane.f32.xlu1 %v2653_v49  ;;  %v18875_v8 = vpop.xlane.xlu0 %2930  ;;  %v18900_v33 = vmul.f32 %v2433_v40, %v23079_v3  ;;  %v2845_v40 = vsel %vm22711_vm0, %v18909_v56, 0.0 }
 0x504   : > { %v18877_v18 = vpop.xlane.xlu1 %2744 }
 0x505   : > { %23080 = vst [vmem:[#allocation29_spill] sm:$0xff] %v18900_v33  ;;  %v2836_v50 = vsel %vm22711_vm0, %v18900_v33, 0.0 }
 0x506   : > { %2663 = vmax.xlane.f32.xlu0 %v2662_v9  ;;  %v2884_v9 = vsel %vm22711_vm0, %v18886_v54, 0.0 }
 0x507   : > { %2606 = vmax.xlane.f32.xlu1 %v2605_v44  ;;  %v18888_v49 = vpop.xlane.xlu0 %2753  ;;  %v2893_v44 = vsel %vm22711_vm0, %v18895_v43, 0.0  ;;  %v2620_v43 = vsel %vm22711_vm0, %v18909_v56, -inf  ;;  %v23093_v56 = vld [vmem:[#allocation42_spill] sm:$0xff] }
 0x508   : > { %v18890_v12 = vpop.xlane.xlu1 %2696  ;;  %v18961_v34 = vmul.f32 %v2438_v14, %v23093_v56  ;;  %v2405_v14 = vmul.f32 %v18585_v42, %v23051_v57 }
 0x50a   : > { %2615 = vmax.xlane.f32.xlu0 %v2614_v23  ;;  %v2419_v23 = vmul.f32 %v18585_v42, %v23037_v63  ;;  %23094 = vst [vmem:[#allocation42_spill] sm:$0xff] %v18961_v34 }
 0x50b   : > { %2885 = vadd.xlane.f32.xlu1 %v2884_v9  ;;  %v18902_v52 = vpop.xlane.xlu0 %2705  ;;  %v23083_v9 = vld [vmem:[#allocation33_spill] sm:$0xff] }
 0x50c   : > { %v18904_v5 = vpop.xlane.xlu1 %2975  ;;  %v2451_v46 = vadd.f32 1.0, %v2419_v23  ;;  %v23085_v23 = vld [vmem:[#allocation52_spill] sm:$0xff] }
 0x50d   : > { %23089 = vst [vmem:[#allocation52_spill] sm:$0xff] %v18947_v16 }
 0x50e   : > { %2894 = vadd.xlane.f32.xlu0 %v2893_v44  ;;  %v2403_v44 = vmul.f32 %v18585_v42, %v23083_v9  ;;  %v18938_v54 = vmul.f32 %v2451_v46, %v23085_v23  ;;  %v2899_v23 = vsel %vm22711_vm0, %v18947_v16, 0.0 }
 0x50f   : > { %2837 = vadd.xlane.f32.xlu1 %v2836_v50  ;;  %v18915_v3 = vpop.xlane.xlu0 %2984 }
 0x510   : > { %v18917_v62 = vpop.xlane.xlu1 %2927  ;;  %23086 = vst [vmem:[#allocation33_spill] sm:$0xff] %v18938_v54  ;;  %v2435_v9 = vadd.f32 1.0, %v2403_v44  ;;  %v2665_v56 = vsel %vm22711_vm0, %v18938_v54, -inf }
 0x512   : > { %2846 = vadd.xlane.f32.xlu0 %v2845_v40  ;;  %v2611_v40 = vsel %vm22711_vm0, %v18900_v33, -inf  ;;  %v23090_v33 = vld [vmem:[#allocation32_spill] sm:$0xff] }
 0x513   : > { %2660 = vmax.xlane.f32.xlu1 %v2659_v30  ;;  %v18927_v63 = vpop.xlane.xlu0 %2936  ;;  %v18952_v46 = vmul.f32 %v2435_v9, %v23090_v33  ;;  %v2851_v9 = vsel %vm22711_vm0, %v18961_v34, 0.0 }
 0x514   : > { %v18929_v50 = vpop.xlane.xlu1 %2750 }
 0x515   : > { %23091 = vst [vmem:[#allocation47_spill] sm:$0xff] %v18952_v46 }
 0x516   : > { %2669 = vmax.xlane.f32.xlu0 %v2668_v32  ;;  %v2890_v32 = vsel %vm22711_vm0, %v18938_v54, 0.0  ;;  %v2437_v54 = vadd.f32 1.0, %v2405_v14  ;;  %v23102_v14 = vld [vmem:[#allocation63_spill] sm:$0xff] }
 0x517   : > { %2612 = vmax.xlane.f32.xlu1 %v2611_v40  ;;  %v18940_v30 = vpop.xlane.xlu0 %2759 }
 0x518   : > { %23087 = vst [vmem:[#allocation43_spill] sm:$0xff] %v18940_v30  ;;  %v18942_v39 = vpop.xlane.xlu1 %2702 }
 0x51a   : > { %2621 = vmax.xlane.f32.xlu0 %v2620_v43  ;;  %v2842_v43 = vsel %vm22711_vm0, %v18952_v46, 0.0 }
 0x51b   : > { %2891 = vadd.xlane.f32.xlu1 %v2890_v32  ;;  %v18954_v44 = vpop.xlane.xlu0 %2711 }
 0x51c   : > { %23092 = vst [vmem:[#allocation32_spill] sm:$0xff] %v18954_v44  ;;  %v18956_v40 = vpop.xlane.xlu1 %2981 }
 0x51e   : > { %2900 = vadd.xlane.f32.xlu0 %v2899_v23  ;;  %v2674_v23 = vsel %vm22711_vm0, %v18947_v16, -inf }
 0x51f   : > { %2843 = vadd.xlane.f32.xlu1 %v2842_v43  ;;  %v18967_v33 = vpop.xlane.xlu0 %2990  ;;  %v2617_v43 = vsel %vm22711_vm0, %v18952_v46, -inf }
 0x520   : > { %23095 = vst [vmem:[#allocation83_spill] sm:$0xff] %v18967_v33  ;;  %v18969_v58 = vpop.xlane.xlu1 %2933 }
 0x522   : > { %2852 = vadd.xlane.f32.xlu0 %v2851_v9  ;;  %v23097_v9 = vld [vmem:[#allocation55_spill] sm:$0xff] }
 0x523   : > { %2666 = vmax.xlane.f32.xlu1 %v2665_v56  ;;  %v18977_v32 = vpop.xlane.xlu0 %2942  ;;  %v18986_v33 = vmul.f32 %v2453_v1, %v23097_v9  ;;  %v2626_v56 = vsel %vm22711_vm0, %v18961_v34, -inf }
 0x524   : > { %23096 = vst [vmem:[#allocation84_spill] sm:$0xff] %v18977_v32  ;;  %v18979_v41 = vpop.xlane.xlu1 %2756 }
 0x525   : > { %23098 = vst [vmem:[#allocation55_spill] sm:$0xff] %v18986_v33  ;;  %v2896_v16 = vsel %vm22711_vm0, %v18986_v33, 0.0 }
 0x526   : > { %2675 = vmax.xlane.f32.xlu0 %v2674_v23  ;;  %v18997_v23 = vmul.f32 %v2437_v54, %v23046_v48 }
 0x527   : > { %2618 = vmax.xlane.f32.xlu1 %v2617_v43  ;;  %v18988_v35 = vpop.xlane.xlu0 %2765  ;;  %v2722_v43 = vsel %vm22711_vm0, %v23102_v14, -inf }
 0x528   : > { %23099 = vst [vmem:[#allocation85_spill] sm:$0xff] %v18988_v35  ;;  %v18990_v57 = vpop.xlane.xlu1 %2708  ;;  %23100 = vst [vmem:[#allocation86_spill] sm:$0xff] %v18997_v23  ;;  %v2848_v9 = vsel %vm22711_vm0, %v18997_v23, 0.0 }
 0x52a   : > { %2627 = vmax.xlane.f32.xlu0 %v2626_v56  ;;  %v2423_v56 = vmul.f32 %v18585_v42, %v23056_v37  ;;  %v2623_v37 = vsel %vm22711_vm0, %v18997_v23, -inf }
 0x52b   : > { %2897 = vadd.xlane.f32.xlu1 %v2896_v16  ;;  %v18999_v46 = vpop.xlane.xlu0 %2717  ;;  %v2671_v16 = vsel %vm22711_vm0, %v18986_v33, -inf }
 0x52c   : > { %23101 = vst [vmem:[#allocation87_spill] sm:$0xff] %v18999_v46  ;;  %v19001_v1 = vpop.xlane.xlu1 %2987  ;;  %v2455_v54 = vadd.f32 1.0, %v2423_v56  ;;  %v2407_v46 = vmul.f32 %v18585_v42, %v23059_v29 }
 0x52e   : > { %2723 = vmax.xlane.f32.xlu0 %v2722_v43 }
 0x52f   : > { %2849 = vadd.xlane.f32.xlu1 %v2848_v9  ;;  %v19009_v34 = vpop.xlane.xlu0 %2996  ;;  %v19024_v9 = vmul.f32 %v2455_v54, %v18190_v27 }
 0x530   : > { %23103 = vst [vmem:[#allocation88_spill] sm:$0xff] %v19009_v34  ;;  %v19011_v48 = vpop.xlane.xlu1 %2939  ;;  %v2439_v34 = vadd.f32 1.0, %v2407_v46 }
 0x531   : > { %23106 = vst [vmem:[#allocation91_spill] sm:$0xff] %v19024_v9  ;;  %v2902_v42 = vsel %vm22711_vm0, %v19024_v9, 0.0 }
 0x532   : > { %v19033_v29 = vmul.f32 %v2439_v34, %v23054_v20 }
 0x533   : > { %2672 = vmax.xlane.f32.xlu1 %v2671_v16  ;;  %v19017_v43 = vpop.xlane.xlu0 %2948 }
 0x534   : > { %23104 = vst [vmem:[#allocation89_spill] sm:$0xff] %v19017_v43  ;;  %v19019_v14 = vpop.xlane.xlu1 %2762  ;;  %23109 = vst [vmem:[#allocation94_spill] sm:$0xff] %v19033_v29  ;;  %v2854_v27 = vsel %vm22711_vm0, %v19033_v29, 0.0  ;;  %v2629_v34 = vsel %vm22711_vm0, %v19033_v29, -inf }
 0x535   : > { %23105 = vst [vmem:[#allocation90_spill] sm:$0xff] %v19019_v14 }
 0x537   : > { %2624 = vmax.xlane.f32.xlu1 %v2623_v37  ;;  %v19026_v35 = vpop.xlane.xlu0 %2771  ;;  %v2677_v37 = vsel %vm22711_vm0, %v19024_v9, -inf }
 0x538   : > { %23107 = vst [vmem:[#allocation92_spill] sm:$0xff] %v19026_v35  ;;  %v19028_v33 = vpop.xlane.xlu1 %2714 }
 0x539   : > { %23108 = vst [vmem:[#allocation93_spill] sm:$0xff] %v19028_v33  ;;  %v16918_v33 = vld [vmem:[#allocation8 + $0x4] ss:$8 sps:$4 sm:$0xff]  }
 0x53a   : > { %3353 = vmatprep.mubr.bf16.mxu0 %v16918_v33 }
 0x53b   : > { %2903 = vadd.xlane.f32.xlu1 %v2902_v42  ;;  %v2862_v56 = vpop.xlane.xlu0 %2861 }
 0x53c   : > { %v19035_v16 = vpop.xlane.xlu1 %2993 }
 0x53d   : > { %23110 = vst [vmem:[#allocation95_spill] sm:$0xff] %v19035_v16 }
 0x53f   : > { %2855 = vadd.xlane.f32.xlu1 %v2854_v27  ;;  %v2811_v46 = vpop.xlane.xlu0 %2810  ;;  %v2725_v27 = vsel %vm22711_vm0, %v18670_v13, -inf }
 0x540   : > { %v19039_v54 = vpop.xlane.xlu1 %2945 }
 0x541   : > { %23111 = vst [vmem:[#allocation96_spill] sm:$0xff] %v19039_v54 }
 0x543   : > { %2678 = vmax.xlane.f32.xlu1 %v2677_v37  ;;  %v2634_v23 = vpop.xlane.xlu0 %2633 }
 0x544   : > { %v19043_v35 = vpop.xlane.xlu1 %2768 }
 0x545   : > { %23112 = vst [vmem:[#allocation97_spill] sm:$0xff] %v19043_v35 }
 0x547   : > { %2630 = vmax.xlane.f32.xlu1 %v2629_v34  ;;  %v2586_v20 = vpop.xlane.xlu0 %2585  ;;  %v3018_v34 = vsel %vm2776_vm7, %v2862_v56, %v18748_v7 }
 0x548   : > { %v19047_v42 = vpop.xlane.xlu1 %2720  ;;  %v3050_v13 = vmul.f32 0.03125, %v3018_v34 }
 0x549   : > { %23113 = vst [vmem:[#allocation98_spill] sm:$0xff] %v19047_v42 }
 0x54b   : > { %2726 = vmax.xlane.f32.xlu1 %v2725_v27  ;;  %v2865_v43 = vpop.xlane.xlu0 %2864 }
 0x54c   : > { %v19051_v54 = vpop.xlane.xlu1 %2999 }
 0x54d   : > { %23114 = vst [vmem:[#allocation99_spill] sm:$0xff] %v19051_v54  ;;  %v3001_v54 = vsel %vm2776_vm7, %v2811_v46, %v18682_v45  ;;  %v2793_v45 = vsel %vm2776_vm7, %v2634_v23, %v18690_v53 }
 0x54e   : > { %v3033_v56 = vmul.f32 0.03125, %v3001_v54 }
 0x54f   : > { %v2817_v32 = vpop.xlane.xlu0 %2816 }
 0x550   : > { %v19053_v9 = vpop.xlane.xlu1 %2951 }
 0x551   : > { %23115 = vst [vmem:[#allocation100_spill] sm:$0xff] %v19053_v9 }
 0x553   : > { %v2640_v37 = vpop.xlane.xlu0 %2639 }
 0x554   : > { %v19055_v35 = vpop.xlane.xlu1 %2774 }
 0x555   : > { %23116 = vst [vmem:[#allocation101_spill] sm:$0xff] %v19055_v35  ;;  %v16921_v35 = vld [vmem:[%s23117_s20 + $0x4] ss:$8 sps:$4 sm:$0xff]  }
 0x556   : > { %3674 = vmatprep.mubr.bf16.mxu1 %v16921_v35 }
 0x557   : > { %v2592_v29 = vpop.xlane.xlu0 %2591 }
 0x558   : > { %v2859_v16 = vpop.xlane.xlu1 %2858 }
 0x559   : > { %v3017_v42 = vsel %vm2776_vm7, %v2859_v16, %v18672_v11 }
 0x55a   : > { %v3049_v27 = vmul.f32 0.03125, %v3017_v42 }
 0x55b   : > { %v2871_v44 = vpop.xlane.xlu0 %2870 }
 0x55c   : > { %v2814_v9 = vpop.xlane.xlu1 %2813  ;;  %v3153_v14 = vpack.c.bf16 %v3050_v13, %v3049_v27  ;;  %v3003_v27 = vsel %vm2776_vm7, %v2817_v32, %v18723_v21 }
 0x55d   : > { %v3002_v7 = vsel %vm2776_vm7, %v2814_v9, %v18761_v6  ;;  %v2777_v6 = vsel %vm2776_vm7, %v2586_v20, %v18702_v26 }
 0x55e   : > { %v3034_v30 = vmul.f32 0.03125, %v3002_v7  ;;  %13734 = vmatprep.subr.bf16.mxu0 %v3153_v14 }
 0x55f   : > { %v2823_v11 = vpop.xlane.xlu0 %2822 }
 0x560   : > { %v3145_v16 = vpack.c.bf16 %v3034_v30, %v3033_v56  ;;  %v2637_v42 = vpop.xlane.xlu1 %2636  ;;  %v3019_v30 = vsel %vm2776_vm7, %v2865_v43, %v18713_v47  ;;  %v3035_v56 = vmul.f32 0.03125, %v3003_v27 }
 0x561   : > { %v2794_v13 = vsel %vm2776_vm7, %v2637_v42, %v18773_v60  ;;  %v3051_v23 = vmul.f32 0.03125, %v3019_v30  ;;  %v3005_v30 = vsel %vm2776_vm7, %v2823_v11, %v18771_v2 }
 0x562   : > { %v3105_v33 = vpack.c.bf16 %v2794_v13, %v2793_v45  ;;  %13735 = vmatpush3.bf16.msra.mxu0 %v3145_v16 }
 0x563   : > { %v2646_v46 = vpop.xlane.xlu0 %2645 }
 0x564   : > { %v2589_v34 = vpop.xlane.xlu1 %2588  ;;  %13846 = vmatprep.subr.bf16.mxu1 %v3105_v33 }
 0x565   : > { %v2778_v35 = vsel %vm2776_vm7, %v2589_v34, %v18786_v38 }
 0x566   : > { %v3097_v14 = vpack.c.bf16 %v2778_v35, %v2777_v6  ;;  %v3021_v6 = vsel %vm2776_vm7, %v2871_v44, %v18759_v61 }
 0x567   : > { %v2598_v9 = vpop.xlane.xlu0 %2597 }
 0x568   : > { %v2868_v53 = vpop.xlane.xlu1 %2867  ;;  %13847 = vmatpush3.bf16.msra.mxu1 %v3097_v14 }
 0x569   : > { %v3020_v60 = vsel %vm2776_vm7, %v2868_v53, %v18800_v51  ;;  %v2795_v51 = vsel %vm2776_vm7, %v2640_v37, %v18734_v55  ;;  %v3053_v37 = vmul.f32 0.03125, %v3021_v6 }
 0x56a   : > { %v3052_v54 = vmul.f32 0.03125, %v3020_v60  ;;  %v3037_v60 = vmul.f32 0.03125, %v3005_v30 }
 0x56b   : > { %v2877_v7 = vpop.xlane.xlu0 %2876 }
 0x56c   : > { %v2820_v26 = vpop.xlane.xlu1 %2819  ;;  %v3154_v20 = vpack.c.bf16 %v3052_v54, %v3051_v23 }
 0x56d   : > { %v3004_v38 = vsel %vm2776_vm7, %v2820_v26, %v18813_v28  ;;  %v2779_v28 = vsel %vm2776_vm7, %v2592_v29, %v18746_v19 }
 0x56e   : > { %v3036_v16 = vmul.f32 0.03125, %v3004_v38  ;;  %13736 = vmatprep.subr.bf16.mxu0 %v3154_v20 }
 0x56f   : > { %v2829_v47 = vpop.xlane.xlu0 %2828 }
 0x570   : > { %v3146_v43 = vpack.c.bf16 %v3036_v16, %v3035_v56  ;;  %v2643_v42 = vpop.xlane.xlu1 %2642  ;;  %v3023_v56 = vsel %vm2776_vm7, %v2877_v7, %v18811_v22 }
 0x571   : > { %v2796_v45 = vsel %vm2776_vm7, %v2643_v42, %v18825_v0  ;;  %v3007_v42 = vsel %vm2776_vm7, %v2829_v47, %v18823_v36 }
 0x572   : > { %v3106_v13 = vpack.c.bf16 %v2796_v45, %v2795_v51  ;;  %13737 = vmatpush3.bf16.msra.mxu0 %v3146_v43 }
 0x573   : > { %v2652_v21 = vpop.xlane.xlu0 %2651 }
 0x574   : > { %v2595_v32 = vpop.xlane.xlu1 %2594  ;;  %13848 = vmatprep.subr.bf16.mxu1 %v3106_v13 }
 0x575   : > { %v2780_v33 = vsel %vm2776_vm7, %v2595_v32, %v18838_v31  ;;  %v2799_v32 = vsel %vm2776_vm7, %v2652_v21, %v18836_v17 }
 0x576   : > { %v3098_v34 = vpack.c.bf16 %v2780_v33, %v2779_v28 }
 0x577   : > { %v2604_v35 = vpop.xlane.xlu0 %2603 }
 0x578   : > { %v2874_v55 = vpop.xlane.xlu1 %2873  ;;  %13849 = vmatpush3.bf16.msra.mxu1 %v3098_v34 }
 0x579   : > { %v3022_v0 = vsel %vm2776_vm7, %v2874_v55, %v18852_v10  ;;  %v2797_v10 = vsel %vm2776_vm7, %v2646_v46, %v18784_v25  ;;  %v3055_v46 = vmul.f32 0.03125, %v3023_v56 }
 0x57a   : > { %v3054_v14 = vmul.f32 0.03125, %v3022_v0 }
 0x57b   : > { %v2883_v53 = vpop.xlane.xlu0 %2882 }
 0x57c   : > { %v2826_v19 = vpop.xlane.xlu1 %2825  ;;  %v3155_v29 = vpack.c.bf16 %v3054_v14, %v3053_v37  ;;  %v3025_v6 = vsel %vm2776_vm7, %v2883_v53, %v18863_v24 }
 0x57d   : > { %v3006_v31 = vsel %vm2776_vm7, %v2826_v19, %v18865_v15  ;;  %v2781_v15 = vsel %vm2776_vm7, %v2598_v9, %v18798_v59  ;;  %v3039_v9 = vmul.f32 0.03125, %v3007_v42 }
 0x57e   : > { %v3038_v23 = vmul.f32 0.03125, %v3006_v31  ;;  %13738 = vmatprep.subr.bf16.mxu0 %v3155_v29 }
 0x57f   : > { %v2835_v61 = vpop.xlane.xlu0 %2834 }
 0x580   : > { %v3147_v44 = vpack.c.bf16 %v3038_v23, %v3037_v60  ;;  %v2649_v54 = vpop.xlane.xlu1 %2648  ;;  %v3009_v37 = vsel %vm2776_vm7, %v2835_v61, %v18875_v8 }
 0x581   : > { %v2798_v27 = vsel %vm2776_vm7, %v2649_v54, %v18877_v18 }
 0x582   : > { %v3107_v26 = vpack.c.bf16 %v2798_v27, %v2797_v10  ;;  %13739 = vmatpush3.bf16.msra.mxu0 %v3147_v44 }
 0x583   : > { %v2658_v2 = vpop.xlane.xlu0 %2657 }
 0x584   : > { %v2601_v11 = vpop.xlane.xlu1 %2600  ;;  %13850 = vmatprep.subr.bf16.mxu1 %v3107_v26 }
 0x585   : > { %v2782_v20 = vsel %vm2776_vm7, %v2601_v11, %v18890_v12 }
 0x586   : > { %v3099_v38 = vpack.c.bf16 %v2782_v20, %v2781_v15 }
 0x587   : > { %v2610_v16 = vpop.xlane.xlu0 %2609 }
 0x588   : > { %v2880_v25 = vpop.xlane.xlu1 %2879  ;;  %13851 = vmatpush3.bf16.msra.mxu1 %v3099_v38  ;;  %v2785_v60 = vsel %vm2776_vm7, %v2610_v16, %v18902_v52  ;;  %v23118_v38 = vld [vmem:[#allocation43_spill] sm:$0xff] }
 0x589   : > { %v3024_v18 = vsel %vm2776_vm7, %v2880_v25, %v18904_v5 }
 0x58a   : > { %v3056_v43 = vmul.f32 0.03125, %v3024_v18 }
 0x58b   : > { %v2889_v45 = vpop.xlane.xlu0 %2888 }
 0x58c   : > { %v2832_v51 = vpop.xlane.xlu1 %2831  ;;  %v3156_v59 = vpack.c.bf16 %v3056_v43, %v3055_v46  ;;  %v3027_v44 = vsel %vm2776_vm7, %v2889_v45, %v18915_v3  ;;  %v23120_v46 = vld [vmem:[#allocation32_spill] sm:$0xff] }
 0x58d   : > { %v3008_v12 = vsel %vm2776_vm7, %v2832_v51, %v18917_v62  ;;  %v2783_v62 = vsel %vm2776_vm7, %v2604_v35, %v18850_v4  ;;  %v3041_v35 = vmul.f32 0.03125, %v3009_v37  ;;  %v23127_v37 = vld [vmem:[#allocation97_spill] sm:$0xff] }
 0x58e   : > { %v3040_v13 = vmul.f32 0.03125, %v3008_v12  ;;  %13740 = vmatprep.subr.bf16.mxu0 %v3156_v59  ;;  %v23122_v59 = vld [vmem:[#allocation83_spill] sm:$0xff] }
 0x58f   : > { %v2841_v36 = vpop.xlane.xlu0 %2840 }
 0x590   : > { %v3148_v22 = vpack.c.bf16 %v3040_v13, %v3039_v9  ;;  %v2655_v7 = vpop.xlane.xlu1 %2654  ;;  %v3011_v27 = vsel %vm2776_vm7, %v2841_v36, %v18927_v63  ;;  %v23123_v13 = vld [vmem:[#allocation95_spill] sm:$0xff] }
 0x591   : > { %v2800_v5 = vsel %vm2776_vm7, %v2655_v7, %v18929_v50  ;;  %v3057_v50 = vmul.f32 0.03125, %v3025_v6  ;;  %v3043_v11 = vmul.f32 0.03125, %v3011_v27  ;;  %v23133_v27 = vld [vmem:[#allocation100_spill] sm:$0xff] }
 0x592   : > { %v3108_v28 = vpack.c.bf16 %v2800_v5, %v2799_v32  ;;  %13741 = vmatpush3.bf16.msra.mxu0 %v3148_v22  ;;  %v23124_v5 = vld [vmem:[#allocation84_spill] sm:$0xff] }
 0x593   : > { %v2664_v21 = vpop.xlane.xlu0 %2663 }
 0x594   : > { %v2607_v47 = vpop.xlane.xlu1 %2606  ;;  %13852 = vmatprep.subr.bf16.mxu1 %v3108_v28  ;;  %v2803_v56 = vsel %vm2776_vm7, %v2664_v21, %v23118_v38  ;;  %v23126_v21 = vld [vmem:[#allocation85_spill] sm:$0xff] }
 0x595   : > { %v2784_v33 = vsel %vm2776_vm7, %v2607_v47, %v18942_v39  ;;  %v23135_v38 = vld [vmem:[#allocation101_spill] sm:$0xff] }
 0x596   : > { %v3100_v34 = vpack.c.bf16 %v2784_v33, %v2783_v62  ;;  %v23125_v62 = vld [vmem:[#allocation96_spill] sm:$0xff] }
 0x597   : > { %v2616_v24 = vpop.xlane.xlu0 %2615 }
 0x598   : > { %v2886_v55 = vpop.xlane.xlu1 %2885  ;;  %13853 = vmatpush3.bf16.msra.mxu1 %v3100_v34  ;;  %v2787_v43 = vsel %vm2776_vm7, %v2616_v24, %v23120_v46 }
 0x599   : > { %v3026_v17 = vsel %vm2776_vm7, %v2886_v55, %v18956_v40  ;;  %v2801_v40 = vsel %vm2776_vm7, %v2658_v2, %v18888_v49 }
 0x59a   : > { %v3058_v0 = vmul.f32 0.03125, %v3026_v17 }
 0x59b   : > { %v2895_v23 = vpop.xlane.xlu0 %2894 }
 0x59c   : > { %v2838_v14 = vpop.xlane.xlu1 %2837  ;;  %v3157_v4 = vpack.c.bf16 %v3058_v0, %v3057_v50  ;;  %v3029_v12 = vsel %vm2776_vm7, %v2895_v23, %v23122_v59  ;;  %v16928_v59 = vld [vmem:[#allocation8 + $0x24] ss:$8 sps:$4 sm:$0xff]  }
 0x59d   : > { %v3010_v39 = vsel %vm2776_vm7, %v2838_v14, %v18969_v58  ;;  %v3061_v7 = vmul.f32 0.03125, %v3029_v12  ;;  %v16919_v12 = vld [vmem:[%s23117_s20] ss:$8 sps:$4 sm:$0xff]  }
 0x59e   : > { %v3042_v30 = vmul.f32 0.03125, %v3010_v39  ;;  %13742 = vmatprep.subr.bf16.mxu0 %v3157_v4 }
 0x59f   : > { %v2847_v26 = vpop.xlane.xlu0 %2846 }
 0x5a0   : > { %v3149_v53 = vpack.c.bf16 %v3042_v30, %v3041_v35  ;;  %v2661_v19 = vpop.xlane.xlu1 %2660  ;;  %v3013_v28 = vsel %vm2776_vm7, %v2847_v26, %v23124_v5  ;;  %v23128_v30 = vld [vmem:[#allocation87_spill] sm:$0xff]  ;;  %v16940_v5 = vld [vmem:[#allocation8 + $0x44] ss:$8 sps:$4 sm:$0xff]  }
 0x5a1   : > { %v2802_v29 = vsel %vm2776_vm7, %v2661_v19, %v18979_v41  ;;  %v3059_v41 = vmul.f32 0.03125, %v3027_v44  ;;  %v3045_v34 = vmul.f32 0.03125, %v3013_v28  ;;  %v16933_v28 = vld [vmem:[%s23117_s20 + $0x20] ss:$8 sps:$4 sm:$0xff]  }
 0x5a2   : > { %v3109_v31 = vpack.c.bf16 %v2802_v29, %v2801_v40  ;;  %13743 = vmatpush3.bf16.msra.mxu0 %v3149_v53  ;;  %v23129_v53 = vld [vmem:[#allocation98_spill] sm:$0xff]  ;;  %v23130_v29 = vld [vmem:[#allocation88_spill] sm:$0xff] }
 0x5a3   : > { %v2670_v25 = vpop.xlane.xlu0 %2669 }
 0x5a4   : > { %v2613_v8 = vpop.xlane.xlu1 %2612  ;;  %13854 = vmatprep.subr.bf16.mxu1 %v3109_v31  ;;  %v2805_v0 = vsel %vm2776_vm7, %v2670_v25, %v23126_v21  ;;  %v16922_v25 = vld [vmem:[#allocation8 + $0x14] ss:$8 sps:$4 sm:$0xff]   ;;  %v16956_v21 = vld [vmem:[#allocation8 + $0x60] ss:$8 sps:$4 sm:$0xff]  }
 0x5a5   : > { %v2786_v58 = vsel %vm2776_vm7, %v2613_v8, %v18990_v57 }
 0x5a6   : > { %v3101_v61 = vpack.c.bf16 %v2786_v58, %v2785_v60  ;;  %v23131_v60 = vld [vmem:[#allocation99_spill] sm:$0xff] }
 0x5a7   : > { %v2622_v9 = vpop.xlane.xlu0 %2621 }
 0x5a8   : > { %v2892_v54 = vpop.xlane.xlu1 %2891  ;;  %13855 = vmatpush3.bf16.msra.mxu1 %v3101_v61  ;;  %v2789_v24 = vsel %vm2776_vm7, %v2622_v9, %v23128_v30  ;;  %v16924_v9 = vld [vmem:[%s23117_s20 + $0x14] ss:$8 sps:$4 sm:$0xff]  }
 0x5a9   : > { %v3028_v49 = vsel %vm2776_vm7, %v2892_v54, %v19001_v1  ;;  %v23119_v1 = vld [vmem:[#allocation90_spill] sm:$0xff]  ;;  %v23132_v54 = vld [vmem:[#allocation89_spill] sm:$0xff] }
 0x5aa   : > { %v3060_v10 = vmul.f32 0.03125, %v3028_v49  ;;  %v16960_v30 = vld [vmem:[%s23117_s20 + $0x74] ss:$8 sps:$4 sm:$0xff]  }
 0x5ab   : > { %v2901_v6 = vpop.xlane.xlu0 %2900 }
 0x5ac   : > { %v2844_v52 = vpop.xlane.xlu1 %2843  ;;  %v3158_v2 = vpack.c.bf16 %v3060_v10, %v3059_v41  ;;  %v3031_v31 = vsel %vm2776_vm7, %v2901_v6, %v23130_v29  ;;  %v16950_v6 = vld [vmem:[#allocation8 + $0x50] ss:$8 sps:$4 sm:$0xff]  }
 0x5ad   : > { %v3012_v57 = vsel %vm2776_vm7, %v2844_v52, %v19011_v48  ;;  %v23121_v48 = vld [vmem:[#allocation93_spill] sm:$0xff]  ;;  %v3063_v23 = vmul.f32 0.03125, %v3031_v31  ;;  %v16974_v29 = vld [vmem:[#allocation8 + $0x90] ss:$8 sps:$4 sm:$0xff]  }
 0x5ae   : > { %v3044_v15 = vmul.f32 0.03125, %v3012_v57  ;;  %13744 = vmatprep.subr.bf16.mxu0 %v3158_v2  ;;  %v16976_v31 = vld [vmem:[#allocation8 + $0xa4] ss:$8 sps:$4 sm:$0xff]  }
 0x5af   : > { %v2853_v39 = vpop.xlane.xlu0 %2852 }
 0x5b0   : > { %v3150_v3 = vpack.c.bf16 %v3044_v15, %v3043_v11  ;;  %v2667_v20 = vpop.xlane.xlu1 %2666  ;;  %v3015_v49 = vsel %vm2776_vm7, %v2853_v39, %v23132_v54  ;;  %v16964_v39 = vld [vmem:[#allocation8 + $0x84] ss:$8 sps:$4 sm:$0xff]   ;;  %v16986_v54 = vld [vmem:[#allocation8 + $0xb0] ss:$8 sps:$4 sm:$0xff]  }
 0x5b1   : > { %v2804_v16 = vsel %vm2776_vm7, %v2667_v20, %v23119_v1  ;;  %v3047_v52 = vmul.f32 0.03125, %v3015_v49  ;;  %v16916_v1 = vld [vmem:[#allocation8] ss:$8 sps:$4 sm:$0xff]   ;;  %v16988_v49 = vld [vmem:[#allocation8 + $0xc4] ss:$8 sps:$4 sm:$0xff]  }
 0x5b2   : > { %v3110_v18 = vpack.c.bf16 %v2804_v16, %v2803_v56  ;;  %13745 = vmatpush3.bf16.msra.mxu0 %v3150_v3  ;;  %v23134_v3 = vld [vmem:[#allocation92_spill] sm:$0xff] }
 0x5b3   : > { %v2676_v61 = vpop.xlane.xlu0 %2675 }
 0x5b4   : > { %v2619_v63 = vpop.xlane.xlu1 %2618  ;;  %13856 = vmatprep.subr.bf16.mxu1 %v3110_v18  ;;  %v2807_v20 = vsel %vm2776_vm7, %v2676_v61, %v23134_v3  ;;  %v16975_v61 = vld [vmem:[%s23117_s20 + $0x90] ss:$8 sps:$4 sm:$0xff]   ;;  %v16996_v3 = vld [vmem:[%s23117_s20 + $0xd4] ss:$8 sps:$4 sm:$0xff]  }
 0x5b5   : > { %v2788_v42 = vsel %vm2776_vm7, %v2619_v63, %v23121_v48 }
 0x5b6   : > { %v3102_v51 = vpack.c.bf16 %v2788_v42, %v2787_v43  ;;  %v16926_v42 = vld [vmem:[#allocation8 + $0x10] ss:$8 sps:$4 sm:$0xff]  }
 0x5b7   : > { %v2628_v57 = vpop.xlane.xlu0 %2627 }
 0x5b8   : > { %v2898_v45 = vpop.xlane.xlu1 %2897  ;;  %13857 = vmatpush3.bf16.msra.mxu1 %v3102_v51 }
 0x5b9   : > { %v3030_v22 = vsel %vm2776_vm7, %v2898_v45, %v23123_v13  ;;  %v16932_v45 = vld [vmem:[#allocation8 + $0x20] ss:$8 sps:$4 sm:$0xff]   ;;  %v16934_v13 = vld [vmem:[#allocation8 + $0x34] ss:$8 sps:$4 sm:$0xff]  }
 0x5ba   : > { %v3062_v32 = vmul.f32 0.03125, %v3030_v22  ;;  %v16927_v22 = vld [vmem:[%s23117_s20 + $0x10] ss:$8 sps:$4 sm:$0xff]  }
 0x5bb   : > { %v2724_v63 = vpop.xlane.xlu0 %2723 }
 0x5bc   : > { %v2850_v36 = vpop.xlane.xlu1 %2849  ;;  %v3159_v47 = vpack.c.bf16 %v3062_v32, %v3061_v7  ;;  %v2791_v43 = vsel %vm2776_vm7, %v2628_v57, %v2724_v63  ;;  %v16930_v7 = vld [vmem:[%s23117_s20 + $0x24] ss:$8 sps:$4 sm:$0xff]   ;;  %v16938_v32 = vld [vmem:[#allocation8 + $0x30] ss:$8 sps:$4 sm:$0xff]  }
 0x5bd   : > { %v3014_v33 = vsel %vm2776_vm7, %v2850_v36, %v23125_v62  ;;  %v16936_v36 = vld [vmem:[%s23117_s20 + $0x34] ss:$8 sps:$4 sm:$0xff]   ;;  %v16946_v62 = vld [vmem:[#allocation8 + $0x54] ss:$8 sps:$4 sm:$0xff]   ;;  %v16998_v57 = vld [vmem:[#allocation8 + $0xd0] ss:$8 sps:$4 sm:$0xff]  }
 0x5be   : > { %v3046_v55 = vmul.f32 0.03125, %v3014_v33  ;;  %13746 = vmatprep.subr.bf16.mxu0 %v3159_v47  ;;  %v16944_v47 = vld [vmem:[#allocation8 + $0x40] ss:$8 sps:$4 sm:$0xff]   ;;  %v17010_v63 = vld [vmem:[#allocation8 + $0xf0] ss:$8 sps:$4 sm:$0xff]  }
 0x5bf   : > { %v16939_v33 = vld [vmem:[%s23117_s20 + $0x30] ss:$8 sps:$4 sm:$0xff]  }
 0x5c0   : > { %v3151_v17 = vpack.c.bf16 %v3046_v55, %v3045_v34  ;;  %v2673_v50 = vpop.xlane.xlu1 %2672  ;;  %v16942_v34 = vld [vmem:[%s23117_s20 + $0x44] ss:$8 sps:$4 sm:$0xff]   ;;  %v16952_v55 = vld [vmem:[#allocation8 + $0x64] ss:$8 sps:$4 sm:$0xff]  }
 0x5c1   : > { %v2806_v14 = vsel %vm2776_vm7, %v2673_v50, %v23127_v37  ;;  %v16948_v50 = vld [vmem:[%s23117_s20 + $0x54] ss:$8 sps:$4 sm:$0xff]   ;;  %v16951_v37 = vld [vmem:[%s23117_s20 + $0x50] ss:$8 sps:$4 sm:$0xff]  }
 0x5c2   : > { %v3111_v4 = vpack.c.bf16 %v2806_v14, %v2805_v0  ;;  %13747 = vmatpush3.bf16.msra.mxu0 %v3151_v17  ;;  %v16945_v17 = vld [vmem:[%s23117_s20 + $0x40] ss:$8 sps:$4 sm:$0xff]   ;;  %v16958_v0 = vld [vmem:[#allocation8 + $0x74] ss:$8 sps:$4 sm:$0xff]  }
 0x5c3   : > { %v16954_v14 = vld [vmem:[%s23117_s20 + $0x64] ss:$8 sps:$4 sm:$0xff]  }
 0x5c4   : > { %v2625_v35 = vpop.xlane.xlu1 %2624  ;;  %13858 = vmatprep.subr.bf16.mxu1 %v3111_v4  ;;  %v16962_v4 = vld [vmem:[#allocation8 + $0x70] ss:$8 sps:$4 sm:$0xff]  }
 0x5c5   : > { %v2790_v19 = vsel %vm2776_vm7, %v2625_v35, %v23129_v53  ;;  %v16957_v35 = vld [vmem:[%s23117_s20 + $0x60] ss:$8 sps:$4 sm:$0xff]   ;;  %v16970_v53 = vld [vmem:[#allocation8 + $0x94] ss:$8 sps:$4 sm:$0xff]  }
 0x5c6   : > { %v3103_v40 = vpack.c.bf16 %v2790_v19, %v2789_v24  ;;  %v16968_v24 = vld [vmem:[#allocation8 + $0x80] ss:$8 sps:$4 sm:$0xff]  }
 0x5c7   : > { %v16963_v19 = vld [vmem:[%s23117_s20 + $0x70] ss:$8 sps:$4 sm:$0xff]  }
 0x5c8   : > { %v2904_v8 = vpop.xlane.xlu1 %2903  ;;  %13859 = vmatpush3.bf16.msra.mxu1 %v3103_v40  ;;  %v16966_v40 = vld [vmem:[%s23117_s20 + $0x84] ss:$8 sps:$4 sm:$0xff]  }
 0x5c9   : > { %v3032_v58 = vsel %vm2776_vm7, %v2904_v8, %v23131_v60  ;;  %v16969_v8 = vld [vmem:[%s23117_s20 + $0x80] ss:$8 sps:$4 sm:$0xff]   ;;  %v16972_v60 = vld [vmem:[%s23117_s20 + $0x94] ss:$8 sps:$4 sm:$0xff]  }
 0x5ca   : > { %v3064_v44 = vmul.f32 0.03125, %v3032_v58  ;;  %v16980_v58 = vld [vmem:[#allocation8 + $0xa0] ss:$8 sps:$4 sm:$0xff]  }
 0x5cc   : > { %v2856_v41 = vpop.xlane.xlu1 %2855  ;;  %v3160_v10 = vpack.c.bf16 %v3064_v44, %v3063_v23  ;;  %v16982_v23 = vld [vmem:[#allocation8 + $0xb4] ss:$8 sps:$4 sm:$0xff]  }
 0x5cd   : > { %v3016_v26 = vsel %vm2776_vm7, %v2856_v41, %v23133_v27  ;;  %v16978_v44 = vld [vmem:[%s23117_s20 + $0xa4] ss:$8 sps:$4 sm:$0xff]   ;;  %v16981_v41 = vld [vmem:[%s23117_s20 + $0xa0] ss:$8 sps:$4 sm:$0xff]   ;;  %v16992_v27 = vld [vmem:[#allocation8 + $0xc0] ss:$8 sps:$4 sm:$0xff]  }
 0x5ce   : > { %v3048_v2 = vmul.f32 0.03125, %v3016_v26  ;;  %13748 = vmatprep.subr.bf16.mxu0 %v3160_v10  ;;  %v16984_v10 = vld [vmem:[%s23117_s20 + $0xb4] ss:$8 sps:$4 sm:$0xff]   ;;  %v16994_v26 = vld [vmem:[#allocation8 + $0xd4] ss:$8 sps:$4 sm:$0xff]  }
 0x5d0   : > { %v3152_v11 = vpack.c.bf16 %v3048_v2, %v3047_v52  ;;  %v2679_v15 = vpop.xlane.xlu1 %2678  ;;  %v16987_v52 = vld [vmem:[%s23117_s20 + $0xb0] ss:$8 sps:$4 sm:$0xff]   ;;  %v16990_v2 = vld [vmem:[%s23117_s20 + $0xc4] ss:$8 sps:$4 sm:$0xff]  }
 0x5d1   : > { %v2808_v56 = vsel %vm2776_vm7, %v2679_v15, %v23135_v38  ;;  %v16993_v15 = vld [vmem:[%s23117_s20 + $0xc0] ss:$8 sps:$4 sm:$0xff]   ;;  %v16999_v38 = vld [vmem:[%s23117_s20 + $0xd0] ss:$8 sps:$4 sm:$0xff]  }
 0x5d2   : > { %v3112_v16 = vpack.c.bf16 %v2808_v56, %v2807_v20  ;;  %13749 = vmatpush3.bf16.msra.mxu0 %v3152_v11  ;;  %v17000_v11 = vld [vmem:[#allocation8 + $0xe4] ss:$8 sps:$4 sm:$0xff]   ;;  %v17004_v20 = vld [vmem:[#allocation8 + $0xe0] ss:$8 sps:$4 sm:$0xff]   ;;  %v17002_v56 = vld [vmem:[%s23117_s20 + $0xe4] ss:$8 sps:$4 sm:$0xff]  }
 0x5d4   : > { %v2631_v18 = vpop.xlane.xlu1 %2630  ;;  %13860 = vmatprep.subr.bf16.mxu1 %v3112_v16  ;;  %v17318_v16 = vmov 0  }
 0x5d5   : > { %3354 = vmatmul.mubr.bf16.vlgmr.msra.gmra.mrb[36].mxu0 %v16916_v1  ;;  %v17005_v1 = vld [vmem:[%s23117_s20 + $0xe0] ss:$8 sps:$4 sm:$0xff]   ;;  %16867 = vset.pattern.permute.xlu0 %v17318_v16 }
 0x5d6   : > { %3361 = vmatprep.mubr.bf16.mxu0 %v16922_v25  ;;  %16869 = vset.pattern.permute.xlu1 %v17318_v16  ;;  %v17006_v25 = vld [vmem:[#allocation8 + $0xf4] ss:$8 sps:$4 sm:$0xff]  }
 0x5d8   : > { %v2727_v46 = vpop.xlane.xlu1 %2726 }
 0x5d9   : > { %v2792_v48 = vsel %vm2776_vm7, %v2631_v18, %v2727_v46  ;;  %v17008_v18 = vld [vmem:[%s23117_s20 + $0xf4] ss:$8 sps:$4 sm:$0xff]   ;;  %v17011_v46 = vld [vmem:[%s23117_s20 + $0xf0] ss:$8 sps:$4 sm:$0xff]  }
 0x5da   : > { %v3104_v51 = vpack.c.bf16 %v2792_v48, %v2791_v43 }
 0x5dc   : > { %13861 = vmatpush3.bf16.msra.mxu1 %v3104_v51 }
 0x5dd   : > { %3362 = vmatmul.mubr.bf16.gmra.mrb[40].mxu0 %v16926_v42 }
 0x5de   : > { %3369 = vmatprep.mubr.bf16.mxu0 %v16928_v59 }
 0x5df   : > { %3675 = vmatmul.mubr.bf16.vlgmr.msra.gmra.mrb[36].mxu1 %v16919_v12 }
 0x5e0   : > { %3682 = vmatprep.mubr.bf16.mxu1 %v16924_v9 }
 0x5e5   : > { %3370 = vmatmul.mubr.bf16.gmra.mrb[44].mxu0 %v16932_v45 }
 0x5e6   : > { %3377 = vmatprep.mubr.bf16.mxu0 %v16934_v13 }
 0x5e7   : > { %3683 = vmatmul.mubr.bf16.gmra.mrb[40].mxu1 %v16927_v22 }
 0x5e8   : > { %3690 = vmatprep.mubr.bf16.mxu1 %v16930_v7 }
 0x5ed   : > { %3378 = vmatmul.mubr.bf16.gmra.mrb[48].mxu0 %v16938_v32 }
 0x5ee   : > { %3385 = vmatprep.mubr.bf16.mxu0 %v16940_v5 }
 0x5ef   : > { %3691 = vmatmul.mubr.bf16.gmra.mrb[44].mxu1 %v16933_v28 }
 0x5f0   : > { %3698 = vmatprep.mubr.bf16.mxu1 %v16936_v36 }
 0x5f5   : > { %3386 = vmatmul.mubr.bf16.gmra.mrb[52].mxu0 %v16944_v47 }
 0x5f6   : > { %3393 = vmatprep.mubr.bf16.mxu0 %v16946_v62 }
 0x5f7   : > { %3699 = vmatmul.mubr.bf16.gmra.mrb[48].mxu1 %v16939_v33 }
 0x5f8   : > { %3706 = vmatprep.mubr.bf16.mxu1 %v16942_v34 }
 0x5fd   : > { %3394 = vmatmul.mubr.bf16.gmra.mrb[56].mxu0 %v16950_v6 }
 0x5fe   : > { %3401 = vmatprep.mubr.bf16.mxu0 %v16952_v55 }
 0x5ff   : > { %3707 = vmatmul.mubr.bf16.gmra.mrb[52].mxu1 %v16945_v17 }
 0x600   : > { %3714 = vmatprep.mubr.bf16.mxu1 %v16948_v50 }
 0x605   : > { %3402 = vmatmul.mubr.bf16.gmra.mrb[60].mxu0 %v16956_v21 }
 0x606   : > { %3409 = vmatprep.mubr.bf16.mxu0 %v16958_v0 }
 0x607   : > { %3715 = vmatmul.mubr.bf16.gmra.mrb[56].mxu1 %v16951_v37 }
 0x608   : > { %3722 = vmatprep.mubr.bf16.mxu1 %v16954_v14 }
 0x60d   : > { %3410 = vmatmul.mubr.bf16.gmra.mrb[64].mxu0 %v16962_v4 }
 0x60e   : > { %3417 = vmatprep.mubr.bf16.mxu0 %v16964_v39 }
 0x60f   : > { %3723 = vmatmul.mubr.bf16.gmra.mrb[60].mxu1 %v16957_v35 }
 0x610   : > { %3730 = vmatprep.mubr.bf16.mxu1 %v16960_v30 }
 0x615   : > { %3418 = vmatmul.mubr.bf16.gmra.mrb[68].mxu0 %v16968_v24 }
 0x616   : > { %3425 = vmatprep.mubr.bf16.mxu0 %v16970_v53 }
 0x617   : > { %3731 = vmatmul.mubr.bf16.gmra.mrb[64].mxu1 %v16963_v19 }
 0x618   : > { %3738 = vmatprep.mubr.bf16.mxu1 %v16966_v40 }
 0x61d   : > { %3426 = vmatmul.mubr.bf16.gmra.mrb[72].mxu0 %v16974_v29 }
 0x61e   : > { %3433 = vmatprep.mubr.bf16.mxu0 %v16976_v31 }
 0x61f   : > { %3739 = vmatmul.mubr.bf16.gmra.mrb[68].mxu1 %v16969_v8 }
 0x620   : > { %3746 = vmatprep.mubr.bf16.mxu1 %v16972_v60 }
 0x625   : > { %3434 = vmatmul.mubr.bf16.gmra.mrb[76].mxu0 %v16980_v58 }
 0x626   : > { %3441 = vmatprep.mubr.bf16.mxu0 %v16982_v23 }
 0x627   : > { %3747 = vmatmul.mubr.bf16.gmra.mrb[72].mxu1 %v16975_v61 }
 0x628   : > { %3754 = vmatprep.mubr.bf16.mxu1 %v16978_v44 }
 0x62d   : > { %3442 = vmatmul.mubr.bf16.gmra.mrb[80].mxu0 %v16986_v54 }
 0x62e   : > { %3449 = vmatprep.mubr.bf16.mxu0 %v16988_v49 }
 0x62f   : > { %3755 = vmatmul.mubr.bf16.gmra.mrb[76].mxu1 %v16981_v41 }
 0x630   : > { %3762 = vmatprep.mubr.bf16.mxu1 %v16984_v10 }
 0x635   : > { %3450 = vmatmul.mubr.bf16.gmra.mrb[84].mxu0 %v16992_v27 }
 0x636   : > { %3457 = vmatprep.mubr.bf16.mxu0 %v16994_v26 }
 0x637   : > { %3763 = vmatmul.mubr.bf16.gmra.mrb[80].mxu1 %v16987_v52 }
 0x638   : > { %3770 = vmatprep.mubr.bf16.mxu1 %v16990_v2 }
 0x63d   : > { %3458 = vmatmul.mubr.bf16.gmra.mrb[88].mxu0 %v16998_v57 }
 0x63e   : > { %3465 = vmatprep.mubr.bf16.mxu0 %v17000_v11 }
 0x63f   : > { %3771 = vmatmul.mubr.bf16.gmra.mrb[84].mxu1 %v16993_v15 }
 0x640   : > { %3778 = vmatprep.mubr.bf16.mxu1 %v16996_v3 }
 0x645   : > { %3466 = vmatmul.mubr.bf16.gmra.mrb[92].mxu0 %v17004_v20 }
 0x646   : > { %3473 = vmatprep.mubr.bf16.mxu0 %v17006_v25 }
 0x647   : > { %3779 = vmatmul.mubr.bf16.gmra.mrb[88].mxu1 %v16999_v38 }
 0x648   : > { %3786 = vmatprep.mubr.bf16.mxu1 %v17002_v56 }
 0x64d   : > { %3474 = vmatmul.mubr.bf16.gmra.mrb[96].mxu0 %v17010_v63 }
 0x64f   : > { %3787 = vmatmul.mubr.bf16.gmra.mrb[92].mxu1 %v17005_v1 }
 0x650   : > { %3794 = vmatprep.mubr.bf16.mxu1 %v17008_v18 }
 0x657   : > { %3795 = vmatmul.mubr.bf16.gmra.mrb[96].mxu1 %v17011_v46 }
 0x6a8   : > { %v13750_v43 = vpop.f32.mrb[36].mxu0 }
 0x6a9   : > { %v13751_v48 = vpop.f32.mrb[37].mxu0 }
 0x6aa   : > { %v13752_v42 = vadd.f32 %v13751_v48, %v13750_v43  ;;  %v13753_v51 = vpop.f32.mrb[38].mxu0 }
 0x6ab   : > { %v13754_v59 = vpop.f32.mrb[39].mxu0 }
 0x6ac   : > { %v13755_v12 = vadd.f32 %v13754_v59, %v13753_v51 }
 0x6b0   : > { %v13756_v9 = vpop.f32.mrb[40].mxu0 }
 0x6b1   : > { %v13757_v45 = vpop.f32.mrb[41].mxu0 }
 0x6b2   : > { %v13862_v13 = vpop.f32.mrb[36].mxu1  ;;  %v13758_v22 = vadd.f32 %v13757_v45, %v13756_v9  ;;  %v13759_v7 = vpop.f32.mrb[42].mxu0 }
 0x6b3   : > { %v13863_v32 = vpop.f32.mrb[37].mxu1  ;;  %v13760_v5 = vpop.f32.mrb[43].mxu0 }
 0x6b4   : > { %v13864_v28 = vadd.f32 %v13863_v32, %v13862_v13  ;;  %v13865_v36 = vpop.f32.mrb[38].mxu1  ;;  %v13761_v47 = vadd.f32 %v13760_v5, %v13759_v7 }
 0x6b5   : > { %v13866_v62 = vpop.f32.mrb[39].mxu1 }
 0x6b6   : > { %v3677_v33 = vadd.f32 %v13864_v28, %v13752_v42  ;;  %v13867_v34 = vadd.f32 %v13866_v62, %v13865_v36 }
 0x6b8   : > { %v3803_v6 = vsub.f32 0.0, %v3677_v33  ;;  %v3680_v55 = vadd.f32 %v13867_v34, %v13755_v12  ;;  %v13762_v17 = vpop.f32.mrb[44].mxu0 }
 0x6b9   : > { %v13763_v50 = vpop.f32.mrb[45].mxu0 }
 0x6ba   : > { %v3835_v21 = vmul.f32 1.442695, %v3803_v6  ;;  %v3804_v0 = vsub.f32 0.0, %v3680_v55  ;;  %v13868_v37 = vpop.f32.mrb[40].mxu1  ;;  %v13764_v14 = vadd.f32 %v13763_v50, %v13762_v17  ;;  %v13765_v4 = vpop.f32.mrb[46].mxu0 }
 0x6bb   : > { %v13869_v39 = vpop.f32.mrb[41].mxu1  ;;  %v13766_v35 = vpop.f32.mrb[47].mxu0 }
 0x6bc   : > { %17016 = vpow2.f32 %v3835_v21  ;;  %v3837_v30 = vmul.f32 1.442695, %v3804_v0  ;;  %v13870_v24 = vadd.f32 %v13869_v39, %v13868_v37  ;;  %v13871_v53 = vpop.f32.mrb[42].mxu1  ;;  %v13767_v19 = vadd.f32 %v13766_v35, %v13765_v4 }
 0x6bd   : > { %v13872_v40 = vpop.f32.mrb[43].mxu1 }
 0x6be   : > { %17018 = vpow2.f32 %v3837_v30  ;;  %v3685_v29 = vadd.f32 %v13870_v24, %v13758_v22  ;;  %v13873_v31 = vadd.f32 %v13872_v40, %v13871_v53 }
 0x6c0   : > { %v3805_v8 = vsub.f32 0.0, %v3685_v29  ;;  %v3688_v60 = vadd.f32 %v13873_v31, %v13761_v47  ;;  %v13768_v58 = vpop.f32.mrb[48].mxu0 }
 0x6c1   : > { %v13769_v23 = vpop.f32.mrb[49].mxu0 }
 0x6c2   : > { %v3839_v61 = vmul.f32 1.442695, %v3805_v8  ;;  %v3806_v44 = vsub.f32 0.0, %v3688_v60  ;;  %v13874_v54 = vpop.f32.mrb[44].mxu1  ;;  %v13770_v49 = vadd.f32 %v13769_v23, %v13768_v58  ;;  %v13771_v41 = vpop.f32.mrb[50].mxu0  ;;  %v17319_v23 = vmov 1  }
 0x6c3   : > { %v13875_v10 = vpop.f32.mrb[45].mxu1  ;;  %v13772_v27 = vpop.f32.mrb[51].mxu0 }
 0x6c4   : > { %17020 = vpow2.f32 %v3839_v61  ;;  %v3841_v26 = vmul.f32 1.442695, %v3806_v44  ;;  %v13876_v52 = vadd.f32 %v13875_v10, %v13874_v54  ;;  %v13877_v2 = vpop.f32.mrb[46].mxu1  ;;  %v13773_v57 = vadd.f32 %v13772_v27, %v13771_v41 }
 0x6c5   : > { %v13878_v11 = vpop.f32.mrb[47].mxu1 }
 0x6c6   : > { %v17017_v15 = vpop.eup %17016  ;;  %v3693_v3 = vadd.f32 %v13876_v52, %v13764_v14  ;;  %v13879_v20 = vadd.f32 %v13878_v11, %v13877_v2  ;;  %17022 = vpow2.f32 %v3841_v26 }
 0x6c7   : > { %v3899_v38 = vadd.f32 1.0, %v17017_v15 }
 0x6c8   : > { %v17019_v56 = vpop.eup %17018  ;;  %v3807_v1 = vsub.f32 0.0, %v3693_v3  ;;  %v3696_v25 = vadd.f32 %v13879_v20, %v13767_v19  ;;  %v13774_v18 = vpop.f32.mrb[52].mxu0 }
 0x6c9   : > { %17024 = vrcp.f32 %v3899_v38  ;;  %v3900_v63 = vadd.f32 1.0, %v17019_v56  ;;  %v13775_v46 = vpop.f32.mrb[53].mxu0 }
 0x6ca   : > { %v3843_v43 = vmul.f32 1.442695, %v3807_v1  ;;  %v13880_v48 = vpop.f32.mrb[48].mxu1  ;;  %v13776_v42 = vadd.f32 %v13775_v46, %v13774_v18  ;;  %v13777_v51 = vpop.f32.mrb[54].mxu0  ;;  %v3808_v32 = vsub.f32 0.0, %v3696_v25 }
 0x6cb   : > { %17026 = vrcp.f32 %v3900_v63  ;;  %v13881_v59 = vpop.f32.mrb[49].mxu1  ;;  %v13778_v12 = vpop.f32.mrb[55].mxu0 }
 0x6cc   : > { %17028 = vpow2.f32 %v3843_v43  ;;  %v13882_v9 = vadd.f32 %v13881_v59, %v13880_v48  ;;  %v13883_v45 = vpop.f32.mrb[50].mxu1  ;;  %v13779_v13 = vadd.f32 %v13778_v12, %v13777_v51  ;;  %v3845_v55 = vmul.f32 1.442695, %v3808_v32 }
 0x6cd   : > { %v13884_v22 = vpop.f32.mrb[51].mxu1 }
 0x6ce   : > { %v17021_v7 = vpop.eup %17020  ;;  %v3701_v5 = vadd.f32 %v13882_v9, %v13770_v49  ;;  %v13885_v28 = vadd.f32 %v13884_v22, %v13883_v45 }
 0x6cf   : > { %v3901_v36 = vadd.f32 1.0, %v17021_v7 }
 0x6d0   : > { %v3809_v47 = vsub.f32 0.0, %v3701_v5  ;;  %v3704_v62 = vadd.f32 %v13885_v28, %v13773_v57  ;;  %v13780_v33 = vpop.f32.mrb[56].mxu0  ;;  %v17023_v34 = vpop.eup %17022 }
 0x6d1   : > { %17030 = vrcp.f32 %v3901_v36  ;;  %v13781_v6 = vpop.f32.mrb[57].mxu0  ;;  %v3902_v39 = vadd.f32 1.0, %v17023_v34 }
 0x6d2   : > { %v3847_v17 = vmul.f32 1.442695, %v3809_v47  ;;  %v13886_v50 = vpop.f32.mrb[52].mxu1  ;;  %v13782_v21 = vadd.f32 %v13781_v6, %v13780_v33  ;;  %v13783_v0 = vpop.f32.mrb[58].mxu0  ;;  %v3810_v52 = vsub.f32 0.0, %v3704_v62 }
 0x6d3   : > { %v17025_v37 = vpop.eup %17024  ;;  %v13887_v14 = vpop.f32.mrb[53].mxu1 }
 0x6d4   : > { %v13784_v4 = vpop.f32.mrb[59].mxu0  ;;  %17032 = vpow2.f32 %v3847_v17  ;;  %v13888_v35 = vadd.f32 %v13887_v14, %v13886_v50  ;;  %4220 = vperm.xlu0 %16867, %v17025_v37   ;;  %v13889_v30 = vpop.f32.mrb[54].mxu1  ;;  %v3849_v63 = vmul.f32 1.442695, %v3810_v52 }
 0x6d5   : > { %v13785_v24 = vadd.f32 %v13784_v4, %v13783_v0  ;;  %v17027_v53 = vpop.eup %17026  ;;  %v13890_v19 = vpop.f32.mrb[55].mxu1  ;;  %17034 = vpow2.f32 %v3845_v55 }
 0x6d6   : > { %v17029_v40 = vpop.eup %17028  ;;  %v3709_v29 = vadd.f32 %v13888_v35, %v13776_v42  ;;  %4224 = vperm.xlu1 %16869, %v17027_v53   ;;  %v13891_v31 = vadd.f32 %v13890_v19, %v13889_v30  ;;  %17036 = vrcp.f32 %v3902_v39 }
 0x6d7   : > { %v3903_v8 = vadd.f32 1.0, %v17029_v40 }
 0x6d8   : > { %v3811_v60 = vsub.f32 0.0, %v3709_v29  ;;  %v3712_v58 = vadd.f32 %v13891_v31, %v13779_v13  ;;  %16868 = vset.pattern.permute.xlu0 %v17319_v23  ;;  %v13786_v61 = vpop.f32.mrb[60].mxu0 }
 0x6d9   : > { %17038 = vrcp.f32 %v3903_v8  ;;  %3965 = vperm.xlu0 %16868, %v17025_v37   ;;  %v13787_v44 = vpop.f32.mrb[61].mxu0 }
 0x6da   : > { %v3851_v54 = vmul.f32 1.442695, %v3811_v60  ;;  %v3812_v49 = vsub.f32 0.0, %v3712_v58  ;;  %16870 = vset.pattern.permute.xlu1 %v17319_v23  ;;  %v13892_v41 = vpop.f32.mrb[56].mxu1  ;;  %v13788_v10 = vadd.f32 %v13787_v44, %v13786_v61  ;;  %v13789_v27 = vpop.f32.mrb[62].mxu0 }
 0x6db   : > { %v17031_v26 = vpop.eup %17030  ;;  %3970 = vperm.xlu1 %16870, %v17027_v53   ;;  %v13893_v2 = vpop.f32.mrb[57].mxu1 }
 0x6dc   : > { %v13790_v57 = vpop.f32.mrb[63].mxu0  ;;  %17040 = vpow2.f32 %v3851_v54  ;;  %v3853_v11 = vmul.f32 1.442695, %v3812_v49  ;;  %v13894_v15 = vadd.f32 %v13893_v2, %v13892_v41  ;;  %v13895_v3 = vpop.f32.mrb[58].mxu1 }
 0x6dd   : > { %v13791_v20 = vadd.f32 %v13790_v57, %v13789_v27  ;;  %3975 = vperm.xlu0 %16868, %v17031_v26   ;;  %v13896_v38 = vpop.f32.mrb[59].mxu1 }
 0x6de   : > { %v17033_v56 = vpop.eup %17032  ;;  %17042 = vpow2.f32 %v3853_v11  ;;  %v3717_v1 = vadd.f32 %v13894_v15, %v13782_v21  ;;  %v13897_v25 = vadd.f32 %v13896_v38, %v13895_v3 }
 0x6df   : > { %v3905_v18 = vadd.f32 1.0, %v17033_v56  ;;  %16871 = vset.pattern.permute.xlu1 %v17318_v16  ;;  %v17035_v46 = vpop.eup %17034 }
 0x6e0   : > { %v3813_v43 = vsub.f32 0.0, %v3717_v1  ;;  %4228 = vperm.xlu1 %16871, %v17031_v26   ;;  %v3720_v48 = vadd.f32 %v13897_v25, %v13785_v24  ;;  %v13792_v42 = vpop.f32.mrb[64].mxu0  ;;  %v17037_v59 = vpop.eup %17036  ;;  %v3904_v32 = vadd.f32 1.0, %v17035_v46 }
 0x6e1   : > { %17044 = vrcp.f32 %v3905_v18  ;;  %v13793_v51 = vpop.f32.mrb[65].mxu0 }
 0x6e2   : > { %v3855_v12 = vmul.f32 1.442695, %v3813_v43  ;;  %v3814_v9 = vsub.f32 0.0, %v3720_v48  ;;  %v13898_v45 = vpop.f32.mrb[60].mxu1  ;;  %v13794_v13 = vadd.f32 %v13793_v51, %v13792_v42  ;;  %v13795_v22 = vpop.f32.mrb[66].mxu0  ;;  %17046 = vpow2.f32 %v3849_v63 }
 0x6e3   : > { %v17039_v7 = vpop.eup %17038  ;;  %v13899_v5 = vpop.f32.mrb[61].mxu1 }
 0x6e4   : > { %v13796_v28 = vpop.f32.mrb[67].mxu0  ;;  %17048 = vpow2.f32 %v3855_v12  ;;  %v3857_v36 = vmul.f32 1.442695, %v3814_v9  ;;  %4232 = vperm.xlu1 %16871, %v17037_v59   ;;  %3985 = vperm.xlu0 %16868, %v17039_v7   ;;  %v13900_v47 = vadd.f32 %v13899_v5, %v13898_v45  ;;  %v13901_v62 = vpop.f32.mrb[62].mxu1 }
 0x6e5   : > { %v13797_v33 = vadd.f32 %v13796_v28, %v13795_v22  ;;  %v13902_v34 = vpop.f32.mrb[63].mxu1 }
 0x6e6   : > { %v17041_v6 = vpop.eup %17040  ;;  %17050 = vpow2.f32 %v3857_v36  ;;  %v3725_v55 = vadd.f32 %v13900_v47, %v13788_v10  ;;  %v13903_v17 = vadd.f32 %v13902_v34, %v13901_v62 }
 0x6e7   : > { %17052 = vrcp.f32 %v3904_v32  ;;  %v3907_v50 = vadd.f32 1.0, %v17041_v6 }
 0x6e8   : > { %v17043_v21 = vpop.eup %17042  ;;  %v3815_v0 = vsub.f32 0.0, %v3725_v55  ;;  %16872 = vset.pattern.permute.xlu1 %v17319_v23  ;;  %v3728_v37 = vadd.f32 %v13903_v17, %v13791_v20  ;;  %v13798_v14 = vpop.f32.mrb[68].mxu0 }
 0x6e9   : > { %17054 = vrcp.f32 %v3907_v50  ;;  %v3908_v4 = vadd.f32 1.0, %v17043_v21  ;;  %3980 = vperm.xlu1 %16872, %v17037_v59   ;;  %v13799_v39 = vpop.f32.mrb[69].mxu0 }
 0x6ea   : > { %v3859_v35 = vmul.f32 1.442695, %v3815_v0  ;;  %v3816_v30 = vsub.f32 0.0, %v3728_v37  ;;  %v13904_v24 = vpop.f32.mrb[64].mxu1  ;;  %v13800_v53 = vadd.f32 %v13799_v39, %v13798_v14  ;;  %v13801_v19 = vpop.f32.mrb[70].mxu0 }
 0x6eb   : > { %v19285_v40 = vpop.eup %17044  ;;  %17056 = vrcp.f32 %v3908_v4  ;;  %v13905_v29 = vpop.f32.mrb[65].mxu1 }
 0x6ec   : > { %v13802_v31 = vpop.f32.mrb[71].mxu0  ;;  %17058 = vpow2.f32 %v3859_v35  ;;  %v3861_v8 = vmul.f32 1.442695, %v3816_v30  ;;  %3995 = vperm.xlu0 %16868, %v19285_v40   ;;  %v13906_v60 = vadd.f32 %v13905_v29, %v13904_v24  ;;  %v13907_v58 = vpop.f32.mrb[66].mxu1 }
 0x6ed   : > { %v13803_v61 = vadd.f32 %v13802_v31, %v13801_v19  ;;  %v17047_v44 = vpop.eup %17046  ;;  %16873 = vset.pattern.permute.xlu1 %v17318_v16  ;;  %v13908_v54 = vpop.f32.mrb[67].mxu1 }
 0x6ee   : > { %v17049_v49 = vpop.eup %17048  ;;  %4236 = vperm.xlu1 %16873, %v17039_v7   ;;  %v3733_v41 = vadd.f32 %v13906_v60, %v13794_v13  ;;  %v13909_v10 = vadd.f32 %v13908_v54, %v13907_v58  ;;  %17060 = vpow2.f32 %v3861_v8  ;;  %v3906_v15 = vadd.f32 1.0, %v17047_v44 }
 0x6ef   : > { %v3909_v27 = vadd.f32 1.0, %v17049_v49 }
 0x6f0   : > { %v17051_v26 = vpop.eup %17050  ;;  %v3817_v52 = vsub.f32 0.0, %v3733_v41  ;;  %v3736_v2 = vadd.f32 %v13909_v10, %v13797_v33  ;;  %v13804_v57 = vpop.f32.mrb[72].mxu0 }
 0x6f1   : > { %v17053_v11 = vpop.eup %17052  ;;  %17062 = vrcp.f32 %v3909_v27  ;;  %v13805_v3 = vpop.f32.mrb[73].mxu0  ;;  %v3910_v20 = vadd.f32 1.0, %v17051_v26 }
 0x6f2   : > { %v3863_v38 = vmul.f32 1.442695, %v3817_v52  ;;  %4240 = vperm.xlu1 %16873, %v17053_v11   ;;  %v3818_v56 = vsub.f32 0.0, %v3736_v2  ;;  %v13910_v1 = vpop.f32.mrb[68].mxu1  ;;  %v13806_v25 = vadd.f32 %v13805_v3, %v13804_v57  ;;  %v13807_v18 = vpop.f32.mrb[74].mxu0 }
 0x6f3   : > { %v19289_v63 = vpop.eup %17054  ;;  %v13911_v46 = vpop.f32.mrb[69].mxu1 }
 0x6f4   : > { %v13808_v43 = vpop.f32.mrb[75].mxu0  ;;  %17064 = vpow2.f32 %v3863_v38  ;;  %4005 = vperm.xlu0 %16868, %v19289_v63   ;;  %v13912_v48 = vadd.f32 %v13911_v46, %v13910_v1  ;;  %v13913_v42 = vpop.f32.mrb[70].mxu1  ;;  %v3865_v12 = vmul.f32 1.442695, %v3818_v56 }
 0x6f5   : > { %v13809_v51 = vadd.f32 %v13808_v43, %v13807_v18  ;;  %v19292_v59 = vpop.eup %17056  ;;  %17066 = vrcp.f32 %v3906_v15  ;;  %v13914_v9 = vpop.f32.mrb[71].mxu1 }
 0x6f6   : > { %v17059_v45 = vpop.eup %17058  ;;  %17068 = vrcp.f32 %v3910_v20  ;;  %16874 = vset.pattern.permute.xlu1 %v17319_v23  ;;  %v3741_v13 = vadd.f32 %v13912_v48, %v13800_v53  ;;  %v13915_v22 = vadd.f32 %v13914_v9, %v13913_v42 }
 0x6f7   : > { %v3911_v7 = vadd.f32 1.0, %v17059_v45  ;;  %3990 = vperm.xlu1 %16874, %v17053_v11   ;;  %17070 = vpow2.f32 %v3865_v12 }
 0x6f8   : > { %16878 = vset.pattern.permute.xlu0 %v17318_v16  ;;  %v3819_v32 = vsub.f32 0.0, %v3741_v13  ;;  %v3744_v5 = vadd.f32 %v13915_v22, %v13803_v61  ;;  %v13810_v28 = vpop.f32.mrb[76].mxu0  ;;  %v17061_v36 = vpop.eup %17060 }
 0x6f9   : > { %4256 = vperm.xlu0 %16878, %v19292_v59   ;;  %v13811_v47 = vpop.f32.mrb[77].mxu0  ;;  %17072 = vrcp.f32 %v3911_v7  ;;  %v3912_v0 = vadd.f32 1.0, %v17061_v36 }
 0x6fa   : > { %v3867_v62 = vmul.f32 1.442695, %v3819_v32  ;;  %v13916_v33 = vpop.f32.mrb[72].mxu1  ;;  %v13812_v34 = vadd.f32 %v13811_v47, %v13810_v28  ;;  %v13813_v6 = vpop.f32.mrb[78].mxu0  ;;  %v3820_v17 = vsub.f32 0.0, %v3744_v5 }
 0x6fb   : > { %v19297_v55 = vpop.eup %17062  ;;  %16875 = vset.pattern.permute.xlu1 %v17318_v16  ;;  %v13917_v50 = vpop.f32.mrb[73].mxu1 }
 0x6fc   : > { %v13814_v21 = vpop.f32.mrb[79].mxu0  ;;  %4244 = vperm.xlu1 %16875, %v19285_v40   ;;  %v13918_v37 = vadd.f32 %v13917_v50, %v13916_v33  ;;  %v13919_v14 = vpop.f32.mrb[74].mxu1  ;;  %17074 = vpow2.f32 %v3867_v62  ;;  %v3869_v19 = vmul.f32 1.442695, %v3820_v17 }
 0x6fd   : > { %v13815_v4 = vadd.f32 %v13814_v21, %v13813_v6  ;;  %16881 = vset.pattern.permute.xlu0 %v17319_v23  ;;  %v13920_v39 = vpop.f32.mrb[75].mxu1  ;;  %17076 = vrcp.f32 %v3912_v0 }
 0x6fe   : > { %v17065_v35 = vpop.eup %17064  ;;  %4015 = vperm.xlu0 %16881, %v19297_v55   ;;  %v3749_v30 = vadd.f32 %v13918_v37, %v13806_v25  ;;  %v13921_v24 = vadd.f32 %v13920_v39, %v13919_v14  ;;  %17078 = vpow2.f32 %v3869_v19 }
 0x6ff   : > { %v17067_v53 = vpop.eup %17066  ;;  %v3913_v60 = vadd.f32 1.0, %v17065_v35 }
 0x700   : > { %v19303_v29 = vpop.eup %17068  ;;  %4248 = vperm.xlu1 %16875, %v17067_v53   ;;  %v3821_v31 = vsub.f32 0.0, %v3749_v30  ;;  %v3752_v40 = vadd.f32 %v13921_v24, %v13809_v51  ;;  %v13816_v8 = vpop.f32.mrb[80].mxu0 }
 0x701   : > { %v13817_v58 = vpop.f32.mrb[81].mxu0  ;;  %v17071_v49 = vpop.eup %17070  ;;  %17080 = vrcp.f32 %v3913_v60 }
 0x702   : > { %16882 = vset.pattern.permute.xlu0 %v17318_v16  ;;  %v13922_v61 = vpop.f32.mrb[76].mxu1  ;;  %v13818_v44 = vadd.f32 %v13817_v58, %v13816_v8  ;;  %v13819_v54 = vpop.f32.mrb[82].mxu0  ;;  %v3871_v27 = vmul.f32 1.442695, %v3821_v31  ;;  %v3822_v11 = vsub.f32 0.0, %v3752_v40  ;;  %v3914_v3 = vadd.f32 1.0, %v17071_v49 }
 0x703   : > { %4264 = vperm.xlu0 %16882, %v19303_v29   ;;  %v13923_v41 = vpop.f32.mrb[77].mxu1  ;;  %v13820_v10 = vpop.f32.mrb[83].mxu0 }
 0x704   : > { %16876 = vset.pattern.permute.xlu1 %v17319_v23  ;;  %v13924_v26 = vadd.f32 %v13923_v41, %v13922_v61  ;;  %v13925_v52 = vpop.f32.mrb[78].mxu1  ;;  %v13821_v2 = vadd.f32 %v13820_v10, %v13819_v54  ;;  %v19308_v57 = vpop.eup %17072  ;;  %17082 = vpow2.f32 %v3871_v27  ;;  %v3873_v18 = vmul.f32 1.442695, %v3822_v11 }
 0x705   : > { %4000 = vperm.xlu1 %16876, %v17067_v53   ;;  %v13926_v15 = vpop.f32.mrb[79].mxu1  ;;  %17084 = vrcp.f32 %v3914_v3 }
 0x706   : > { %v3757_v20 = vadd.f32 %v13924_v26, %v13812_v34  ;;  %v13927_v38 = vadd.f32 %v13926_v15, %v13925_v52  ;;  %v17075_v56 = vpop.eup %17074  ;;  %17086 = vpow2.f32 %v3873_v18 }
 0x707   : > { %16885 = vset.pattern.permute.xlu0 %v17319_v23  ;;  %v19313_v43 = vpop.eup %17076  ;;  %v3915_v9 = vadd.f32 1.0, %v17075_v56 }
 0x708   : > { %4025 = vperm.xlu0 %16885, %v19308_v57   ;;  %v3760_v1 = vadd.f32 %v13927_v38, %v13815_v4  ;;  %v13822_v25 = vpop.f32.mrb[84].mxu0  ;;  %v3823_v48 = vsub.f32 0.0, %v3757_v20  ;;  %v17079_v5 = vpop.eup %17078 }
 0x709   : > { %16877 = vset.pattern.permute.xlu1 %v17318_v16  ;;  %v13823_v46 = vpop.f32.mrb[85].mxu0  ;;  %17088 = vrcp.f32 %v3915_v9  ;;  %v3916_v34 = vadd.f32 1.0, %v17079_v5 }
 0x70a   : > { %4252 = vperm.xlu1 %16877, %v19289_v63   ;;  %v13928_v42 = vpop.f32.mrb[80].mxu1  ;;  %v13824_v51 = vadd.f32 %v13823_v46, %v13822_v25  ;;  %v13825_v12 = vpop.f32.mrb[86].mxu0  ;;  %v3875_v63 = vmul.f32 1.442695, %v3823_v48  ;;  %v3824_v33 = vsub.f32 0.0, %v3760_v1 }
 0x70b   : > { %v13929_v45 = vpop.f32.mrb[81].mxu1  ;;  %v13826_v13 = vpop.f32.mrb[87].mxu0 }
 0x70c   : > { %16886 = vset.pattern.permute.xlu0 %v17318_v16  ;;  %v13930_v22 = vadd.f32 %v13929_v45, %v13928_v42  ;;  %v13931_v7 = vpop.f32.mrb[82].mxu1  ;;  %v13827_v32 = vadd.f32 %v13826_v13, %v13825_v12  ;;  %v19319_v62 = vpop.eup %17080  ;;  %17090 = vpow2.f32 %v3875_v63  ;;  %v3877_v4 = vmul.f32 1.442695, %v3824_v33 }
 0x70d   : > { %4272 = vperm.xlu0 %16886, %v19313_v43   ;;  %v13932_v28 = vpop.f32.mrb[83].mxu1  ;;  %17092 = vrcp.f32 %v3916_v34 }
 0x70e   : > { %16879 = vset.pattern.permute.xlu1 %v17319_v23  ;;  %v3765_v36 = vadd.f32 %v13930_v22, %v13818_v44  ;;  %v13933_v47 = vadd.f32 %v13932_v28, %v13931_v7  ;;  %v17083_v21 = vpop.eup %17082  ;;  %17094 = vpow2.f32 %v3877_v4 }
 0x70f   : > { %4010 = vperm.xlu1 %16879, %v19292_v59   ;;  %v19325_v59 = vpop.eup %17084  ;;  %v3917_v31 = vadd.f32 1.0, %v17083_v21 }
 0x710   : > { %v3768_v6 = vadd.f32 %v13933_v47, %v13821_v2  ;;  %v13828_v17 = vpop.f32.mrb[88].mxu0  ;;  %v3825_v30 = vsub.f32 0.0, %v3765_v36  ;;  %v17087_v58 = vpop.eup %17086 }
 0x711   : > { %16889 = vset.pattern.permute.xlu0 %v17319_v23  ;;  %v13829_v50 = vpop.f32.mrb[89].mxu0  ;;  %17096 = vrcp.f32 %v3917_v31  ;;  %v3918_v10 = vadd.f32 1.0, %v17087_v58 }
 0x712   : > { %4035 = vperm.xlu0 %16889, %v19319_v62   ;;  %v13934_v0 = vpop.f32.mrb[84].mxu1  ;;  %v13830_v37 = vadd.f32 %v13829_v50, %v13828_v17  ;;  %v13831_v14 = vpop.f32.mrb[90].mxu0  ;;  %v3879_v61 = vmul.f32 1.442695, %v3825_v30  ;;  %v3826_v49 = vsub.f32 0.0, %v3768_v6 }
 0x713   : > { %16880 = vset.pattern.permute.xlu1 %v17318_v16  ;;  %v13935_v39 = vpop.f32.mrb[85].mxu1  ;;  %v13832_v35 = vpop.f32.mrb[91].mxu0 }
 0x714   : > { %4260 = vperm.xlu1 %16880, %v19297_v55   ;;  %v13936_v24 = vadd.f32 %v13935_v39, %v13934_v0  ;;  %v13937_v53 = vpop.f32.mrb[86].mxu1  ;;  %v13833_v19 = vadd.f32 %v13832_v35, %v13831_v14  ;;  %v19331_v55 = vpop.eup %17088  ;;  %17098 = vpow2.f32 %v3879_v61 }
 0x715   : > { %v13938_v40 = vpop.f32.mrb[87].mxu1  ;;  %17100 = vrcp.f32 %v3918_v10 }
 0x716   : > { %16890 = vset.pattern.permute.xlu0 %v17318_v16  ;;  %v3773_v8 = vadd.f32 %v13936_v24, %v13824_v51  ;;  %v13939_v60 = vadd.f32 %v13938_v40, %v13937_v53  ;;  %v17091_v15 = vpop.eup %17090  ;;  %v12937_v24 = vld [vmem:[%s23136_s23 + $0x40] sm:$0xff]  ;;  %v12938_v53 = vld [vmem:[%s23137_s17 + $0x48] sm:$0xff]  ;;  %s22426_s23 = scalar_lea.hbm %s23925_s12, %s13650_s14 }
 0x717   : > { %4280 = vperm.xlu0 %16890, %v19325_v59   ;;  %v19337_v1 = vpop.eup %17092  ;;  %v3919_v48 = vadd.f32 1.0, %v17091_v15  ;;  %v15994_v31 = vpack.c.bf16 %v12938_v53, %v12937_v24 }
 0x718   : > { %16883 = vset.pattern.permute.xlu1 %v17319_v23  ;;  %v3776_v44 = vadd.f32 %v13939_v60, %v13827_v32  ;;  %v13834_v54 = vpop.f32.mrb[92].mxu0  ;;  %v3827_v25 = vsub.f32 0.0, %v3773_v8  ;;  %v17095_v51 = vpop.eup %17094 }
 0x719   : > { %4020 = vperm.xlu1 %16883, %v19303_v29   ;;  %v13835_v41 = vpop.f32.mrb[93].mxu0  ;;  %v3881_v29 = vmul.f32 1.442695, %v3826_v49  ;;  %v3920_v22 = vadd.f32 1.0, %v17095_v51  ;;  %15995 = vmatprep.subr.bf16.mxu0 %v15994_v31 }
 0x71a   : > { %v13940_v27 = vpop.f32.mrb[88].mxu1  ;;  %v13836_v26 = vadd.f32 %v13835_v41, %v13834_v54  ;;  %v13837_v52 = vpop.f32.mrb[94].mxu0  ;;  %v3883_v12 = vmul.f32 1.442695, %v3827_v25  ;;  %15997 = vmatpush3.bf16.msra.mxu0 %v15994_v31 }
 0x71b   : > { %16893 = vset.pattern.permute.xlu0 %v17319_v23  ;;  %v13941_v2 = vpop.f32.mrb[89].mxu1  ;;  %v13838_v11 = vpop.f32.mrb[95].mxu0  ;;  %17102 = vpow2.f32 %v3881_v29  ;;  %v12940_v29 = vld [vmem:[%s23137_s17 + $0x58] sm:$0xff] }
 0x71c   : > { %4045 = vperm.xlu0 %16893, %v19331_v55   ;;  %v13942_v3 = vadd.f32 %v13941_v2, %v13940_v27  ;;  %v13943_v20 = vpop.f32.mrb[90].mxu1  ;;  %v13839_v38 = vadd.f32 %v13838_v11, %v13837_v52  ;;  %v19343_v45 = vpop.eup %17096  ;;  %17104 = vrcp.f32 %v3919_v48 }
 0x71d   : > { %16884 = vset.pattern.permute.xlu1 %v17318_v16  ;;  %v13944_v56 = vpop.f32.mrb[91].mxu1  ;;  %17106 = vpow2.f32 %v3883_v12 }
 0x71e   : > { %4268 = vperm.xlu1 %16884, %v19308_v57   ;;  %v3781_v18 = vadd.f32 %v13942_v3, %v13830_v37  ;;  %v13945_v46 = vadd.f32 %v13944_v56, %v13943_v20  ;;  %v3828_v57 = vsub.f32 0.0, %v3776_v44  ;;  %v17099_v28 = vpop.eup %17098  ;;  %17108 = vrcp.f32 %v3920_v22  ;;  %v23138_v3 = vld [vmem:[#allocation64_spill] sm:$0xff] }
 0x71f   : > { %v17101_v34 = vpop.eup %17100  ;;  %v3921_v6 = vadd.f32 1.0, %v17099_v28 }
 0x720   : > { %16894 = vset.pattern.permute.xlu0 %v17318_v16  ;;  %v3784_v42 = vadd.f32 %v13945_v46, %v13833_v19  ;;  %v3885_v47 = vmul.f32 1.442695, %v3828_v57  ;;  %v3829_v21 = vsub.f32 0.0, %v3781_v18  ;;  %v13840_v46 = vpop.f32.mrb[96].mxu0 }
 0x721   : > { %4288 = vperm.xlu0 %16894, %v19337_v1  }
 0x722   : > { %16887 = vset.pattern.permute.xlu1 %v17319_v23  ;;  %v13946_v9 = vpop.f32.mrb[92].mxu1  ;;  %v3830_v33 = vsub.f32 0.0, %v3784_v42  ;;  %17110 = vpow2.f32 %v3885_v47  ;;  %v3887_v14 = vmul.f32 1.442695, %v3829_v21  ;;  %v23139_v42 = vld [vmem:[#allocation28_spill] sm:$0xff]  ;;  %v12942_v21 = vld [vmem:[%s23137_s17 + $0x68] sm:$0xff] }
 0x723   : > { %4030 = vperm.xlu1 %16887, %v19313_v43   ;;  %v13947_v13 = vpop.f32.mrb[93].mxu1  ;;  %17112 = vrcp.f32 %v3921_v6 }
 0x724   : > { %v13948_v7 = vadd.f32 %v13947_v13, %v13946_v9  ;;  %v13949_v32 = vpop.f32.mrb[94].mxu1  ;;  %v3889_v50 = vmul.f32 1.442695, %v3830_v33  ;;  %v13841_v9 = vpop.f32.mrb[97].mxu0 }
 0x725   : > { %16897 = vset.pattern.permute.xlu0 %v17319_v23  ;;  %v13950_v5 = vpop.f32.mrb[95].mxu1  ;;  %v17103_v17 = vpop.eup %17102  ;;  %v13842_v57 = vadd.f32 %v13841_v9, %v13840_v46 }
 0x726   : > { %4055 = vperm.xlu0 %16897, %v19343_v45   ;;  %v3789_v63 = vadd.f32 %v13948_v7, %v13836_v26  ;;  %v13951_v36 = vadd.f32 %v13950_v5, %v13949_v32  ;;  %v17105_v0 = vpop.eup %17104  ;;  %v3922_v37 = vadd.f32 1.0, %v17103_v17  ;;  %17114 = vpow2.f32 %v3889_v50  ;;  %v13843_v22 = vpop.f32.mrb[98].mxu0  ;;  %v12941_v50 = vld [vmem:[%s23137_s17 + $0x60] sm:$0xff] }
 0x727   : > { %16888 = vset.pattern.permute.xlu1 %v17318_v16  ;;  %v13844_v47 = vpop.f32.mrb[99].mxu0 }
 0x728   : > { %4276 = vperm.xlu1 %16888, %v19319_v62   ;;  %v19350_v43 = vadd.f32 %v13951_v36, %v13839_v38  ;;  %v17107_v62 = vpop.eup %17106  ;;  %v3831_v4 = vsub.f32 0.0, %v3789_v63  ;;  %17116 = vrcp.f32 %v3922_v37  ;;  %v12939_v38 = vld [vmem:[%s23137_s17 + $0x50] sm:$0xff]  ;;  %v13845_v6 = vadd.f32 %v13844_v47, %v13843_v22 }
 0x729   : > { %v17109_v39 = vpop.eup %17108  ;;  %v3923_v35 = vadd.f32 1.0, %v17107_v62  ;;  %17118 = vpow2.f32 %v3887_v14  ;;  %v23140_v63 = vld [vmem:[#allocation44_spill] sm:$0xff]  ;;  %v23141_v62 = vld [vmem:[#allocation31_spill] sm:$0xff] }
 0x72a   : > { %16898 = vset.pattern.permute.xlu0 %v17318_v16  ;;  %v3891_v30 = vmul.f32 1.442695, %v3831_v4  ;;  %v3832_v49 = vsub.f32 0.0, %v19350_v43  ;;  %v13952_v48 = vpop.f32.mrb[96].mxu1  ;;  %v16002_v4 = vpack.c.bf16 %v12942_v21, %v12941_v50  ;;  %v23151_v47 = vld [vmem:[#allocation76_spill] sm:$0xff]  ;;  %v23153_v21 = vld [vmem:[#allocation77_spill] sm:$0xff] }
 0x72b   : > { %4296 = vperm.xlu0 %16898, %v17101_v34   ;;  %17120 = vrcp.f32 %v3923_v35  ;;  %v13953_v13 = vpop.f32.mrb[97].mxu1  ;;  %v12943_v35 = vld [vmem:[%s23137_s17 + $0x70] sm:$0xff] }
 0x72c   : > { %16891 = vset.pattern.permute.xlu1 %v17319_v23  ;;  %17122 = vpow2.f32 %v3891_v30  ;;  %v3893_v27 = vmul.f32 1.442695, %v3832_v49  ;;  %v13954_v32 = vadd.f32 %v13953_v13, %v13952_v48  ;;  %v13955_v5 = vpop.f32.mrb[98].mxu1  ;;  %v12944_v30 = vld [vmem:[%s23137_s17 + $0x78] sm:$0xff]  ;;  %v23148_v48 = vld [vmem:[#allocation72_spill] sm:$0xff] }
 0x72d   : > { %4040 = vperm.xlu1 %16891, %v19325_v59   ;;  %v17111_v59 = vpop.eup %17110  ;;  %v13956_v33 = vpop.f32.mrb[99].mxu1  ;;  %v16006_v31 = vpack.c.bf16 %v12944_v30, %v12943_v35  ;;  %v23144_v49 = vld [vmem:[#allocation49_spill] sm:$0xff] }
 0x72e   : > { %v17113_v19 = vpop.eup %17112  ;;  %v3924_v40 = vadd.f32 1.0, %v17111_v59  ;;  %v19401_v43 = vadd.f32 %v13954_v32, %v13842_v57  ;;  %v13957_v17 = vadd.f32 %v13956_v33, %v13955_v5  ;;  %v23142_v59 = vld [vmem:[#allocation68_spill] sm:$0xff]  ;;  %v23150_v5 = vld [vmem:[#allocation61_spill] sm:$0xff] }
 0x72f   : > { %16901 = vset.pattern.permute.xlu0 %v17319_v23 }
 0x730   : > { %4065 = vperm.xlu0 %16901, %v17105_v0   ;;  %v17115_v8 = vpop.eup %17114  ;;  %17124 = vrcp.f32 %v3924_v40  ;;  %v23143_v40 = vld [vmem:[#allocation66_spill] sm:$0xff] }
 0x731   : > { %16892 = vset.pattern.permute.xlu1 %v17318_v16  ;;  %v3926_v58 = vadd.f32 1.0, %v17115_v8 }
 0x732   : > { %4284 = vperm.xlu1 %16892, %v19331_v55   ;;  %v17117_v60 = vpop.eup %17116 }
 0x733   : > { %v17119_v61 = vpop.eup %17118  ;;  %17126 = vrcp.f32 %v3926_v58 }
 0x734   : > { %16902 = vset.pattern.permute.xlu0 %v17318_v16  ;;  %v3925_v54 = vadd.f32 1.0, %v17119_v61  ;;  %v4772_v61 = vld [vmem:[#allocation2 + $0x8] sm:$0xff] }
 0x735   : > { %4304 = vperm.xlu0 %16902, %v17109_v39   ;;  %v17121_v44 = vpop.eup %17120  ;;  %14830 = vmatprep.mubr.msk.f32.mxu0 %vm22833_vm1, %v4772_v61 }
 0x736   : > { %16895 = vset.pattern.permute.xlu1 %v17319_v23  ;;  %v17123_v55 = vpop.eup %17122  ;;  %17128 = vrcp.f32 %v3925_v54 }
 0x737   : > { %4050 = vperm.xlu1 %16895, %v19337_v1   ;;  %v3927_v41 = vadd.f32 1.0, %v17123_v55  ;;  %v15998_v1 = vpack.c.bf16 %v12940_v29, %v12939_v38 }
 0x739   : > { %16905 = vset.pattern.permute.xlu0 %v17319_v23  ;;  %17130 = vrcp.f32 %v3927_v41  ;;  %15999 = vmatprep.subr.bf16.mxu0 %v15998_v1 }
 0x73a   : > { %4075 = vperm.xlu0 %16905, %v17113_v19   ;;  %v19375_v10 = vpop.eup %17124  ;;  %17132 = vpow2.f32 %v3893_v27  ;;  %16001 = vmatpush3.bf16.msra.mxu0 %v15998_v1 }
 0x73b   : > { %16896 = vset.pattern.permute.xlu1 %v17318_v16  ;;  %16003 = vmatprep.subr.bf16.mxu0 %v16002_v4 }
 0x73c   : > { %4292 = vperm.xlu1 %16896, %v19343_v45  }
 0x73d   : > { %v19379_v26 = vpop.eup %17126 }
 0x73e   : > { %16906 = vset.pattern.permute.xlu0 %v17318_v16  ;;  %16005 = vmatpush3.bf16.msra.mxu0 %v16002_v4 }
 0x73f   : > { %4312 = vperm.xlu0 %16906, %v17117_v60   ;;  %16007 = vmatprep.subr.bf16.mxu0 %v16006_v31 }
 0x740   : > { %16899 = vset.pattern.permute.xlu1 %v17319_v23  ;;  %v17129_v52 = vpop.eup %17128 }
 0x741   : > { %4060 = vperm.xlu1 %16899, %v17101_v34  }
 0x742   : > { %16009 = vmatpush3.bf16.msra.mxu0 %v16006_v31 }
 0x743   : > { %16909 = vset.pattern.permute.xlu0 %v17319_v23  ;;  %v17131_v2 = vpop.eup %17130 }
 0x744   : > { %4085 = vperm.xlu0 %16909, %v17121_v44   ;;  %v17133_v15 = vpop.eup %17132 }
 0x745   : > { %16900 = vset.pattern.permute.xlu1 %v17318_v16  ;;  %v3928_v18 = vadd.f32 1.0, %v17133_v15 }
 0x746   : > { %4300 = vperm.xlu1 %16900, %v17105_v0  }
 0x747   : > { %17134 = vrcp.f32 %v3928_v18 }
 0x748   : > { %16910 = vset.pattern.permute.xlu0 %v17318_v16 }
 0x749   : > { %4320 = vperm.xlu0 %16910, %v19375_v10  }
 0x74a   : > { %16903 = vset.pattern.permute.xlu1 %v17319_v23 }
 0x74b   : > { %4070 = vperm.xlu1 %16903, %v17109_v39   ;;  %v19411_v39 = vadd.f32 %v13957_v17, %v13845_v6  ;;  %v23152_v17 = vld [vmem:[#allocation25_spill] sm:$0xff] }
 0x74d   : > { %4328 = vperm.xlu0 %16910, %v19379_v26  }
 0x74f   : > { %16904 = vset.pattern.permute.xlu1 %v17318_v16 }
 0x750   : > { %4308 = vperm.xlu1 %16904, %v17113_v19  }
 0x751   : > { %16912 = vset.pattern.permute.xlu0 %v17319_v23  ;;  %v17135_v27 = vpop.eup %17134 }
 0x752   : > { %4095 = vperm.xlu0 %16912, %v17129_v52  }
 0x753   : > { %v4221_v11 = vpop.permute.xlu0 %4220 }
 0x754   : > { %v4347_v20 = vmul.f32 %v4221_v11, %v23138_v3  ;;  %16907 = vset.pattern.permute.xlu1 %v17319_v23  ;;  %v4773_v11 = vld [vmem:[#allocation2 + $0x10] sm:$0xff] }
 0x755   : > { %4080 = vperm.xlu1 %16907, %v17117_v60   ;;  %v19393_v56 = vpop.permute.xlu1 %4224  ;;  %14831 = vmatmul.mubr.msk.f32.vlgmr.msra.gmra.mrb[34].mxu0 %vm22833_vm1, %v4773_v11  ;;  %v23158_v11 = vld [vmem:[#allocation27_spill] sm:$0xff] }
 0x756   : > { %v4379_v25 = vadd.f32 1.0, %v4347_v20  ;;  %4105 = vperm.xlu0 %16912, %v17131_v2   ;;  %v23146_v20 = vld [vmem:[#allocation20_spill] sm:$0xff]  ;;  %v4348_v46 = vmul.f32 %v19393_v56, %v23142_v59 }
 0x758   : > { %v4411_v51 = vmul.f32 %v4379_v25, %v23139_v42  ;;  %v3966_v12 = vpop.permute.xlu0 %3965  ;;  %v23147_v25 = vld [vmem:[#allocation22_spill] sm:$0xff] }
 0x759   : > { %v4123_v45 = vmul.f32 %v3966_v12, %v23139_v42  ;;  %16908 = vset.pattern.permute.xlu1 %v17318_v16 }
 0x75a   : > { %4316 = vperm.xlu1 %16908, %v17121_v44   ;;  %v3971_v7 = vpop.permute.xlu1 %3970  ;;  %4507 = vrot.lane.b32.xlu0 %v4411_v51, %s17316_s16 }
 0x75b   : > { %v4155_v28 = vadd.f32 1.0, %v4123_v45  ;;  %v4124_v36 = vmul.f32 %v3971_v7, %v23140_v63  ;;  %16913 = vset.pattern.permute.xlu0 %v17318_v16  ;;  %v23149_v45 = vld [vmem:[#allocation73_spill] sm:$0xff] }
 0x75c   : > { %v3976_v34 = vpop.permute.xlu0 %3975 }
 0x75d   : > { %v4187_v0 = vmul.f32 %v4155_v28, %v23138_v3  ;;  %v4156_v37 = vadd.f32 1.0, %v4124_v36  ;;  %v4125_v14 = vmul.f32 %v3976_v34, %v23141_v62 }
 0x75e   : > { %4324 = vperm.xlu1 %16908, %v17129_v52  }
 0x75f   : > { %4443 = vst.msk [vmem:[#allocation2 + $0x18] sm:$0xff] %vm22711_vm0, %v4187_v0  ;;  %v4188_v24 = vmul.f32 %v4156_v37, %v23142_v59  ;;  %v4157_v53 = vadd.f32 1.0, %v4125_v14  ;;  %v4229_v19 = vpop.permute.xlu1 %4228 }
 0x760   : > { %v4349_v8 = vmul.f32 %v4229_v19, %v23143_v40  ;;  %v23154_v19 = vld [vmem:[#allocation35_spill] sm:$0xff] }
 0x761   : > { %4444 = vst.msk [vmem:[#allocation2 + $0x20] sm:$0xff] %vm22711_vm0, %v4188_v24  ;;  %v4189_v60 = vmul.f32 %v4157_v53, %v23143_v40 }
 0x762   : > { %v4381_v58 = vadd.f32 1.0, %v4349_v8  ;;  %4332 = vperm.xlu1 %16908, %v17131_v2   ;;  %v23145_v2 = vld [vmem:[#allocation69_spill] sm:$0xff] }
 0x763   : > { %4445 = vst.msk [vmem:[#allocation2 + $0x28] sm:$0xff] %vm22711_vm0, %v4189_v60  ;;  %v4233_v44 = vpop.permute.xlu1 %4232  ;;  %v3986_v54 = vpop.permute.xlu0 %3985  ;;  %v23155_v8 = vld [vmem:[#allocation29_spill] sm:$0xff] }
 0x764   : > { %v4413_v55 = vmul.f32 %v4381_v58, %v23141_v62  ;;  %v4127_v41 = vmul.f32 %v3986_v54, %v23144_v49  ;;  %v4350_v22 = vmul.f32 %v4233_v44, %v23148_v48  ;;  %v23156_v44 = vld [vmem:[#allocation80_spill] sm:$0xff] }
 0x766   : > { %v4159_v52 = vadd.f32 1.0, %v4127_v41  ;;  %4336 = vperm.xlu1 %16908, %v17135_v27   ;;  %4511 = vrot.lane.b32.xlu0 %v4413_v55, %s17316_s16  ;;  %v23157_v55 = vld [vmem:[#allocation81_spill] sm:$0xff] }
 0x768   : > { %v4191_v15 = vmul.f32 %v4159_v52, %v23145_v2  ;;  %v3981_v3 = vpop.permute.xlu1 %3980 }
 0x769   : > { %v4126_v38 = vmul.f32 %v3981_v3, %v23146_v20 }
 0x76a   : > { %4447 = vst.msk [vmem:[#allocation2 + $0x38] sm:$0xff] %vm22711_vm0, %v4191_v15  ;;  %16911 = vset.pattern.permute.xlu1 %v17319_v23  ;;  %v23159_v15 = vld [vmem:[#allocation47_spill] sm:$0xff] }
 0x76b   : > { %v4158_v29 = vadd.f32 1.0, %v4126_v38  ;;  %4090 = vperm.xlu1 %16911, %v19375_v10   ;;  %v3996_v1 = vpop.permute.xlu0 %3995  ;;  %v4380_v10 = vadd.f32 1.0, %v4348_v46 }
 0x76c   : > { %v4129_v18 = vmul.f32 %v3996_v1, %v23147_v25 }
 0x76d   : > { %v4190_v42 = vmul.f32 %v4158_v29, %v23148_v48  ;;  %v4237_v51 = vpop.permute.xlu1 %4236  ;;  %v4412_v36 = vmul.f32 %v4380_v10, %v23140_v63  ;;  %v23161_v48 = vld [vmem:[#allocation39_spill] sm:$0xff]  ;;  %v23163_v10 = vld [vmem:[#allocation38_spill] sm:$0xff] }
 0x76e   : > { %v4161_v12 = vadd.f32 1.0, %v4129_v18  ;;  %v4351_v9 = vmul.f32 %v4237_v51, %v23145_v2 }
 0x76f   : > { %4446 = vst.msk [vmem:[#allocation2 + $0x30] sm:$0xff] %vm22711_vm0, %v4190_v42  ;;  %4100 = vperm.xlu1 %16911, %v19379_v26   ;;  %v4382_v26 = vadd.f32 1.0, %v4350_v22 }
 0x770   : > { %v4193_v57 = vmul.f32 %v4161_v12, %v23149_v45  ;;  %v4383_v13 = vadd.f32 1.0, %v4351_v9 }
 0x771   : > { %v4241_v7 = vpop.permute.xlu1 %4240  ;;  %v4414_v62 = vmul.f32 %v4382_v26, %v23146_v20 }
 0x772   : > { %4449 = vst.msk [vmem:[#allocation2 + $0x48] sm:$0xff] %vm22711_vm0, %v4193_v57  ;;  %v4415_v56 = vmul.f32 %v4383_v13, %v23144_v49  ;;  %v4352_v33 = vmul.f32 %v4241_v7, %v23151_v47  ;;  %v23162_v57 = vld [vmem:[#allocation62_spill] sm:$0xff] }
 0x773   : > { %4110 = vperm.xlu1 %16911, %v17135_v27   ;;  %v4006_v32 = vpop.permute.xlu0 %4005 }
 0x774   : > { %v4131_v28 = vmul.f32 %v4006_v32, %v23150_v5  ;;  %4515 = vrot.lane.b32.xlu0 %v4415_v56, %s17316_s16  ;;  %v4384_v14 = vadd.f32 1.0, %v4352_v33  ;;  %v23164_v32 = vld [vmem:[#allocation86_spill] sm:$0xff] }
 0x776   : > { %v4163_v34 = vadd.f32 1.0, %v4131_v28  ;;  %v3991_v6 = vpop.permute.xlu1 %3990  ;;  %v4416_v59 = vmul.f32 %v4384_v14, %v23152_v17 }
 0x777   : > { %v4128_v50 = vmul.f32 %v3991_v6, %v23152_v17  ;;  %4509 = vrot.lane.b32.xlu1 %v4412_v36, %s17316_s16 }
 0x778   : > { %v4195_v0 = vmul.f32 %v4163_v34, %v23153_v21  ;;  %v4257_v37 = vpop.permute.xlu0 %4256  ;;  %v23165_v34 = vld [vmem:[#allocation37_spill] sm:$0xff] }
 0x779   : > { %v4160_v4 = vadd.f32 1.0, %v4128_v50  ;;  %v4356_v60 = vmul.f32 %v4257_v37, %v23155_v8 }
 0x77a   : > { %4451 = vst.msk [vmem:[#allocation2 + $0x58] sm:$0xff] %vm22711_vm0, %v4195_v0 }
 0x77b   : > { %v4192_v63 = vmul.f32 %v4160_v4, %v23151_v47  ;;  %4513 = vrot.lane.b32.xlu1 %v4414_v62, %s17316_s16  ;;  %v4245_v35 = vpop.permute.xlu1 %4244  ;;  %v4388_v52 = vadd.f32 1.0, %v4356_v60  ;;  %v23167_v4 = vld [vmem:[#allocation42_spill] sm:$0xff]  ;;  %v23169_v60 = vld [vmem:[#allocation41_spill] sm:$0xff] }
 0x77c   : > { %v4353_v30 = vmul.f32 %v4245_v35, %v23149_v45 }
 0x77d   : > { %4448 = vst.msk [vmem:[#allocation2 + $0x40] sm:$0xff] %vm22711_vm0, %v4192_v63  ;;  %v4016_v24 = vpop.permute.xlu0 %4015 }
 0x77e   : > { %v4385_v53 = vadd.f32 1.0, %v4353_v30  ;;  %v4133_v31 = vmul.f32 %v4016_v24, %v23154_v19 }
 0x77f   : > { %4517 = vrot.lane.b32.xlu1 %v4416_v59, %s17316_s16  ;;  %v4249_v40 = vpop.permute.xlu1 %4248  ;;  %v23168_v59 = vld [vmem:[#allocation94_spill] sm:$0xff] }
 0x780   : > { %v4417_v58 = vmul.f32 %v4385_v53, %v23147_v25  ;;  %v4165_v61 = vadd.f32 1.0, %v4133_v31  ;;  %v4354_v54 = vmul.f32 %v4249_v40, %v23156_v44  ;;  %v23160_v25 = vld [vmem:[#allocation30_spill] sm:$0xff] }
 0x781   : > { %v4420_v18 = vmul.f32 %v4388_v52, %v23160_v25  ;;  %v23171_v52 = vld [vmem:[#allocation65_spill] sm:$0xff] }
 0x782   : > { %v4197_v49 = vmul.f32 %v4165_v61, %v23157_v55  ;;  %v4386_v41 = vadd.f32 1.0, %v4354_v54  ;;  %4519 = vrot.lane.b32.xlu0 %v4417_v58, %s17316_s16  ;;  %v4265_v27 = vpop.permute.xlu0 %4264  ;;  %v23170_v54 = vld [vmem:[#allocation24_spill] sm:$0xff] }
 0x783   : > { %v4358_v3 = vmul.f32 %v4265_v27, %v23159_v15 }
 0x784   : > { %4453 = vst.msk [vmem:[#allocation2 + $0x68] sm:$0xff] %vm22711_vm0, %v4197_v49  ;;  %v4418_v2 = vmul.f32 %v4386_v41, %v23158_v11  ;;  %v4001_v20 = vpop.permute.xlu1 %4000 }
 0x785   : > { %v4130_v38 = vmul.f32 %v4001_v20, %v23158_v11  ;;  %v4390_v46 = vadd.f32 1.0, %v4358_v3  ;;  %v23172_v20 = vld [vmem:[#allocation36_spill] sm:$0xff] }
 0x786   : > { %4521 = vrot.lane.b32.xlu1 %v4418_v2, %s17316_s16 }
 0x787   : > { %v4162_v29 = vadd.f32 1.0, %v4130_v38  ;;  %v4026_v1 = vpop.permute.xlu0 %4025  ;;  %v4422_v13 = vmul.f32 %v4390_v46, %v23162_v57 }
 0x788   : > { %v4135_v42 = vmul.f32 %v4026_v1, %v23161_v48 }
 0x789   : > { %v4194_v51 = vmul.f32 %v4162_v29, %v23156_v44  ;;  %v4253_v12 = vpop.permute.xlu1 %4252 }
 0x78a   : > { %v4167_v9 = vadd.f32 1.0, %v4135_v42  ;;  %v4355_v45 = vmul.f32 %v4253_v12, %v23153_v21  ;;  %4525 = vrot.lane.b32.xlu1 %v4420_v18, %s17316_s16  ;;  %v23166_v21 = vld [vmem:[#allocation63_spill] sm:$0xff]  ;;  %v23173_v18 = vld [vmem:[#allocation34_spill] sm:$0xff] }
 0x78b   : > { %4450 = vst.msk [vmem:[#allocation2 + $0x50] sm:$0xff] %vm22711_vm0, %v4194_v51  ;;  %v23174_v12 = vld [vmem:[#allocation26_spill] sm:$0xff] }
 0x78c   : > { %v4199_v22 = vmul.f32 %v4167_v9, %v23163_v10  ;;  %v4387_v7 = vadd.f32 1.0, %v4355_v45  ;;  %v4273_v56 = vpop.permute.xlu0 %4272 }
 0x78d   : > { %v4360_v28 = vmul.f32 %v4273_v56, %v23164_v32 }
 0x78e   : > { %4455 = vst.msk [vmem:[#allocation2 + $0x78] sm:$0xff] %vm22711_vm0, %v4199_v22  ;;  %v4419_v36 = vmul.f32 %v4387_v7, %v23150_v5  ;;  %v4011_v26 = vpop.permute.xlu1 %4010  ;;  %4529 = vrot.lane.b32.xlu1 %v4422_v13, %s17316_s16 }
 0x78f   : > { %v4392_v47 = vadd.f32 1.0, %v4360_v28  ;;  %v4132_v33 = vmul.f32 %v4011_v26, %v23160_v25  ;;  %v23176_v28 = vld [vmem:[#allocation70_spill] sm:$0xff] }
 0x790   : > { %4523 = vrot.lane.b32.xlu0 %v4419_v36, %s17316_s16 }
 0x791   : > { %v4424_v6 = vmul.f32 %v4392_v47, %v23165_v34  ;;  %v4164_v17 = vadd.f32 1.0, %v4132_v33  ;;  %v4036_v50 = vpop.permute.xlu0 %4035 }
 0x792   : > { %v4137_v0 = vmul.f32 %v4036_v50, %v23166_v21 }
 0x793   : > { %v4196_v37 = vmul.f32 %v4164_v17, %v23155_v8  ;;  %v4261_v62 = vpop.permute.xlu1 %4260  ;;  %4533 = vrot.lane.b32.xlu1 %v4424_v6, %s17316_s16  ;;  %v4765_v6 = vld [vmem:[%s23137_s17 + $0x8] sm:$0xff] }
 0x794   : > { %v4169_v5 = vadd.f32 1.0, %v4137_v0  ;;  %v4357_v14 = vmul.f32 %v4261_v62, %v23157_v55  ;;  %v23177_v17 = vld [vmem:[#allocation23_spill] sm:$0xff] }
 0x795   : > { %4452 = vst.msk [vmem:[#allocation2 + $0x60] sm:$0xff] %vm22711_vm0, %v4196_v37 }
 0x796   : > { %v4201_v63 = vmul.f32 %v4169_v5, %v23167_v4  ;;  %v4389_v35 = vadd.f32 1.0, %v4357_v14  ;;  %v4281_v30 = vpop.permute.xlu0 %4280 }
 0x797   : > { %v4362_v24 = vmul.f32 %v4281_v30, %v23168_v59  ;;  %v23179_v30 = vld [vmem:[#allocation67_spill] sm:$0xff] }
 0x798   : > { %4457 = vst.msk [vmem:[#allocation2 + $0x88] sm:$0xff] %vm22711_vm0, %v4201_v63  ;;  %v4421_v53 = vmul.f32 %v4389_v35, %v23154_v19  ;;  %v4021_v31 = vpop.permute.xlu1 %4020 }
 0x799   : > { %v4394_v40 = vadd.f32 1.0, %v4362_v24  ;;  %v4134_v8 = vmul.f32 %v4021_v31, %v23162_v57 }
 0x79a   : > { %4527 = vrot.lane.b32.xlu0 %v4421_v53, %s17316_s16 }
 0x79b   : > { %v4426_v58 = vmul.f32 %v4394_v40, %v23169_v60  ;;  %v4166_v61 = vadd.f32 1.0, %v4134_v8  ;;  %v4046_v44 = vpop.permute.xlu0 %4045  ;;  %v23180_v40 = vld [vmem:[#allocation74_spill] sm:$0xff] }
 0x79c   : > { %v4139_v55 = vmul.f32 %v4046_v44, %v23170_v54  ;;  %v23181_v44 = vld [vmem:[#allocation59_spill] sm:$0xff] }
 0x79d   : > { %v4198_v49 = vmul.f32 %v4166_v61, %v23159_v15  ;;  %v4269_v41 = vpop.permute.xlu1 %4268  ;;  %4537 = vrot.lane.b32.xlu1 %v4426_v58, %s17316_s16 }
 0x79e   : > { %v4171_v27 = vadd.f32 1.0, %v4139_v55  ;;  %v4359_v19 = vmul.f32 %v4269_v41, %v23163_v10  ;;  %v23175_v10 = vld [vmem:[#allocation40_spill] sm:$0xff] }
 0x79f   : > { %4454 = vst.msk [vmem:[#allocation2 + $0x70] sm:$0xff] %vm22711_vm0, %v4198_v49 }
 0x7a0   : > { %v4203_v11 = vmul.f32 %v4171_v27, %v23171_v52  ;;  %v4391_v2 = vadd.f32 1.0, %v4359_v19  ;;  %v4289_v3 = vpop.permute.xlu0 %4288  ;;  %v23182_v27 = vld [vmem:[#allocation21_spill] sm:$0xff] }
 0x7a1   : > { %v4364_v38 = vmul.f32 %v4289_v3, %v23172_v20  ;;  %v23183_v3 = vld [vmem:[#allocation71_spill] sm:$0xff] }
 0x7a2   : > { %4459 = vst.msk [vmem:[#allocation2 + $0x98] sm:$0xff] %vm22711_vm0, %v4203_v11  ;;  %v4423_v29 = vmul.f32 %v4391_v2, %v23161_v48  ;;  %v4031_v1 = vpop.permute.xlu1 %4030 }
 0x7a3   : > { %v4396_v15 = vadd.f32 1.0, %v4364_v38  ;;  %v4136_v25 = vmul.f32 %v4031_v1, %v23165_v34  ;;  %v4764_v34 = vld [vmem:[%s23137_s17] sm:$0xff] }
 0x7a4   : > { %4531 = vrot.lane.b32.xlu0 %v4423_v29, %s17316_s16  ;;  %v16010_v62 = vpack.c.bf16 %v4765_v6, %v4764_v34 }
 0x7a5   : > { %v4428_v46 = vmul.f32 %v4396_v15, %v23173_v18  ;;  %v4168_v42 = vadd.f32 1.0, %v4136_v25  ;;  %v4056_v51 = vpop.permute.xlu0 %4055  ;;  %v23184_v15 = vld [vmem:[#allocation78_spill] sm:$0xff] }
 0x7a6   : > { %v4141_v9 = vmul.f32 %v4056_v51, %v23174_v12  ;;  %16011 = vmatprep.subr.bf16.mxu0 %v16010_v62  ;;  %v4766_v51 = vld [vmem:[%s23137_s17 + $0x10] sm:$0xff] }
 0x7a7   : > { %v4200_v45 = vmul.f32 %v4168_v42, %v23164_v32  ;;  %v4277_v57 = vpop.permute.xlu1 %4276  ;;  %4541 = vrot.lane.b32.xlu1 %v4428_v46, %s17316_s16  ;;  %16013 = vmatpush3.bf16.msra.mxu0 %v16010_v62 }
 0x7a8   : > { %v4173_v13 = vadd.f32 1.0, %v4141_v9  ;;  %v4361_v48 = vmul.f32 %v4277_v57, %v23167_v4  ;;  %v4767_v9 = vld [vmem:[%s23137_s17 + $0x18] sm:$0xff] }
 0x7a9   : > { %4456 = vst.msk [vmem:[#allocation2 + $0x80] sm:$0xff] %vm22711_vm0, %v4200_v45  ;;  %v23185_v45 = vld [vmem:[#allocation50_spill] sm:$0xff] }
 0x7aa   : > { %v4205_v22 = vmul.f32 %v4173_v13, %v23175_v10  ;;  %v4393_v7 = vadd.f32 1.0, %v4361_v48  ;;  %v4297_v56 = vpop.permute.xlu0 %4296 }
 0x7ab   : > { %v4366_v36 = vmul.f32 %v4297_v56, %v23176_v28 }
 0x7ac   : > { %4461 = vst.msk [vmem:[#allocation2 + $0xa8] sm:$0xff] %vm22711_vm0, %v4205_v22  ;;  %v4425_v26 = vmul.f32 %v4393_v7, %v23166_v21  ;;  %v4041_v47 = vpop.permute.xlu1 %4040  ;;  %v23178_v21 = vld [vmem:[#allocation45_spill] sm:$0xff] }
 0x7ad   : > { %v4398_v32 = vadd.f32 1.0, %v4366_v36  ;;  %v4138_v33 = vmul.f32 %v4041_v47, %v23169_v60  ;;  %v3833_v47 = vsub.f32 0.0, %v19401_v43 }
 0x7ae   : > { %4535 = vrot.lane.b32.xlu0 %v4425_v26, %s17316_s16 }
 0x7af   : > { %v4430_v50 = vmul.f32 %v4398_v32, %v23177_v17  ;;  %v4170_v0 = vadd.f32 1.0, %v4138_v33  ;;  %v4066_v37 = vpop.permute.xlu0 %4065  ;;  %v23187_v32 = vld [vmem:[#allocation75_spill] sm:$0xff] }
 0x7b0   : > { %v4143_v5 = vmul.f32 %v4066_v37, %v23178_v21 }
 0x7b1   : > { %v4202_v14 = vmul.f32 %v4170_v0, %v23168_v59  ;;  %v4285_v4 = vpop.permute.xlu1 %4284  ;;  %4545 = vrot.lane.b32.xlu1 %v4430_v50, %s17316_s16  ;;  %v3895_v0 = vmul.f32 1.442695, %v3833_v47 }
 0x7b2   : > { %v4175_v63 = vadd.f32 1.0, %v4143_v5  ;;  %v4363_v35 = vmul.f32 %v4285_v4, %v23171_v52 }
 0x7b3   : > { %4458 = vst.msk [vmem:[#allocation2 + $0x90] sm:$0xff] %vm22711_vm0, %v4202_v14  ;;  %v23189_v14 = vld [vmem:[#allocation51_spill] sm:$0xff]  ;;  %17136 = vpow2.f32 %v3895_v0 }
 0x7b4   : > { %v4207_v24 = vmul.f32 %v4175_v63, %v23179_v30  ;;  %v4395_v53 = vadd.f32 1.0, %v4363_v35  ;;  %v4305_v31 = vpop.permute.xlu0 %4304  ;;  %v23190_v35 = vld [vmem:[#allocation33_spill] sm:$0xff] }
 0x7b5   : > { %v4368_v8 = vmul.f32 %v4305_v31, %v23180_v40 }
 0x7b6   : > { %4463 = vst.msk [vmem:[#allocation2 + $0xb8] sm:$0xff] %vm22711_vm0, %v4207_v24  ;;  %v4427_v59 = vmul.f32 %v4395_v53, %v23170_v54  ;;  %v4051_v60 = vpop.permute.xlu1 %4050 }
 0x7b7   : > { %v4400_v58 = vadd.f32 1.0, %v4368_v8  ;;  %v4140_v61 = vmul.f32 %v4051_v60, %v23173_v18  ;;  %v3834_v8 = vsub.f32 0.0, %v19411_v39 }
 0x7b8   : > { %4539 = vrot.lane.b32.xlu0 %v4427_v59, %s17316_s16  ;;  %v23191_v59 = vld [vmem:[#allocation53_spill] sm:$0xff] }
 0x7b9   : > { %v4432_v55 = vmul.f32 %v4400_v58, %v23181_v44  ;;  %v4172_v49 = vadd.f32 1.0, %v4140_v61  ;;  %v4076_v41 = vpop.permute.xlu0 %4075  ;;  %v4768_v61 = vld [vmem:[%s23137_s17 + $0x20] sm:$0xff] }
 0x7ba   : > { %v4145_v19 = vmul.f32 %v4076_v41, %v23182_v27 }
 0x7bb   : > { %v4204_v52 = vmul.f32 %v4172_v49, %v23172_v20  ;;  %v4293_v11 = vpop.permute.xlu1 %4292  ;;  %4549 = vrot.lane.b32.xlu1 %v4432_v55, %s17316_s16  ;;  %v23192_v55 = vld [vmem:[#allocation54_spill] sm:$0xff] }
 0x7bc   : > { %v4177_v2 = vadd.f32 1.0, %v4145_v19  ;;  %v4365_v54 = vmul.f32 %v4293_v11, %v23175_v10  ;;  %v16014_v10 = vpack.c.bf16 %v4767_v9, %v4766_v51  ;;  %v3897_v11 = vmul.f32 1.442695, %v3834_v8  ;;  %v23195_v51 = vld [vmem:[#allocation57_spill] sm:$0xff] }
 0x7bd   : > { %4460 = vst.msk [vmem:[#allocation2 + $0xa0] sm:$0xff] %vm22711_vm0, %v4204_v52 }
 0x7be   : > { %v4209_v38 = vmul.f32 %v4177_v2, %v23183_v3  ;;  %v4397_v29 = vadd.f32 1.0, %v4365_v54  ;;  %v4313_v1 = vpop.permute.xlu0 %4312  ;;  %16015 = vmatprep.subr.bf16.mxu0 %v16014_v10  ;;  %17138 = vpow2.f32 %v3897_v11 }
 0x7bf   : > { %v4370_v25 = vmul.f32 %v4313_v1, %v23184_v15  ;;  %16017 = vmatpush3.bf16.msra.mxu0 %v16014_v10 }
 0x7c0   : > { %4465 = vst.msk [vmem:[#allocation2 + $0xc8] sm:$0xff] %vm22711_vm0, %v4209_v38  ;;  %v4429_v18 = vmul.f32 %v4397_v29, %v23174_v12  ;;  %v4061_v46 = vpop.permute.xlu1 %4060  ;;  %v23186_v12 = vld [vmem:[#allocation60_spill] sm:$0xff]  ;;  %v23194_v29 = vld [vmem:[#allocation58_spill] sm:$0xff] }
 0x7c1   : > { %v4402_v20 = vadd.f32 1.0, %v4370_v25  ;;  %v4142_v42 = vmul.f32 %v4061_v46, %v23177_v17  ;;  %v23188_v17 = vld [vmem:[#allocation82_spill] sm:$0xff] }
 0x7c2   : > { %4543 = vrot.lane.b32.xlu0 %v4429_v18, %s17316_s16  ;;  %v17137_v18 = vpop.eup %17136 }
 0x7c3   : > { %v4434_v57 = vmul.f32 %v4402_v20, %v23185_v45  ;;  %v4174_v13 = vadd.f32 1.0, %v4142_v42  ;;  %v4086_v48 = vpop.permute.xlu0 %4085 }
 0x7c4   : > { %v4147_v22 = vmul.f32 %v4086_v48, %v23186_v12 }
 0x7c5   : > { %v4206_v7 = vmul.f32 %v4174_v13, %v23176_v28  ;;  %v4301_v56 = vpop.permute.xlu1 %4300  ;;  %4553 = vrot.lane.b32.xlu1 %v4434_v57, %s17316_s16  ;;  %v3929_v57 = vadd.f32 1.0, %v17137_v18 }
 0x7c6   : > { %v4179_v36 = vadd.f32 1.0, %v4147_v22  ;;  %v4367_v26 = vmul.f32 %v4301_v56, %v23179_v30  ;;  %v4770_v56 = vld [vmem:[%s23137_s17 + $0x30] sm:$0xff] }
 0x7c7   : > { %4462 = vst.msk [vmem:[#allocation2 + $0xb0] sm:$0xff] %vm22711_vm0, %v4206_v7  ;;  %17140 = vrcp.f32 %v3929_v57 }
 0x7c8   : > { %v4211_v33 = vmul.f32 %v4179_v36, %v23187_v32  ;;  %v4399_v34 = vadd.f32 1.0, %v4367_v26  ;;  %v4321_v6 = vpop.permute.xlu0 %4320  ;;  %v4771_v36 = vld [vmem:[%s23137_s17 + $0x38] sm:$0xff] }
 0x7c9   : > { %v4372_v50 = vmul.f32 %v4321_v6, %v23188_v17 }
 0x7ca   : > { %4467 = vst.msk [vmem:[#allocation2 + $0xd8] sm:$0xff] %vm22711_vm0, %v4211_v33  ;;  %v4431_v28 = vmul.f32 %v4399_v34, %v23178_v21  ;;  %v4071_v37 = vpop.permute.xlu1 %4070  ;;  %v17139_v34 = vpop.eup %17138 }
 0x7cb   : > { %v4404_v62 = vadd.f32 1.0, %v4372_v50  ;;  %v4144_v5 = vmul.f32 %v4071_v37, %v23181_v44  ;;  %v23196_v37 = vld [vmem:[#allocation55_spill] sm:$0xff] }
 0x7cc   : > { %4547 = vrot.lane.b32.xlu0 %v4431_v28, %s17316_s16  ;;  %v4329_v43 = vpop.permute.xlu0 %4328  ;;  %v3930_v28 = vadd.f32 1.0, %v17139_v34 }
 0x7cd   : > { %v4436_v4 = vmul.f32 %v4404_v62, %v23189_v14  ;;  %v4176_v63 = vadd.f32 1.0, %v4144_v5  ;;  %v4374_v30 = vmul.f32 %v4329_v43, %v23190_v35 }
 0x7ce   : > { %17142 = vrcp.f32 %v3930_v28 }
 0x7cf   : > { %v4208_v24 = vmul.f32 %v4176_v63, %v23180_v40  ;;  %v4406_v53 = vadd.f32 1.0, %v4374_v30  ;;  %v4309_v31 = vpop.permute.xlu1 %4308  ;;  %4557 = vrot.lane.b32.xlu1 %v4436_v4, %s17316_s16  ;;  %v4769_v40 = vld [vmem:[%s23137_s17 + $0x28] sm:$0xff]  ;;  %v23197_v63 = vld [vmem:[#allocation56_spill] sm:$0xff] }
 0x7d0   : > { %v4369_v21 = vmul.f32 %v4309_v31, %v23183_v3  ;;  %v16018_v41 = vpack.c.bf16 %v4769_v40, %v4768_v61  ;;  %v23193_v3 = vld [vmem:[#allocation79_spill] sm:$0xff] }
 0x7d1   : > { %4464 = vst.msk [vmem:[#allocation2 + $0xc0] sm:$0xff] %vm22711_vm0, %v4208_v24  ;;  %v4438_v60 = vmul.f32 %v4406_v53, %v23191_v59  ;;  %v4096_v58 = vpop.permute.xlu0 %4095  ;;  %v17141_v4 = vpop.eup %17140 }
 0x7d2   : > { %v4401_v44 = vadd.f32 1.0, %v4369_v21  ;;  %v4149_v49 = vmul.f32 %v4096_v58, %v23192_v55  ;;  %16019 = vmatprep.subr.bf16.mxu0 %v16018_v41 }
 0x7d3   : > { %4561 = vrot.lane.b32.xlu1 %v4438_v60, %s17316_s16  ;;  %16021 = vmatpush3.bf16.msra.mxu0 %v16018_v41 }
 0x7d4   : > { %v4433_v39 = vmul.f32 %v4401_v44, %v23182_v27  ;;  %v4181_v19 = vadd.f32 1.0, %v4149_v49  ;;  %v4081_v52 = vpop.permute.xlu1 %4080 }
 0x7d5   : > { %v4146_v2 = vmul.f32 %v4081_v52, %v23185_v45  ;;  %v4106_v54 = vpop.permute.xlu0 %4105 }
 0x7d6   : > { %v4213_v38 = vmul.f32 %v4181_v19, %v23193_v3  ;;  %v4151_v1 = vmul.f32 %v4106_v54, %v23194_v29  ;;  %4551 = vrot.lane.b32.xlu0 %v4433_v39, %s17316_s16 }
 0x7d7   : > { %v4178_v25 = vadd.f32 1.0, %v4146_v2 }
 0x7d8   : > { %4469 = vst.msk [vmem:[#allocation2 + $0xe8] sm:$0xff] %vm22711_vm0, %v4213_v38  ;;  %v4183_v27 = vadd.f32 1.0, %v4151_v1 }
 0x7d9   : > { %v4210_v46 = vmul.f32 %v4178_v25, %v23184_v15  ;;  %v4317_v20 = vpop.permute.xlu1 %4316  ;;  %v4508_v42 = vpop.permute.xlu0 %4507 }
 0x7da   : > { %v4215_v9 = vmul.f32 %v4183_v27, %v23195_v51  ;;  %v4371_v45 = vmul.f32 %v4317_v20, %v23187_v32  ;;  %4604 = vst.msk [vmem:[#allocation2 + $0x18] sm:$0xff] %vm22712_vm8, %v4508_v42  ;;  %v16022_v32 = vpack.c.bf16 %v4771_v36, %v4770_v56 }
 0x7db   : > { %4466 = vst.msk [vmem:[#allocation2 + $0xd0] sm:$0xff] %vm22711_vm0, %v4210_v46 }
 0x7dc   : > { %4471 = vst.msk [vmem:[#allocation2 + $0xf8] sm:$0xff] %vm22711_vm0, %v4215_v9  ;;  %v4403_v13 = vadd.f32 1.0, %v4371_v45  ;;  %16023 = vmatprep.subr.bf16.mxu0 %v16022_v32 }
 0x7dd   : > { %v4325_v48 = vpop.permute.xlu1 %4324  ;;  %v4512_v10 = vpop.permute.xlu0 %4511  ;;  %16025 = vmatpush3.bf16.msra.mxu0 %v16022_v32 }
 0x7de   : > { %v4435_v22 = vmul.f32 %v4403_v13, %v23186_v12  ;;  %v4373_v15 = vmul.f32 %v4325_v48, %v23193_v3  ;;  %4606 = vst.msk [vmem:[#allocation2 + $0x28] sm:$0xff] %vm22712_vm8, %v4512_v10 }
 0x7e0   : > { %v4405_v7 = vadd.f32 1.0, %v4373_v15  ;;  %4555 = vrot.lane.b32.xlu0 %v4435_v22, %s17316_s16 }
 0x7e1   : > { %v4333_v26 = vpop.permute.xlu1 %4332  ;;  %v4774_v47 = vld [vmem:[#allocation2 + $0x18] sm:$0xff] }
 0x7e2   : > { %v4437_v12 = vmul.f32 %v4405_v7, %v23192_v55  ;;  %v4375_v33 = vmul.f32 %v4333_v26, %v23195_v51  ;;  %14833 = vmatprep.mubr.msk.f32.mxu0 %vm22833_vm1, %v4774_v47  ;;  %v17143_v55 = vpop.eup %17142 }
 0x7e4   : > { %v4407_v6 = vadd.f32 1.0, %v4375_v33  ;;  %4559 = vrot.lane.b32.xlu0 %v4437_v12, %s17316_s16 }
 0x7e5   : > { %v4337_v50 = vpop.permute.xlu1 %4336  ;;  %v4776_v11 = vld [vmem:[#allocation2 + $0x28] sm:$0xff] }
 0x7e6   : > { %v4439_v0 = vmul.f32 %v4407_v6, %v23194_v29  ;;  %v4376_v62 = vmul.f32 %v4337_v50, %v23196_v37  ;;  %v4516_v5 = vpop.permute.xlu0 %4515 }
 0x7e7   : > { %4608 = vst.msk [vmem:[#allocation2 + $0x38] sm:$0xff] %vm22712_vm8, %v4516_v5 }
 0x7e8   : > { %v4408_v43 = vadd.f32 1.0, %v4376_v62  ;;  %4563 = vrot.lane.b32.xlu0 %v4439_v0, %s17316_s16 }
 0x7ea   : > { %v4440_v30 = vmul.f32 %v4408_v43, %v23197_v63  ;;  %v4091_v24 = vpop.permute.xlu1 %4090 }
 0x7eb   : > { %v4148_v53 = vmul.f32 %v4091_v24, %v23189_v14  ;;  %v602_v24 = vlaneseq }
 0x7ec   : > { %4340 = vperm.xlu0 %16913, %v17141_v4   ;;  %4565 = vrot.lane.b32.xlu1 %v4440_v30, %s17316_s16 }
 0x7ed   : > { %v4180_v31 = vadd.f32 1.0, %v4148_v53 }
 0x7ee   : > { %v4101_v21 = vpop.permute.xlu1 %4100 }
 0x7ef   : > { %v4212_v8 = vmul.f32 %v4180_v31, %v23188_v17  ;;  %v4150_v60 = vmul.f32 %v4101_v21, %v23191_v59  ;;  %v13009_v59 = vld [vmem:[%s23137_s17 + $0x80] sm:$0xff] }
 0x7f0   : > { %4115 = vperm.xlu1 %16911, %v17141_v4  }
 0x7f1   : > { %4468 = vst.msk [vmem:[#allocation2 + $0xe0] sm:$0xff] %vm22711_vm0, %v4212_v8  ;;  %v4182_v58 = vadd.f32 1.0, %v4150_v60  ;;  %v19699_v8 = vshrl.u32 %v602_v24, 7 }
 0x7f2   : > { %v4111_v61 = vpop.permute.xlu1 %4110 }
 0x7f3   : > { %v4214_v40 = vmul.f32 %v4182_v58, %v23190_v35  ;;  %v4152_v44 = vmul.f32 %v4111_v61, %v23197_v63  ;;  %v13010_v35 = vld [vmem:[%s23137_s17 + $0x88] sm:$0xff] }
 0x7f4   : > { %16914 = vset.pattern.permute.xlu1 %v17318_v16  ;;  %v4520_v14 = vpop.permute.xlu0 %4519  ;;  %v19636_v16 = vpack.c.bf16 %v13010_v35, %v13009_v59  ;;  %v607_v59 = vadd.s32 32, %v19699_v8 }
 0x7f5   : > { %4470 = vst.msk [vmem:[#allocation2 + $0xf0] sm:$0xff] %vm22711_vm0, %v4214_v40  ;;  %v4184_v49 = vadd.f32 1.0, %v4152_v44  ;;  %4344 = vperm.xlu1 %16914, %v17143_v55   ;;  %v639_v40 = vand.u32 15, %v19699_v8  ;;  %v605_v44 = vadd.s32 16, %v19699_v8 }
 0x7f6   : > { %4610 = vst.msk [vmem:[#allocation2 + $0x48] sm:$0xff] %vm22712_vm8, %v4520_v14  ;;  %v4510_v17 = vpop.permute.xlu1 %4509  ;;  %16027 = vmatprep.subr.bf16.mxu0 %v19636_v16  ;;  %v4636_v14 = vld [vmem:[#allocation2 + $0x7] sm:$0xff] }
 0x7f7   : > { %v4216_v41 = vmul.f32 %v4184_v49, %v23196_v37  ;;  %4605 = vst.msk [vmem:[#allocation2 + $0x20] sm:$0xff] %vm22712_vm8, %v4510_v17  ;;  %vm19716_vm9 = vcmp.ge.s32.totalorder %v639_v40, 1  ;;  %v23202_v49 = vmov 0  ;;  %v653_v17 = vand.u32 15, %v605_v44 }
 0x7f8   : > { %v23203_v49 = vsel %vm19716_vm9, 4294967295, %v23202_v49  ;;  %v4732_v35 = vsel %vm19716_vm9, %v4636_v14, 0.0  ;;  %v23217_v44 = vmov 0 }
 0x7f9   : > { %4472 = vst.msk [vmem:[#allocation2 + $0x100] sm:$0xff] %vm22711_vm0, %v4216_v41  ;;  %16915 = vset.pattern.permute.xlu1 %v17319_v23  ;;  %v4778_v23 = vld [vmem:[#allocation2 + $0x38] sm:$0xff]  ;;  %23204 = vst [vmem:[#allocation83_spill] sm:$0xff] %v23203_v49  ;;  %vm19735_vm10 = vcmp.ge.s32.totalorder %v653_v17, 1 }
 0x7fa   : > { %v4514_v39 = vpop.permute.xlu1 %4513  ;;  %4120 = vperm.xlu1 %16915, %v17143_v55   ;;  %v13216_v49 = vld [vmem:[%s23137_s17 + $0x1f8] sm:$0xff] }
 0x7fb   : > { %4607 = vst.msk [vmem:[#allocation2 + $0x30] sm:$0xff] %vm22712_vm8, %v4514_v39  ;;  %v13011_v39 = vld [vmem:[%s23137_s17 + $0x90] sm:$0xff] }
 0x7fd   : > { %v4780_v1 = vld [vmem:[#allocation2 + $0x48] sm:$0xff] }
 0x7fe   : > { %v4518_v19 = vpop.permute.xlu1 %4517  ;;  %v4775_v52 = vld [vmem:[#allocation2 + $0x20] sm:$0xff] }
 0x7ff   : > { %4609 = vst.msk [vmem:[#allocation2 + $0x40] sm:$0xff] %vm22712_vm8, %v4518_v19  ;;  %14834 = vmatmul.mubr.msk.f32.gmra.mrb[100].mxu0 %vm22833_vm1, %v4775_v52  ;;  %v13012_v19 = vld [vmem:[%s23137_s17 + $0x98] sm:$0xff]  ;;  %v609_v52 = vadd.s32 48, %v19699_v8 }
 0x800   : > { %14836 = vmatprep.mubr.msk.f32.mxu0 %vm22833_vm1, %v4776_v11  ;;  %v4637_v11 = vld [vmem:[#allocation2 + $0xf] sm:$0xff] }
 0x802   : > { %v4522_v2 = vpop.permute.xlu1 %4521  ;;  %v4524_v54 = vpop.permute.xlu0 %4523  ;;  %v4777_v3 = vld [vmem:[#allocation2 + $0x30] sm:$0xff] }
 0x803   : > { %4611 = vst.msk [vmem:[#allocation2 + $0x50] sm:$0xff] %vm22712_vm8, %v4522_v2  ;;  %4612 = vst.msk [vmem:[#allocation2 + $0x58] sm:$0xff] %vm22712_vm8, %v4524_v54  ;;  %14837 = vmatmul.mubr.msk.f32.gmra.mrb[102].mxu0 %vm22833_vm1, %v4777_v3  ;;  %v19739_v54 = vld [vmem:[#allocation2 + $0x17] sm:$0xff]  ;;  %v667_v3 = vand.u32 15, %v607_v59  ;;  %v617_v59 = vadd.s32 112, %v19699_v8 }
 0x804   : > { %14839 = vmatprep.mubr.msk.f32.mxu0 %vm22833_vm1, %v4778_v23  ;;  %v16030_v23 = vpack.c.bf16 %v13012_v19, %v13011_v39 }
 0x805   : > { %vm19753_vm11 = vcmp.ge.s32.totalorder %v667_v3, 1 }
 0x806   : > { %v4526_v38 = vpop.permute.xlu1 %4525  ;;  %v4779_v29 = vld [vmem:[#allocation2 + $0x40] sm:$0xff] }
 0x807   : > { %4613 = vst.msk [vmem:[#allocation2 + $0x60] sm:$0xff] %vm22712_vm8, %v4526_v38  ;;  %14840 = vmatmul.mubr.msk.f32.gmra.mrb[104].mxu0 %vm22833_vm1, %v4779_v29  ;;  %v13013_v38 = vld [vmem:[%s23137_s17 + $0xa0] sm:$0xff]  ;;  %v13014_v29 = vld [vmem:[%s23137_s17 + $0xa8] sm:$0xff] }
 0x808   : > { %14842 = vmatprep.mubr.msk.f32.mxu0 %vm22833_vm1, %v4780_v1 }
 0x80a   : > { %v4530_v25 = vpop.permute.xlu1 %4529  ;;  %v4781_v18 = vld [vmem:[#allocation2 + $0x50] sm:$0xff]  ;;  %v4782_v27 = vld [vmem:[#allocation2 + $0x58] sm:$0xff] }
 0x80b   : > { %4615 = vst.msk [vmem:[#allocation2 + $0x70] sm:$0xff] %vm22712_vm8, %v4530_v25  ;;  %14843 = vmatmul.mubr.msk.f32.gmra.mrb[106].mxu0 %vm22833_vm1, %v4781_v18  ;;  %v4734_v25 = vsel %vm19735_vm10, %v19739_v54, 0.0  ;;  %v681_v18 = vand.u32 15, %v609_v52  ;;  %v19823_v14 = vld [vmem:[#allocation2 + $0x57] sm:$0xff] }
 0x80c   : > { %v4528_v46 = vpop.permute.xlu0 %4527  ;;  %14845 = vmatprep.mubr.msk.f32.mxu0 %vm22833_vm1, %v4782_v27  ;;  %v23208_v27 = vld [vmem:[#allocation52_spill] sm:$0xff] }
 0x80d   : > { %4614 = vst.msk [vmem:[#allocation2 + $0x68] sm:$0xff] %vm22712_vm8, %v4528_v46  ;;  %vm19774_vm12 = vcmp.ge.s32.totalorder %v681_v18, 1 }
 0x80e   : > { %v4534_v20 = vpop.permute.xlu1 %4533  ;;  %v4783_v42 = vld [vmem:[#allocation2 + $0x60] sm:$0xff] }
 0x80f   : > { %4617 = vst.msk [vmem:[#allocation2 + $0x80] sm:$0xff] %vm22712_vm8, %v4534_v20  ;;  %14846 = vmatmul.mubr.msk.f32.gmra.mrb[108].mxu0 %vm22833_vm1, %v4783_v42  ;;  %v23209_v20 = vmov 0  ;;  %v19757_v42 = vld [vmem:[#allocation2 + $0x27] sm:$0xff] }
 0x810   : > { %v23210_v20 = vsel %vm19753_vm11, 4294967295, %v23209_v20 }
 0x812   : > { %v4538_v51 = vpop.permute.xlu1 %4537  ;;  %v4785_v45 = vld [vmem:[#allocation2 + $0x70] sm:$0xff] }
 0x813   : > { %4619 = vst.msk [vmem:[#allocation2 + $0x90] sm:$0xff] %vm22712_vm8, %v4538_v51  ;;  %v611_v51 = vadd.s32 64, %v19699_v8 }
 0x814   : > { %v4784_v9 = vld [vmem:[#allocation2 + $0x68] sm:$0xff] }
 0x815   : > { %14848 = vmatprep.mubr.msk.f32.mxu0 %vm22833_vm1, %v4784_v9  ;;  %v16034_v9 = vpack.c.bf16 %v13014_v29, %v13013_v38  ;;  %v23220_v38 = vmov 0  ;;  %v19842_v29 = vld [vmem:[#allocation2 + $0x67] sm:$0xff] }
 0x816   : > { %v4532_v57 = vpop.permute.xlu0 %4531  ;;  %14849 = vmatmul.mubr.msk.f32.gmra.mrb[110].mxu0 %vm22833_vm1, %v4785_v45  ;;  %v4787_v10 = vld [vmem:[#allocation2 + $0x80] sm:$0xff] }
 0x817   : > { %4616 = vst.msk [vmem:[#allocation2 + $0x78] sm:$0xff] %vm22712_vm8, %v4532_v57  ;;  %v19761_v57 = vld [vmem:[#allocation2 + $0x1f] sm:$0xff] }
 0x819   : > { %v4542_v13 = vpop.permute.xlu1 %4541 }
 0x81a   : > { %4621 = vst.msk [vmem:[#allocation2 + $0xa0] sm:$0xff] %vm22712_vm8, %v4542_v13  ;;  %v4789_v56 = vld [vmem:[#allocation2 + $0x90] sm:$0xff] }
 0x81b   : > { %v13015_v13 = vld [vmem:[%s23137_s17 + $0xb0] sm:$0xff] }
 0x81e   : > { %v4786_v48 = vld [vmem:[#allocation2 + $0x78] sm:$0xff] }
 0x81f   : > { %14851 = vmatprep.mubr.msk.f32.mxu0 %vm22833_vm1, %v4786_v48  ;;  %v13016_v48 = vld [vmem:[%s23137_s17 + $0xb8] sm:$0xff] }
 0x820   : > { %v4536_v22 = vpop.permute.xlu0 %4535  ;;  %14852 = vmatmul.mubr.msk.f32.gmra.mrb[112].mxu0 %vm22833_vm1, %v4787_v10 }
 0x821   : > { %4618 = vst.msk [vmem:[#allocation2 + $0x88] sm:$0xff] %vm22712_vm8, %v4536_v22  ;;  %v4791_v32 = vld [vmem:[#allocation2 + $0xa0] sm:$0xff]  ;;  %v23211_v22 = vmov 0 }
 0x822   : > { %v23212_v22 = vsel %vm19774_vm12, 4294967295, %v23211_v22 }
 0x823   : > { %v4546_v15 = vpop.permute.xlu1 %4545 }
 0x824   : > { %4623 = vst.msk [vmem:[#allocation2 + $0xb0] sm:$0xff] %vm22712_vm8, %v4546_v15  ;;  %v23213_v15 = vld [vmem:[#allocation48_spill] sm:$0xff] }
 0x828   : > { %v4788_v7 = vld [vmem:[#allocation2 + $0x88] sm:$0xff] }
 0x829   : > { %14854 = vmatprep.mubr.msk.f32.mxu0 %vm22833_vm1, %v4788_v7 }
 0x82a   : > { %v4540_v36 = vpop.permute.xlu0 %4539  ;;  %14855 = vmatmul.mubr.msk.f32.gmra.mrb[114].mxu0 %vm22833_vm1, %v4789_v56 }
 0x82b   : > { %4620 = vst.msk [vmem:[#allocation2 + $0x98] sm:$0xff] %vm22712_vm8, %v4540_v36  ;;  %v4793_v6 = vld [vmem:[#allocation2 + $0xb0] sm:$0xff] }
 0x82c   : > { %v19781_v36 = vld [vmem:[#allocation2 + $0x37] sm:$0xff] }
 0x82d   : > { %v4550_v26 = vpop.permute.xlu1 %4549 }
 0x82e   : > { %4625 = vst.msk [vmem:[#allocation2 + $0xc0] sm:$0xff] %vm22712_vm8, %v4550_v26  ;;  %v695_v26 = vand.u32 15, %v611_v51  ;;  %v23222_v51 = vmov 0 }
 0x830   : > { %vm19800_vm13 = vcmp.ge.s32.totalorder %v695_v26, 1  ;;  %v19877_v26 = vld [vmem:[#allocation2 + $0x7f] sm:$0xff] }
 0x832   : > { %v4790_v47 = vld [vmem:[#allocation2 + $0x98] sm:$0xff] }
 0x833   : > { %14857 = vmatprep.mubr.msk.f32.mxu0 %vm22833_vm1, %v4790_v47  ;;  %v613_v47 = vadd.s32 80, %v19699_v8 }
 0x834   : > { %v4544_v12 = vpop.permute.xlu0 %4543  ;;  %14858 = vmatmul.mubr.msk.f32.gmra.mrb[116].mxu0 %vm22833_vm1, %v4791_v32  ;;  %v16038_v32 = vpack.c.bf16 %v13016_v48, %v13015_v13  ;;  %v621_v13 = vadd.s32 144, %v19699_v8  ;;  %v19862_v48 = vld [vmem:[#allocation2 + $0x6f] sm:$0xff] }
 0x835   : > { %4622 = vst.msk [vmem:[#allocation2 + $0xa8] sm:$0xff] %vm22712_vm8, %v4544_v12  ;;  %v4795_v62 = vld [vmem:[#allocation2 + $0xc0] sm:$0xff] }
 0x837   : > { %v4554_v33 = vpop.permute.xlu1 %4553 }
 0x838   : > { %4627 = vst.msk [vmem:[#allocation2 + $0xd0] sm:$0xff] %vm22712_vm8, %v4554_v33  ;;  %v19785_v33 = vld [vmem:[#allocation2 + $0x2f] sm:$0xff] }
 0x83c   : > { %v4792_v34 = vld [vmem:[#allocation2 + $0xa8] sm:$0xff] }
 0x83d   : > { %14860 = vmatprep.mubr.msk.f32.mxu0 %vm22833_vm1, %v4792_v34  ;;  %v13049_v34 = vld [vmem:[%s23137_s17 + $0xc0] sm:$0xff] }
 0x83e   : > { %v4548_v50 = vpop.permute.xlu0 %4547  ;;  %14861 = vmatmul.mubr.msk.f32.gmra.mrb[118].mxu0 %vm22833_vm1, %v4793_v6  ;;  %v13050_v6 = vld [vmem:[%s23137_s17 + $0xc8] sm:$0xff] }
 0x83f   : > { %4624 = vst.msk [vmem:[#allocation2 + $0xb8] sm:$0xff] %vm22712_vm8, %v4548_v50  ;;  %v19684_v4 = vld [vmem:[#allocation2 + $0xd0] sm:$0xff]  ;;  %v4738_v50 = vsel %vm19774_vm12, %v19781_v36, 0.0  ;;  %v19808_v24 = vpack.c.bf16 %v13050_v6, %v13049_v34  ;;  %v625_v6 = vadd.s32 176, %v19699_v8 }
 0x841   : > { %v4558_v28 = vpop.permute.xlu1 %4557 }
 0x842   : > { %4629 = vst.msk [vmem:[#allocation2 + $0xe0] sm:$0xff] %vm22712_vm8, %v4558_v28 }
 0x845   : > { %v4562_v0 = vpop.permute.xlu1 %4561 }
 0x846   : > { %4631 = vst.msk [vmem:[#allocation2 + $0xf0] sm:$0xff] %vm22712_vm8, %v4562_v0  ;;  %v4794_v37 = vld [vmem:[#allocation2 + $0xb8] sm:$0xff] }
 0x847   : > { %14863 = vmatprep.mubr.msk.f32.mxu0 %vm22833_vm1, %v4794_v37 }
 0x848   : > { %v4552_v5 = vpop.permute.xlu0 %4551  ;;  %14864 = vmatmul.mubr.msk.f32.gmra.mrb[120].mxu0 %vm22833_vm1, %v4795_v62  ;;  %v19804_v62 = vld [vmem:[#allocation2 + $0x47] sm:$0xff] }
 0x849   : > { %4626 = vst.msk [vmem:[#allocation2 + $0xc8] sm:$0xff] %vm22712_vm8, %v4552_v5  ;;  %v19695_v21 = vld [vmem:[#allocation2 + $0xe0] sm:$0xff]  ;;  %v709_v5 = vand.u32 15, %v613_v47  ;;  %v4740_v40 = vsel %vm19800_vm13, %v19804_v62, 0.0 }
 0x84a   : > { %23198 = vst [vmem:[#allocation43_spill] sm:$0xff] %v19695_v21 }
 0x84b   : > { %vm19819_vm14 = vcmp.ge.s32.totalorder %v709_v5, 1  ;;  %v19904_v5 = vld [vmem:[#allocation2 + $0xa7] sm:$0xff] }
 0x84c   : > { %v23218_v44 = vsel %vm19819_vm14, 4294967295, %v23217_v44  ;;  %v4742_v3 = vsel %vm19819_vm14, %v19823_v14, 0.0 }
 0x84d   : > { %v19706_v61 = vld [vmem:[#allocation2 + $0xf0] sm:$0xff] }
 0x84e   : > { %23200 = vst [vmem:[#allocation32_spill] sm:$0xff] %v19706_v61 }
 0x850   : > { %v4796_v43 = vld [vmem:[#allocation2 + $0xc8] sm:$0xff] }
 0x851   : > { %14866 = vmatprep.mubr.msk.f32.mxu0 %vm22833_vm1, %v4796_v43  ;;  %v615_v43 = vadd.s32 96, %v19699_v8 }
 0x852   : > { %v4556_v63 = vpop.permute.xlu0 %4555  ;;  %14867 = vmatmul.mubr.msk.f32.gmra.mrb[122].mxu0 %vm22833_vm1, %v19684_v4 }
 0x853   : > { %4628 = vst.msk [vmem:[#allocation2 + $0xd8] sm:$0xff] %vm22712_vm8, %v4556_v63  ;;  %v23216_v63 = vld [vmem:[#allocation91_spill] sm:$0xff]  ;;  %v723_v17 = vand.u32 15, %v615_v43  ;;  %v793_v43 = vand.u32 15, %v625_v6 }
 0x855   : > { %vm19838_vm15 = vcmp.ge.s32.totalorder %v723_v17, 1  ;;  %vm19915_vm6 = vcmp.ge.s32.totalorder %v793_v43, 1  ;;  %v19919_v17 = vld [vmem:[#allocation2 + $0xb7] sm:$0xff] }
 0x856   : > { %v4560_v30 = vpop.permute.xlu0 %4559  ;;  %v23221_v38 = vsel %vm19838_vm15, 4294967295, %v23220_v38 }
 0x857   : > { %4630 = vst.msk [vmem:[#allocation2 + $0xe8] sm:$0xff] %vm22712_vm8, %v4560_v30 }
 0x85a   : > { %v4564_v53 = vpop.permute.xlu0 %4563  ;;  %v19690_v31 = vld [vmem:[#allocation2 + $0xd8] sm:$0xff] }
 0x85b   : > { %4632 = vst.msk [vmem:[#allocation2 + $0xf8] sm:$0xff] %vm22712_vm8, %v4564_v53  ;;  %14869 = vmatprep.mubr.msk.f32.mxu0 %vm22833_vm1, %v19690_v31  ;;  %v19811_v53 = vld [vmem:[#allocation2 + $0x3f] sm:$0xff] }
 0x85c   : > { %14870 = vmatmul.mubr.msk.f32.gmra.mrb[124].mxu0 %vm22833_vm1, %v19695_v21 }
 0x85e   : > { %v4566_v60 = vpop.permute.xlu1 %4565  ;;  %v19701_v58 = vld [vmem:[#allocation2 + $0xe8] sm:$0xff] }
 0x85f   : > { %23199 = vst [vmem:[#allocation90_spill] sm:$0xff] %v19701_v58  ;;  %4633 = vst.msk [vmem:[#allocation2 + $0x100] sm:$0xff] %vm22712_vm8, %v4566_v60  ;;  %14872 = vmatprep.mubr.msk.f32.mxu0 %vm22833_vm1, %v19701_v58  ;;  %v20015_v58 = vld [vmem:[#allocation2 + $0x19] sm:$0xff] }
 0x860   : > { %14873 = vmatmul.mubr.msk.f32.gmra.mrb[126].mxu0 %vm22833_vm1, %v19706_v61  ;;  %v13053_v61 = vld [vmem:[%s23137_s17 + $0xe0] sm:$0xff]  ;;  %23244 = vst [vmem:[#allocation85_spill] sm:$0xff] %v20015_v58 }
 0x862   : > { %v19712_v55 = vld [vmem:[#allocation2 + $0xf8] sm:$0xff] }
 0x863   : > { %23201 = vst [vmem:[#allocation93_spill] sm:$0xff] %v19712_v55  ;;  %14875 = vmatprep.mubr.msk.f32.mxu0 %vm22833_vm1, %v19712_v55 }
 0x866   : > { %v19723_v41 = vld [vmem:[#allocation2 + $0x100] sm:$0xff] }
 0x867   : > { %23205 = vst [vmem:[#allocation95_spill] sm:$0xff] %v19723_v41  ;;  %14876 = vmatmul.mubr.msk.f32.gmra.mrb[128].mxu0 %vm22833_vm1, %v19723_v41 }
 0x868   : > { %14894 = vmatprep.mubr.msk.f32.mxu0 %vm22833_vm1, %v4732_v35  ;;  %v23219_v35 = vld [vmem:[#allocation46_spill] sm:$0xff] }
 0x86b   : > { %v4341_v1 = vpop.permute.xlu0 %4340  ;;  %14895 = vmatmul.mubr.msk.f32.vlgmr.msra.gmra.mrb[34].mxu0 %vm22833_vm1, %v4637_v11  ;;  %v19829_v11 = vld [vmem:[#allocation2 + $0x4f] sm:$0xff] }
 0x86c   : > { %v4377_v46 = vmul.f32 %v4341_v1, %v23208_v27  ;;  %14897 = vmatprep.mubr.msk.f32.mxu0 %vm22833_vm1, %v4734_v25  ;;  %16029 = vmatpush3.bf16.msra.mxu0 %v19636_v16  ;;  %v4736_v16 = vsel %vm19753_vm11, %v19757_v42, 0.0  ;;  %v737_v1 = vand.u32 15, %v617_v59  ;;  %v619_v25 = vadd.s32 128, %v19699_v8 }
 0x86d   : > { %16031 = vmatprep.subr.bf16.mxu0 %v16030_v23 }
 0x86e   : > { %v4409_v45 = vadd.f32 1.0, %v4377_v46  ;;  %v4744_v46 = vsel %vm19838_vm15, %v19842_v29, 0.0  ;;  %vm19855_vm2 = vcmp.ge.s32.totalorder %v737_v1, 1  ;;  %v631_v1 = vadd.s32 224, %v19699_v8 }
 0x86f   : > { %v4116_v10 = vpop.permute.xlu1 %4115  ;;  %14898 = vmatmul.mubr.msk.f32.gmra.mrb[100].mxu0 %vm22833_vm1, %v19761_v57  ;;  %v23223_v51 = vsel %vm19855_vm2, 4294967295, %v23222_v51 }
 0x870   : > { %v4441_v7 = vmul.f32 %v4409_v45, %v23213_v15  ;;  %v4153_v56 = vmul.f32 %v4116_v10, %v23213_v15  ;;  %14900 = vmatprep.mubr.msk.f32.mxu0 %vm22833_vm1, %v4736_v16  ;;  %16033 = vmatpush3.bf16.msra.mxu0 %v16030_v23  ;;  %v751_v45 = vand.u32 15, %v619_v25  ;;  %v23224_v16 = vmov 0  ;;  %v19874_v15 = vld [vmem:[#allocation2 + $0x87] sm:$0xff]  ;;  %v19937_v25 = vld [vmem:[#allocation2 + $0xbf] sm:$0xff] }
 0x871   : > { %16035 = vmatprep.subr.bf16.mxu0 %v16034_v9 }
 0x872   : > { %v4185_v12 = vadd.f32 1.0, %v4153_v56  ;;  %4567 = vrot.lane.b32.xlu0 %v4441_v7, %s17316_s16  ;;  %vm19870_vm3 = vcmp.ge.s32.totalorder %v751_v45, 1  ;;  %v765_v7 = vand.u32 15, %v621_v13  ;;  %v623_v56 = vadd.s32 160, %v19699_v8  ;;  %v19949_v45 = vld [vmem:[#allocation2 + $0xd7] sm:$0xff] }
 0x873   : > { %14901 = vmatmul.mubr.msk.f32.gmra.mrb[102].mxu0 %vm22833_vm1, %v19785_v33  ;;  %v23225_v16 = vsel %vm19870_vm3, 4294967295, %v23224_v16  ;;  %v4748_v47 = vsel %vm19870_vm3, %v19874_v15, 0.0  ;;  %v835_v13 = vand.u32 15, %v631_v1  ;;  %v606_v1 = vadd.s32 24, %v19699_v8 }
 0x874   : > { %v4217_v28 = vmul.f32 %v4185_v12, %v23208_v27  ;;  %v4345_v0 = vpop.permute.xlu1 %4344  ;;  %14903 = vmatprep.mubr.msk.f32.mxu0 %vm22833_vm1, %v4738_v50  ;;  %16037 = vmatpush3.bf16.msra.mxu0 %v16034_v9  ;;  %v19846_v27 = vld [vmem:[#allocation2 + $0x5f] sm:$0xff]  ;;  %v19859_v9 = vld [vmem:[#allocation2 + $0x77] sm:$0xff]  ;;  %vm19885_vm4 = vcmp.ge.s32.totalorder %v765_v7, 1  ;;  %v779_v34 = vand.u32 15, %v623_v56  ;;  %v19892_v50 = vld [vmem:[#allocation2 + $0x8f] sm:$0xff] }
 0x875   : > { %v4378_v30 = vmul.f32 %v4345_v0, %v23216_v63  ;;  %16039 = vmatprep.subr.bf16.mxu0 %v16038_v32  ;;  %v4746_v10 = vsel %vm19855_vm2, %v19859_v9, 0.0  ;;  %v19889_v12 = vld [vmem:[#allocation2 + $0x97] sm:$0xff]  ;;  %v23228_v0 = vmov 0  ;;  %v19952_v7 = vld [vmem:[#allocation2 + $0xcf] sm:$0xff]  ;;  %vm19960_vm8 = vcmp.ge.s32.totalorder %v835_v13, 1  ;;  %v19990_v13 = vld [vmem:[#allocation2 + $0xff] sm:$0xff] }
 0x876   : > { %4473 = vst.msk [vmem:[#allocation2 + $0x108] sm:$0xff] %vm22711_vm0, %v4217_v28  ;;  %v4750_v28 = vsel %vm19885_vm4, %v19889_v12, 0.0  ;;  %vm19900_vm5 = vcmp.ge.s32.totalorder %v779_v34, 1  ;;  %v19964_v34 = vld [vmem:[#allocation2 + $0xe7] sm:$0xff] }
 0x877   : > { %v4410_v60 = vadd.f32 1.0, %v4378_v30  ;;  %14904 = vmatmul.mubr.msk.f32.gmra.mrb[104].mxu0 %vm22833_vm1, %v19811_v53  ;;  %v23229_v0 = vsel %vm19900_vm5, 4294967295, %v23228_v0  ;;  %v19907_v30 = vld [vmem:[#allocation2 + $0x9f] sm:$0xff]  ;;  %v4760_v43 = vsel %vm19960_vm8, %v19964_v34, 0.0 }
 0x878   : > { %14906 = vmatprep.mubr.msk.f32.mxu0 %vm22833_vm1, %v4740_v40  ;;  %16041 = vmatpush3.bf16.msra.mxu0 %v16038_v32  ;;  %v23226_v32 = vmov 0  ;;  %v23230_v40 = vmov 0 }
 0x879   : > { %v4442_v39 = vmul.f32 %v4410_v60, %v23219_v35  ;;  %v4121_v19 = vpop.permute.xlu1 %4120  ;;  %16043 = vmatprep.subr.bf16.mxu0 %v19808_v24  ;;  %v23227_v32 = vsel %vm19885_vm4, 4294967295, %v23226_v32  ;;  %v4752_v60 = vsel %vm19900_vm5, %v19904_v5, 0.0  ;;  %v23231_v40 = vsel %vm19915_vm6, 4294967295, %v23230_v40 }
 0x87a   : > { %v4154_v52 = vmul.f32 %v4121_v19, %v23219_v35  ;;  %v629_v35 = vadd.s32 208, %v19699_v8  ;;  %v4754_v19 = vsel %vm19915_vm6, %v19919_v17, 0.0 }
 0x87b   : > { %4569 = vrot.lane.b32.xlu0 %v4442_v39, %s17316_s16  ;;  %14907 = vmatmul.mubr.msk.f32.gmra.mrb[106].mxu0 %vm22833_vm1, %v19829_v11  ;;  %v19922_v39 = vld [vmem:[#allocation2 + $0xaf] sm:$0xff] }
 0x87c   : > { %v4186_v23 = vadd.f32 1.0, %v4154_v52  ;;  %14909 = vmatprep.mubr.msk.f32.mxu0 %vm22833_vm1, %v4742_v3  ;;  %v23232_v52 = vmov 0  ;;  %v19934_v3 = vld [vmem:[#allocation2 + $0xc7] sm:$0xff] }
 0x87e   : > { %v4218_v18 = vmul.f32 %v4186_v23, %v23216_v63  ;;  %v627_v63 = vadd.s32 192, %v19699_v8  ;;  %v821_v23 = vand.u32 15, %v629_v35  ;;  %v19981_v35 = vld [vmem:[#allocation2 + $0xef] sm:$0xff] }
 0x87f   : > { %14910 = vmatmul.mubr.msk.f32.gmra.mrb[108].mxu0 %vm22833_vm1, %v19846_v27 }
 0x880   : > { %4474 = vst.msk [vmem:[#allocation2 + $0x110] sm:$0xff] %vm22711_vm0, %v4218_v18  ;;  %14912 = vmatprep.mubr.msk.f32.mxu0 %vm22833_vm1, %v4744_v46  ;;  %v807_v59 = vand.u32 15, %v627_v63  ;;  %vm19945_vm0 = vcmp.ge.s32.totalorder %v821_v23, 1  ;;  %v23234_v46 = vmov 0  ;;  %v604_v63 = vadd.s32 8, %v19699_v8 }
 0x881   : > { %v23235_v46 = vsel %vm19945_vm0, 4294967295, %v23234_v46  ;;  %v4758_v56 = vsel %vm19945_vm0, %v19949_v45, 0.0 }
 0x882   : > { %vm19930_vm7 = vcmp.ge.s32.totalorder %v807_v59, 1  ;;  %v19979_v59 = vld [vmem:[#allocation2 + $0xf7] sm:$0xff]  ;;  %v646_v23 = vand.u32 15, %v604_v63  ;;  %v660_v63 = vand.u32 15, %v606_v1  ;;  %v23245_v1 = vmov 0 }
 0x883   : > { %14913 = vmatmul.mubr.msk.f32.gmra.mrb[110].mxu0 %vm22833_vm1, %v19862_v48  ;;  %v23233_v52 = vsel %vm19930_vm7, 4294967295, %v23232_v52  ;;  %v4756_v18 = vsel %vm19930_vm7, %v19934_v3, 0.0 }
 0x884   : > { %14915 = vmatprep.mubr.msk.f32.mxu0 %vm22833_vm1, %v4746_v10  ;;  %v633_v10 = vadd.s32 240, %v19699_v8 }
 0x886   : > { %v849_v6 = vand.u32 15, %v633_v10  ;;  %v13051_v10 = vld [vmem:[%s23137_s17 + $0xd0] sm:$0xff] }
 0x887   : > { %14916 = vmatmul.mubr.msk.f32.gmra.mrb[112].mxu0 %vm22833_vm1, %v19877_v26 }
 0x888   : > { %14918 = vmatprep.mubr.msk.f32.mxu0 %vm22833_vm1, %v4748_v47  ;;  %v23236_v47 = vmov 0  ;;  %vm19975_vm0 = vcmp.ge.s32.totalorder %v849_v6, 1  ;;  %v23241_v6 = vmov 0 }
 0x889   : > { %v23237_v47 = vsel %vm19960_vm8, 4294967295, %v23236_v47  ;;  %vm20017_vm8 = vcmp.le.s32.totalorder %v660_v63, 14  ;;  %v13055_v63 = vld [vmem:[%s23137_s17 + $0xf0] sm:$0xff] }
 0x88a   : > { %v23246_v1 = vsel %vm20017_vm8, 4294967295, %v23245_v1 }
 0x88b   : > { %14919 = vmatmul.mubr.msk.f32.gmra.mrb[114].mxu0 %vm22833_vm1, %v19892_v50  ;;  %23247 = vst [vmem:[#allocation97_spill] sm:$0xff] %v23246_v1  ;;  %v612_v1 = vadd.s32 72, %v19699_v8 }
 0x88c   : > { %14921 = vmatprep.mubr.msk.f32.mxu0 %vm22833_vm1, %v4750_v28  ;;  %v19966_v28 = vld [vmem:[#allocation2 + $0xdf] sm:$0xff] }
 0x88f   : > { %14922 = vmatmul.mubr.msk.f32.gmra.mrb[116].mxu0 %vm22833_vm1, %v19907_v30 }
 0x890   : > { %14924 = vmatprep.mubr.msk.f32.mxu0 %vm22833_vm1, %v4752_v60  ;;  %v23238_v60 = vmov 0 }
 0x891   : > { %v23239_v60 = vsel %vm19975_vm0, 4294967295, %v23238_v60 }
 0x892   : > { %23240 = vst [vmem:[#allocation84_spill] sm:$0xff] %v23239_v60 }
 0x893   : > { %14925 = vmatmul.mubr.msk.f32.gmra.mrb[118].mxu0 %vm22833_vm1, %v19922_v39 }
 0x894   : > { %14927 = vmatprep.mubr.msk.f32.mxu0 %vm22833_vm1, %v4754_v19  ;;  %v4762_v19 = vsel %vm19975_vm0, %v19979_v59, 0.0  ;;  %vm20000_vm0 = vcmp.le.s32.totalorder %v646_v23, 14  ;;  %v13054_v23 = vld [vmem:[%s23137_s17 + $0xe8] sm:$0xff] }
 0x895   : > { %v23242_v6 = vsel %vm20000_vm0, 4294967295, %v23241_v6 }
 0x896   : > { %23243 = vst [vmem:[#allocation96_spill] sm:$0xff] %v23242_v6  ;;  %v20037_v6 = vld [vmem:[#allocation2 + $0x29] sm:$0xff] }
 0x897   : > { %14928 = vmatmul.mubr.msk.f32.gmra.mrb[120].mxu0 %vm22833_vm1, %v19937_v25  ;;  %23249 = vst [vmem:[#allocation98_spill] sm:$0xff] %v20037_v6 }
 0x898   : > { %14930 = vmatprep.mubr.msk.f32.mxu0 %vm22833_vm1, %v4756_v18  ;;  %v5455_v18 = vld [vmem:[#allocation2 + $0x9] sm:$0xff] }
 0x89b   : > { %14931 = vmatmul.mubr.msk.f32.gmra.mrb[122].mxu0 %vm22833_vm1, %v19952_v7 }
 0x89c   : > { %14933 = vmatprep.mubr.msk.f32.mxu0 %vm22833_vm1, %v4758_v56  ;;  %v13052_v56 = vld [vmem:[%s23137_s17 + $0xd8] sm:$0xff] }
 0x89d   : > { %v16046_v41 = vpack.c.bf16 %v13052_v56, %v13051_v10  ;;  %v610_v56 = vadd.s32 56, %v19699_v8 }
 0x89f   : > { %14934 = vmatmul.mubr.msk.f32.gmra.mrb[124].mxu0 %vm22833_vm1, %v19966_v28 }
 0x8a0   : > { %14936 = vmatprep.mubr.msk.f32.mxu0 %vm22833_vm1, %v4760_v43  ;;  %v5456_v43 = vld [vmem:[#allocation2 + $0x11] sm:$0xff] }
 0x8a1   : > { %v5552_v55 = vsel %vm20000_vm0, %v5456_v43, 0.0  ;;  %v16050_v43 = vpack.c.bf16 %v13054_v23, %v13053_v61  ;;  %v20043_v61 = vld [vmem:[#allocation2 + $0x31] sm:$0xff]  ;;  %v688_v23 = vand.u32 15, %v610_v56  ;;  %v13090_v56 = vld [vmem:[%s23137_s17 + $0x108] sm:$0xff] }
 0x8a2   : > { %23253 = vst [vmem:[#allocation99_spill] sm:$0xff] %v20043_v61 }
 0x8a3   : > { %14937 = vmatmul.mubr.msk.f32.gmra.mrb[126].mxu0 %vm22833_vm1, %v19981_v35 }
 0x8a4   : > { %14939 = vmatprep.mubr.msk.f32.mxu0 %vm22833_vm1, %v4762_v19  ;;  %v608_v19 = vadd.s32 40, %v19699_v8 }
 0x8a6   : > { %v674_v10 = vand.u32 15, %v608_v19  ;;  %v13056_v19 = vld [vmem:[%s23137_s17 + $0xf8] sm:$0xff] }
 0x8a7   : > { %14940 = vmatmul.mubr.msk.f32.gmra.mrb[128].mxu0 %vm22833_vm1, %v19990_v13 }
 0x8a8   : > { %14958 = vmatprep.mubr.msk.f32.mxu0 %vm22833_vm1, %v5455_v18  ;;  %v20021_v18 = vld [vmem:[#allocation2 + $0x21] sm:$0xff]  ;;  %vm20039_vm0 = vcmp.le.s32.totalorder %v674_v10, 14 }
 0x8a9   : > { %23248 = vst [vmem:[#allocation87_spill] sm:$0xff] %v20021_v18  ;;  %v13089_v10 = vld [vmem:[%s23137_s17 + $0x100] sm:$0xff] }
 0x8ab   : > { %14959 = vmatmul.mubr.msk.f32.vlgmr.msra.gmra.mrb[34].mxu0 %vm22833_vm1, %v5552_v55  ;;  %v5554_v55 = vsel %vm20017_vm8, %v20021_v18, 0.0  ;;  %v16054_v18 = vpack.c.bf16 %v13056_v19, %v13055_v63  ;;  %vm20060_vm8 = vcmp.le.s32.totalorder %v688_v23, 14  ;;  %v20064_v63 = vld [vmem:[#allocation2 + $0x41] sm:$0xff]  ;;  %v702_v19 = vand.u32 15, %v612_v1  ;;  %v20075_v23 = vld [vmem:[#allocation2 + $0x49] sm:$0xff]  ;;  %v20081_v1 = vld [vmem:[#allocation2 + $0x51] sm:$0xff] }
 0x8ac   : > { %14961 = vmatprep.mubr.msk.f32.mxu0 %vm22833_vm1, %v20015_v58  ;;  %16045 = vmatpush3.bf16.msra.mxu0 %v19808_v24  ;;  %v23250_v24 = vmov 0  ;;  %v20058_v58 = vld [vmem:[#allocation2 + $0x39] sm:$0xff]  ;;  %23260 = vst [vmem:[#allocation92_spill] sm:$0xff] %v20081_v1 }
 0x8ad   : > { %16047 = vmatprep.subr.bf16.mxu0 %v16046_v41  ;;  %v23251_v24 = vsel %vm20039_vm0, 4294967295, %v23250_v24 }
 0x8ae   : > { %23252 = vst [vmem:[#allocation88_spill] sm:$0xff] %v23251_v24  ;;  %v614_v24 = vadd.s32 88, %v19699_v8 }
 0x8af   : > { %14962 = vmatmul.mubr.msk.f32.gmra.mrb[100].mxu0 %vm22833_vm1, %v5554_v55  ;;  %v5556_v55 = vsel %vm20039_vm0, %v20043_v61, 0.0  ;;  %v20069_v61 = vpack.c.bf16 %v13090_v56, %v13089_v10  ;;  %vm20077_vm0 = vcmp.le.s32.totalorder %v702_v19, 14  ;;  %v20091_v56 = vld [vmem:[#allocation2 + $0x59] sm:$0xff]  ;;  %v23262_v19 = vmov 0 }
 0x8b0   : > { %14964 = vmatprep.mubr.msk.f32.mxu0 %vm22833_vm1, %v20037_v6  ;;  %16049 = vmatpush3.bf16.msra.mxu0 %v16046_v41  ;;  %v23254_v41 = vmov 0  ;;  %v23257_v6 = vmov 0  ;;  %v716_v21 = vand.u32 15, %v614_v24  ;;  %v5560_v10 = vsel %vm20077_vm0, %v20081_v1, 0.0  ;;  %23261 = vst [vmem:[#allocation101_spill] sm:$0xff] %v20091_v56  ;;  %v20097_v24 = vld [vmem:[#allocation2 + $0x61] sm:$0xff] }
 0x8b1   : > { %16051 = vmatprep.subr.bf16.mxu0 %v16050_v43  ;;  %v23255_v41 = vsel %vm20060_vm8, 4294967295, %v23254_v41  ;;  %v23258_v6 = vsel %vm20077_vm0, 4294967295, %v23257_v6  ;;  %23265 = vst [vmem:[#allocation28_spill] sm:$0xff] %v20097_v24  ;;  %v620_v1 = vadd.s32 136, %v19699_v8 }
 0x8b2   : > { %23256 = vst [vmem:[#allocation89_spill] sm:$0xff] %v23255_v41  ;;  %23259 = vst [vmem:[#allocation100_spill] sm:$0xff] %v23258_v6  ;;  %v618_v41 = vadd.s32 120, %v19699_v8  ;;  %v20112_v6 = vld [vmem:[#allocation2 + $0x71] sm:$0xff] }
 0x8b3   : > { %14965 = vmatmul.mubr.msk.f32.gmra.mrb[102].mxu0 %vm22833_vm1, %v5556_v55  ;;  %v5558_v55 = vsel %vm20060_vm8, %v20064_v63, 0.0  ;;  %vm20093_vm8 = vcmp.le.s32.totalorder %v716_v21, 14  ;;  %v23267_v21 = vmov 0  ;;  %23270 = vst [vmem:[#allocation68_spill] sm:$0xff] %v20112_v6 }
 0x8b4   : > { %14967 = vmatprep.mubr.msk.f32.mxu0 %vm22833_vm1, %v20058_v58  ;;  %16053 = vmatpush3.bf16.msra.mxu0 %v16050_v43  ;;  %v616_v43 = vadd.s32 104, %v19699_v8  ;;  %v23263_v19 = vsel %vm20093_vm8, 4294967295, %v23262_v19 }
 0x8b5   : > { %16055 = vmatprep.subr.bf16.mxu0 %v16054_v18  ;;  %23264 = vst [vmem:[#allocation64_spill] sm:$0xff] %v23263_v19 }
 0x8b7   : > { %14968 = vmatmul.mubr.msk.f32.gmra.mrb[104].mxu0 %vm22833_vm1, %v5558_v55  ;;  %v730_v55 = vand.u32 15, %v616_v43  ;;  %v744_v43 = vand.u32 15, %v618_v41  ;;  %v758_v41 = vand.u32 15, %v620_v1 }
 0x8b8   : > { %14970 = vmatprep.mubr.msk.f32.mxu0 %vm22833_vm1, %v20075_v23  ;;  %16057 = vmatpush3.bf16.msra.mxu0 %v16054_v18  ;;  %v5562_v18 = vsel %vm20093_vm8, %v20097_v24, 0.0  ;;  %v20127_v24 = vld [vmem:[#allocation2 + $0x81] sm:$0xff] }
 0x8b9   : > { %16059 = vmatprep.subr.bf16.mxu0 %v20069_v61  ;;  %vm20108_vm0 = vcmp.le.s32.totalorder %v730_v55, 14  ;;  %vm20123_vm8 = vcmp.le.s32.totalorder %v744_v43, 14  ;;  %v23272_v55 = vmov 0  ;;  %23275 = vst [vmem:[#allocation69_spill] sm:$0xff] %v20127_v24  ;;  %v23277_v43 = vmov 0 }
 0x8ba   : > { %v23268_v21 = vsel %vm20108_vm0, 4294967295, %v23267_v21  ;;  %v5564_v19 = vsel %vm20108_vm0, %v20112_v6, 0.0  ;;  %v23273_v55 = vsel %vm20123_vm8, 4294967295, %v23272_v55  ;;  %vm20138_vm0 = vcmp.le.s32.totalorder %v758_v41, 14  ;;  %v20142_v6 = vld [vmem:[#allocation2 + $0x91] sm:$0xff] }
 0x8bb   : > { %14971 = vmatmul.mubr.msk.f32.gmra.mrb[106].mxu0 %vm22833_vm1, %v5560_v10  ;;  %v20106_v10 = vld [vmem:[#allocation2 + $0x69] sm:$0xff]  ;;  %23269 = vst [vmem:[#allocation31_spill] sm:$0xff] %v23268_v21  ;;  %23274 = vst [vmem:[#allocation49_spill] sm:$0xff] %v23273_v55  ;;  %v5566_v21 = vsel %vm20123_vm8, %v20127_v24, 0.0  ;;  %v23278_v43 = vsel %vm20138_vm0, 4294967295, %v23277_v43  ;;  %v5568_v55 = vsel %vm20138_vm0, %v20142_v6, 0.0 }
 0x8bc   : > { %14973 = vmatprep.mubr.msk.f32.mxu0 %vm22833_vm1, %v20091_v56  ;;  %23266 = vst [vmem:[#allocation44_spill] sm:$0xff] %v20106_v10  ;;  %v622_v56 = vadd.s32 152, %v19699_v8  ;;  %23279 = vst [vmem:[#allocation22_spill] sm:$0xff] %v23278_v43  ;;  %v23282_v41 = vmov 0  ;;  %v20157_v24 = vld [vmem:[#allocation2 + $0xa1] sm:$0xff] }
 0x8bd   : > { %23280 = vst [vmem:[#allocation72_spill] sm:$0xff] %v20142_v6  ;;  %23285 = vst [vmem:[#allocation76_spill] sm:$0xff] %v20157_v24  ;;  %v20172_v6 = vld [vmem:[#allocation2 + $0xb1] sm:$0xff] }
 0x8be   : > { %v772_v1 = vand.u32 15, %v622_v56  ;;  %23290 = vst [vmem:[#allocation35_spill] sm:$0xff] %v20172_v6 }
 0x8bf   : > { %14974 = vmatmul.mubr.msk.f32.gmra.mrb[108].mxu0 %vm22833_vm1, %v5562_v18  ;;  %v20121_v18 = vld [vmem:[#allocation2 + $0x79] sm:$0xff] }
 0x8c0   : > { %14976 = vmatprep.mubr.msk.f32.mxu0 %vm22833_vm1, %v20106_v10  ;;  %23271 = vst [vmem:[#allocation66_spill] sm:$0xff] %v20121_v18  ;;  %v624_v10 = vadd.s32 168, %v19699_v8  ;;  %vm20153_vm8 = vcmp.le.s32.totalorder %v772_v1, 14  ;;  %v23287_v1 = vmov 0 }
 0x8c1   : > { %v23283_v41 = vsel %vm20153_vm8, 4294967295, %v23282_v41  ;;  %v5570_v43 = vsel %vm20153_vm8, %v20157_v24, 0.0  ;;  %v20187_v24 = vld [vmem:[#allocation2 + $0xc1] sm:$0xff] }
 0x8c2   : > { %23284 = vst [vmem:[#allocation61_spill] sm:$0xff] %v23283_v41  ;;  %v786_v56 = vand.u32 15, %v624_v10  ;;  %23294 = vst [vmem:[#allocation80_spill] sm:$0xff] %v20187_v24 }
 0x8c3   : > { %14977 = vmatmul.mubr.msk.f32.gmra.mrb[110].mxu0 %vm22833_vm1, %v5564_v19  ;;  %v20136_v19 = vld [vmem:[#allocation2 + $0x89] sm:$0xff] }
 0x8c4   : > { %14979 = vmatprep.mubr.msk.f32.mxu0 %vm22833_vm1, %v20121_v18  ;;  %23276 = vst [vmem:[#allocation20_spill] sm:$0xff] %v20136_v19  ;;  %v626_v18 = vadd.s32 184, %v19699_v8  ;;  %vm20168_vm0 = vcmp.le.s32.totalorder %v786_v56, 14  ;;  %v23291_v56 = vmov 0 }
 0x8c5   : > { %v23288_v1 = vsel %vm20168_vm0, 4294967295, %v23287_v1  ;;  %v5572_v41 = vsel %vm20168_vm0, %v20172_v6, 0.0  ;;  %v20202_v6 = vld [vmem:[#allocation2 + $0xd1] sm:$0xff] }
 0x8c6   : > { %23289 = vst [vmem:[#allocation77_spill] sm:$0xff] %v23288_v1  ;;  %v800_v10 = vand.u32 15, %v626_v18 }
 0x8c7   : > { %14980 = vmatmul.mubr.msk.f32.gmra.mrb[112].mxu0 %vm22833_vm1, %v5566_v21  ;;  %v20151_v21 = vld [vmem:[#allocation2 + $0x99] sm:$0xff] }
 0x8c8   : > { %14982 = vmatprep.mubr.msk.f32.mxu0 %vm22833_vm1, %v20136_v19  ;;  %23281 = vst [vmem:[#allocation73_spill] sm:$0xff] %v20151_v21  ;;  %v628_v19 = vadd.s32 200, %v19699_v8  ;;  %vm20183_vm8 = vcmp.le.s32.totalorder %v800_v10, 14  ;;  %v23296_v10 = vmov 0 }
 0x8c9   : > { %v23292_v56 = vsel %vm20183_vm8, 4294967295, %v23291_v56  ;;  %v5574_v1 = vsel %vm20183_vm8, %v20187_v24, 0.0  ;;  %v20217_v24 = vld [vmem:[#allocation2 + $0xe1] sm:$0xff] }
 0x8ca   : > { %23293 = vst [vmem:[#allocation29_spill] sm:$0xff] %v23292_v56  ;;  %v814_v18 = vand.u32 15, %v628_v19  ;;  %23303 = vst [vmem:[#allocation39_spill] sm:$0xff] %v20217_v24 }
 0x8cb   : > { %14983 = vmatmul.mubr.msk.f32.gmra.mrb[114].mxu0 %vm22833_vm1, %v5568_v55  ;;  %v20166_v55 = vld [vmem:[#allocation2 + $0xa9] sm:$0xff] }
 0x8cc   : > { %14985 = vmatprep.mubr.msk.f32.mxu0 %vm22833_vm1, %v20151_v21  ;;  %23286 = vst [vmem:[#allocation25_spill] sm:$0xff] %v20166_v55  ;;  %v630_v21 = vadd.s32 216, %v19699_v8  ;;  %vm20198_vm0 = vcmp.le.s32.totalorder %v814_v18, 14  ;;  %v23300_v18 = vmov 0 }
 0x8cd   : > { %v23297_v10 = vsel %vm20198_vm0, 4294967295, %v23296_v10  ;;  %v5576_v56 = vsel %vm20198_vm0, %v20202_v6, 0.0 }
 0x8ce   : > { %23298 = vst [vmem:[#allocation27_spill] sm:$0xff] %v23297_v10  ;;  %v828_v19 = vand.u32 15, %v630_v21  ;;  %v20225_v10 = vld [vmem:[#allocation2 + $0xe9] sm:$0xff] }
 0x8cf   : > { %14986 = vmatmul.mubr.msk.f32.gmra.mrb[116].mxu0 %vm22833_vm1, %v5570_v43  ;;  %v20181_v43 = vld [vmem:[#allocation2 + $0xb9] sm:$0xff]  ;;  %23304 = vst [vmem:[#allocation62_spill] sm:$0xff] %v20225_v10 }
 0x8d0   : > { %14988 = vmatprep.mubr.msk.f32.mxu0 %vm22833_vm1, %v20166_v55  ;;  %v632_v55 = vadd.s32 232, %v19699_v8  ;;  %vm20213_vm8 = vcmp.le.s32.totalorder %v828_v19, 14  ;;  %v20231_v19 = vld [vmem:[#allocation2 + $0xf1] sm:$0xff] }
 0x8d1   : > { %v23301_v18 = vsel %vm20213_vm8, 4294967295, %v23300_v18 }
 0x8d2   : > { %23302 = vst [vmem:[#allocation30_spill] sm:$0xff] %v23301_v18  ;;  %v842_v21 = vand.u32 15, %v632_v55  ;;  %v634_v18 = vadd.s32 248, %v19699_v8 }
 0x8d3   : > { %14989 = vmatmul.mubr.msk.f32.gmra.mrb[118].mxu0 %vm22833_vm1, %v5572_v41  ;;  %v20196_v41 = vld [vmem:[#allocation2 + $0xc9] sm:$0xff] }
 0x8d4   : > { %14991 = vmatprep.mubr.msk.f32.mxu0 %vm22833_vm1, %v20181_v43  ;;  %23295 = vst [vmem:[#allocation81_spill] sm:$0xff] %v20196_v41  ;;  %vm20227_vm0 = vcmp.le.s32.totalorder %v842_v21, 14  ;;  %v856_v21 = vand.u32 15, %v634_v18  ;;  %v5977_v18 = vsel %vm19716_vm9, %v19739_v54, 0.0 }
 0x8d5   : > { %v5580_v55 = vsel %vm20227_vm0, %v20231_v19, 0.0 }
 0x8d6   : > { %vm20245_vm7 = vcmp.le.s32.totalorder %v856_v21, 14 }
 0x8d7   : > { %14992 = vmatmul.mubr.msk.f32.gmra.mrb[120].mxu0 %vm22833_vm1, %v5574_v1  ;;  %v20211_v1 = vld [vmem:[#allocation2 + $0xd9] sm:$0xff] }
 0x8d8   : > { %14994 = vmatprep.mubr.msk.f32.mxu0 %vm22833_vm1, %v20196_v41  ;;  %23299 = vst [vmem:[#allocation47_spill] sm:$0xff] %v20211_v1  ;;  %v5578_v41 = vsel %vm20213_vm8, %v20217_v24, 0.0  ;;  %vm23308_vm8 = vcmask 523520  }
 0x8db   : > { %14995 = vmatmul.mubr.msk.f32.gmra.mrb[122].mxu0 %vm22833_vm1, %v5576_v56  ;;  %v23305_v56 = vmov 0 }
 0x8dc   : > { %14997 = vmatprep.mubr.msk.f32.mxu0 %vm22833_vm1, %v20211_v1  ;;  %v23306_v56 = vsel %vm20227_vm0, 4294967295, %v23305_v56  ;;  %v23309_v1 = vmov 0 }
 0x8dd   : > { %23307 = vst [vmem:[#allocation38_spill] sm:$0xff] %v23306_v56  ;;  %v23310_v1 = vsel %vm20245_vm7, 4294967295, %v23309_v1 }
 0x8de   : > { %23311 = vst [vmem:[#allocation86_spill] sm:$0xff] %v23310_v1  ;;  %v13093_v1 = vld [vmem:[%s23137_s17 + $0x120] sm:$0xff] }
 0x8df   : > { %14998 = vmatmul.mubr.msk.f32.gmra.mrb[124].mxu0 %vm22833_vm1, %v5578_v41  ;;  %v20240_v41 = vld [vmem:[#allocation2 + $0xf9] sm:$0xff] }
 0x8e0   : > { %15000 = vmatprep.mubr.msk.f32.mxu0 %vm22833_vm1, %v20225_v10 }
 0x8e3   : > { %15001 = vmatmul.mubr.msk.f32.gmra.mrb[126].mxu0 %vm22833_vm1, %v5580_v55  ;;  %v13091_v55 = vld [vmem:[%s23137_s17 + $0x110] sm:$0xff] }
 0x8e4   : > { %v4568_v24 = vpop.permute.xlu0 %4567  ;;  %15003 = vmatprep.mubr.msk.f32.mxu0 %vm22833_vm1, %v20240_v41 }
 0x8e5   : > { %4634 = vst.msk [vmem:[#allocation2 + $0x108] sm:$0xff] %vm23308_vm8, %v4568_v24  ;;  %v13092_v24 = vld [vmem:[%s23137_s17 + $0x118] sm:$0xff] }
 0x8e6   : > { %v16062_v21 = vpack.c.bf16 %v13092_v24, %v13091_v55  ;;  %v13096_v55 = vld [vmem:[%s23137_s17 + $0x138] sm:$0xff] }
 0x8e7   : > { %v20409_v24 = vld [vmem:[#allocation2 + $0x38] sm:$0xff] }
 0x8ec   : > { %v20249_v10 = vld [vmem:[#allocation2 + $0x101] sm:$0xff] }
 0x8ed   : > { %23312 = vst [vmem:[#allocation37_spill] sm:$0xff] %v20249_v10  ;;  %v4570_v56 = vpop.permute.xlu0 %4569  ;;  %v5582_v8 = vsel %vm20245_vm7, %v20249_v10, 0.0  ;;  %v13094_v10 = vld [vmem:[%s23137_s17 + $0x128] sm:$0xff] }
 0x8ee   : > { %4635 = vst.msk [vmem:[#allocation2 + $0x110] sm:$0xff] %vm23308_vm8, %v4570_v56  ;;  %15004 = vmatmul.mubr.msk.f32.gmra.mrb[128].mxu0 %vm22833_vm1, %v5582_v8  ;;  %v5979_v56 = vsel %vm19735_vm10, %v19757_v42, 0.0  ;;  %v16066_v54 = vpack.c.bf16 %v13094_v10, %v13093_v1  ;;  %v13095_v8 = vld [vmem:[%s23137_s17 + $0x130] sm:$0xff]  ;;  %v5981_v42 = vsel %vm19753_vm11, %v19781_v36, 0.0  ;;  %v13130_v10 = vld [vmem:[%s23137_s17 + $0x148] sm:$0xff]  ;;  %v5983_v36 = vsel %vm19774_vm12, %v19804_v62, 0.0 }
 0x8ef   : > { %15022 = vmatprep.mubr.msk.f32.mxu0 %vm22833_vm1, %v5977_v18  ;;  %v5985_v1 = vsel %vm19800_vm13, %v19823_v14, 0.0  ;;  %v5987_v62 = vsel %vm19819_vm14, %v19842_v29, 0.0  ;;  %v5991_v14 = vsel %vm19855_vm2, %v19874_v15, 0.0  ;;  %v5995_v29 = vsel %vm19885_vm4, %v19904_v5, 0.0 }
 0x8f0   : > { %vm23313_vm8 = vnez %v23233_v52 }
 0x8f2   : > { %15023 = vmatmul.mubr.msk.f32.vlgmr.msra.gmra.mrb[34].mxu0 %vm22833_vm1, %v19761_v57  ;;  %v16070_v57 = vpack.c.bf16 %v13096_v55, %v13095_v8  ;;  %v20423_v8 = vld [vmem:[#allocation2 + $0x48] sm:$0xff] }
 0x8f3   : > { %16061 = vmatpush3.bf16.msra.mxu0 %v20069_v61  ;;  %15025 = vmatprep.mubr.msk.f32.mxu0 %vm22833_vm1, %v5979_v56  ;;  %v13129_v61 = vld [vmem:[%s23137_s17 + $0x140] sm:$0xff] }
 0x8f4   : > { %16063 = vmatprep.subr.bf16.mxu0 %v16062_v21  ;;  %v13169_v56 = vld [vmem:[%s23137_s17 + $0x180] sm:$0xff] }
 0x8f5   : > { %v20377_v5 = vld [vmem:[#allocation2 + $0x10f] sm:$0xff] }
 0x8f6   : > { %15026 = vmatmul.mubr.msk.f32.gmra.mrb[100].mxu0 %vm22833_vm1, %v19785_v33  ;;  %v16074_v33 = vpack.c.bf16 %v13130_v10, %v13129_v61  ;;  %v20435_v61 = vld [vmem:[#allocation2 + $0x60] sm:$0xff]  ;;  %v20439_v10 = vld [vmem:[#allocation2 + $0x68] sm:$0xff] }
 0x8f7   : > { %15028 = vmatprep.mubr.msk.f32.mxu0 %vm22833_vm1, %v5981_v42  ;;  %16065 = vmatpush3.bf16.msra.mxu0 %v16062_v21  ;;  %v20413_v21 = vld [vmem:[#allocation2 + $0x40] sm:$0xff]  ;;  %v20427_v42 = vld [vmem:[#allocation2 + $0x50] sm:$0xff] }
 0x8f8   : > { %16067 = vmatprep.subr.bf16.mxu0 %v16066_v54 }
 0x8fa   : > { %15029 = vmatmul.mubr.msk.f32.gmra.mrb[102].mxu0 %vm22833_vm1, %v19811_v53  ;;  %v5989_v53 = vsel %vm19838_vm15, %v19859_v9, 0.0  ;;  %v5999_v9 = vsel %vm19915_vm6, %v19934_v3, 0.0  ;;  %vm23315_vm6 = vnez %v23237_v47 }
 0x8fb   : > { %15031 = vmatprep.mubr.msk.f32.mxu0 %vm22833_vm1, %v5983_v36  ;;  %16069 = vmatpush3.bf16.msra.mxu0 %v16066_v54  ;;  %v13170_v54 = vld [vmem:[%s23137_s17 + $0x188] sm:$0xff]  ;;  %v20443_v36 = vld [vmem:[#allocation2 + $0x70] sm:$0xff] }
 0x8fc   : > { %16071 = vmatprep.subr.bf16.mxu0 %v16070_v57  ;;  %v16090_v55 = vpack.c.bf16 %v13170_v54, %v13169_v56  ;;  %v13174_v56 = vld [vmem:[%s23137_s17 + $0x1a8] sm:$0xff]  ;;  %v23326_v54 = vld [vmem:[#allocation98_spill] sm:$0xff] }
 0x8fe   : > { %15032 = vmatmul.mubr.msk.f32.gmra.mrb[104].mxu0 %vm22833_vm1, %v19829_v11  ;;  %v5993_v11 = vsel %vm19870_vm3, %v19889_v12, 0.0  ;;  %v20369_v12 = vld [vmem:[#allocation2 + $0x107] sm:$0xff] }
 0x8ff   : > { %15034 = vmatprep.mubr.msk.f32.mxu0 %vm22833_vm1, %v5985_v1  ;;  %16073 = vmatpush3.bf16.msra.mxu0 %v16070_v57  ;;  %v20431_v57 = vld [vmem:[#allocation2 + $0x58] sm:$0xff]  ;;  %v20451_v1 = vld [vmem:[#allocation2 + $0x80] sm:$0xff] }
 0x900   : > { %16075 = vmatprep.subr.bf16.mxu0 %v16074_v33 }
 0x902   : > { %15035 = vmatmul.mubr.msk.f32.gmra.mrb[106].mxu0 %vm22833_vm1, %v19846_v27  ;;  %v5997_v27 = vsel %vm19900_vm5, %v19919_v17, 0.0  ;;  %vm23314_vm5 = vnez %v23235_v46  ;;  %v13132_v17 = vld [vmem:[%s23137_s17 + $0x158] sm:$0xff] }
 0x903   : > { %15037 = vmatprep.mubr.msk.f32.mxu0 %vm22833_vm1, %v5987_v62  ;;  %v6003_v15 = vsel %vm23314_vm5, %v19964_v34, 0.0  ;;  %v20395_v34 = vld [vmem:[#allocation2 + $0x28] sm:$0xff] }
 0x904   : > { %v20455_v62 = vld [vmem:[#allocation2 + $0x88] sm:$0xff] }
 0x906   : > { %15038 = vmatmul.mubr.msk.f32.gmra.mrb[108].mxu0 %vm22833_vm1, %v19862_v48  ;;  %v6001_v48 = vsel %vm23313_vm8, %v19949_v45, 0.0  ;;  %vm23316_vm8 = vnez %v23239_v60  ;;  %v13133_v45 = vld [vmem:[%s23137_s17 + $0x160] sm:$0xff] }
 0x907   : > { %15040 = vmatprep.mubr.msk.f32.mxu0 %vm22833_vm1, %v5989_v53  ;;  %v20459_v53 = vld [vmem:[#allocation2 + $0x90] sm:$0xff] }
 0x90a   : > { %15041 = vmatmul.mubr.msk.f32.gmra.mrb[110].mxu0 %vm22833_vm1, %v19877_v26  ;;  %v6005_v26 = vsel %vm23315_vm6, %v19979_v59, 0.0  ;;  %v20399_v59 = vld [vmem:[#allocation2 + $0x30] sm:$0xff] }
 0x90b   : > { %15043 = vmatprep.mubr.msk.f32.mxu0 %vm22833_vm1, %v5991_v14  ;;  %v20463_v14 = vld [vmem:[#allocation2 + $0x98] sm:$0xff] }
 0x90e   : > { %15044 = vmatmul.mubr.msk.f32.gmra.mrb[112].mxu0 %vm22833_vm1, %v19892_v50  ;;  %v6007_v50 = vsel %vm23316_vm8, %v20369_v12, 0.0 }
 0x90f   : > { %15046 = vmatprep.mubr.msk.f32.mxu0 %vm22833_vm1, %v5993_v11  ;;  %v20467_v11 = vld [vmem:[#allocation2 + $0xa0] sm:$0xff] }
 0x912   : > { %15047 = vmatmul.mubr.msk.f32.gmra.mrb[114].mxu0 %vm22833_vm1, %v19907_v30  ;;  %v13131_v30 = vld [vmem:[%s23137_s17 + $0x150] sm:$0xff] }
 0x913   : > { %15049 = vmatprep.mubr.msk.f32.mxu0 %vm22833_vm1, %v5995_v29  ;;  %v16078_v3 = vpack.c.bf16 %v13132_v17, %v13131_v30  ;;  %v20471_v29 = vld [vmem:[#allocation2 + $0xa8] sm:$0xff]  ;;  %v23319_v30 = vld [vmem:[#allocation32_spill] sm:$0xff]  ;;  %v23320_v17 = vld [vmem:[#allocation93_spill] sm:$0xff] }
 0x916   : > { %15050 = vmatmul.mubr.msk.f32.gmra.mrb[116].mxu0 %vm22833_vm1, %v19922_v39  ;;  %v6371_v39 = vld [vmem:[#allocation2 + $0x18] sm:$0xff] }
 0x917   : > { %15052 = vmatprep.mubr.msk.f32.mxu0 %vm22833_vm1, %v5997_v27  ;;  %v20475_v27 = vld [vmem:[#allocation2 + $0xb0] sm:$0xff] }
 0x91a   : > { %15053 = vmatmul.mubr.msk.f32.gmra.mrb[118].mxu0 %vm22833_vm1, %v19937_v25  ;;  %v6372_v25 = vld [vmem:[#allocation2 + $0x20] sm:$0xff] }
 0x91b   : > { %15055 = vmatprep.mubr.msk.f32.mxu0 %vm22833_vm1, %v5999_v9  ;;  %v20479_v9 = vld [vmem:[#allocation2 + $0xb8] sm:$0xff] }
 0x91e   : > { %15056 = vmatmul.mubr.msk.f32.gmra.mrb[120].mxu0 %vm22833_vm1, %v19952_v7  ;;  %v13134_v7 = vld [vmem:[%s23137_s17 + $0x168] sm:$0xff] }
 0x91f   : > { %15058 = vmatprep.mubr.msk.f32.mxu0 %vm22833_vm1, %v6001_v48  ;;  %v20483_v48 = vld [vmem:[#allocation2 + $0xc0] sm:$0xff] }
 0x922   : > { %15059 = vmatmul.mubr.msk.f32.gmra.mrb[122].mxu0 %vm22833_vm1, %v19966_v28  ;;  %v16082_v28 = vpack.c.bf16 %v13134_v7, %v13133_v45  ;;  %v23322_v45 = vld [vmem:[#allocation85_spill] sm:$0xff] }
 0x923   : > { %15061 = vmatprep.mubr.msk.f32.mxu0 %vm22833_vm1, %v6003_v15  ;;  %v20487_v15 = vld [vmem:[#allocation2 + $0xc8] sm:$0xff] }
 0x926   : > { %15062 = vmatmul.mubr.msk.f32.gmra.mrb[124].mxu0 %vm22833_vm1, %v19981_v35  ;;  %v13135_v35 = vld [vmem:[%s23137_s17 + $0x170] sm:$0xff] }
 0x927   : > { %15064 = vmatprep.mubr.msk.f32.mxu0 %vm22833_vm1, %v6005_v26  ;;  %v23317_v26 = vld [vmem:[#allocation43_spill] sm:$0xff] }
 0x92a   : > { %15065 = vmatmul.mubr.msk.f32.gmra.mrb[126].mxu0 %vm22833_vm1, %v19990_v13  ;;  %v13136_v13 = vld [vmem:[%s23137_s17 + $0x178] sm:$0xff] }
 0x92b   : > { %15067 = vmatprep.mubr.msk.f32.mxu0 %vm22833_vm1, %v6007_v50  ;;  %v16086_v18 = vpack.c.bf16 %v13136_v13, %v13135_v35  ;;  %v23318_v50 = vld [vmem:[#allocation90_spill] sm:$0xff]  ;;  %v23324_v35 = vld [vmem:[#allocation96_spill] sm:$0xff] }
 0x92c   : > { %vm23325_vm8 = vnez %v23324_v35 }
 0x92e   : > { %15068 = vmatmul.mubr.msk.f32.gmra.mrb[128].mxu0 %vm22833_vm1, %v20377_v5 }
 0x92f   : > { %15086 = vmatprep.mubr.msk.f32.mxu0 %vm22833_vm1, %v6371_v39  ;;  %v23321_v39 = vld [vmem:[#allocation95_spill] sm:$0xff] }
 0x932   : > { %15087 = vmatmul.mubr.msk.f32.vlgmr.msra.gmra.mrb[34].mxu0 %vm22833_vm1, %v6372_v25  ;;  %v13172_v25 = vld [vmem:[%s23137_s17 + $0x198] sm:$0xff] }
 0x933   : > { %16077 = vmatpush3.bf16.msra.mxu0 %v16074_v33  ;;  %15089 = vmatprep.mubr.msk.f32.mxu0 %vm22833_vm1, %v20395_v34  ;;  %v20447_v33 = vld [vmem:[#allocation2 + $0x78] sm:$0xff] }
 0x934   : > { %16079 = vmatprep.subr.bf16.mxu0 %v16078_v3 }
 0x936   : > { %15090 = vmatmul.mubr.msk.f32.gmra.mrb[100].mxu0 %vm22833_vm1, %v20399_v59 }
 0x937   : > { %15092 = vmatprep.mubr.msk.f32.mxu0 %vm22833_vm1, %v20409_v24  ;;  %16081 = vmatpush3.bf16.msra.mxu0 %v16078_v3  ;;  %v20505_v3 = vld [vmem:[#allocation2 + $0x108] sm:$0xff] }
 0x938   : > { %16083 = vmatprep.subr.bf16.mxu0 %v16082_v28 }
 0x93a   : > { %15093 = vmatmul.mubr.msk.f32.gmra.mrb[102].mxu0 %vm22833_vm1, %v20413_v21 }
 0x93b   : > { %15095 = vmatprep.mubr.msk.f32.mxu0 %vm22833_vm1, %v20423_v8  ;;  %16085 = vmatpush3.bf16.msra.mxu0 %v16082_v28  ;;  %v23323_v28 = vld [vmem:[#allocation87_spill] sm:$0xff] }
 0x93c   : > { %16087 = vmatprep.subr.bf16.mxu0 %v16086_v18  ;;  %v6798_v13 = vsel %vm23325_vm8, %v23323_v28, 0.0  ;;  %v13209_v28 = vld [vmem:[%s23137_s17 + $0x1c0] sm:$0xff] }
 0x93e   : > { %15096 = vmatmul.mubr.msk.f32.gmra.mrb[104].mxu0 %vm22833_vm1, %v20427_v42 }
 0x93f   : > { %15098 = vmatprep.mubr.msk.f32.mxu0 %vm22833_vm1, %v20431_v57  ;;  %16089 = vmatpush3.bf16.msra.mxu0 %v16086_v18  ;;  %v13173_v18 = vld [vmem:[%s23137_s17 + $0x1a0] sm:$0xff] }
 0x940   : > { %16091 = vmatprep.subr.bf16.mxu0 %v16090_v55 }
 0x942   : > { %15099 = vmatmul.mubr.msk.f32.gmra.mrb[106].mxu0 %vm22833_vm1, %v20435_v61 }
 0x943   : > { %15101 = vmatprep.mubr.msk.f32.mxu0 %vm22833_vm1, %v20439_v10 }
 0x946   : > { %15102 = vmatmul.mubr.msk.f32.gmra.mrb[108].mxu0 %vm22833_vm1, %v20443_v36 }
 0x947   : > { %15104 = vmatprep.mubr.msk.f32.mxu0 %vm22833_vm1, %v20447_v33 }
 0x94a   : > { %15105 = vmatmul.mubr.msk.f32.gmra.mrb[110].mxu0 %vm22833_vm1, %v20451_v1 }
 0x94b   : > { %15107 = vmatprep.mubr.msk.f32.mxu0 %vm22833_vm1, %v20455_v62 }
 0x94e   : > { %15108 = vmatmul.mubr.msk.f32.gmra.mrb[112].mxu0 %vm22833_vm1, %v20459_v53 }
 0x94f   : > { %15110 = vmatprep.mubr.msk.f32.mxu0 %vm22833_vm1, %v20463_v14 }
 0x952   : > { %15111 = vmatmul.mubr.msk.f32.gmra.mrb[114].mxu0 %vm22833_vm1, %v20467_v11 }
 0x953   : > { %15113 = vmatprep.mubr.msk.f32.mxu0 %vm22833_vm1, %v20471_v29 }
 0x956   : > { %15114 = vmatmul.mubr.msk.f32.gmra.mrb[116].mxu0 %vm22833_vm1, %v20475_v27 }
 0x957   : > { %15116 = vmatprep.mubr.msk.f32.mxu0 %vm22833_vm1, %v20479_v9 }
 0x95a   : > { %15117 = vmatmul.mubr.msk.f32.gmra.mrb[118].mxu0 %vm22833_vm1, %v20483_v48 }
 0x95b   : > { %15119 = vmatprep.mubr.msk.f32.mxu0 %vm22833_vm1, %v20487_v15 }
 0x95e   : > { %15120 = vmatmul.mubr.msk.f32.gmra.mrb[120].mxu0 %vm22833_vm1, %v19684_v4  ;;  %v20509_v4 = vld [vmem:[#allocation2 + $0x110] sm:$0xff] }
 0x95f   : > { %15122 = vmatprep.mubr.msk.f32.mxu0 %vm22833_vm1, %v19690_v31  ;;  %v13171_v31 = vld [vmem:[%s23137_s17 + $0x190] sm:$0xff] }
 0x960   : > { %v16094_v7 = vpack.c.bf16 %v13172_v25, %v13171_v31  ;;  %v13176_v31 = vld [vmem:[%s23137_s17 + $0x1b8] sm:$0xff]  ;;  %v23330_v25 = vld [vmem:[#allocation88_spill] sm:$0xff] }
 0x961   : > { %vm23331_vm8 = vnez %v23330_v25 }
 0x962   : > { %15123 = vmatmul.mubr.msk.f32.gmra.mrb[122].mxu0 %vm22833_vm1, %v23317_v26  ;;  %v16098_v26 = vpack.c.bf16 %v13174_v56, %v13173_v18  ;;  %v23333_v18 = vld [vmem:[#allocation89_spill] sm:$0xff] }
 0x963   : > { %15125 = vmatprep.mubr.msk.f32.mxu0 %vm22833_vm1, %v23318_v50  ;;  %v23327_v50 = vld [vmem:[#allocation99_spill] sm:$0xff]  ;;  %v23335_v56 = vld [vmem:[#allocation101_spill] sm:$0xff] }
 0x966   : > { %15126 = vmatmul.mubr.msk.f32.gmra.mrb[124].mxu0 %vm22833_vm1, %v23319_v30  ;;  %v23328_v30 = vld [vmem:[#allocation97_spill] sm:$0xff] }
 0x967   : > { %15128 = vmatprep.mubr.msk.f32.mxu0 %vm22833_vm1, %v23320_v17  ;;  %vm23329_vm6 = vnez %v23328_v30 }
 0x968   : > { %v6800_v17 = vsel %vm23329_vm6, %v23327_v50, 0.0  ;;  %vm23334_vm6 = vnez %v23333_v18  ;;  %v23337_v50 = vld [vmem:[#allocation100_spill] sm:$0xff] }
 0x96a   : > { %15129 = vmatmul.mubr.msk.f32.gmra.mrb[126].mxu0 %vm22833_vm1, %v23321_v39  ;;  %v13175_v39 = vld [vmem:[%s23137_s17 + $0x1b0] sm:$0xff] }
 0x96b   : > { %15131 = vmatprep.mubr.msk.f32.mxu0 %vm22833_vm1, %v20505_v3 }
 0x96e   : > { %15132 = vmatmul.mubr.msk.f32.gmra.mrb[128].mxu0 %vm22833_vm1, %v20509_v4 }
 0x96f   : > { %15150 = vmatprep.mubr.msk.f32.mxu0 %vm22833_vm1, %v23322_v45  ;;  %v6802_v45 = vsel %vm23331_vm8, %v20064_v63, 0.0  ;;  %vm23338_vm8 = vnez %v23337_v50 }
 0x972   : > { %15151 = vmatmul.mubr.msk.f32.vlgmr.msra.gmra.mrb[34].mxu0 %vm22833_vm1, %v6798_v13  ;;  %v13210_v13 = vld [vmem:[%s23137_s17 + $0x1c8] sm:$0xff] }
 0x973   : > { %16093 = vmatpush3.bf16.msra.mxu0 %v16090_v55  ;;  %15153 = vmatprep.mubr.msk.f32.mxu0 %vm22833_vm1, %v23326_v54  ;;  %v16102_v55 = vpack.c.bf16 %v13176_v31, %v13175_v39  ;;  %v23336_v54 = vld [vmem:[#allocation28_spill] sm:$0xff] }
 0x974   : > { %16095 = vmatprep.subr.bf16.mxu0 %v16094_v7  ;;  %v23341_v39 = vld [vmem:[#allocation64_spill] sm:$0xff] }
 0x975   : > { %vm23342_vm5 = vnez %v23341_v39 }
 0x976   : > { %15154 = vmatmul.mubr.msk.f32.gmra.mrb[100].mxu0 %vm22833_vm1, %v6800_v17  ;;  %v6806_v17 = vsel %vm23338_vm8, %v23336_v54, 0.0 }
 0x977   : > { %15156 = vmatprep.mubr.msk.f32.mxu0 %vm22833_vm1, %v20058_v58  ;;  %16097 = vmatpush3.bf16.msra.mxu0 %v16094_v7  ;;  %v16106_v58 = vpack.c.bf16 %v13210_v13, %v13209_v28  ;;  %v23332_v7 = vld [vmem:[#allocation92_spill] sm:$0xff]  ;;  %v23345_v28 = vld [vmem:[#allocation31_spill] sm:$0xff] }
 0x978   : > { %16099 = vmatprep.subr.bf16.mxu0 %v16098_v26  ;;  %v6804_v63 = vsel %vm23334_vm6, %v23332_v7, 0.0  ;;  %vm23346_vm6 = vnez %v23345_v28  ;;  %v23347_v7 = vld [vmem:[#allocation20_spill] sm:$0xff] }
 0x97a   : > { %15157 = vmatmul.mubr.msk.f32.gmra.mrb[102].mxu0 %vm22833_vm1, %v6802_v45  ;;  %v23343_v45 = vld [vmem:[#allocation66_spill] sm:$0xff] }
 0x97b   : > { %15159 = vmatprep.mubr.msk.f32.mxu0 %vm22833_vm1, %v20075_v23  ;;  %16101 = vmatpush3.bf16.msra.mxu0 %v16098_v26  ;;  %v23339_v23 = vld [vmem:[#allocation44_spill] sm:$0xff] }
 0x97c   : > { %16103 = vmatprep.subr.bf16.mxu0 %v16102_v55  ;;  %v23340_v26 = vld [vmem:[#allocation68_spill] sm:$0xff] }
 0x97d   : > { %v6808_v31 = vsel %vm23342_vm5, %v23340_v26, 0.0  ;;  %v23353_v26 = vld [vmem:[#allocation22_spill] sm:$0xff] }
 0x97e   : > { %15160 = vmatmul.mubr.msk.f32.gmra.mrb[104].mxu0 %vm22833_vm1, %v6804_v63  ;;  %v23348_v63 = vld [vmem:[#allocation72_spill] sm:$0xff]  ;;  %vm23354_vm5 = vnez %v23353_v26 }
 0x97f   : > { %15162 = vmatprep.mubr.msk.f32.mxu0 %vm22833_vm1, %v23335_v56  ;;  %16105 = vmatpush3.bf16.msra.mxu0 %v16102_v55  ;;  %v23344_v55 = vld [vmem:[#allocation69_spill] sm:$0xff] }
 0x980   : > { %16107 = vmatprep.subr.bf16.mxu0 %v16106_v58  ;;  %v6810_v13 = vsel %vm23346_vm6, %v23344_v55, 0.0  ;;  %v23349_v56 = vld [vmem:[#allocation49_spill] sm:$0xff]  ;;  %v23356_v55 = vld [vmem:[#allocation35_spill] sm:$0xff] }
 0x981   : > { %vm23350_vm8 = vnez %v23349_v56 }
 0x982   : > { %15163 = vmatmul.mubr.msk.f32.gmra.mrb[106].mxu0 %vm22833_vm1, %v6806_v17  ;;  %v6812_v54 = vsel %vm23350_vm8, %v23348_v63, 0.0  ;;  %v23351_v17 = vld [vmem:[#allocation73_spill] sm:$0xff]  ;;  %v23359_v63 = vld [vmem:[#allocation80_spill] sm:$0xff] }
 0x983   : > { %15165 = vmatprep.mubr.msk.f32.mxu0 %vm22833_vm1, %v23339_v23  ;;  %v23352_v23 = vld [vmem:[#allocation76_spill] sm:$0xff] }
 0x986   : > { %15166 = vmatmul.mubr.msk.f32.gmra.mrb[108].mxu0 %vm22833_vm1, %v6808_v31  ;;  %v6814_v31 = vsel %vm23354_vm5, %v23352_v23, 0.0  ;;  %v23362_v23 = vld [vmem:[#allocation81_spill] sm:$0xff] }
 0x987   : > { %15168 = vmatprep.mubr.msk.f32.mxu0 %vm22833_vm1, %v23343_v45  ;;  %v23355_v45 = vld [vmem:[#allocation25_spill] sm:$0xff] }
 0x98a   : > { %15169 = vmatmul.mubr.msk.f32.gmra.mrb[110].mxu0 %vm22833_vm1, %v6810_v13  ;;  %v23357_v13 = vld [vmem:[#allocation61_spill] sm:$0xff] }
 0x98b   : > { %15171 = vmatprep.mubr.msk.f32.mxu0 %vm22833_vm1, %v23347_v7  ;;  %vm23358_vm6 = vnez %v23357_v13 }
 0x98c   : > { %v6816_v7 = vsel %vm23358_vm6, %v23356_v55, 0.0  ;;  %v23365_v55 = vld [vmem:[#allocation47_spill] sm:$0xff] }
 0x98e   : > { %15172 = vmatmul.mubr.msk.f32.gmra.mrb[112].mxu0 %vm22833_vm1, %v6812_v54  ;;  %v23360_v54 = vld [vmem:[#allocation77_spill] sm:$0xff] }
 0x98f   : > { %15174 = vmatprep.mubr.msk.f32.mxu0 %vm22833_vm1, %v23351_v17  ;;  %vm23361_vm8 = vnez %v23360_v54 }
 0x990   : > { %v6818_v17 = vsel %vm23361_vm8, %v23359_v63, 0.0  ;;  %v23369_v63 = vld [vmem:[#allocation62_spill] sm:$0xff] }
 0x992   : > { %15175 = vmatmul.mubr.msk.f32.gmra.mrb[114].mxu0 %vm22833_vm1, %v6814_v31  ;;  %v23363_v31 = vld [vmem:[#allocation29_spill] sm:$0xff] }
 0x993   : > { %15177 = vmatprep.mubr.msk.f32.mxu0 %vm22833_vm1, %v23355_v45  ;;  %vm23364_vm5 = vnez %v23363_v31 }
 0x994   : > { %v6820_v45 = vsel %vm23364_vm5, %v20202_v6, 0.0  ;;  %v23372_v6 = vld [vmem:[#allocation37_spill] sm:$0xff] }
 0x996   : > { %15178 = vmatmul.mubr.msk.f32.gmra.mrb[116].mxu0 %vm22833_vm1, %v6816_v7  ;;  %v23366_v7 = vld [vmem:[#allocation39_spill] sm:$0xff] }
 0x997   : > { %15180 = vmatprep.mubr.msk.f32.mxu0 %vm22833_vm1, %v20181_v43  ;;  %v23367_v43 = vld [vmem:[#allocation27_spill] sm:$0xff] }
 0x998   : > { %vm23368_vm6 = vnez %v23367_v43 }
 0x999   : > { %v6822_v13 = vsel %vm23368_vm6, %v23366_v7, 0.0  ;;  %v20627_v7 = vld [vmem:[#allocation2 + $0x109] sm:$0xff] }
 0x99a   : > { %15181 = vmatmul.mubr.msk.f32.gmra.mrb[118].mxu0 %vm22833_vm1, %v6818_v17  ;;  %v23370_v17 = vld [vmem:[#allocation30_spill] sm:$0xff]  ;;  %23374 = vst [vmem:[#allocation63_spill] sm:$0xff] %v20627_v7 }
 0x99b   : > { %15183 = vmatprep.mubr.msk.f32.mxu0 %vm22833_vm1, %v23362_v23  ;;  %vm23371_vm8 = vnez %v23370_v17  ;;  %v7192_v17 = vld [vmem:[#allocation2 + $0x2f] sm:$0xff] }
 0x99c   : > { %v6824_v23 = vsel %vm23371_vm8, %v20231_v19, 0.0  ;;  %v13213_v19 = vld [vmem:[%s23137_s17 + $0x1e0] sm:$0xff] }
 0x99e   : > { %15184 = vmatmul.mubr.msk.f32.gmra.mrb[120].mxu0 %vm22833_vm1, %v6820_v45  ;;  %v7193_v45 = vld [vmem:[#allocation2 + $0x37] sm:$0xff] }
 0x99f   : > { %15186 = vmatprep.mubr.msk.f32.mxu0 %vm22833_vm1, %v23365_v55  ;;  %v6826_v55 = vsel %vm20227_vm0, %v23372_v6, 0.0  ;;  %v13212_v6 = vld [vmem:[%s23137_s17 + $0x1d8] sm:$0xff] }
 0x9a2   : > { %15187 = vmatmul.mubr.msk.f32.gmra.mrb[122].mxu0 %vm22833_vm1, %v6822_v13  ;;  %v20629_v13 = vld [vmem:[#allocation2 + $0x111] sm:$0xff] }
 0x9a3   : > { %15189 = vmatprep.mubr.msk.f32.mxu0 %vm22833_vm1, %v23369_v63  ;;  %23375 = vst [vmem:[#allocation42_spill] sm:$0xff] %v20629_v13  ;;  %v7191_v63 = vld [vmem:[#allocation2 + $0x27] sm:$0xff] }
 0x9a6   : > { %15190 = vmatmul.mubr.msk.f32.gmra.mrb[124].mxu0 %vm22833_vm1, %v6824_v23  ;;  %v6828_v23 = vsel %vm20245_vm7, %v20629_v13, 0.0  ;;  %v13214_v13 = vld [vmem:[%s23137_s17 + $0x1e8] sm:$0xff] }
 0x9a7   : > { %15192 = vmatprep.mubr.msk.f32.mxu0 %vm22833_vm1, %v20240_v41  ;;  %v13211_v41 = vld [vmem:[%s23137_s17 + $0x1d0] sm:$0xff] }
 0x9aa   : > { %15193 = vmatmul.mubr.msk.f32.gmra.mrb[126].mxu0 %vm22833_vm1, %v6826_v55  ;;  %v7223_v55 = vsel %vm19716_vm9, %v7191_v63, 0.0  ;;  %v7195_v63 = vld [vmem:[#allocation2 + $0x47] sm:$0xff] }
 0x9ab   : > { %15195 = vmatprep.mubr.msk.f32.mxu0 %vm22833_vm1, %v20627_v7  ;;  %v16110_v7 = vpack.c.bf16 %v13212_v6, %v13211_v41  ;;  %v16114_v41 = vpack.c.bf16 %v13214_v13, %v13213_v19  ;;  %v7194_v6 = vld [vmem:[#allocation2 + $0x3f] sm:$0xff]  ;;  %v7196_v13 = vld [vmem:[#allocation2 + $0x4f] sm:$0xff] }
 0x9ac   : > { %v13249_v19 = vld [vmem:[%s23137_s17 + $0x200] sm:$0xff] }
 0x9ae   : > { %15196 = vmatmul.mubr.msk.f32.gmra.mrb[128].mxu0 %vm22833_vm1, %v6828_v23  ;;  %v7225_v23 = vsel %vm19735_vm10, %v7193_v45, 0.0 }
 0x9af   : > { %15214 = vmatprep.mubr.msk.f32.mxu0 %vm22833_vm1, %v7223_v55  ;;  %v13215_v55 = vld [vmem:[%s23137_s17 + $0x1f0] sm:$0xff] }
 0x9b0   : > { %v16118_v45 = vpack.c.bf16 %v13216_v49, %v13215_v55 }
 0x9b2   : > { %15215 = vmatmul.mubr.msk.f32.vlgmr.msra.gmra.mrb[34].mxu0 %vm22833_vm1, %v7192_v17  ;;  %v7227_v17 = vsel %vm19753_vm11, %v7195_v63, 0.0 }
 0x9b3   : > { %16109 = vmatpush3.bf16.msra.mxu0 %v16106_v58  ;;  %15217 = vmatprep.mubr.msk.f32.mxu0 %vm22833_vm1, %v7225_v23  ;;  %v7197_v58 = vld [vmem:[#allocation2 + $0x57] sm:$0xff]  ;;  %v13250_v23 = vld [vmem:[%s23137_s17 + $0x208] sm:$0xff] }
 0x9b4   : > { %16111 = vmatprep.subr.bf16.mxu0 %v16110_v7  ;;  %v7229_v63 = vsel %vm19774_vm12, %v7197_v58, 0.0  ;;  %v20676_v49 = vpack.c.bf16 %v13250_v23, %v13249_v19  ;;  %v7200_v58 = vld [vmem:[#allocation2 + $0x6f] sm:$0xff]  ;;  %v7202_v19 = vld [vmem:[#allocation2 + $0x7f] sm:$0xff] }
 0x9b6   : > { %15218 = vmatmul.mubr.msk.f32.gmra.mrb[100].mxu0 %vm22833_vm1, %v7194_v6  ;;  %v7199_v6 = vld [vmem:[#allocation2 + $0x67] sm:$0xff] }
 0x9b7   : > { %15220 = vmatprep.mubr.msk.f32.mxu0 %vm22833_vm1, %v7227_v17  ;;  %16113 = vmatpush3.bf16.msra.mxu0 %v16110_v7  ;;  %v7198_v7 = vld [vmem:[#allocation2 + $0x5f] sm:$0xff]  ;;  %v7231_v55 = vsel %vm19800_vm13, %v7199_v6, 0.0  ;;  %v7201_v17 = vld [vmem:[#allocation2 + $0x77] sm:$0xff] }
 0x9b8   : > { %16115 = vmatprep.subr.bf16.mxu0 %v16114_v41 }
 0x9ba   : > { %15221 = vmatmul.mubr.msk.f32.gmra.mrb[102].mxu0 %vm22833_vm1, %v7196_v13  ;;  %v7203_v13 = vld [vmem:[#allocation2 + $0x87] sm:$0xff] }
 0x9bb   : > { %15223 = vmatprep.mubr.msk.f32.mxu0 %vm22833_vm1, %v7229_v63  ;;  %16117 = vmatpush3.bf16.msra.mxu0 %v16114_v41  ;;  %v7233_v41 = vsel %vm19819_vm14, %v7201_v17, 0.0  ;;  %v7235_v23 = vsel %vm19838_vm15, %v7203_v13, 0.0  ;;  %v7204_v63 = vld [vmem:[#allocation2 + $0x8f] sm:$0xff] }
 0x9bc   : > { %16119 = vmatprep.subr.bf16.mxu0 %v16118_v45 }
 0x9be   : > { %15224 = vmatmul.mubr.msk.f32.gmra.mrb[104].mxu0 %vm22833_vm1, %v7198_v7  ;;  %v7207_v7 = vld [vmem:[#allocation2 + $0xa7] sm:$0xff] }
 0x9bf   : > { %15226 = vmatprep.mubr.msk.f32.mxu0 %vm22833_vm1, %v7231_v55  ;;  %16121 = vmatpush3.bf16.msra.mxu0 %v16118_v45  ;;  %v7205_v45 = vld [vmem:[#allocation2 + $0x97] sm:$0xff]  ;;  %v7206_v55 = vld [vmem:[#allocation2 + $0x9f] sm:$0xff]  ;;  %v7239_v17 = vsel %vm19870_vm3, %v7207_v7, 0.0  ;;  %vm23378_vm3 = vnez %v23231_v40 }
 0x9c0   : > { %16123 = vmatprep.subr.bf16.mxu0 %v20676_v49  ;;  %v7237_v6 = vsel %vm19855_vm2, %v7205_v45, 0.0  ;;  %vm23377_vm2 = vnez %v23229_v0 }
 0x9c2   : > { %15227 = vmatmul.mubr.msk.f32.gmra.mrb[106].mxu0 %vm22833_vm1, %v7200_v58  ;;  %v7209_v58 = vld [vmem:[#allocation2 + $0xb7] sm:$0xff] }
 0x9c3   : > { %15229 = vmatprep.mubr.msk.f32.mxu0 %vm22833_vm1, %v7233_v41  ;;  %v7208_v41 = vld [vmem:[#allocation2 + $0xaf] sm:$0xff]  ;;  %v7241_v13 = vsel %vm19885_vm4, %v7209_v58, 0.0  ;;  %vm23379_vm4 = vnez %v23233_v52 }
 0x9c6   : > { %15230 = vmatmul.mubr.msk.f32.gmra.mrb[108].mxu0 %vm22833_vm1, %v7202_v19  ;;  %v7211_v19 = vld [vmem:[#allocation2 + $0xc7] sm:$0xff] }
 0x9c7   : > { %15232 = vmatprep.mubr.msk.f32.mxu0 %vm22833_vm1, %v7235_v23  ;;  %v7210_v23 = vld [vmem:[#allocation2 + $0xbf] sm:$0xff]  ;;  %v7243_v45 = vsel %vm23377_vm2, %v7211_v19, 0.0  ;;  %vm23380_vm2 = vnez %v23235_v46 }
 0x9ca   : > { %15233 = vmatmul.mubr.msk.f32.gmra.mrb[110].mxu0 %vm22833_vm1, %v7204_v63  ;;  %v7213_v63 = vld [vmem:[#allocation2 + $0xd7] sm:$0xff] }
 0x9cb   : > { %15235 = vmatprep.mubr.msk.f32.mxu0 %vm22833_vm1, %v7237_v6  ;;  %v7212_v6 = vld [vmem:[#allocation2 + $0xcf] sm:$0xff]  ;;  %v7245_v7 = vsel %vm23378_vm3, %v7213_v63, 0.0  ;;  %vm23381_vm3 = vnez %v23237_v47  ;;  %v7221_v63 = vld [vmem:[#allocation2 + $0x117] sm:$0xff] }
 0x9ce   : > { %15236 = vmatmul.mubr.msk.f32.gmra.mrb[112].mxu0 %vm22833_vm1, %v7206_v55  ;;  %v7215_v55 = vld [vmem:[#allocation2 + $0xe7] sm:$0xff] }
 0x9cf   : > { %15238 = vmatprep.mubr.msk.f32.mxu0 %vm22833_vm1, %v7239_v17  ;;  %v7214_v17 = vld [vmem:[#allocation2 + $0xdf] sm:$0xff]  ;;  %v7247_v58 = vsel %vm23379_vm4, %v7215_v55, 0.0  ;;  %vm23382_vm4 = vnez %v23239_v60  ;;  %v13251_v55 = vld [vmem:[%s23137_s17 + $0x210] sm:$0xff] }
 0x9d2   : > { %15239 = vmatmul.mubr.msk.f32.gmra.mrb[114].mxu0 %vm22833_vm1, %v7208_v41  ;;  %v7217_v41 = vld [vmem:[#allocation2 + $0xf7] sm:$0xff] }
 0x9d3   : > { %15241 = vmatprep.mubr.msk.f32.mxu0 %vm22833_vm1, %v7241_v13  ;;  %v7216_v13 = vld [vmem:[#allocation2 + $0xef] sm:$0xff]  ;;  %v7249_v19 = vsel %vm23380_vm2, %v7217_v41, 0.0  ;;  %vm23385_vm2 = vnez %v23330_v25 }
 0x9d6   : > { %15242 = vmatmul.mubr.msk.f32.gmra.mrb[116].mxu0 %vm22833_vm1, %v7210_v23  ;;  %v7218_v23 = vld [vmem:[#allocation2 + $0xff] sm:$0xff] }
 0x9d7   : > { %15244 = vmatprep.mubr.msk.f32.mxu0 %vm22833_vm1, %v7243_v45  ;;  %v7251_v45 = vsel %vm23381_vm3, %v20369_v12, 0.0  ;;  %v13252_v12 = vld [vmem:[%s23137_s17 + $0x218] sm:$0xff]  ;;  %vm23384_vm3 = vnez %v23328_v30 }
 0x9da   : > { %15245 = vmatmul.mubr.msk.f32.gmra.mrb[118].mxu0 %vm22833_vm1, %v7212_v6  ;;  %v7253_v6 = vsel %vm23382_vm4, %v7221_v63, 0.0  ;;  %vm23383_vm4 = vnez %v23324_v35  ;;  %v8022_v63 = vld [vmem:[#allocation2 + $0x81] sm:$0xff] }
 0x9db   : > { %15247 = vmatprep.mubr.msk.f32.mxu0 %vm22833_vm1, %v7245_v7  ;;  %v7222_v7 = vld [vmem:[#allocation2 + $0x11f] sm:$0xff] }
 0x9de   : > { %15248 = vmatmul.mubr.msk.f32.gmra.mrb[120].mxu0 %vm22833_vm1, %v7214_v17  ;;  %v13253_v17 = vld [vmem:[%s23137_s17 + $0x220] sm:$0xff] }
 0x9df   : > { %15250 = vmatprep.mubr.msk.f32.mxu0 %vm22833_vm1, %v7247_v58  ;;  %v13254_v58 = vld [vmem:[%s23137_s17 + $0x228] sm:$0xff] }
 0x9e0   : > { %v16130_v41 = vpack.c.bf16 %v13254_v58, %v13253_v17  ;;  %v8026_v17 = vld [vmem:[#allocation2 + $0xa1] sm:$0xff] }
 0x9e2   : > { %15251 = vmatmul.mubr.msk.f32.gmra.mrb[122].mxu0 %vm22833_vm1, %v7216_v13  ;;  %v13256_v13 = vld [vmem:[%s23137_s17 + $0x238] sm:$0xff] }
 0x9e3   : > { %15253 = vmatprep.mubr.msk.f32.mxu0 %vm22833_vm1, %v7249_v19  ;;  %v8020_v19 = vld [vmem:[#allocation2 + $0x71] sm:$0xff] }
 0x9e6   : > { %15254 = vmatmul.mubr.msk.f32.gmra.mrb[124].mxu0 %vm22833_vm1, %v7218_v23 }
 0x9e7   : > { %15256 = vmatprep.mubr.msk.f32.mxu0 %vm22833_vm1, %v7251_v45  ;;  %v8021_v45 = vld [vmem:[#allocation2 + $0x79] sm:$0xff] }
 0x9ea   : > { %15257 = vmatmul.mubr.msk.f32.gmra.mrb[126].mxu0 %vm22833_vm1, %v20377_v5  ;;  %v16126_v5 = vpack.c.bf16 %v13252_v12, %v13251_v55  ;;  %v8024_v55 = vld [vmem:[#allocation2 + $0x91] sm:$0xff] }
 0x9eb   : > { %15259 = vmatprep.mubr.msk.f32.mxu0 %vm22833_vm1, %v7253_v6 }
 0x9ee   : > { %15260 = vmatmul.mubr.msk.f32.gmra.mrb[128].mxu0 %vm22833_vm1, %v7222_v7  ;;  %v8023_v7 = vld [vmem:[#allocation2 + $0x89] sm:$0xff] }
 0x9ef   : > { %15278 = vmatprep.mubr.msk.f32.mxu0 %vm22833_vm1, %v20395_v34  ;;  %v13255_v34 = vld [vmem:[%s23137_s17 + $0x230] sm:$0xff] }
 0x9f2   : > { %15279 = vmatmul.mubr.msk.f32.vlgmr.msra.gmra.mrb[34].mxu0 %vm22833_vm1, %v20399_v59  ;;  %v16134_v59 = vpack.c.bf16 %v13256_v13, %v13255_v34  ;;  %v8028_v34 = vld [vmem:[#allocation2 + $0xb1] sm:$0xff] }
 0x9f3   : > { %16125 = vmatpush3.bf16.msra.mxu0 %v20676_v49  ;;  %15281 = vmatprep.mubr.msk.f32.mxu0 %vm22833_vm1, %v20409_v24  ;;  %v7638_v24 = vld [vmem:[#allocation2 + $0xd0] sm:$0xff] }
 0x9f4   : > { %16127 = vmatprep.subr.bf16.mxu0 %v16126_v5  ;;  %v8019_v49 = vld [vmem:[#allocation2 + $0x69] sm:$0xff] }
 0x9f6   : > { %15282 = vmatmul.mubr.msk.f32.gmra.mrb[100].mxu0 %vm22833_vm1, %v20413_v21  ;;  %v7639_v21 = vld [vmem:[#allocation2 + $0xd8] sm:$0xff] }
 0x9f7   : > { %15284 = vmatprep.mubr.msk.f32.mxu0 %vm22833_vm1, %v20423_v8  ;;  %16129 = vmatpush3.bf16.msra.mxu0 %v16126_v5  ;;  %v7640_v8 = vld [vmem:[#allocation2 + $0xe0] sm:$0xff] }
 0x9f8   : > { %16131 = vmatprep.subr.bf16.mxu0 %v16130_v41  ;;  %v8025_v5 = vld [vmem:[#allocation2 + $0x99] sm:$0xff] }
 0x9fa   : > { %15285 = vmatmul.mubr.msk.f32.gmra.mrb[102].mxu0 %vm22833_vm1, %v20427_v42  ;;  %v7641_v42 = vld [vmem:[#allocation2 + $0xe8] sm:$0xff] }
 0x9fb   : > { %15287 = vmatprep.mubr.msk.f32.mxu0 %vm22833_vm1, %v20431_v57  ;;  %16133 = vmatpush3.bf16.msra.mxu0 %v16130_v41  ;;  %v7642_v57 = vld [vmem:[#allocation2 + $0xf0] sm:$0xff] }
 0x9fc   : > { %16135 = vmatprep.subr.bf16.mxu0 %v16134_v59  ;;  %v8027_v41 = vld [vmem:[#allocation2 + $0xa9] sm:$0xff] }
 0x9fe   : > { %15288 = vmatmul.mubr.msk.f32.gmra.mrb[104].mxu0 %vm22833_vm1, %v20435_v61  ;;  %v7643_v61 = vld [vmem:[#allocation2 + $0xf8] sm:$0xff] }
 0x9ff   : > { %15290 = vmatprep.mubr.msk.f32.mxu0 %vm22833_vm1, %v20439_v10  ;;  %16137 = vmatpush3.bf16.msra.mxu0 %v16134_v59  ;;  %v7644_v10 = vld [vmem:[#allocation2 + $0x100] sm:$0xff] }
 0xa00   : > { %v8029_v59 = vld [vmem:[#allocation2 + $0xb9] sm:$0xff] }
 0xa02   : > { %15291 = vmatmul.mubr.msk.f32.gmra.mrb[106].mxu0 %vm22833_vm1, %v20443_v36  ;;  %v7647_v36 = vld [vmem:[#allocation2 + $0x118] sm:$0xff] }
 0xa03   : > { %15293 = vmatprep.mubr.msk.f32.mxu0 %vm22833_vm1, %v20447_v33  ;;  %v7648_v33 = vld [vmem:[#allocation2 + $0x120] sm:$0xff] }
 0xa06   : > { %15294 = vmatmul.mubr.msk.f32.gmra.mrb[108].mxu0 %vm22833_vm1, %v20451_v1  ;;  %v8011_v1 = vld [vmem:[#allocation2 + $0x29] sm:$0xff] }
 0xa07   : > { %15296 = vmatprep.mubr.msk.f32.mxu0 %vm22833_vm1, %v20455_v62  ;;  %v8012_v62 = vld [vmem:[#allocation2 + $0x31] sm:$0xff] }
 0xa0a   : > { %15297 = vmatmul.mubr.msk.f32.gmra.mrb[110].mxu0 %vm22833_vm1, %v20459_v53  ;;  %v8044_v53 = vsel %vm23383_vm4, %v8012_v62, 0.0  ;;  %vm23386_vm4 = vnez %v23333_v18  ;;  %v8036_v62 = vld [vmem:[#allocation2 + $0xf1] sm:$0xff] }
 0xa0b   : > { %15299 = vmatprep.mubr.msk.f32.mxu0 %vm22833_vm1, %v20463_v14  ;;  %v8013_v14 = vld [vmem:[#allocation2 + $0x39] sm:$0xff] }
 0xa0e   : > { %15300 = vmatmul.mubr.msk.f32.gmra.mrb[112].mxu0 %vm22833_vm1, %v20467_v11  ;;  %v8014_v11 = vld [vmem:[#allocation2 + $0x41] sm:$0xff] }
 0xa0f   : > { %15302 = vmatprep.mubr.msk.f32.mxu0 %vm22833_vm1, %v20471_v29  ;;  %v8046_v29 = vsel %vm23384_vm3, %v8014_v11, 0.0  ;;  %vm23387_vm3 = vnez %v23337_v50  ;;  %v8038_v11 = vld [vmem:[#allocation2 + $0x101] sm:$0xff] }
 0xa10   : > { %v8052_v23 = vsel %vm23387_vm3, %v8020_v19, 0.0  ;;  %vm23390_vm3 = vnez %v23349_v56 }
 0xa11   : > { %v8058_v58 = vsel %vm23390_vm3, %v8026_v17, 0.0  ;;  %vm23394_vm3 = vnez %v23360_v54 }
 0xa12   : > { %15303 = vmatmul.mubr.msk.f32.gmra.mrb[114].mxu0 %vm22833_vm1, %v20475_v27  ;;  %v8015_v27 = vld [vmem:[#allocation2 + $0x49] sm:$0xff] }
 0xa13   : > { %15305 = vmatprep.mubr.msk.f32.mxu0 %vm22833_vm1, %v20479_v9  ;;  %v8016_v9 = vld [vmem:[#allocation2 + $0x51] sm:$0xff] }
 0xa16   : > { %15306 = vmatmul.mubr.msk.f32.gmra.mrb[116].mxu0 %vm22833_vm1, %v20483_v48  ;;  %v8048_v48 = vsel %vm23385_vm2, %v8016_v9, 0.0  ;;  %vm23388_vm2 = vnez %v23341_v39  ;;  %v23396_v9 = vld [vmem:[#allocation63_spill] sm:$0xff] }
 0xa17   : > { %15308 = vmatprep.mubr.msk.f32.mxu0 %vm22833_vm1, %v20487_v15  ;;  %v8017_v15 = vld [vmem:[#allocation2 + $0x59] sm:$0xff]  ;;  %v8054_v6 = vsel %vm23388_vm2, %v8022_v63, 0.0  ;;  %vm23391_vm2 = vnez %v23353_v26  ;;  %v13291_v63 = vld [vmem:[%s23400_s11 + $0x48] sm:$0xff] }
 0xa18   : > { %v8060_v13 = vsel %vm23391_vm2, %v8028_v34, 0.0 }
 0xa1a   : > { %15309 = vmatmul.mubr.msk.f32.gmra.mrb[118].mxu0 %vm22833_vm1, %v7638_v24  ;;  %v8030_v24 = vld [vmem:[#allocation2 + $0xc1] sm:$0xff] }
 0xa1b   : > { %15311 = vmatprep.mubr.msk.f32.mxu0 %vm22833_vm1, %v7639_v21  ;;  %v23392_v21 = vld [vmem:[#allocation61_spill] sm:$0xff] }
 0xa1e   : > { %15312 = vmatmul.mubr.msk.f32.gmra.mrb[120].mxu0 %vm22833_vm1, %v7640_v8 }
 0xa1f   : > { %15314 = vmatprep.mubr.msk.f32.mxu0 %vm22833_vm1, %v7641_v42  ;;  %v8031_v42 = vld [vmem:[#allocation2 + $0xc9] sm:$0xff] }
 0xa22   : > { %15315 = vmatmul.mubr.msk.f32.gmra.mrb[122].mxu0 %vm22833_vm1, %v7642_v57  ;;  %v8032_v57 = vld [vmem:[#allocation2 + $0xd1] sm:$0xff] }
 0xa23   : > { %15317 = vmatprep.mubr.msk.f32.mxu0 %vm22833_vm1, %v7643_v61  ;;  %v8064_v61 = vsel %vm23394_vm3, %v8032_v57, 0.0  ;;  %vm23429_vm3 = vcmask 523264  }
 0xa26   : > { %15318 = vmatmul.mubr.msk.f32.gmra.mrb[124].mxu0 %vm22833_vm1, %v7644_v10  ;;  %v8033_v10 = vld [vmem:[#allocation2 + $0xd9] sm:$0xff] }
 0xa27   : > { %15320 = vmatprep.mubr.msk.f32.mxu0 %vm22833_vm1, %v20505_v3  ;;  %v8018_v3 = vld [vmem:[#allocation2 + $0x61] sm:$0xff] }
 0xa2a   : > { %15321 = vmatmul.mubr.msk.f32.gmra.mrb[126].mxu0 %vm22833_vm1, %v20509_v4  ;;  %v8050_v4 = vsel %vm23386_vm4, %v8018_v3, 0.0  ;;  %vm23389_vm4 = vnez %v23345_v28  ;;  %v23397_v3 = vld [vmem:[#allocation42_spill] sm:$0xff] }
 0xa2b   : > { %15323 = vmatprep.mubr.msk.f32.mxu0 %vm22833_vm1, %v7647_v36  ;;  %v8056_v12 = vsel %vm23389_vm4, %v8024_v55, 0.0  ;;  %vm23393_vm4 = vnez %v23392_v21  ;;  %v8034_v36 = vld [vmem:[#allocation2 + $0xe1] sm:$0xff] }
 0xa2c   : > { %v8062_v8 = vsel %vm23393_vm4, %v8030_v24, 0.0  ;;  %v8964_v21 = vld [vmem:[#allocation2 + $0x8] sm:$0xff] }
 0xa2d   : > { %15406 = vmatprep.mubr.msk.f32.mxu1 %vm22833_vm1, %v8964_v21 }
 0xa2e   : > { %15324 = vmatmul.mubr.msk.f32.gmra.mrb[128].mxu0 %vm22833_vm1, %v7648_v33  ;;  %v8066_v33 = vsel %vm23364_vm5, %v8034_v36, 0.0 }
 0xa2f   : > { %15342 = vmatprep.mubr.msk.f32.mxu0 %vm22833_vm1, %v8011_v1  ;;  %v8035_v1 = vld [vmem:[#allocation2 + $0xe9] sm:$0xff] }
 0xa32   : > { %15343 = vmatmul.mubr.msk.f32.vlgmr.msra.gmra.mrb[34].mxu0 %vm22833_vm1, %v8044_v53  ;;  %v8068_v53 = vsel %vm23368_vm6, %v8036_v62, 0.0 }
 0xa33   : > { %15345 = vmatprep.mubr.msk.f32.mxu0 %vm22833_vm1, %v8013_v14  ;;  %v8037_v14 = vld [vmem:[#allocation2 + $0xf9] sm:$0xff] }
 0xa36   : > { %15346 = vmatmul.mubr.msk.f32.gmra.mrb[100].mxu0 %vm22833_vm1, %v8046_v29 }
 0xa37   : > { %15348 = vmatprep.mubr.msk.f32.mxu0 %vm22833_vm1, %v8015_v27  ;;  %v8070_v27 = vsel %vm23371_vm8, %v8038_v11, 0.0 }
 0xa3a   : > { %15349 = vmatmul.mubr.msk.f32.gmra.mrb[102].mxu0 %vm22833_vm1, %v8048_v48  ;;  %v8041_v48 = vld [vmem:[#allocation2 + $0x119] sm:$0xff] }
 0xa3b   : > { %15351 = vmatprep.mubr.msk.f32.mxu0 %vm22833_vm1, %v8017_v15  ;;  %v8042_v15 = vld [vmem:[#allocation2 + $0x121] sm:$0xff] }
 0xa3e   : > { %15352 = vmatmul.mubr.msk.f32.gmra.mrb[104].mxu0 %vm22833_vm1, %v8050_v4 }
 0xa3f   : > { %15354 = vmatprep.mubr.msk.f32.mxu0 %vm22833_vm1, %v8019_v49  ;;  %v8072_v49 = vsel %vm20227_vm0, %v23397_v3, 0.0 }
 0xa42   : > { %15355 = vmatmul.mubr.msk.f32.gmra.mrb[106].mxu0 %vm22833_vm1, %v8052_v23  ;;  %v8074_v23 = vsel %vm20245_vm7, %v8042_v15, 0.0  ;;  %vm23402_vm7 = vcmask 261120  }
 0xa43   : > { %15357 = vmatprep.mubr.msk.f32.mxu0 %vm22833_vm1, %v8021_v45  ;;  %v13290_v45 = vld [vmem:[%s23400_s11 + $0x40] sm:$0xff]  ;;  %vm23403_vm0 = vmmov %vm23402_vm7 }
 0xa46   : > { %15358 = vmatmul.mubr.msk.f32.gmra.mrb[108].mxu0 %vm22833_vm1, %v8054_v6  ;;  %v16138_v6 = vpack.c.bf16 %v13291_v63, %v13290_v45  ;;  %v13292_v45 = vld [vmem:[%s23400_s11 + $0x50] sm:$0xff]  ;;  %v13293_v63 = vld [vmem:[%s23400_s11 + $0x58] sm:$0xff] }
 0xa47   : > { %15360 = vmatprep.mubr.msk.f32.mxu0 %vm22833_vm1, %v8023_v7  ;;  %v20879_v7 = vld [vmem:[%s23401_s9] ss:$0 sm:$0xff] }
 0xa48   : > { %16139 = vmatprep.subr.bf16.mxu1 %v16138_v6 }
 0xa49   : > { %16141 = vmatpush3.bf16.msra.mxu1 %v16138_v6 }
 0xa4a   : > { %15361 = vmatmul.mubr.msk.f32.gmra.mrb[110].mxu0 %vm22833_vm1, %v8056_v12 }
 0xa4b   : > { %15363 = vmatprep.mubr.msk.f32.mxu0 %vm22833_vm1, %v8025_v5 }
 0xa4e   : > { %15364 = vmatmul.mubr.msk.f32.gmra.mrb[112].mxu0 %vm22833_vm1, %v8058_v58 }
 0xa4f   : > { %15366 = vmatprep.mubr.msk.f32.mxu0 %vm22833_vm1, %v8027_v41 }
 0xa52   : > { %15367 = vmatmul.mubr.msk.f32.gmra.mrb[114].mxu0 %vm22833_vm1, %v8060_v13 }
 0xa53   : > { %15369 = vmatprep.mubr.msk.f32.mxu0 %vm22833_vm1, %v8029_v59 }
 0xa56   : > { %15370 = vmatmul.mubr.msk.f32.gmra.mrb[116].mxu0 %vm22833_vm1, %v8062_v8 }
 0xa57   : > { %15372 = vmatprep.mubr.msk.f32.mxu0 %vm22833_vm1, %v8031_v42 }
 0xa5a   : > { %15373 = vmatmul.mubr.msk.f32.gmra.mrb[118].mxu0 %vm22833_vm1, %v8064_v61 }
 0xa5b   : > { %15375 = vmatprep.mubr.msk.f32.mxu0 %vm22833_vm1, %v8033_v10 }
 0xa5e   : > { %15376 = vmatmul.mubr.msk.f32.gmra.mrb[120].mxu0 %vm22833_vm1, %v8066_v33 }
 0xa5f   : > { %15378 = vmatprep.mubr.msk.f32.mxu0 %vm22833_vm1, %v8035_v1 }
 0xa62   : > { %15379 = vmatmul.mubr.msk.f32.gmra.mrb[122].mxu0 %vm22833_vm1, %v8068_v53 }
 0xa63   : > { %15381 = vmatprep.mubr.msk.f32.mxu0 %vm22833_vm1, %v8037_v14 }
 0xa66   : > { %15382 = vmatmul.mubr.msk.f32.gmra.mrb[124].mxu0 %vm22833_vm1, %v8070_v27 }
 0xa67   : > { %15384 = vmatprep.mubr.msk.f32.mxu0 %vm22833_vm1, %v23396_v9 }
 0xa6a   : > { %15385 = vmatmul.mubr.msk.f32.gmra.mrb[126].mxu0 %vm22833_vm1, %v8072_v49 }
 0xa6b   : > { %15387 = vmatprep.mubr.msk.f32.mxu0 %vm22833_vm1, %v8041_v48 }
 0xa6e   : > { %15388 = vmatmul.mubr.msk.f32.gmra.mrb[128].mxu0 %vm22833_vm1, %v8074_v23 }
 0xb05   : > { %v15344_v55 = vpop.f32.mrb[34].mxu0 }
 0xb06   : > { %v8445_v12 = vadd.f32 %v15344_v55, %v20879_v7  ;;  %v8246_v5 = vpop.f32.mrb[35].mxu0 }
 0xb07   : > { %v8444_v17 = vadd.f32 %v20879_v7, %v8246_v5 }
 0xb08   : > { %v20883_v58 = vmax.f32 %v8445_v12, 0.0  ;;  %v16142_v12 = vpack.c.bf16 %v13293_v63, %v13292_v45 }
 0xb09   : > { %v20885_v41 = vmax.f32 %v8444_v17, 0.0  ;;  %v15347_v34 = vpop.f32.mrb[100].mxu0 }
 0xb0a   : > { %v8447_v13 = vadd.f32 %v15347_v34, %v20879_v7  ;;  %8542 = vrot.lane.b32.xlu0 %v20883_v58, %s17317_s10  ;;  %v8256_v59 = vpop.f32.mrb[101].mxu0  ;;  %16143 = vmatprep.subr.bf16.mxu1 %v16142_v12 }
 0xb0b   : > { %v8446_v24 = vadd.f32 %v20879_v7, %v8256_v59  ;;  %8540 = vrot.lane.b32.xlu1 %v20885_v41, %s17317_s10  ;;  %16145 = vmatpush3.bf16.msra.mxu1 %v16142_v12 }
 0xb0c   : > { %v20893_v8 = vmax.f32 %v8447_v13, 0.0 }
 0xb0d   : > { %v20895_v42 = vmax.f32 %v8446_v24, 0.0  ;;  %v15350_v57 = vpop.f32.mrb[102].mxu0 }
 0xb0e   : > { %v8449_v61 = vadd.f32 %v15350_v57, %v20879_v7  ;;  %8546 = vrot.lane.b32.xlu0 %v20893_v8, %s17317_s10  ;;  %v8266_v10 = vpop.f32.mrb[103].mxu0 }
 0xb0f   : > { %v8448_v36 = vadd.f32 %v20879_v7, %v8266_v10  ;;  %8544 = vrot.lane.b32.xlu1 %v20895_v42, %s17317_s10 }
 0xb10   : > { %v20903_v33 = vmax.f32 %v8449_v61, 0.0 }
 0xb11   : > { %v20905_v1 = vmax.f32 %v8448_v36, 0.0  ;;  %v15353_v62 = vpop.f32.mrb[104].mxu0 }
 0xb12   : > { %v8451_v53 = vadd.f32 %v15353_v62, %v20879_v7  ;;  %8550 = vrot.lane.b32.xlu0 %v20903_v33, %s17317_s10  ;;  %v8276_v14 = vpop.f32.mrb[105].mxu0 }
 0xb13   : > { %v8450_v11 = vadd.f32 %v20879_v7, %v8276_v14  ;;  %8548 = vrot.lane.b32.xlu1 %v20905_v1, %s17317_s10 }
 0xb14   : > { %v20913_v27 = vmax.f32 %v8451_v53, 0.0 }
 0xb15   : > { %v20915_v9 = vmax.f32 %v8450_v11, 0.0  ;;  %v15356_v48 = vpop.f32.mrb[106].mxu0 }
 0xb16   : > { %v8453_v15 = vadd.f32 %v15356_v48, %v20879_v7  ;;  %8554 = vrot.lane.b32.xlu0 %v20913_v27, %s17317_s10  ;;  %v8286_v3 = vpop.f32.mrb[107].mxu0 }
 0xb17   : > { %v8452_v49 = vadd.f32 %v20879_v7, %v8286_v3  ;;  %8552 = vrot.lane.b32.xlu1 %v20915_v9, %s17317_s10 }
 0xb18   : > { %v20923_v23 = vmax.f32 %v8453_v15, 0.0 }
 0xb19   : > { %v20931_v6 = vmax.f32 %v8452_v49, 0.0  ;;  %v15359_v55 = vpop.f32.mrb[108].mxu0 }
 0xb1a   : > { %v8455_v5 = vadd.f32 %v15359_v55, %v20879_v7  ;;  %8558 = vrot.lane.b32.xlu0 %v20923_v23, %s17317_s10  ;;  %v8296_v17 = vpop.f32.mrb[109].mxu0 }
 0xb1b   : > { %v8454_v34 = vadd.f32 %v20879_v7, %v8296_v17  ;;  %8556 = vrot.lane.b32.xlu1 %v20931_v6, %s17317_s10 }
 0xb1c   : > { %v20939_v13 = vmax.f32 %v8455_v5, 0.0 }
 0xb1d   : > { %v20941_v59 = vmax.f32 %v8454_v34, 0.0  ;;  %v15362_v24 = vpop.f32.mrb[110].mxu0 }
 0xb1e   : > { %v8457_v57 = vadd.f32 %v15362_v24, %v20879_v7  ;;  %8562 = vrot.lane.b32.xlu0 %v20939_v13, %s17317_s10  ;;  %v8306_v61 = vpop.f32.mrb[111].mxu0 }
 0xb1f   : > { %v8456_v10 = vadd.f32 %v20879_v7, %v8306_v61  ;;  %8560 = vrot.lane.b32.xlu1 %v20941_v59, %s17317_s10 }
 0xb20   : > { %v20949_v36 = vmax.f32 %v8457_v57, 0.0 }
 0xb21   : > { %v20951_v62 = vmax.f32 %v8456_v10, 0.0  ;;  %v15365_v53 = vpop.f32.mrb[112].mxu0 }
 0xb22   : > { %v8459_v14 = vadd.f32 %v15365_v53, %v20879_v7  ;;  %8566 = vrot.lane.b32.xlu0 %v20949_v36, %s17317_s10  ;;  %v8316_v11 = vpop.f32.mrb[113].mxu0 }
 0xb23   : > { %v8458_v48 = vadd.f32 %v20879_v7, %v8316_v11  ;;  %8564 = vrot.lane.b32.xlu1 %v20951_v62, %s17317_s10 }
 0xb24   : > { %v20959_v15 = vmax.f32 %v8459_v14, 0.0 }
 0xb25   : > { %v20961_v3 = vmax.f32 %v8458_v48, 0.0  ;;  %v15368_v49 = vpop.f32.mrb[114].mxu0 }
 0xb26   : > { %v8461_v45 = vadd.f32 %v15368_v49, %v20879_v7  ;;  %8570 = vrot.lane.b32.xlu0 %v20959_v15, %s17317_s10  ;;  %v8326_v63 = vpop.f32.mrb[115].mxu0 }
 0xb27   : > { %v8460_v55 = vadd.f32 %v20879_v7, %v8326_v63  ;;  %8568 = vrot.lane.b32.xlu1 %v20961_v3, %s17317_s10 }
 0xb28   : > { %v20969_v12 = vmax.f32 %v8461_v45, 0.0 }
 0xb29   : > { %v20971_v5 = vmax.f32 %v8460_v55, 0.0  ;;  %v15371_v17 = vpop.f32.mrb[116].mxu0 }
 0xb2a   : > { %v8463_v34 = vadd.f32 %v15371_v17, %v20879_v7  ;;  %8574 = vrot.lane.b32.xlu0 %v20969_v12, %s17317_s10  ;;  %v8336_v24 = vpop.f32.mrb[117].mxu0 }
 0xb2b   : > { %v8462_v57 = vadd.f32 %v20879_v7, %v8336_v24  ;;  %8572 = vrot.lane.b32.xlu1 %v20971_v5, %s17317_s10 }
 0xb2c   : > { %v20979_v61 = vmax.f32 %v8463_v34, 0.0 }
 0xb2d   : > { %v20981_v10 = vmax.f32 %v8462_v57, 0.0  ;;  %v15374_v53 = vpop.f32.mrb[118].mxu0 }
 0xb2e   : > { %v8465_v14 = vadd.f32 %v15374_v53, %v20879_v7  ;;  %8578 = vrot.lane.b32.xlu0 %v20979_v61, %s17317_s10  ;;  %v8346_v11 = vpop.f32.mrb[119].mxu0 }
 0xb2f   : > { %v8464_v48 = vadd.f32 %v20879_v7, %v8346_v11  ;;  %8576 = vrot.lane.b32.xlu1 %v20981_v10, %s17317_s10 }
 0xb30   : > { %v20989_v49 = vmax.f32 %v8465_v14, 0.0 }
 0xb31   : > { %v20991_v45 = vmax.f32 %v8464_v48, 0.0  ;;  %v15377_v63 = vpop.f32.mrb[120].mxu0 }
 0xb32   : > { %v8467_v55 = vadd.f32 %v15377_v63, %v20879_v7  ;;  %8582 = vrot.lane.b32.xlu0 %v20989_v49, %s17317_s10  ;;  %v8356_v17 = vpop.f32.mrb[121].mxu0 }
 0xb33   : > { %v8466_v34 = vadd.f32 %v20879_v7, %v8356_v17  ;;  %8580 = vrot.lane.b32.xlu1 %v20991_v45, %s17317_s10  ;;  %v13295_v17 = vld [vmem:[%s23400_s11 + $0x68] sm:$0xff] }
 0xb34   : > { %v20999_v24 = vmax.f32 %v8467_v55, 0.0  ;;  %v13294_v55 = vld [vmem:[%s23400_s11 + $0x60] sm:$0xff] }
 0xb35   : > { %v21001_v57 = vmax.f32 %v8466_v34, 0.0  ;;  %v15380_v53 = vpop.f32.mrb[122].mxu0  ;;  %v16146_v19 = vpack.c.bf16 %v13295_v17, %v13294_v55 }
 0xb36   : > { %v8469_v14 = vadd.f32 %v15380_v53, %v20879_v7  ;;  %8586 = vrot.lane.b32.xlu0 %v20999_v24, %s17317_s10  ;;  %v8366_v11 = vpop.f32.mrb[123].mxu0 }
 0xb37   : > { %v8468_v48 = vadd.f32 %v20879_v7, %v8366_v11  ;;  %8584 = vrot.lane.b32.xlu1 %v21001_v57, %s17317_s10  ;;  %16147 = vmatprep.subr.bf16.mxu1 %v16146_v19 }
 0xb38   : > { %v21009_v63 = vmax.f32 %v8469_v14, 0.0  ;;  %16149 = vmatpush3.bf16.msra.mxu1 %v16146_v19  ;;  %v13297_v19 = vld [vmem:[%s23400_s11 + $0x78] sm:$0xff] }
 0xb39   : > { %v21017_v34 = vmax.f32 %v8468_v48, 0.0  ;;  %v15383_v53 = vpop.f32.mrb[124].mxu0 }
 0xb3a   : > { %v8471_v4 = vadd.f32 %v15383_v53, %v20879_v7  ;;  %8590 = vrot.lane.b32.xlu0 %v21009_v63, %s17317_s10  ;;  %v8376_v11 = vpop.f32.mrb[125].mxu0 }
 0xb3b   : > { %v8470_v14 = vadd.f32 %v20879_v7, %v8376_v11  ;;  %8588 = vrot.lane.b32.xlu1 %v21017_v34, %s17317_s10 }
 0xb3c   : > { %v21025_v29 = vmax.f32 %v8471_v4, 0.0  ;;  %v13296_v4 = vld [vmem:[%s23400_s11 + $0x70] sm:$0xff] }
 0xb3d   : > { %v21027_v43 = vmax.f32 %v8470_v14, 0.0  ;;  %v15386_v48 = vpop.f32.mrb[126].mxu0  ;;  %v16150_v31 = vpack.c.bf16 %v13297_v19, %v13296_v4  ;;  %v8957_v4 = vld [vmem:[%s23400_s11 + $0x8] sm:$0xff] }
 0xb3e   : > { %v8473_v55 = vadd.f32 %v15386_v48, %v20879_v7  ;;  %8594 = vrot.lane.b32.xlu0 %v21025_v29, %s17317_s10  ;;  %v8386_v17 = vpop.f32.mrb[127].mxu0 }
 0xb3f   : > { %v8472_v53 = vadd.f32 %v20879_v7, %v8386_v17  ;;  %8592 = vrot.lane.b32.xlu1 %v21027_v43, %s17317_s10  ;;  %16151 = vmatprep.subr.bf16.mxu1 %v16150_v31 }
 0xb40   : > { %v21035_v11 = vmax.f32 %v8473_v55, 0.0  ;;  %16153 = vmatpush3.bf16.msra.mxu1 %v16150_v31 }
 0xb41   : > { %v21043_v14 = vmax.f32 %v8472_v53, 0.0  ;;  %v15389_v48 = vpop.f32.mrb[128].mxu0  ;;  %v8956_v53 = vld [vmem:[%s23400_s11] sm:$0xff] }
 0xb42   : > { %v21046_v54 = vadd.f32 %v15389_v48, %v20879_v7  ;;  %8598 = vrot.lane.b32.xlu0 %v21035_v11, %s17317_s10  ;;  %v8396_v55 = vpop.f32.mrb[129].mxu0  ;;  %v16154_v19 = vpack.c.bf16 %v8957_v4, %v8956_v53  ;;  %v8965_v48 = vld [vmem:[#allocation2 + $0x10] sm:$0xff] }
 0xb43   : > { %v21051_v17 = vadd.f32 %v20879_v7, %v8396_v55  ;;  %8596 = vrot.lane.b32.xlu1 %v21043_v14, %s17317_s10  ;;  %15407 = vmatmul.mubr.msk.f32.vlgmr.msra.gmra.mrb[34].mxu1 %vm22833_vm1, %v8965_v48  ;;  %vm23404_vm1 = vmmov %vm23403_vm0 }
 0xb44   : > { %16155 = vmatprep.subr.bf16.mxu1 %v16154_v19 }
 0xb45   : > { %16157 = vmatpush3.bf16.msra.mxu1 %v16154_v19 }
 0xb7c   : > { %v8543_v7 = vpop.permute.xlu0 %8542 }
 0xb7d   : > { %v8637_v31 = vmul.f32 %v8543_v7, %v20883_v58  ;;  %v8701_v55 = vmax.f32 %v20883_v58, %v8543_v7  ;;  %v8541_v26 = vpop.permute.xlu1 %8540 }
 0xb7e   : > { %v8636_v56 = vmul.f32 %v8541_v26, %v20885_v41  ;;  %v8700_v28 = vmax.f32 %v20885_v41, %v8541_v26 }
 0xb7f   : > { %8669 = vst.msk [vmem:[#allocation2 + $0x20] sm:$0xff] %vm23402_vm7, %v8637_v31  ;;  %8766 = vrot.lane.b32.xlu0 %v8701_v55, %s17316_s16  ;;  %vm23405_vm7 = vmmov %vm23403_vm0  ;;  %v8959_v31 = vld [vmem:[%s23400_s11 + $0x18] sm:$0xff] }
 0xb80   : > { %8668 = vst.msk [vmem:[#allocation2 + $0x18] sm:$0xff] %vm23403_vm0, %v8636_v56  ;;  %v8547_v21 = vpop.permute.xlu0 %8546  ;;  %8764 = vrot.lane.b32.xlu1 %v8700_v28, %s17316_s16 }
 0xb81   : > { %v8639_v53 = vmul.f32 %v8547_v21, %v20893_v8  ;;  %v8703_v4 = vmax.f32 %v20893_v8, %v8547_v21  ;;  %v8545_v19 = vpop.permute.xlu1 %8544 }
 0xb82   : > { %v8638_v58 = vmul.f32 %v8545_v19, %v20895_v42  ;;  %v8702_v48 = vmax.f32 %v20895_v42, %v8545_v19  ;;  %v8958_v42 = vld [vmem:[%s23400_s11 + $0x10] sm:$0xff] }
 0xb83   : > { %8671 = vst.msk [vmem:[#allocation2 + $0x30] sm:$0xff] %vm23404_vm1, %v8639_v53  ;;  %8770 = vrot.lane.b32.xlu0 %v8703_v4, %s17316_s16  ;;  %vm23406_vm1 = vmmov %vm23403_vm0  ;;  %v16158_v55 = vpack.c.bf16 %v8959_v31, %v8958_v42 }
 0xb84   : > { %8670 = vst.msk [vmem:[#allocation2 + $0x28] sm:$0xff] %vm23405_vm7, %v8638_v58  ;;  %v8551_v26 = vpop.permute.xlu0 %8550  ;;  %8768 = vrot.lane.b32.xlu1 %v8702_v48, %s17316_s16  ;;  %vm23407_vm7 = vmmov %vm23403_vm0 }
 0xb85   : > { %v8641_v28 = vmul.f32 %v8551_v26, %v20903_v33  ;;  %v8705_v56 = vmax.f32 %v20903_v33, %v8551_v26  ;;  %v8549_v41 = vpop.permute.xlu1 %8548  ;;  %16159 = vmatprep.subr.bf16.mxu1 %v16158_v55 }
 0xb86   : > { %v8640_v8 = vmul.f32 %v8549_v41, %v20905_v1  ;;  %v8704_v7 = vmax.f32 %v20905_v1, %v8549_v41  ;;  %16161 = vmatpush3.bf16.msra.mxu1 %v16158_v55 }
 0xb87   : > { %8673 = vst.msk [vmem:[#allocation2 + $0x40] sm:$0xff] %vm23403_vm0, %v8641_v28  ;;  %8774 = vrot.lane.b32.xlu0 %v8705_v56, %s17316_s16 }
 0xb88   : > { %8672 = vst.msk [vmem:[#allocation2 + $0x38] sm:$0xff] %vm23406_vm1, %v8640_v8  ;;  %v8555_v33 = vpop.permute.xlu0 %8554  ;;  %8772 = vrot.lane.b32.xlu1 %v8704_v7, %s17316_s16  ;;  %vm23408_vm1 = vmmov %vm23403_vm0 }
 0xb89   : > { %v8643_v1 = vmul.f32 %v8555_v33, %v20913_v27  ;;  %v8707_v21 = vmax.f32 %v20913_v27, %v8555_v33  ;;  %v8553_v53 = vpop.permute.xlu1 %8552 }
 0xb8a   : > { %v8642_v4 = vmul.f32 %v8553_v53, %v20915_v9  ;;  %v8706_v19 = vmax.f32 %v20915_v9, %v8553_v53 }
 0xb8b   : > { %8675 = vst.msk [vmem:[#allocation2 + $0x50] sm:$0xff] %vm23407_vm7, %v8643_v1  ;;  %8778 = vrot.lane.b32.xlu0 %v8707_v21, %s17316_s16  ;;  %vm23409_vm7 = vmmov %vm23403_vm0  ;;  %v8961_v21 = vld [vmem:[%s23400_s11 + $0x28] sm:$0xff] }
 0xb8c   : > { %8674 = vst.msk [vmem:[#allocation2 + $0x48] sm:$0xff] %vm23403_vm0, %v8642_v4  ;;  %v8559_v58 = vpop.permute.xlu0 %8558  ;;  %8776 = vrot.lane.b32.xlu1 %v8706_v19, %s17316_s16 }
 0xb8d   : > { %v8645_v48 = vmul.f32 %v8559_v58, %v20923_v23  ;;  %v8709_v27 = vmax.f32 %v20923_v23, %v8559_v58  ;;  %v8557_v26 = vpop.permute.xlu1 %8556 }
 0xb8e   : > { %v8644_v28 = vmul.f32 %v8557_v26, %v20931_v6  ;;  %v8708_v9 = vmax.f32 %v20931_v6, %v8557_v26 }
 0xb8f   : > { %8677 = vst.msk [vmem:[#allocation2 + $0x60] sm:$0xff] %vm23408_vm1, %v8645_v48  ;;  %8782 = vrot.lane.b32.xlu0 %v8709_v27, %s17316_s16  ;;  %vm23410_vm1 = vmmov %vm23403_vm0 }
 0xb90   : > { %8676 = vst.msk [vmem:[#allocation2 + $0x58] sm:$0xff] %vm23409_vm7, %v8644_v28  ;;  %v8563_v56 = vpop.permute.xlu0 %8562  ;;  %8780 = vrot.lane.b32.xlu1 %v8708_v9, %s17316_s16  ;;  %vm23411_vm7 = vmmov %vm23403_vm0 }
 0xb91   : > { %v8647_v41 = vmul.f32 %v8563_v56, %v20939_v13  ;;  %v8711_v8 = vmax.f32 %v20939_v13, %v8563_v56  ;;  %v8561_v7 = vpop.permute.xlu1 %8560 }
 0xb92   : > { %v8646_v23 = vmul.f32 %v8561_v7, %v20941_v59  ;;  %v8710_v42 = vmax.f32 %v20941_v59, %v8561_v7  ;;  %v8960_v59 = vld [vmem:[%s23400_s11 + $0x20] sm:$0xff] }
 0xb93   : > { %8679 = vst.msk [vmem:[#allocation2 + $0x70] sm:$0xff] %vm23403_vm0, %v8647_v41  ;;  %8786 = vrot.lane.b32.xlu0 %v8711_v8, %s17316_s16  ;;  %v16162_v53 = vpack.c.bf16 %v8961_v21, %v8960_v59 }
 0xb94   : > { %8678 = vst.msk [vmem:[#allocation2 + $0x68] sm:$0xff] %vm23410_vm1, %v8646_v23  ;;  %v8567_v6 = vpop.permute.xlu0 %8566  ;;  %8784 = vrot.lane.b32.xlu1 %v8710_v42, %s17316_s16  ;;  %vm23412_vm1 = vmmov %vm23403_vm0 }
 0xb95   : > { %v8649_v31 = vmul.f32 %v8567_v6, %v20949_v36  ;;  %v8713_v33 = vmax.f32 %v20949_v36, %v8567_v6  ;;  %v8565_v55 = vpop.permute.xlu1 %8564  ;;  %16163 = vmatprep.subr.bf16.mxu1 %v16162_v53 }
 0xb96   : > { %v8648_v13 = vmul.f32 %v8565_v55, %v20951_v62  ;;  %v8712_v1 = vmax.f32 %v20951_v62, %v8565_v55  ;;  %16165 = vmatpush3.bf16.msra.mxu1 %v16162_v53  ;;  %v8963_v55 = vld [vmem:[%s23400_s11 + $0x38] sm:$0xff] }
 0xb97   : > { %8681 = vst.msk [vmem:[#allocation2 + $0x80] sm:$0xff] %vm23411_vm7, %v8649_v31  ;;  %8790 = vrot.lane.b32.xlu0 %v8713_v33, %s17316_s16  ;;  %vm23413_vm7 = vmmov %vm23403_vm0 }
 0xb98   : > { %8680 = vst.msk [vmem:[#allocation2 + $0x78] sm:$0xff] %vm23403_vm0, %v8648_v13  ;;  %v8571_v36 = vpop.permute.xlu0 %8570  ;;  %8788 = vrot.lane.b32.xlu1 %v8712_v1, %s17316_s16 }
 0xb99   : > { %v8651_v62 = vmul.f32 %v8571_v36, %v20959_v15  ;;  %v8715_v4 = vmax.f32 %v20959_v15, %v8571_v36  ;;  %v8569_v19 = vpop.permute.xlu1 %8568 }
 0xb9a   : > { %v8650_v58 = vmul.f32 %v8569_v19, %v20961_v3  ;;  %v8714_v48 = vmax.f32 %v20961_v3, %v8569_v19 }
 0xb9b   : > { %8683 = vst.msk [vmem:[#allocation2 + $0x90] sm:$0xff] %vm23412_vm1, %v8651_v62  ;;  %8794 = vrot.lane.b32.xlu0 %v8715_v4, %s17316_s16  ;;  %vm23414_vm1 = vmmov %vm23403_vm0 }
 0xb9c   : > { %8682 = vst.msk [vmem:[#allocation2 + $0x88] sm:$0xff] %vm23413_vm7, %v8650_v58  ;;  %v8575_v27 = vpop.permute.xlu0 %8574  ;;  %8792 = vrot.lane.b32.xlu1 %v8714_v48, %s17316_s16  ;;  %vm23415_vm7 = vmmov %vm23403_vm0 }
 0xb9d   : > { %v8653_v26 = vmul.f32 %v8575_v27, %v20969_v12  ;;  %v8717_v15 = vmax.f32 %v20969_v12, %v8575_v27  ;;  %v8573_v28 = vpop.permute.xlu1 %8572 }
 0xb9e   : > { %v8652_v9 = vmul.f32 %v8573_v28, %v20971_v5  ;;  %v8716_v3 = vmax.f32 %v20971_v5, %v8573_v28 }
 0xb9f   : > { %8685 = vst.msk [vmem:[#allocation2 + $0xa0] sm:$0xff] %vm23403_vm0, %v8653_v26  ;;  %8798 = vrot.lane.b32.xlu0 %v8717_v15, %s17316_s16 }
 0xba0   : > { %8684 = vst.msk [vmem:[#allocation2 + $0x98] sm:$0xff] %vm23414_vm1, %v8652_v9  ;;  %v8579_v56 = vpop.permute.xlu0 %8578  ;;  %8796 = vrot.lane.b32.xlu1 %v8716_v3, %s17316_s16  ;;  %vm23416_vm1 = vmmov %vm23403_vm0 }
 0xba1   : > { %v8655_v41 = vmul.f32 %v8579_v56, %v20979_v61  ;;  %v8719_v8 = vmax.f32 %v20979_v61, %v8579_v56  ;;  %v8577_v7 = vpop.permute.xlu1 %8576 }
 0xba2   : > { %v8654_v12 = vmul.f32 %v8577_v7, %v20981_v10  ;;  %v8718_v23 = vmax.f32 %v20981_v10, %v8577_v7  ;;  %v8962_v10 = vld [vmem:[%s23400_s11 + $0x30] sm:$0xff] }
 0xba3   : > { %8687 = vst.msk [vmem:[#allocation2 + $0xb0] sm:$0xff] %vm23415_vm7, %v8655_v41  ;;  %8802 = vrot.lane.b32.xlu0 %v8719_v8, %s17316_s16  ;;  %vm23417_vm7 = vmmov %vm23403_vm0  ;;  %v16166_v13 = vpack.c.bf16 %v8963_v55, %v8962_v10 }
 0xba4   : > { %8686 = vst.msk [vmem:[#allocation2 + $0xa8] sm:$0xff] %vm23403_vm0, %v8654_v12  ;;  %v8583_v5 = vpop.permute.xlu0 %8582  ;;  %8800 = vrot.lane.b32.xlu1 %v8718_v23, %s17316_s16 }
 0xba5   : > { %v8657_v42 = vmul.f32 %v8583_v5, %v20989_v49  ;;  %v8721_v6 = vmax.f32 %v20989_v49, %v8583_v5  ;;  %v8581_v31 = vpop.permute.xlu1 %8580  ;;  %16167 = vmatprep.subr.bf16.mxu1 %v16166_v13 }
 0xba6   : > { %v8656_v61 = vmul.f32 %v8581_v31, %v20991_v45  ;;  %v8720_v33 = vmax.f32 %v20991_v45, %v8581_v31  ;;  %16169 = vmatpush3.bf16.msra.mxu1 %v16166_v13 }
 0xba7   : > { %8689 = vst.msk [vmem:[#allocation2 + $0xc0] sm:$0xff] %vm23416_vm1, %v8657_v42  ;;  %8806 = vrot.lane.b32.xlu0 %v8721_v6, %s17316_s16  ;;  %vm23418_vm1 = vmmov %vm23403_vm0 }
 0xba8   : > { %8688 = vst.msk [vmem:[#allocation2 + $0xb8] sm:$0xff] %vm23417_vm7, %v8656_v61  ;;  %v8587_v49 = vpop.permute.xlu0 %8586  ;;  %8804 = vrot.lane.b32.xlu1 %v8720_v33, %s17316_s16  ;;  %vm23419_vm7 = vmmov %vm23403_vm0 }
 0xba9   : > { %v8659_v45 = vmul.f32 %v8587_v49, %v20999_v24  ;;  %v8723_v1 = vmax.f32 %v20999_v24, %v8587_v49  ;;  %v8585_v59 = vpop.permute.xlu1 %8584 }
 0xbaa   : > { %v8658_v21 = vmul.f32 %v8585_v59, %v21001_v57  ;;  %v8722_v36 = vmax.f32 %v21001_v57, %v8585_v59 }
 0xbab   : > { %8691 = vst.msk [vmem:[#allocation2 + $0xd0] sm:$0xff] %vm23403_vm0, %v8659_v45  ;;  %8810 = vrot.lane.b32.xlu0 %v8723_v1, %s17316_s16 }
 0xbac   : > { %8690 = vst.msk [vmem:[#allocation2 + $0xc8] sm:$0xff] %vm23418_vm1, %v8658_v21  ;;  %v8591_v53 = vpop.permute.xlu0 %8590  ;;  %8808 = vrot.lane.b32.xlu1 %v8722_v36, %s17316_s16  ;;  %vm23420_vm1 = vmmov %vm23403_vm0 }
 0xbad   : > { %v8661_v62 = vmul.f32 %v8591_v53, %v21009_v63  ;;  %v8725_v24 = vmax.f32 %v21009_v63, %v8591_v53  ;;  %v8589_v4 = vpop.permute.xlu1 %8588 }
 0xbae   : > { %v8660_v19 = vmul.f32 %v8589_v4, %v21017_v34  ;;  %v8724_v57 = vmax.f32 %v21017_v34, %v8589_v4 }
 0xbaf   : > { %8693 = vst.msk [vmem:[#allocation2 + $0xe0] sm:$0xff] %vm23419_vm7, %v8661_v62  ;;  %8814 = vrot.lane.b32.xlu0 %v8725_v24, %s17316_s16  ;;  %vm23421_vm7 = vmmov %vm23403_vm0 }
 0xbb0   : > { %8692 = vst.msk [vmem:[#allocation2 + $0xd8] sm:$0xff] %vm23403_vm0, %v8660_v19  ;;  %v8595_v58 = vpop.permute.xlu0 %8594  ;;  %8812 = vrot.lane.b32.xlu1 %v8724_v57, %s17316_s16 }
 0xbb1   : > { %v8663_v48 = vmul.f32 %v8595_v58, %v21025_v29  ;;  %v8727_v27 = vmax.f32 %v21025_v29, %v8595_v58  ;;  %v8593_v26 = vpop.permute.xlu1 %8592  ;;  %v13362_v29 = vld [vmem:[%s23400_s11 + $0x80] sm:$0xff] }
 0xbb2   : > { %v8662_v63 = vmul.f32 %v8593_v26, %v21027_v43  ;;  %v8726_v15 = vmax.f32 %v21027_v43, %v8593_v26  ;;  %v13363_v43 = vld [vmem:[%s23400_s11 + $0x88] sm:$0xff] }
 0xbb3   : > { %8695 = vst.msk [vmem:[#allocation2 + $0xf0] sm:$0xff] %vm23420_vm1, %v8663_v48  ;;  %8818 = vrot.lane.b32.xlu0 %v8727_v27, %s17316_s16  ;;  %v21203_v8 = vpack.c.bf16 %v13363_v43, %v13362_v29  ;;  %vm23422_vm1 = vmmov %vm23403_vm0 }
 0xbb4   : > { %8694 = vst.msk [vmem:[#allocation2 + $0xe8] sm:$0xff] %vm23421_vm7, %v8662_v63  ;;  %v8599_v34 = vpop.permute.xlu0 %8598  ;;  %8816 = vrot.lane.b32.xlu1 %v8726_v15, %s17316_s16  ;;  %vm23423_vm7 = vcmask 523520  }
 0xbb5   : > { %v8665_v28 = vmul.f32 %v8599_v34, %v21035_v11  ;;  %v8729_v9 = vmax.f32 %v21035_v11, %v8599_v34  ;;  %v8597_v3 = vpop.permute.xlu1 %8596  ;;  %16171 = vmatprep.subr.bf16.mxu1 %v21203_v8  ;;  %v21211_v11 = vmax.f32 %v21051_v17, 0.0 }
 0xbb6   : > { %v8664_v56 = vmul.f32 %v8597_v3, %v21043_v14  ;;  %v8728_v41 = vmax.f32 %v21043_v14, %v8597_v3  ;;  %v21216_v14 = vmax.f32 %v21046_v54, 0.0 }
 0xbb7   : > { %8697 = vst.msk [vmem:[#allocation2 + $0x100] sm:$0xff] %vm23403_vm0, %v8665_v28  ;;  %8822 = vrot.lane.b32.xlu0 %v8729_v9, %s17316_s16  ;;  %vm23424_vm0 = vmmov %vm23423_vm7 }
 0xbb8   : > { %8696 = vst.msk [vmem:[#allocation2 + $0xf8] sm:$0xff] %vm23422_vm1, %v8664_v56  ;;  %8820 = vrot.lane.b32.xlu1 %v8728_v41, %s17316_s16  ;;  %vm23425_vm1 = vmmov %vm23424_vm0 }
 0xbb9   : > { %vm23426_vm8 = vmmov %vm23424_vm0 }
 0xbba   : > { %vm23427_vm6 = vmmov %vm23424_vm0 }
 0xbbb   : > { %vm23428_vm5 = vmmov %vm23424_vm0 }
 0xbbc   : > { %8600 = vrot.lane.b32.xlu1 %v21211_v11, %s17317_s10 }
 0xbc0   : > { %8602 = vrot.lane.b32.xlu1 %v21216_v14, %s17317_s10  ;;  %s17236_s10 = sshll.u32 %s17320_s19, 4  ;;  %s17237_s10 = int_to_ptr.vmem [resolvable:$false] %s17236_s10 }
 0xbc1   : > { %s17238_s13 = scalar_lea.vmem %s17237_s10, 8192 }
 0xbf1   : > { %v8767_v7 = vpop.permute.xlu0 %8766 }
 0xbf2   : > { %8861 = vst.msk [vmem:[#allocation2 + $0x20] sm:$0xff] %vm23423_vm7, %v8767_v7  ;;  %v8765_v12 = vpop.permute.xlu1 %8764  ;;  %vm23431_vm7 = vmmov %vm23429_vm3 }
 0xbf3   : > { %8860 = vst.msk [vmem:[#allocation2 + $0x18] sm:$0xff] %vm23424_vm0, %v8765_v12 }
 0xbf5   : > { %v8771_v23 = vpop.permute.xlu0 %8770 }
 0xbf6   : > { %8863 = vst.msk [vmem:[#allocation2 + $0x30] sm:$0xff] %vm23425_vm1, %v8771_v23  ;;  %v8769_v17 = vpop.permute.xlu1 %8768  ;;  %vm23438_vm1 = vmmov %vm23424_vm0 }
 0xbf7   : > { %8862 = vst.msk [vmem:[#allocation2 + $0x28] sm:$0xff] %vm23426_vm8, %v8769_v17  ;;  %vm23434_vm8 = vmmov %vm23429_vm3 }
 0xbf9   : > { %v8775_v5 = vpop.permute.xlu0 %8774  ;;  %v21230_v6 = vld [vmem:[#allocation2 + $0x20] sm:$0xff] }
 0xbfa   : > { %8865 = vst.msk [vmem:[#allocation2 + $0x40] sm:$0xff] %vm23427_vm6, %v8775_v5  ;;  %v8773_v54 = vpop.permute.xlu1 %8772  ;;  %v21225_v42 = vld [vmem:[#allocation2 + $0x18] sm:$0xff]  ;;  %23430 = vst [vmem:[#allocation94_spill] sm:$0xff] %v21230_v6 }
 0xbfb   : > { %8864 = vst.msk [vmem:[#allocation2 + $0x38] sm:$0xff] %vm23428_vm5, %v8773_v54  ;;  %15409 = vmatprep.mubr.msk.f32.mxu1 %vm23429_vm3, %v21225_v42  ;;  %vm23433_vm6 = vmmov %vm23424_vm0 }
 0xbfc   : > { %15410 = vmatmul.mubr.msk.f32.gmra.mrb[100].mxu1 %vm23431_vm7, %v21230_v6  ;;  %vm23436_vm5 = vmmov %vm23424_vm0 }
 0xbfd   : > { %v8779_v31 = vpop.permute.xlu0 %8778  ;;  %v21240_v10 = vld [vmem:[#allocation2 + $0x30] sm:$0xff]  ;;  %vm23439_vm7 = vmmov %vm23429_vm3 }
 0xbfe   : > { %8867 = vst.msk [vmem:[#allocation2 + $0x50] sm:$0xff] %vm23424_vm0, %v8779_v31  ;;  %v8777_v61 = vpop.permute.xlu1 %8776  ;;  %v21235_v33 = vld [vmem:[#allocation2 + $0x28] sm:$0xff]  ;;  %23435 = vst [vmem:[#allocation24_spill] sm:$0xff] %v21240_v10 }
 0xbff   : > { %23432 = vst [vmem:[#allocation41_spill] sm:$0xff] %v21235_v33  ;;  %8866 = vst.msk [vmem:[#allocation2 + $0x48] sm:$0xff] %vm23433_vm6, %v8777_v61  ;;  %15412 = vmatprep.mubr.msk.f32.mxu1 %vm23434_vm8, %v21235_v33  ;;  %v21576_v33 = vld [vmem:[#allocation2 + $0x19] sm:$0xff]  ;;  %v21578_v6 = vld [vmem:[#allocation2 + $0x21] sm:$0xff] }
 0xc00   : > { %15413 = vmatmul.mubr.msk.f32.gmra.mrb[102].mxu1 %vm23429_vm3, %v21240_v10  ;;  %vm23441_vm0 = vmmov %vm23429_vm3  ;;  %v13407_v10 = vld [vmem:[%s23400_s11 + $0xe8] sm:$0xff] }
 0xc01   : > { %v8783_v55 = vpop.permute.xlu0 %8782  ;;  %v21250_v45 = vld [vmem:[#allocation2 + $0x40] sm:$0xff]  ;;  %vm23442_vm6 = vmmov %vm23438_vm1 }
 0xc02   : > { %8869 = vst.msk [vmem:[#allocation2 + $0x60] sm:$0xff] %vm23436_vm5, %v8783_v55  ;;  %v8781_v49 = vpop.permute.xlu1 %8780  ;;  %v21245_v13 = vld [vmem:[#allocation2 + $0x38] sm:$0xff]  ;;  %23440 = vst [vmem:[#allocation36_spill] sm:$0xff] %v21250_v45 }
 0xc03   : > { %23437 = vst [vmem:[#allocation65_spill] sm:$0xff] %v21245_v13  ;;  %8868 = vst.msk [vmem:[#allocation2 + $0x58] sm:$0xff] %vm23438_vm1, %v8781_v49  ;;  %15415 = vmatprep.mubr.msk.f32.mxu1 %vm23439_vm7, %v21245_v13  ;;  %v13406_v13 = vld [vmem:[%s23400_s11 + $0xe0] sm:$0xff] }
 0xc04   : > { %15416 = vmatmul.mubr.msk.f32.gmra.mrb[104].mxu1 %vm23441_vm0, %v21250_v45  ;;  %vm23444_vm8 = vmmov %vm23438_vm1 }
 0xc05   : > { %v8787_v1 = vpop.permute.xlu0 %8786  ;;  %vm23445_vm3 = vmmov %vm23441_vm0  ;;  %v21260_v36 = vld [vmem:[#allocation2 + $0x50] sm:$0xff] }
 0xc06   : > { %8871 = vst.msk [vmem:[#allocation2 + $0x70] sm:$0xff] %vm23442_vm6, %v8787_v1  ;;  %v8785_v59 = vpop.permute.xlu1 %8784  ;;  %v21255_v21 = vld [vmem:[#allocation2 + $0x48] sm:$0xff]  ;;  %23446 = vst [vmem:[#allocation26_spill] sm:$0xff] %v21260_v36 }
 0xc07   : > { %23443 = vst [vmem:[#allocation34_spill] sm:$0xff] %v21255_v21  ;;  %8870 = vst.msk [vmem:[#allocation2 + $0x68] sm:$0xff] %vm23444_vm8, %v8785_v59  ;;  %15418 = vmatprep.mubr.msk.f32.mxu1 %vm23445_vm3, %v21255_v21  ;;  %v9648_v21 = vld [vmem:[#allocation2 + $0x11] sm:$0xff] }
 0xc08   : > { %vm23447_vm5 = vmmov %vm23441_vm0 }
 0xc09   : > { %15419 = vmatmul.mubr.msk.f32.gmra.mrb[106].mxu1 %vm23447_vm5, %v21260_v36  ;;  %v8791_v53 = vpop.permute.xlu0 %8790  ;;  %vm23449_vm7 = vmmov %vm23438_vm1  ;;  %v21270_v4 = vld [vmem:[#allocation2 + $0x60] sm:$0xff]  ;;  %v13405_v36 = vld [vmem:[%s23400_s11 + $0xd8] sm:$0xff] }
 0xc0a   : > { %8873 = vst.msk [vmem:[#allocation2 + $0x80] sm:$0xff] %vm23438_vm1, %v8791_v53  ;;  %v8789_v62 = vpop.permute.xlu1 %8788  ;;  %v21265_v24 = vld [vmem:[#allocation2 + $0x58] sm:$0xff]  ;;  %23450 = vst [vmem:[#allocation70_spill] sm:$0xff] %v21270_v4 }
 0xc0b   : > { %23448 = vst [vmem:[#allocation40_spill] sm:$0xff] %v21265_v24  ;;  %8872 = vst.msk [vmem:[#allocation2 + $0x78] sm:$0xff] %vm23449_vm7, %v8789_v62  ;;  %15421 = vmatprep.mubr.msk.f32.mxu1 %vm23441_vm0, %v21265_v24 }
 0xc0c   : > { %vm23451_vm6 = vmmov %vm23441_vm0 }
 0xc0d   : > { %15422 = vmatmul.mubr.msk.f32.gmra.mrb[108].mxu1 %vm23451_vm6, %v21270_v4  ;;  %v8795_v19 = vpop.permute.xlu0 %8794  ;;  %vm23452_vm8 = vmmov %vm23438_vm1  ;;  %v21280_v48 = vld [vmem:[#allocation2 + $0x70] sm:$0xff] }
 0xc0e   : > { %8875 = vst.msk [vmem:[#allocation2 + $0x90] sm:$0xff] %vm23452_vm8, %v8795_v19  ;;  %v8793_v57 = vpop.permute.xlu1 %8792  ;;  %v21275_v58 = vld [vmem:[#allocation2 + $0x68] sm:$0xff]  ;;  %vm23454_vm3 = vmmov %vm23438_vm1 }
 0xc0f   : > { %23453 = vst [vmem:[#allocation23_spill] sm:$0xff] %v21275_v58  ;;  %8874 = vst.msk [vmem:[#allocation2 + $0x88] sm:$0xff] %vm23454_vm3, %v8793_v57  ;;  %v9647_v4 = vld [vmem:[#allocation2 + $0x9] sm:$0xff] }
 0xc10   : > { %vm23455_vm5 = vmmov %vm23441_vm0  ;;  %23456 = vst [vmem:[#allocation45_spill] sm:$0xff] %v21280_v48 }
 0xc11   : > { %15424 = vmatprep.mubr.msk.f32.mxu1 %vm23455_vm5, %v21275_v58  ;;  %vm23457_vm1 = vmmov %vm23441_vm0  ;;  %v8799_v27 = vpop.permute.xlu0 %8798  ;;  %v21290_v15 = vld [vmem:[#allocation2 + $0x80] sm:$0xff] }
 0xc12   : > { %15425 = vmatmul.mubr.msk.f32.gmra.mrb[110].mxu1 %vm23457_vm1, %v21280_v48  ;;  %vm23458_vm7 = vmmov %vm23454_vm3  ;;  %v8797_v26 = vpop.permute.xlu1 %8796  ;;  %v21285_v63 = vld [vmem:[#allocation2 + $0x78] sm:$0xff]  ;;  %23462 = vst [vmem:[#allocation74_spill] sm:$0xff] %v21290_v15 }
 0xc13   : > { %8877 = vst.msk [vmem:[#allocation2 + $0xa0] sm:$0xff] %vm23458_vm7, %v8799_v27  ;;  %23459 = vst [vmem:[#allocation67_spill] sm:$0xff] %v21285_v63 }
 0xc14   : > { %vm23460_vm0 = vmmov %vm23454_vm3 }
 0xc15   : > { %8876 = vst.msk [vmem:[#allocation2 + $0x98] sm:$0xff] %vm23460_vm0, %v8797_v26  ;;  %vm23461_vm6 = vmmov %vm23457_vm1  ;;  %v8803_v34 = vpop.permute.xlu0 %8802  ;;  %v21300_v3 = vld [vmem:[#allocation2 + $0x90] sm:$0xff] }
 0xc16   : > { %15427 = vmatprep.mubr.msk.f32.mxu1 %vm23461_vm6, %v21285_v63  ;;  %vm23463_vm8 = vmmov %vm23457_vm1  ;;  %v8801_v28 = vpop.permute.xlu1 %8800  ;;  %v21295_v9 = vld [vmem:[#allocation2 + $0x88] sm:$0xff]  ;;  %23467 = vst [vmem:[#allocation21_spill] sm:$0xff] %v21300_v3 }
 0xc17   : > { %15428 = vmatmul.mubr.msk.f32.gmra.mrb[112].mxu1 %vm23463_vm8, %v21290_v15  ;;  %vm23464_vm3 = vmmov %vm23460_vm0  ;;  %23465 = vst [vmem:[#allocation59_spill] sm:$0xff] %v21295_v9 }
 0xc18   : > { %8879 = vst.msk [vmem:[#allocation2 + $0xb0] sm:$0xff] %vm23464_vm3, %v8803_v34  ;;  %vm23466_vm5 = vmmov %vm23460_vm0  ;;  %15430 = vmatprep.mubr.msk.f32.mxu1 %vm23457_vm1, %v21295_v9 }
 0xc19   : > { %8878 = vst.msk [vmem:[#allocation2 + $0xa8] sm:$0xff] %vm23466_vm5, %v8801_v28  ;;  %vm23468_vm7 = vmmov %vm23457_vm1  ;;  %v8807_v29 = vpop.permute.xlu0 %8806 }
 0xc1a   : > { %8881 = vst.msk [vmem:[#allocation2 + $0xc0] sm:$0xff] %vm23460_vm0, %v8807_v29  ;;  %v8805_v43 = vpop.permute.xlu1 %8804  ;;  %vm23470_vm6 = vmmov %vm23460_vm0  ;;  %v21310_v41 = vld [vmem:[#allocation2 + $0xa0] sm:$0xff] }
 0xc1b   : > { %15431 = vmatmul.mubr.msk.f32.gmra.mrb[114].mxu1 %vm23468_vm7, %v21300_v3  ;;  %8880 = vst.msk [vmem:[#allocation2 + $0xb8] sm:$0xff] %vm23470_vm6, %v8805_v43  ;;  %vm23471_vm8 = vmmov %vm23457_vm1  ;;  %v8892_v43 = vld [vmem:[#allocation2 + $0x7] sm:$0xff] }
 0xc1c   : > { %v21305_v56 = vld [vmem:[#allocation2 + $0x98] sm:$0xff]  ;;  %23472 = vst [vmem:[#allocation78_spill] sm:$0xff] %v21310_v41  ;;  %vm23473_vm3 = vmmov %vm23457_vm1 }
 0xc1d   : > { %23469 = vst [vmem:[#allocation71_spill] sm:$0xff] %v21305_v56  ;;  %15433 = vmatprep.mubr.msk.f32.mxu1 %vm23471_vm8, %v21305_v56  ;;  %v8811_v7 = vpop.permute.xlu0 %8810  ;;  %vm23474_vm5 = vmmov %vm23460_vm0 }
 0xc1e   : > { %8883 = vst.msk [vmem:[#allocation2 + $0xd0] sm:$0xff] %vm23474_vm5, %v8811_v7  ;;  %v8809_v12 = vpop.permute.xlu1 %8808  ;;  %vm23476_vm1 = vmmov %vm23460_vm0 }
 0xc1f   : > { %15434 = vmatmul.mubr.msk.f32.gmra.mrb[116].mxu1 %vm23473_vm3, %v21310_v41  ;;  %8882 = vst.msk [vmem:[#allocation2 + $0xc8] sm:$0xff] %vm23476_vm1, %v8809_v12  ;;  %vm23477_vm7 = vmmov %vm23473_vm3  ;;  %v21320_v17 = vld [vmem:[#allocation2 + $0xb0] sm:$0xff] }
 0xc20   : > { %v21315_v23 = vld [vmem:[#allocation2 + $0xa8] sm:$0xff]  ;;  %23478 = vst [vmem:[#allocation60_spill] sm:$0xff] %v21320_v17  ;;  %vm23479_vm0 = vmmov %vm23473_vm3 }
 0xc21   : > { %23475 = vst [vmem:[#allocation50_spill] sm:$0xff] %v21315_v23  ;;  %15436 = vmatprep.mubr.msk.f32.mxu1 %vm23477_vm7, %v21315_v23  ;;  %v8815_v5 = vpop.permute.xlu0 %8814  ;;  %vm23480_vm6 = vmmov %vm23476_vm1  ;;  %v21330_v61 = vld [vmem:[#allocation2 + $0xc0] sm:$0xff]  ;;  %v21508_v23 = vld [vmem:[#allocation2 + $0xaf] sm:$0xff] }
 0xc22   : > { %8885 = vst.msk [vmem:[#allocation2 + $0xe0] sm:$0xff] %vm23480_vm6, %v8815_v5  ;;  %v8813_v54 = vpop.permute.xlu1 %8812  ;;  %v21325_v31 = vld [vmem:[#allocation2 + $0xb8] sm:$0xff]  ;;  %vm23482_vm8 = vmmov %vm23476_vm1 }
 0xc23   : > { %15437 = vmatmul.mubr.msk.f32.gmra.mrb[118].mxu1 %vm23479_vm0, %v21320_v17  ;;  %23481 = vst [vmem:[#allocation75_spill] sm:$0xff] %v21325_v31  ;;  %8884 = vst.msk [vmem:[#allocation2 + $0xd8] sm:$0xff] %vm23482_vm8, %v8813_v54  ;;  %v8924_v54 = vsel %vm19716_vm9, %v8892_v43, 0.0  ;;  %v13367_v43 = vld [vmem:[%s23400_s11 + $0xa8] sm:$0xff]  ;;  %v21506_v17 = vld [vmem:[#allocation2 + $0xb7] sm:$0xff] }
 0xc24   : > { %vm23483_vm3 = vmmov %vm23479_vm0  ;;  %23484 = vst [vmem:[#allocation82_spill] sm:$0xff] %v21330_v61  ;;  %v21518_v56 = vld [vmem:[#allocation2 + $0xbf] sm:$0xff] }
 0xc25   : > { %15439 = vmatprep.mubr.msk.f32.mxu1 %vm23483_vm3, %v21325_v31  ;;  %vm23485_vm5 = vmmov %vm23479_vm0  ;;  %v8819_v55 = vpop.permute.xlu0 %8818  ;;  %v21340_v59 = vld [vmem:[#allocation2 + $0xd0] sm:$0xff]  ;;  %v21498_v31 = vld [vmem:[#allocation2 + $0x9f] sm:$0xff] }
 0xc26   : > { %8887 = vst.msk [vmem:[#allocation2 + $0xf0] sm:$0xff] %vm23476_vm1, %v8819_v55  ;;  %v8817_v49 = vpop.permute.xlu1 %8816  ;;  %v21335_v1 = vld [vmem:[#allocation2 + $0xc8] sm:$0xff]  ;;  %vm23487_vm7 = vmmov %vm23476_vm1 }
 0xc27   : > { %15440 = vmatmul.mubr.msk.f32.gmra.mrb[120].mxu1 %vm23485_vm5, %v21330_v61  ;;  %23486 = vst [vmem:[#allocation51_spill] sm:$0xff] %v21335_v1  ;;  %8886 = vst.msk [vmem:[#allocation2 + $0xe8] sm:$0xff] %vm23487_vm7, %v8817_v49  ;;  %v21496_v61 = vld [vmem:[#allocation2 + $0xa7] sm:$0xff]  ;;  %v21528_v9 = vld [vmem:[#allocation2 + $0xcf] sm:$0xff] }
 0xc28   : > { %15442 = vmatprep.mubr.msk.f32.mxu1 %vm23479_vm0, %v21335_v1  ;;  %23488 = vst [vmem:[#allocation33_spill] sm:$0xff] %v21340_v59  ;;  %vm23489_vm6 = vmmov %vm23479_vm0  ;;  %v21488_v1 = vld [vmem:[#allocation2 + $0x8f] sm:$0xff]  ;;  %v21516_v41 = vld [vmem:[#allocation2 + $0xc7] sm:$0xff] }
 0xc29   : > { %v8823_v53 = vpop.permute.xlu0 %8822  ;;  %vm23490_vm8 = vmmov %vm23476_vm1  ;;  %v21350_v57 = vld [vmem:[#allocation2 + $0xe0] sm:$0xff] }
 0xc2a   : > { %8889 = vst.msk [vmem:[#allocation2 + $0x100] sm:$0xff] %vm23490_vm8, %v8823_v53  ;;  %v8821_v62 = vpop.permute.xlu1 %8820  ;;  %v21345_v19 = vld [vmem:[#allocation2 + $0xd8] sm:$0xff]  ;;  %vm23492_vm3 = vmmov %vm23476_vm1  ;;  %v13364_v53 = vld [vmem:[%s23400_s11 + $0x90] sm:$0xff] }
 0xc2b   : > { %15443 = vmatmul.mubr.msk.f32.gmra.mrb[122].mxu1 %vm23489_vm6, %v21340_v59  ;;  %23491 = vst [vmem:[#allocation53_spill] sm:$0xff] %v21345_v19  ;;  %8888 = vst.msk [vmem:[#allocation2 + $0xf8] sm:$0xff] %vm23492_vm3, %v8821_v62  ;;  %vm23499_vm6 = vcmask 261120   ;;  %v13365_v62 = vld [vmem:[%s23400_s11 + $0x98] sm:$0xff] }
 0xc2c   : > { %vm23493_vm5 = vmmov %vm23479_vm0  ;;  %23494 = vst [vmem:[#allocation54_spill] sm:$0xff] %v21350_v57  ;;  %v21486_v59 = vld [vmem:[#allocation2 + $0x97] sm:$0xff]  ;;  %v21538_v63 = vld [vmem:[#allocation2 + $0xdf] sm:$0xff] }
 0xc2d   : > { %15445 = vmatprep.mubr.msk.f32.mxu1 %vm23493_vm5, %v21345_v19  ;;  %vm23495_vm1 = vmmov %vm23479_vm0  ;;  %v21360_v29 = vld [vmem:[#allocation2 + $0xf0] sm:$0xff]  ;;  %v21478_v19 = vld [vmem:[#allocation2 + $0x7f] sm:$0xff] }
 0xc2e   : > { %v8601_v27 = vpop.permute.xlu1 %8600  ;;  %v21354_v26 = vld [vmem:[#allocation2 + $0xe8] sm:$0xff]  ;;  %vm23497_vm7 = vmmov %vm23479_vm0  ;;  %23498 = vst [vmem:[#allocation58_spill] sm:$0xff] %v21360_v29  ;;  %v21526_v3 = vld [vmem:[#allocation2 + $0xd7] sm:$0xff] }
 0xc2f   : > { %15446 = vmatmul.mubr.msk.f32.gmra.mrb[124].mxu1 %vm23495_vm1, %v21350_v57  ;;  %23496 = vst [vmem:[#allocation79_spill] sm:$0xff] %v21354_v26  ;;  %v8666_v34 = vmul.f32 %v8601_v27, %v21211_v11  ;;  %v8730_v28 = vmax.f32 %v21211_v11, %v8601_v27  ;;  %vm23502_vm8 = vmmov %vm23479_vm0  ;;  %v21387_v27 = vld [vmem:[#allocation2 + $0x17] sm:$0xff]  ;;  %v21476_v57 = vld [vmem:[#allocation2 + $0x87] sm:$0xff] }
 0xc30   : > { %15448 = vmatprep.mubr.msk.f32.mxu1 %vm23497_vm7, %v21354_v26  ;;  %vm23504_vm3 = vmmov %vm23479_vm0  ;;  %v21468_v26 = vld [vmem:[#allocation2 + $0x6f] sm:$0xff]  ;;  %v21536_v15 = vld [vmem:[#allocation2 + $0xe7] sm:$0xff] }
 0xc31   : > { %8698 = vst.msk [vmem:[#allocation2 + $0x108] sm:$0xff] %vm23499_vm6, %v8666_v34  ;;  %8824 = vrot.lane.b32.xlu0 %v8730_v28, %s17316_s16  ;;  %v21374_v49 = vld [vmem:[#allocation2 + $0x100] sm:$0xff]  ;;  %vm23505_vm5 = vmmov %vm23499_vm6  ;;  %v16174_v34 = vpack.c.bf16 %v13365_v62, %v13364_v53  ;;  %v13368_v53 = vld [vmem:[%s23400_s11 + $0xb0] sm:$0xff] }
 0xc32   : > { %v8603_v7 = vpop.permute.xlu1 %8602  ;;  %v21366_v12 = vld [vmem:[#allocation2 + $0xf8] sm:$0xff]  ;;  %23503 = vst [vmem:[#allocation55_spill] sm:$0xff] %v21374_v49  ;;  %vm23506_vm1 = vmmov %vm23479_vm0  ;;  %v13366_v28 = vld [vmem:[%s23400_s11 + $0xa0] sm:$0xff] }
 0xc33   : > { %15449 = vmatmul.mubr.msk.f32.gmra.mrb[126].mxu1 %vm23479_vm0, %v21360_v29  ;;  %23500 = vst [vmem:[#allocation57_spill] sm:$0xff] %v21366_v12  ;;  %v8667_v11 = vmul.f32 %v8603_v7, %v21216_v14  ;;  %v8731_v55 = vmax.f32 %v21216_v14, %v8603_v7  ;;  %v8893_v14 = vld [vmem:[#allocation2 + $0xf] sm:$0xff]  ;;  %vm23507_vm7 = vmmov %vm23479_vm0  ;;  %v8926_v7 = vsel %vm19735_vm10, %v21387_v27, 0.0  ;;  %v13369_v62 = vld [vmem:[%s23400_s11 + $0xb8] sm:$0xff] }
 0xc34   : > { %15451 = vmatprep.mubr.msk.f32.mxu1 %vm23502_vm8, %v21366_v12  ;;  %vm23508_vm6 = vmmov %vm23479_vm0  ;;  %v21445_v29 = vld [vmem:[#allocation2 + $0x57] sm:$0xff]  ;;  %v21548_v58 = vld [vmem:[#allocation2 + $0xef] sm:$0xff] }
 0xc35   : > { %8699 = vst.msk [vmem:[#allocation2 + $0x110] sm:$0xff] %vm23505_vm5, %v8667_v11  ;;  %8826 = vrot.lane.b32.xlu0 %v8731_v55, %s17316_s16  ;;  %v16178_v11 = vpack.c.bf16 %v13367_v43, %v13366_v28  ;;  %v21403_v55 = vld [vmem:[#allocation2 + $0x1f] sm:$0xff]  ;;  %vm23509_vm8 = vmmov %vm23479_vm0  ;;  %v16182_v28 = vpack.c.bf16 %v13369_v62, %v13368_v53  ;;  %v21419_v43 = vld [vmem:[#allocation2 + $0x2f] sm:$0xff]  ;;  %s12682_s16 = sshll.u32 %s22329_s0, 4  ;;  %s22428_s16 = int_to_ptr.vmem [resolvable:$true] %s12682_s16 }
 0xc36   : > { %vm23511_vm5 = vmmov %vm23479_vm0  ;;  %v21437_v62 = vld [vmem:[#allocation2 + $0x3f] sm:$0xff]  ;;  %v21546_v48 = vld [vmem:[#allocation2 + $0xf7] sm:$0xff]  ;;  %s17232_s26 = scalar_lea.vmem %s22428_s16, 4096  ;;  %p17239_p1 = scmp.lt.s32.totalorder %s22428_s16, %s17237_s10 }
 0xc37   : > { %15452 = vmatmul.mubr.msk.f32.gmra.mrb[128].mxu1 %vm23504_vm3, %v21374_v49  ;;  %v13403_v49 = vld [vmem:[%s23400_s11 + $0xc8] sm:$0xff]  ;;  %vm23510_vm3 = vmmov %vm23479_vm0  ;;  %v21556_v24 = vld [vmem:[#allocation2 + $0xff] sm:$0xff]  ;;  %p17233_p3 = scmp.ne.s32.totalorder %s22428_s16, %s17232_s26  ;;  %p17240_p5 = scmp.lt.s32.totalorder %s17238_s13, %s17232_s26 }
 0xc38   : > { %15470 = vmatprep.mubr.msk.f32.mxu1 %vm23506_vm1, %v8924_v54  ;;  %v21401_v54 = vld [vmem:[#allocation2 + $0x27] sm:$0xff]  ;;  %vm23512_vm1 = vmmov %vm23479_vm0 }
 0xc39   : > { %p17234_p7 = pnand %p17233_p3, %p17502_p12  ;;  %p17241_p2 = por %p17240_p5, %p17239_p1 }
 0xc3b   : > { %15471 = vmatmul.mubr.msk.f32.vlgmr.msra.gmra.mrb[34].mxu1 %vm23507_vm7, %v8893_v14  ;;  %v21417_v14 = vld [vmem:[#allocation2 + $0x37] sm:$0xff]  ;;  %vm23513_vm7 = vmmov %vm23479_vm0  ;;  %p17235_p9 = pneg %p17234_p7 }
 0xc3c   : > { %16173 = vmatpush3.bf16.msra.mxu1 %v21203_v8  ;;  %15473 = vmatprep.mubr.msk.f32.mxu1 %vm23479_vm0, %v8926_v7  ;;  %v8928_v8 = vsel %vm19753_vm11, %v21401_v54, 0.0  ;;  %v13402_v7 = vld [vmem:[%s23400_s11 + $0xc0] sm:$0xff] }
 0xc3d   : > { %16175 = vmatprep.subr.bf16.mxu1 %v16174_v34  ;;  %v21435_v53 = vpack.c.bf16 %v13403_v49, %v13402_v7  ;;  %v8934_v49 = vsel %vm19819_vm14, %v21445_v29, 0.0  ;;  %v21456_v7 = vld [vmem:[#allocation2 + $0x67] sm:$0xff]  ;;  %p17242_p6 = pnand %p17241_p2, %p17235_p9 }
 0xc3f   : > { %15474 = vmatmul.mubr.msk.f32.gmra.mrb[100].mxu1 %vm23508_vm6, %v21403_v55  ;;  %vm23514_vm6 = vmmov %vm23479_vm0 }
 0xc40   : > { %15476 = vmatprep.mubr.msk.f32.mxu1 %vm23509_vm8, %v8928_v8  ;;  %16177 = vmatpush3.bf16.msra.mxu1 %v16174_v34  ;;  %v8930_v8 = vsel %vm19774_vm12, %v21417_v14, 0.0  ;;  %v21433_v34 = vld [vmem:[#allocation2 + $0x47] sm:$0xff]  ;;  %vm23515_vm8 = vmmov %vm23479_vm0 }
 0xc41   : > { %16179 = vmatprep.subr.bf16.mxu1 %v16178_v11  ;;  %v8932_v12 = vsel %vm19800_vm13, %v21433_v34, 0.0 }
 0xc43   : > { %15477 = vmatmul.mubr.msk.f32.gmra.mrb[102].mxu1 %vm23510_vm3, %v21419_v43  ;;  %vm23516_vm3 = vmmov %vm23479_vm0 }
 0xc44   : > { %15479 = vmatprep.mubr.msk.f32.mxu1 %vm23511_vm5, %v8930_v8  ;;  %16181 = vmatpush3.bf16.msra.mxu1 %v16178_v11  ;;  %v21448_v11 = vld [vmem:[#allocation2 + $0x4f] sm:$0xff]  ;;  %v21458_v8 = vld [vmem:[#allocation2 + $0x5f] sm:$0xff]  ;;  %vm23517_vm5 = vmmov %vm23479_vm0 }
 0xc45   : > { %16183 = vmatprep.subr.bf16.mxu1 %v16182_v28 }
 0xc47   : > { %15480 = vmatmul.mubr.msk.f32.gmra.mrb[104].mxu1 %vm23512_vm1, %v21437_v62  ;;  %vm23518_vm1 = vnez %v23223_v51 }
 0xc48   : > { %15482 = vmatprep.mubr.msk.f32.mxu1 %vm23513_vm7, %v8932_v12  ;;  %16185 = vmatpush3.bf16.msra.mxu1 %v16182_v28  ;;  %v8936_v12 = vsel %vm19838_vm15, %v21456_v7, 0.0  ;;  %v21466_v28 = vld [vmem:[#allocation2 + $0x77] sm:$0xff]  ;;  %vm23519_vm7 = vmmov %vm23479_vm0 }
 0xc49   : > { %16187 = vmatprep.subr.bf16.mxu1 %v21435_v53 }
 0xc4b   : > { %15483 = vmatmul.mubr.msk.f32.gmra.mrb[106].mxu1 %vm23479_vm0, %v21448_v11 }
 0xc4c   : > { %15485 = vmatprep.mubr.msk.f32.mxu1 %vm23514_vm6, %v8934_v49  ;;  %v8938_v49 = vsel %vm23518_vm1, %v21466_v28, 0.0  ;;  %vm23520_vm6 = vnez %v23225_v16 }
 0xc4f   : > { %15486 = vmatmul.mubr.msk.f32.gmra.mrb[108].mxu1 %vm23515_vm8, %v21458_v8  ;;  %vm23521_vm8 = vmmov %vm23479_vm0 }
 0xc50   : > { %15488 = vmatprep.mubr.msk.f32.mxu1 %vm23516_vm3, %v8936_v12  ;;  %v8940_v12 = vsel %vm23520_vm6, %v21476_v57, 0.0  ;;  %vm23522_vm3 = vmmov %vm23479_vm0 }
 0xc51   : > { %vm23526_vm6 = vmmov %vm23479_vm0 }
 0xc53   : > { %15489 = vmatmul.mubr.msk.f32.gmra.mrb[110].mxu1 %vm23517_vm5, %v21468_v26  ;;  %vm23523_vm5 = vnez %v23227_v32 }
 0xc54   : > { %15491 = vmatprep.mubr.msk.f32.mxu1 %vm23519_vm7, %v8938_v49  ;;  %v8942_v49 = vsel %vm23523_vm5, %v21486_v59, 0.0  ;;  %vm23524_vm7 = vmmov %vm23479_vm0 }
 0xc55   : > { %vm23529_vm5 = vmmov %vm23479_vm0 }
 0xc57   : > { %15492 = vmatmul.mubr.msk.f32.gmra.mrb[112].mxu1 %vm23479_vm0, %v21478_v19 }
 0xc58   : > { %15494 = vmatprep.mubr.msk.f32.mxu1 %vm23521_vm8, %v8940_v12  ;;  %vm23525_vm8 = vnez %v23229_v0 }
 0xc59   : > { %v8944_v12 = vsel %vm23525_vm8, %v21496_v61, 0.0  ;;  %vm23531_vm8 = vmmov %vm23479_vm0 }
 0xc5b   : > { %15495 = vmatmul.mubr.msk.f32.gmra.mrb[114].mxu1 %vm23522_vm3, %v21488_v1  ;;  %vm23527_vm3 = vmmov %vm23479_vm0 }
 0xc5c   : > { %15497 = vmatprep.mubr.msk.f32.mxu1 %vm23524_vm7, %v8942_v49  ;;  %vm23528_vm7 = vnez %v23231_v40 }
 0xc5d   : > { %v8946_v49 = vsel %vm23528_vm7, %v21506_v17, 0.0  ;;  %vm23534_vm7 = vmmov %vm23479_vm0 }
 0xc5f   : > { %15498 = vmatmul.mubr.msk.f32.gmra.mrb[116].mxu1 %vm23479_vm0, %v21498_v31 }
 0xc60   : > { %15500 = vmatprep.mubr.msk.f32.mxu1 %vm23526_vm6, %v8944_v12  ;;  %vm23530_vm6 = vnez %v23233_v52 }
 0xc61   : > { %v8948_v12 = vsel %vm23530_vm6, %v21516_v41, 0.0  ;;  %vm23536_vm6 = vmmov %vm23479_vm0 }
 0xc63   : > { %15501 = vmatmul.mubr.msk.f32.gmra.mrb[118].mxu1 %vm23527_vm3, %v21508_v23  ;;  %vm23532_vm3 = vmmov %vm23479_vm0 }
 0xc64   : > { %15503 = vmatprep.mubr.msk.f32.mxu1 %vm23529_vm5, %v8946_v49  ;;  %vm23533_vm5 = vnez %v23235_v46 }
 0xc65   : > { %v8950_v49 = vsel %vm23533_vm5, %v21526_v3, 0.0  ;;  %vm23539_vm5 = vmmov %vm23479_vm0 }
 0xc67   : > { %15504 = vmatmul.mubr.msk.f32.gmra.mrb[120].mxu1 %vm23479_vm0, %v21518_v56 }
 0xc68   : > { %15506 = vmatprep.mubr.msk.f32.mxu1 %vm23531_vm8, %v8948_v12  ;;  %vm23535_vm8 = vnez %v23237_v47 }
 0xc69   : > { %v8952_v12 = vsel %vm23535_vm8, %v21536_v15, 0.0 }
 0xc6b   : > { %15507 = vmatmul.mubr.msk.f32.gmra.mrb[122].mxu1 %vm23532_vm3, %v21528_v9  ;;  %vm23537_vm3 = vmmov %vm23479_vm0 }
 0xc6c   : > { %15509 = vmatprep.mubr.msk.f32.mxu1 %vm23534_vm7, %v8950_v49  ;;  %vm23538_vm7 = vnez %v23239_v60 }
 0xc6d   : > { %v8954_v49 = vsel %vm23538_vm7, %v21546_v48, 0.0 }
 0xc6f   : > { %15510 = vmatmul.mubr.msk.f32.gmra.mrb[124].mxu1 %vm23479_vm0, %v21538_v63 }
 0xc70   : > { %15512 = vmatprep.mubr.msk.f32.mxu1 %vm23536_vm6, %v8952_v12  ;;  %v13404_v12 = vld [vmem:[%s23400_s11 + $0xd0] sm:$0xff]  ;;  %vm23540_vm6 = vmmov %vm23479_vm0 }
 0xc71   : > { %v16190_v45 = vpack.c.bf16 %v13405_v36, %v13404_v12  ;;  %v13409_v12 = vld [vmem:[%s23400_s11 + $0xf8] sm:$0xff] }
 0xc73   : > { %15513 = vmatmul.mubr.msk.f32.gmra.mrb[126].mxu1 %vm23537_vm3, %v21548_v58  ;;  %vm23542_vm3 = vmmov %vm23479_vm0 }
 0xc74   : > { %15515 = vmatprep.mubr.msk.f32.mxu1 %vm23539_vm5, %v8954_v49  ;;  %vm23541_vm5 = vnez %v23324_v35  ;;  %v21609_v35 = vld [vmem:[#allocation2 + $0x39] sm:$0xff]  ;;  %vm23553_vm7 = vmmov %vm23542_vm3 }
 0xc75   : > { %v9680_v49 = vsel %vm23541_vm5, %v9648_v21, 0.0  ;;  %v16194_v21 = vpack.c.bf16 %v13407_v10, %v13406_v13  ;;  %vm23550_vm5 = vmmov %vm23542_vm3 }
 0xc76   : > { %vm23563_vm8 = vmmov %vm23542_vm3 }
 0xc77   : > { %15516 = vmatmul.mubr.msk.f32.gmra.mrb[128].mxu1 %vm23540_vm6, %v21556_v24  ;;  %vm23543_vm6 = vmmov %vm23479_vm0 }
 0xc78   : > { %15534 = vmatprep.mubr.msk.f32.mxu1 %vm23479_vm0, %v9647_v4  ;;  %vm23544_vm0 = vnez %v23328_v30  ;;  %v13408_v4 = vld [vmem:[%s23400_s11 + $0xf0] sm:$0xff]  ;;  %v13442_v30 = vld [vmem:[%s23400_s11 + $0x100] sm:$0xff] }
 0xc79   : > { %v9682_v36 = vsel %vm23544_vm0, %v21578_v6, 0.0  ;;  %v16198_v10 = vpack.c.bf16 %v13409_v12, %v13408_v4  ;;  %vm23547_vm0 = vnez %v23330_v25  ;;  %v21621_v12 = vld [vmem:[#allocation2 + $0x49] sm:$0xff] }
 0xc7b   : > { %15535 = vmatmul.mubr.msk.f32.vlgmr.msra.gmra.mrb[34].mxu1 %vm23542_vm3, %v9680_v49  ;;  %v21595_v49 = vld [vmem:[#allocation2 + $0x31] sm:$0xff] }
 0xc7c   : > { %16189 = vmatpush3.bf16.msra.mxu1 %v21435_v53  ;;  %15537 = vmatprep.mubr.msk.f32.mxu1 %vm23543_vm6, %v21576_v33  ;;  %v21593_v53 = vld [vmem:[#allocation2 + $0x29] sm:$0xff]  ;;  %vm23546_vm6 = vmmov %vm23542_vm3  ;;  %v9684_v13 = vsel %vm23547_vm0, %v21595_v49, 0.0  ;;  %vm23549_vm0 = vnez %v23333_v18  ;;  %v21644_v18 = vld [vmem:[#allocation2 + $0x71] sm:$0xff] }
 0xc7d   : > { %16191 = vmatprep.subr.bf16.mxu1 %v16190_v45  ;;  %23545 = vst [vmem:[#allocation56_spill] sm:$0xff] %v21593_v53  ;;  %23559 = vst [vmem:[#allocation43_spill] sm:$0xff] %v21644_v18 }
 0xc7f   : > { %15538 = vmatmul.mubr.msk.f32.gmra.mrb[100].mxu1 %vm23542_vm3, %v9682_v36  ;;  %v13443_v36 = vld [vmem:[%s23400_s11 + $0x108] sm:$0xff] }
 0xc80   : > { %15540 = vmatprep.mubr.msk.f32.mxu1 %vm23546_vm6, %v21593_v53  ;;  %16193 = vmatpush3.bf16.msra.mxu1 %v16190_v45  ;;  %v21611_v53 = vld [vmem:[#allocation2 + $0x41] sm:$0xff]  ;;  %vm23548_vm6 = vmmov %vm23542_vm3  ;;  %v21615_v45 = vpack.c.bf16 %v13443_v36, %v13442_v30 }
 0xc81   : > { %16195 = vmatprep.subr.bf16.mxu1 %v16194_v21  ;;  %v9686_v4 = vsel %vm23549_vm0, %v21611_v53, 0.0  ;;  %v21634_v36 = vld [vmem:[#allocation2 + $0x61] sm:$0xff]  ;;  %vm23557_vm0 = vnez %v23341_v39 }
 0xc82   : > { %23555 = vst [vmem:[#allocation91_spill] sm:$0xff] %v21634_v36 }
 0xc83   : > { %15541 = vmatmul.mubr.msk.f32.gmra.mrb[102].mxu1 %vm23542_vm3, %v9684_v13  ;;  %v21623_v13 = vld [vmem:[#allocation2 + $0x51] sm:$0xff] }
 0xc84   : > { %15543 = vmatprep.mubr.msk.f32.mxu1 %vm23548_vm6, %v21609_v35  ;;  %16197 = vmatpush3.bf16.msra.mxu1 %v16194_v21  ;;  %23551 = vst [vmem:[#allocation52_spill] sm:$0xff] %v21623_v13  ;;  %vm23552_vm6 = vnez %v23337_v50  ;;  %v21632_v21 = vld [vmem:[#allocation2 + $0x59] sm:$0xff] }
 0xc85   : > { %16199 = vmatprep.subr.bf16.mxu1 %v16198_v10  ;;  %v9688_v30 = vsel %vm23552_vm6, %v21623_v13, 0.0  ;;  %23554 = vst [vmem:[#allocation48_spill] sm:$0xff] %v21632_v21  ;;  %vm23560_vm6 = vmmov %vm23542_vm3  ;;  %v21654_v13 = vld [vmem:[#allocation2 + $0x81] sm:$0xff] }
 0xc86   : > { %23565 = vst [vmem:[#allocation32_spill] sm:$0xff] %v21654_v13 }
 0xc87   : > { %15544 = vmatmul.mubr.msk.f32.gmra.mrb[104].mxu1 %vm23550_vm5, %v9686_v4  ;;  %vm23556_vm5 = vmmov %vm23542_vm3  ;;  %v9690_v4 = vsel %vm23557_vm0, %v21634_v36, 0.0  ;;  %v21664_v36 = vld [vmem:[#allocation2 + $0x91] sm:$0xff] }
 0xc88   : > { %15546 = vmatprep.mubr.msk.f32.mxu1 %vm23542_vm3, %v21621_v12  ;;  %16201 = vmatpush3.bf16.msra.mxu1 %v16198_v10  ;;  %v21642_v10 = vld [vmem:[#allocation2 + $0x69] sm:$0xff]  ;;  %23571 = vst [vmem:[#allocation95_spill] sm:$0xff] %v21664_v36 }
 0xc89   : > { %16203 = vmatprep.subr.bf16.mxu1 %v21615_v45  ;;  %23558 = vst [vmem:[#allocation46_spill] sm:$0xff] %v21642_v10 }
 0xc8b   : > { %15547 = vmatmul.mubr.msk.f32.gmra.mrb[106].mxu1 %vm23553_vm7, %v9688_v30  ;;  %v23561_v30 = vld [vmem:[#allocation31_spill] sm:$0xff] }
 0xc8c   : > { %15549 = vmatprep.mubr.msk.f32.mxu1 %vm23556_vm5, %v21632_v21  ;;  %vm23562_vm7 = vnez %v23561_v30  ;;  %v21652_v21 = vld [vmem:[#allocation2 + $0x79] sm:$0xff]  ;;  %vm23566_vm5 = vmmov %vm23542_vm3  ;;  %v9696_v30 = vsel %vm23391_vm2, %v21664_v36, 0.0  ;;  %v21694_v36 = vld [vmem:[#allocation2 + $0xc1] sm:$0xff] }
 0xc8d   : > { %v9692_v50 = vsel %vm23562_vm7, %v21644_v18, 0.0  ;;  %23564 = vst [vmem:[#allocation90_spill] sm:$0xff] %v21652_v21  ;;  %vm23569_vm0 = vmmov %vm23566_vm5  ;;  %v21674_v18 = vld [vmem:[#allocation2 + $0xa1] sm:$0xff] }
 0xc8e   : > { %23576 = vst [vmem:[#allocation87_spill] sm:$0xff] %v21674_v18  ;;  %vm23584_vm2 = vmmov %vm23569_vm0 }
 0xc8f   : > { %15550 = vmatmul.mubr.msk.f32.gmra.mrb[108].mxu1 %vm23542_vm3, %v9690_v4  ;;  %v23567_v4 = vld [vmem:[#allocation49_spill] sm:$0xff]  ;;  %23586 = vst [vmem:[#allocation92_spill] sm:$0xff] %v21694_v36 }
 0xc90   : > { %15552 = vmatprep.mubr.msk.f32.mxu1 %vm23560_vm6, %v21642_v10  ;;  %vm23568_vm3 = vnez %v23567_v4  ;;  %v21662_v10 = vld [vmem:[#allocation2 + $0x89] sm:$0xff]  ;;  %vm23572_vm6 = vmmov %vm23569_vm0  ;;  %v9698_v4 = vsel %vm23393_vm4, %v21674_v18, 0.0  ;;  %vm23590_vm4 = vcmask 523520  }
 0xc91   : > { %v9694_v39 = vsel %vm23568_vm3, %v21654_v13, 0.0  ;;  %23570 = vst [vmem:[#allocation93_spill] sm:$0xff] %v21662_v10  ;;  %v21684_v13 = vld [vmem:[#allocation2 + $0xb1] sm:$0xff]  ;;  %vm23597_vm3 = vmmov %vm23584_vm2 }
 0xc92   : > { %23580 = vst [vmem:[#allocation99_spill] sm:$0xff] %v21684_v13 }
 0xc93   : > { %15553 = vmatmul.mubr.msk.f32.gmra.mrb[110].mxu1 %vm23563_vm8, %v9692_v50  ;;  %vm23574_vm8 = vmmov %vm23569_vm0 }
 0xc94   : > { %15555 = vmatprep.mubr.msk.f32.mxu1 %vm23566_vm5, %v21652_v21  ;;  %v21672_v21 = vld [vmem:[#allocation2 + $0x99] sm:$0xff]  ;;  %vm23577_vm5 = vmmov %vm23569_vm0 }
 0xc95   : > { %23575 = vst [vmem:[#allocation85_spill] sm:$0xff] %v21672_v21 }
 0xc97   : > { %15556 = vmatmul.mubr.msk.f32.gmra.mrb[112].mxu1 %vm23569_vm0, %v9694_v39  ;;  %v23588_v39 = vld [vmem:[#allocation29_spill] sm:$0xff] }
 0xc98   : > { %15558 = vmatprep.mubr.msk.f32.mxu1 %vm23572_vm6, %v21662_v10  ;;  %v21682_v10 = vld [vmem:[#allocation2 + $0xa9] sm:$0xff]  ;;  %vm23581_vm6 = vmmov %vm23569_vm0 }
 0xc99   : > { %23579 = vst [vmem:[#allocation98_spill] sm:$0xff] %v21682_v10 }
 0xc9b   : > { %15559 = vmatmul.mubr.msk.f32.gmra.mrb[114].mxu1 %vm23574_vm8, %v9696_v30  ;;  %v23582_v30 = vld [vmem:[#allocation77_spill] sm:$0xff] }
 0xc9c   : > { %15561 = vmatprep.mubr.msk.f32.mxu1 %vm23577_vm5, %v21672_v21  ;;  %vm23583_vm8 = vnez %v23582_v30  ;;  %v21692_v21 = vld [vmem:[#allocation2 + $0xb9] sm:$0xff]  ;;  %vm23587_vm5 = vmmov %vm23569_vm0  ;;  %v21703_v30 = vld [vmem:[#allocation2 + $0xc9] sm:$0xff] }
 0xc9d   : > { %v9700_v50 = vsel %vm23583_vm8, %v21684_v13, 0.0  ;;  %23585 = vst [vmem:[#allocation88_spill] sm:$0xff] %v21692_v21  ;;  %23592 = vst [vmem:[#allocation101_spill] sm:$0xff] %v21703_v30  ;;  %v21705_v13 = vld [vmem:[#allocation2 + $0xd1] sm:$0xff] }
 0xc9e   : > { %23593 = vst [vmem:[#allocation28_spill] sm:$0xff] %v21705_v13  ;;  %vm23596_vm8 = vmmov %vm23590_vm4 }
 0xc9f   : > { %15562 = vmatmul.mubr.msk.f32.gmra.mrb[116].mxu1 %vm23569_vm0, %v9698_v4  ;;  %vm23589_vm0 = vnez %v23588_v39  ;;  %v21714_v39 = vld [vmem:[#allocation2 + $0xd9] sm:$0xff] }
 0xca0   : > { %15564 = vmatprep.mubr.msk.f32.mxu1 %vm23581_vm6, %v21682_v10  ;;  %v9702_v18 = vsel %vm23589_vm0, %v21694_v36, 0.0  ;;  %vm23591_vm6 = vmmov %vm23584_vm2  ;;  %v23594_v10 = vld [vmem:[#allocation27_spill] sm:$0xff]  ;;  %23598 = vst [vmem:[#allocation44_spill] sm:$0xff] %v21714_v39 }
 0xca1   : > { %v21724_v36 = vld [vmem:[#allocation2 + $0xe9] sm:$0xff] }
 0xca2   : > { %23602 = vst [vmem:[#allocation68_spill] sm:$0xff] %v21724_v36 }
 0xca3   : > { %15565 = vmatmul.mubr.msk.f32.gmra.mrb[118].mxu1 %vm23584_vm2, %v9700_v50  ;;  %v8825_v4 = vpop.permute.xlu0 %8824 }
 0xca4   : > { %15567 = vmatprep.mubr.msk.f32.mxu1 %vm23587_vm5, %v21692_v21  ;;  %8890 = vst.msk [vmem:[#allocation2 + $0x108] sm:$0xff] %vm23590_vm4, %v8825_v4  ;;  %vm23595_vm5 = vnez %v23594_v10  ;;  %v21716_v4 = vld [vmem:[#allocation2 + $0xe1] sm:$0xff]  ;;  %vm23599_vm4 = vmmov %vm23584_vm2  ;;  %v21726_v10 = vld [vmem:[#allocation2 + $0xf1] sm:$0xff] }
 0xca5   : > { %v9704_v21 = vsel %vm23595_vm5, %v21705_v13, 0.0  ;;  %vm23606_vm5 = vmmov %vm23584_vm2 }
 0xca7   : > { %15568 = vmatmul.mubr.msk.f32.gmra.mrb[120].mxu1 %vm23591_vm6, %v9702_v18  ;;  %v8827_v50 = vpop.permute.xlu0 %8826  ;;  %v23600_v18 = vld [vmem:[#allocation30_spill] sm:$0xff] }
 0xca8   : > { %15570 = vmatprep.mubr.msk.f32.mxu1 %vm23584_vm2, %v21703_v30  ;;  %8891 = vst.msk [vmem:[#allocation2 + $0x110] sm:$0xff] %vm23596_vm8, %v8827_v50  ;;  %vm23601_vm6 = vnez %v23600_v18  ;;  %vm23603_vm8 = vmmov %vm23584_vm2 }
 0xca9   : > { %v9706_v30 = vsel %vm23601_vm6, %v21716_v4, 0.0 }
 0xcab   : > { %15571 = vmatmul.mubr.msk.f32.gmra.mrb[122].mxu1 %vm23597_vm3, %v9704_v21  ;;  %v23604_v21 = vld [vmem:[#allocation38_spill] sm:$0xff] }
 0xcac   : > { %15573 = vmatprep.mubr.msk.f32.mxu1 %vm23599_vm4, %v21714_v39  ;;  %vm23605_vm3 = vnez %v23604_v21  ;;  %v21734_v39 = vld [vmem:[#allocation2 + $0xf9] sm:$0xff]  ;;  %v21736_v13 = vld [vmem:[#allocation2 + $0x101] sm:$0xff]  ;;  %vm23609_vm4 = vmmov %vm23584_vm2 }
 0xcad   : > { %v9708_v50 = vsel %vm23605_vm3, %v21726_v10, 0.0  ;;  %23607 = vst [vmem:[#allocation66_spill] sm:$0xff] %v21734_v39  ;;  %23608 = vst [vmem:[#allocation69_spill] sm:$0xff] %v21736_v13  ;;  %v13445_v21 = vld [vmem:[%s23400_s11 + $0x118] sm:$0xff] }
 0xcaf   : > { %15574 = vmatmul.mubr.msk.f32.gmra.mrb[124].mxu1 %vm23584_vm2, %v9706_v30  ;;  %v23610_v30 = vld [vmem:[#allocation86_spill] sm:$0xff] }
 0xcb0   : > { %15576 = vmatprep.mubr.msk.f32.mxu1 %vm23603_vm8, %v21724_v36  ;;  %vm23611_vm2 = vnez %v23610_v30  ;;  %v13444_v36 = vld [vmem:[%s23400_s11 + $0x110] sm:$0xff]  ;;  %vm23613_vm8 = vmmov %vm23609_vm4  ;;  %v13446_v30 = vld [vmem:[%s23400_s11 + $0x120] sm:$0xff] }
 0xcb1   : > { %v9710_v18 = vsel %vm23611_vm2, %v21736_v13, 0.0  ;;  %v13447_v13 = vld [vmem:[%s23400_s11 + $0x128] sm:$0xff] }
 0xcb3   : > { %15577 = vmatmul.mubr.msk.f32.gmra.mrb[126].mxu1 %vm23606_vm5, %v9708_v50  ;;  %vm23612_vm5 = vmmov %vm23609_vm4  ;;  %v10105_v50 = vsel %vm19716_vm9, %v21387_v27, 0.0  ;;  %v16210_v27 = vpack.c.bf16 %v13447_v13, %v13446_v30  ;;  %v13482_v13 = vld [vmem:[%s23400_s11 + $0x140] sm:$0xff]  ;;  %v13483_v30 = vld [vmem:[%s23400_s11 + $0x148] sm:$0xff] }
 0xcb4   : > { %15579 = vmatprep.mubr.msk.f32.mxu1 %vm23609_vm4, %v21734_v39  ;;  %v16206_v39 = vpack.c.bf16 %v13445_v21, %v13444_v36  ;;  %v13448_v36 = vld [vmem:[%s23400_s11 + $0x130] sm:$0xff]  ;;  %v13449_v21 = vld [vmem:[%s23400_s11 + $0x138] sm:$0xff] }
 0xcb7   : > { %15580 = vmatmul.mubr.msk.f32.gmra.mrb[128].mxu1 %vm23612_vm5, %v9710_v18  ;;  %v10107_v18 = vsel %vm19735_vm10, %v21401_v54, 0.0  ;;  %vm23614_vm5 = vmmov %vm23609_vm4 }
 0xcb8   : > { %15598 = vmatprep.mubr.msk.f32.mxu1 %vm23613_vm8, %v10105_v50  ;;  %vm23615_vm8 = vmmov %vm23609_vm4  ;;  %v10111_v50 = vsel %vm19774_vm12, %v21433_v34, 0.0 }
 0xcb9   : > { %vm23621_vm12 = vmmov %vm23609_vm4 }
 0xcbb   : > { %15599 = vmatmul.mubr.msk.f32.vlgmr.msra.gmra.mrb[34].mxu1 %vm23609_vm4, %v21403_v55  ;;  %v10109_v55 = vsel %vm19753_vm11, %v21417_v14, 0.0  ;;  %vm23618_vm11 = vmmov %vm23609_vm4 }
 0xcbc   : > { %16205 = vmatpush3.bf16.msra.mxu1 %v21615_v45  ;;  %15601 = vmatprep.mubr.msk.f32.mxu1 %vm23614_vm5, %v10107_v18  ;;  %v16214_v45 = vpack.c.bf16 %v13449_v21, %v13448_v36  ;;  %vm23616_vm5 = vmmov %vm23609_vm4  ;;  %v10113_v18 = vsel %vm19800_vm13, %v21445_v29, 0.0  ;;  %v10117_v36 = vsel %vm19838_vm15, %v21466_v28, 0.0  ;;  %v10119_v21 = vsel %vm23518_vm1, %v21476_v57, 0.0 }
 0xcbd   : > { %16207 = vmatprep.subr.bf16.mxu1 %v16206_v39  ;;  %vm23628_vm15 = vmmov %vm23609_vm4 }
 0xcbe   : > { %vm23631_vm1 = vmmov %vm23609_vm4 }
 0xcbf   : > { %15602 = vmatmul.mubr.msk.f32.gmra.mrb[100].mxu1 %vm23615_vm8, %v21419_v43  ;;  %vm23617_vm8 = vmmov %vm23609_vm4 }
 0xcc0   : > { %15604 = vmatprep.mubr.msk.f32.mxu1 %vm23609_vm4, %v10109_v55  ;;  %16209 = vmatpush3.bf16.msra.mxu1 %v16206_v39  ;;  %v16218_v39 = vpack.c.bf16 %v13483_v30, %v13482_v13 }
 0xcc1   : > { %16211 = vmatprep.subr.bf16.mxu1 %v16210_v27 }
 0xcc3   : > { %15605 = vmatmul.mubr.msk.f32.gmra.mrb[102].mxu1 %vm23616_vm5, %v21437_v62  ;;  %vm23619_vm5 = vmmov %vm23609_vm4 }
 0xcc4   : > { %15607 = vmatprep.mubr.msk.f32.mxu1 %vm23617_vm8, %v10111_v50  ;;  %16213 = vmatpush3.bf16.msra.mxu1 %v16210_v27  ;;  %v10115_v27 = vsel %vm19819_vm14, %v21456_v7, 0.0  ;;  %vm23620_vm8 = vmmov %vm23609_vm4 }
 0xcc5   : > { %16215 = vmatprep.subr.bf16.mxu1 %v16214_v45  ;;  %vm23626_vm14 = vmmov %vm23609_vm4 }
 0xcc7   : > { %15608 = vmatmul.mubr.msk.f32.gmra.mrb[104].mxu1 %vm23609_vm4, %v21448_v11 }
 0xcc8   : > { %15610 = vmatprep.mubr.msk.f32.mxu1 %vm23618_vm11, %v10113_v18  ;;  %16217 = vmatpush3.bf16.msra.mxu1 %v16214_v45  ;;  %vm23622_vm11 = vmmov %vm23609_vm4 }
 0xcc9   : > { %16219 = vmatprep.subr.bf16.mxu1 %v16218_v39 }
 0xccb   : > { %15611 = vmatmul.mubr.msk.f32.gmra.mrb[106].mxu1 %vm23619_vm5, %v21458_v8  ;;  %vm23623_vm5 = vmmov %vm23609_vm4 }
 0xccc   : > { %15613 = vmatprep.mubr.msk.f32.mxu1 %vm23620_vm8, %v10115_v27  ;;  %vm23624_vm8 = vmmov %vm23609_vm4 }
 0xccf   : > { %15614 = vmatmul.mubr.msk.f32.gmra.mrb[108].mxu1 %vm23621_vm12, %v21468_v26  ;;  %vm23625_vm12 = vnez %v23225_v16 }
 0xcd0   : > { %15616 = vmatprep.mubr.msk.f32.mxu1 %vm23609_vm4, %v10117_v36  ;;  %v10121_v55 = vsel %vm23625_vm12, %v21486_v59, 0.0  ;;  %vm23634_vm12 = vmmov %vm23631_vm1  ;;  %v21857_v36 = vld [vmem:[#allocation2 + $0x107] sm:$0xff] }
 0xcd3   : > { %15617 = vmatmul.mubr.msk.f32.gmra.mrb[110].mxu1 %vm23622_vm11, %v21478_v19  ;;  %vm23627_vm11 = vnez %v23227_v32 }
 0xcd4   : > { %15619 = vmatprep.mubr.msk.f32.mxu1 %vm23623_vm5, %v10119_v21  ;;  %v10123_v45 = vsel %vm23627_vm11, %v21496_v61, 0.0  ;;  %vm23629_vm5 = vmmov %vm23609_vm4 }
 0xcd5   : > { %vm23637_vm11 = vmmov %vm23631_vm1 }
 0xcd7   : > { %15620 = vmatmul.mubr.msk.f32.gmra.mrb[112].mxu1 %vm23624_vm8, %v21488_v1  ;;  %vm23630_vm8 = vnez %v23229_v0 }
 0xcd8   : > { %15622 = vmatprep.mubr.msk.f32.mxu1 %vm23626_vm14, %v10121_v55  ;;  %v10125_v13 = vsel %vm23630_vm8, %v21506_v17, 0.0  ;;  %vm23632_vm14 = vmmov %vm23631_vm1  ;;  %v21865_v55 = vld [vmem:[#allocation2 + $0x10f] sm:$0xff] }
 0xcd9   : > { %vm23639_vm8 = vmmov %vm23631_vm1  ;;  %23646 = vst [vmem:[#allocation20_spill] sm:$0xff] %v21865_v55 }
 0xcdb   : > { %15623 = vmatmul.mubr.msk.f32.gmra.mrb[114].mxu1 %vm23609_vm4, %v21498_v31  ;;  %vm23633_vm4 = vnez %v23231_v40 }
 0xcdc   : > { %15625 = vmatprep.mubr.msk.f32.mxu1 %vm23628_vm15, %v10123_v45  ;;  %v10127_v30 = vsel %vm23633_vm4, %v21516_v41, 0.0  ;;  %vm23635_vm15 = vmmov %vm23631_vm1  ;;  %v13484_v45 = vld [vmem:[%s23400_s11 + $0x150] sm:$0xff] }
 0xcdd   : > { %vm23642_vm4 = vmmov %vm23631_vm1 }
 0xcdf   : > { %15626 = vmatmul.mubr.msk.f32.gmra.mrb[116].mxu1 %vm23629_vm5, %v21508_v23  ;;  %vm23636_vm5 = vnez %v23233_v52  ;;  %v11349_v52 = vld [vmem:[#allocation2 + $0x117] sm:$0xff] }
 0xce0   : > { %15628 = vmatprep.mubr.msk.f32.mxu1 %vm23631_vm1, %v10125_v13  ;;  %v10129_v50 = vsel %vm23636_vm5, %v21526_v3, 0.0  ;;  %v13485_v13 = vld [vmem:[%s23400_s11 + $0x158] sm:$0xff] }
 0xce3   : > { %15629 = vmatmul.mubr.msk.f32.gmra.mrb[118].mxu1 %vm23632_vm14, %v21518_v56  ;;  %vm23638_vm14 = vnez %v23235_v46 }
 0xce4   : > { %15631 = vmatprep.mubr.msk.f32.mxu1 %vm23634_vm12, %v10127_v30  ;;  %v10131_v18 = vsel %vm23638_vm14, %v21536_v15, 0.0  ;;  %vm23640_vm12 = vmmov %vm23631_vm1  ;;  %v16222_v30 = vpack.c.bf16 %v13485_v13, %v13484_v45  ;;  %v13489_v45 = vld [vmem:[%s23400_s11 + $0x178] sm:$0xff]  ;;  %v23652_v13 = vld [vmem:[#allocation24_spill] sm:$0xff] }
 0xce5   : > { %vm23645_vm14 = vmmov %vm23642_vm4 }
 0xce7   : > { %15632 = vmatmul.mubr.msk.f32.gmra.mrb[120].mxu1 %vm23635_vm15, %v21528_v9  ;;  %vm23641_vm15 = vnez %v23237_v47 }
 0xce8   : > { %15634 = vmatprep.mubr.msk.f32.mxu1 %vm23637_vm11, %v10129_v50  ;;  %v10133_v27 = vsel %vm23641_vm15, %v21546_v48, 0.0  ;;  %vm23643_vm11 = vmmov %vm23631_vm1  ;;  %v13486_v50 = vld [vmem:[%s23400_s11 + $0x160] sm:$0xff] }
 0xceb   : > { %15635 = vmatmul.mubr.msk.f32.gmra.mrb[122].mxu1 %vm23631_vm1, %v21538_v63  ;;  %vm23644_vm1 = vnez %v23239_v60 }
 0xcec   : > { %15637 = vmatprep.mubr.msk.f32.mxu1 %vm23639_vm8, %v10131_v18  ;;  %v10135_v21 = vsel %vm23644_vm1, %v21857_v36, 0.0  ;;  %vm23647_vm8 = vmmov %vm23642_vm4  ;;  %v13487_v18 = vld [vmem:[%s23400_s11 + $0x168] sm:$0xff] }
 0xced   : > { %v16226_v60 = vpack.c.bf16 %v13487_v18, %v13486_v50  ;;  %v13522_v50 = vld [vmem:[%s23400_s11 + $0x180] sm:$0xff]  ;;  %v13523_v18 = vld [vmem:[%s23400_s11 + $0x188] sm:$0xff]  ;;  %vm23666_vm1 = vmmov %vm23642_vm4 }
 0xcee   : > { %vm23672_vm15 = vmmov %vm23666_vm1 }
 0xcef   : > { %15638 = vmatmul.mubr.msk.f32.gmra.mrb[124].mxu1 %vm23640_vm12, %v21548_v58  ;;  %vm23651_vm12 = vmmov %vm23642_vm4 }
 0xcf0   : > { %15640 = vmatprep.mubr.msk.f32.mxu1 %vm23642_vm4, %v10133_v27  ;;  %v23648_v27 = vld [vmem:[#allocation94_spill] sm:$0xff] }
 0xcf3   : > { %15641 = vmatmul.mubr.msk.f32.gmra.mrb[126].mxu1 %vm23643_vm11, %v21556_v24  ;;  %vm23653_vm11 = vmmov %vm23642_vm4 }
 0xcf4   : > { %15643 = vmatprep.mubr.msk.f32.mxu1 %vm23645_vm14, %v10135_v21  ;;  %vm23649_vm14 = vmmov %vm23642_vm4  ;;  %v23650_v21 = vld [vmem:[#allocation41_spill] sm:$0xff] }
 0xcf7   : > { %15644 = vmatmul.mubr.msk.f32.gmra.mrb[128].mxu1 %vm23647_vm8, %v21865_v55  ;;  %v23654_v55 = vld [vmem:[#allocation65_spill] sm:$0xff]  ;;  %vm23655_vm8 = vmmov %vm23642_vm4 }
 0xcf8   : > { %15662 = vmatprep.mubr.msk.f32.mxu1 %vm23642_vm4, %v21225_v42  ;;  %v13488_v42 = vld [vmem:[%s23400_s11 + $0x170] sm:$0xff] }
 0xcfb   : > { %15663 = vmatmul.mubr.msk.f32.vlgmr.msra.gmra.mrb[34].mxu1 %vm23649_vm14, %v23648_v27  ;;  %v23656_v27 = vld [vmem:[#allocation36_spill] sm:$0xff]  ;;  %vm23658_vm14 = vmmov %vm23642_vm4 }
 0xcfc   : > { %16221 = vmatpush3.bf16.msra.mxu1 %v16218_v39  ;;  %15665 = vmatprep.mubr.msk.f32.mxu1 %vm23651_vm12, %v23650_v21  ;;  %v16230_v39 = vpack.c.bf16 %v13489_v45, %v13488_v42  ;;  %v23657_v21 = vld [vmem:[#allocation34_spill] sm:$0xff]  ;;  %vm23660_vm12 = vmmov %vm23642_vm4  ;;  %v23661_v42 = vld [vmem:[#allocation40_spill] sm:$0xff] }
 0xcfd   : > { %16223 = vmatprep.subr.bf16.mxu1 %v16222_v30  ;;  %v23663_v45 = vld [vmem:[#allocation70_spill] sm:$0xff] }
 0xcff   : > { %15666 = vmatmul.mubr.msk.f32.gmra.mrb[100].mxu1 %vm23653_vm11, %v23652_v13  ;;  %vm23662_vm11 = vmmov %vm23642_vm4  ;;  %v23665_v13 = vld [vmem:[#allocation23_spill] sm:$0xff] }
 0xd00   : > { %15668 = vmatprep.mubr.msk.f32.mxu1 %vm23655_vm8, %v23654_v55  ;;  %16225 = vmatpush3.bf16.msra.mxu1 %v16222_v30  ;;  %v16234_v55 = vpack.c.bf16 %v13523_v18, %v13522_v50  ;;  %v23659_v30 = vld [vmem:[#allocation26_spill] sm:$0xff]  ;;  %vm23664_vm8 = vmmov %vm23642_vm4  ;;  %v23673_v18 = vld [vmem:[#allocation59_spill] sm:$0xff] }
 0xd01   : > { %16227 = vmatprep.subr.bf16.mxu1 %v16226_v60  ;;  %v23671_v50 = vld [vmem:[#allocation74_spill] sm:$0xff] }
 0xd03   : > { %15669 = vmatmul.mubr.msk.f32.gmra.mrb[102].mxu1 %vm23642_vm4, %v23656_v27  ;;  %v23667_v27 = vld [vmem:[#allocation45_spill] sm:$0xff]  ;;  %vm23668_vm4 = vmmov %vm23666_vm1 }
 0xd04   : > { %15671 = vmatprep.mubr.msk.f32.mxu1 %vm23658_vm14, %v23657_v21  ;;  %16229 = vmatpush3.bf16.msra.mxu1 %v16226_v60  ;;  %v23669_v60 = vld [vmem:[#allocation67_spill] sm:$0xff]  ;;  %vm23670_vm14 = vmmov %vm23666_vm1 }
 0xd05   : > { %16231 = vmatprep.subr.bf16.mxu1 %v16230_v39  ;;  %v23677_v21 = vld [vmem:[#allocation71_spill] sm:$0xff] }
 0xd07   : > { %15672 = vmatmul.mubr.msk.f32.gmra.mrb[104].mxu1 %vm23660_vm12, %v23659_v30  ;;  %vm23674_vm12 = vmmov %vm23666_vm1  ;;  %v23679_v30 = vld [vmem:[#allocation78_spill] sm:$0xff] }
 0xd08   : > { %15674 = vmatprep.mubr.msk.f32.mxu1 %vm23662_vm11, %v23661_v42  ;;  %16233 = vmatpush3.bf16.msra.mxu1 %v16230_v39  ;;  %v23675_v39 = vld [vmem:[#allocation21_spill] sm:$0xff]  ;;  %vm23676_vm11 = vmmov %vm23666_vm1  ;;  %v23680_v42 = vld [vmem:[#allocation50_spill] sm:$0xff] }
 0xd09   : > { %16235 = vmatprep.subr.bf16.mxu1 %v16234_v55 }
 0xd0b   : > { %15675 = vmatmul.mubr.msk.f32.gmra.mrb[106].mxu1 %vm23664_vm8, %v23663_v45  ;;  %vm23678_vm8 = vmmov %vm23666_vm1  ;;  %v23682_v45 = vld [vmem:[#allocation60_spill] sm:$0xff] }
 0xd0c   : > { %15677 = vmatprep.mubr.msk.f32.mxu1 %vm23666_vm1, %v23665_v13  ;;  %v23684_v13 = vld [vmem:[#allocation75_spill] sm:$0xff] }
 0xd0f   : > { %15678 = vmatmul.mubr.msk.f32.gmra.mrb[108].mxu1 %vm23668_vm4, %v23667_v27  ;;  %vm23681_vm4 = vmmov %vm23666_vm1  ;;  %v23686_v27 = vld [vmem:[#allocation82_spill] sm:$0xff] }
 0xd10   : > { %15680 = vmatprep.mubr.msk.f32.mxu1 %vm23670_vm14, %v23669_v60  ;;  %vm23683_vm14 = vmmov %vm23666_vm1  ;;  %v23688_v60 = vld [vmem:[#allocation51_spill] sm:$0xff] }
 0xd13   : > { %15681 = vmatmul.mubr.msk.f32.gmra.mrb[110].mxu1 %vm23672_vm15, %v23671_v50  ;;  %vm23685_vm15 = vmmov %vm23666_vm1  ;;  %v23690_v50 = vld [vmem:[#allocation33_spill] sm:$0xff] }
 0xd14   : > { %15683 = vmatprep.mubr.msk.f32.mxu1 %vm23674_vm12, %v23673_v18  ;;  %vm23687_vm12 = vmmov %vm23666_vm1  ;;  %v23692_v18 = vld [vmem:[#allocation53_spill] sm:$0xff] }
 0xd17   : > { %15684 = vmatmul.mubr.msk.f32.gmra.mrb[112].mxu1 %vm23676_vm11, %v23675_v39  ;;  %vm23689_vm11 = vmmov %vm23666_vm1  ;;  %v23693_v39 = vld [vmem:[#allocation54_spill] sm:$0xff] }
 0xd18   : > { %15686 = vmatprep.mubr.msk.f32.mxu1 %vm23678_vm8, %v23677_v21  ;;  %vm23691_vm8 = vmmov %vm23666_vm1  ;;  %v23695_v21 = vld [vmem:[#allocation79_spill] sm:$0xff] }
 0xd1b   : > { %15687 = vmatmul.mubr.msk.f32.gmra.mrb[114].mxu1 %vm23666_vm1, %v23679_v30  ;;  %v23697_v30 = vld [vmem:[#allocation58_spill] sm:$0xff] }
 0xd1c   : > { %15689 = vmatprep.mubr.msk.f32.mxu1 %vm23681_vm4, %v23680_v42  ;;  %vm23694_vm4 = vmmov %vm23666_vm1  ;;  %v23699_v42 = vld [vmem:[#allocation57_spill] sm:$0xff] }
 0xd1f   : > { %15690 = vmatmul.mubr.msk.f32.gmra.mrb[116].mxu1 %vm23683_vm14, %v23682_v45  ;;  %vm23696_vm14 = vmmov %vm23666_vm1  ;;  %v23701_v45 = vld [vmem:[#allocation55_spill] sm:$0xff] }
 0xd20   : > { %15692 = vmatprep.mubr.msk.f32.mxu1 %vm23685_vm15, %v23684_v13  ;;  %vm23698_vm15 = vmmov %vm23666_vm1  ;;  %v21953_v13 = vld [vmem:[#allocation2 + $0x108] sm:$0xff] }
 0xd23   : > { %15693 = vmatmul.mubr.msk.f32.gmra.mrb[118].mxu1 %vm23687_vm12, %v23686_v27  ;;  %vm23700_vm12 = vmmov %vm23666_vm1  ;;  %v21957_v27 = vld [vmem:[#allocation2 + $0x110] sm:$0xff] }
 0xd24   : > { %15695 = vmatprep.mubr.msk.f32.mxu1 %vm23689_vm11, %v23688_v60  ;;  %vm23702_vm11 = vmmov %vm23666_vm1  ;;  %v13524_v60 = vld [vmem:[%s23400_s11 + $0x190] sm:$0xff] }
 0xd27   : > { %15696 = vmatmul.mubr.msk.f32.gmra.mrb[120].mxu1 %vm23691_vm8, %v23690_v50  ;;  %vm23703_vm8 = vmmov %vm23666_vm1  ;;  %v13525_v50 = vld [vmem:[%s23400_s11 + $0x198] sm:$0xff] }
 0xd28   : > { %15698 = vmatprep.mubr.msk.f32.mxu1 %vm23666_vm1, %v23692_v18  ;;  %v16238_v18 = vpack.c.bf16 %v13525_v50, %v13524_v60  ;;  %v23710_v60 = vld [vmem:[#allocation97_spill] sm:$0xff]  ;;  %v13528_v50 = vld [vmem:[%s23400_s11 + $0x1b0] sm:$0xff] }
 0xd2b   : > { %15699 = vmatmul.mubr.msk.f32.gmra.mrb[122].mxu1 %vm23694_vm4, %v23693_v39  ;;  %vm23704_vm4 = vmmov %vm23666_vm1  ;;  %v23705_v39 = vld [vmem:[#allocation96_spill] sm:$0xff] }
 0xd2c   : > { %15701 = vmatprep.mubr.msk.f32.mxu1 %vm23696_vm14, %v23695_v21  ;;  %vm23706_vm14 = vnez %v23705_v39  ;;  %v13529_v39 = vld [vmem:[%s23400_s11 + $0x1b8] sm:$0xff] }
 0xd2d   : > { %v10926_v21 = vsel %vm23706_vm14, %v21578_v6, 0.0 }
 0xd2f   : > { %15702 = vmatmul.mubr.msk.f32.gmra.mrb[124].mxu1 %vm23698_vm15, %v23697_v30  ;;  %v13526_v30 = vld [vmem:[%s23400_s11 + $0x1a0] sm:$0xff]  ;;  %vm23707_vm15 = vmmov %vm23666_vm1 }
 0xd30   : > { %15704 = vmatprep.mubr.msk.f32.mxu1 %vm23700_vm12, %v23699_v42  ;;  %v13527_v42 = vld [vmem:[%s23400_s11 + $0x1a8] sm:$0xff]  ;;  %vm23709_vm12 = vmmov %vm23666_vm1 }
 0xd33   : > { %15705 = vmatmul.mubr.msk.f32.gmra.mrb[126].mxu1 %vm23702_vm11, %v23701_v45  ;;  %v23708_v45 = vld [vmem:[#allocation56_spill] sm:$0xff]  ;;  %vm23711_vm11 = vnez %v23710_v60 }
 0xd34   : > { %15707 = vmatprep.mubr.msk.f32.mxu1 %vm23703_vm8, %v21953_v13  ;;  %v10928_v6 = vsel %vm23711_vm11, %v21595_v49, 0.0  ;;  %vm23712_vm8 = vmmov %vm23666_vm1 }
 0xd35   : > { %vm23724_vm11 = vmmov %vm23666_vm1 }
 0xd37   : > { %15708 = vmatmul.mubr.msk.f32.gmra.mrb[128].mxu1 %vm23666_vm1, %v21957_v27 }
 0xd38   : > { %15726 = vmatprep.mubr.msk.f32.mxu1 %vm23704_vm4, %v21576_v33  ;;  %v16242_v33 = vpack.c.bf16 %v13527_v42, %v13526_v30  ;;  %vm23713_vm4 = vnez %v23330_v25  ;;  %v13563_v30 = vld [vmem:[%s23400_s11 + $0x1c8] sm:$0xff]  ;;  %v23719_v42 = vld [vmem:[#allocation48_spill] sm:$0xff] }
 0xd39   : > { %v10930_v49 = vsel %vm23713_vm4, %v21611_v53, 0.0  ;;  %vm23720_vm4 = vmmov %vm23666_vm1 }
 0xd3b   : > { %15727 = vmatmul.mubr.msk.f32.vlgmr.msra.gmra.mrb[34].mxu1 %vm23707_vm15, %v10926_v21  ;;  %v13562_v21 = vld [vmem:[%s23400_s11 + $0x1c0] sm:$0xff]  ;;  %vm23714_vm15 = vmmov %vm23666_vm1 }
 0xd3c   : > { %16237 = vmatpush3.bf16.msra.mxu1 %v16234_v55  ;;  %15729 = vmatprep.mubr.msk.f32.mxu1 %vm23709_vm12, %v23708_v45  ;;  %v16246_v55 = vpack.c.bf16 %v13529_v39, %v13528_v50  ;;  %vm23715_vm12 = vmmov %vm23666_vm1  ;;  %v23717_v39 = vld [vmem:[#allocation89_spill] sm:$0xff]  ;;  %v23721_v45 = vld [vmem:[#allocation91_spill] sm:$0xff] }
 0xd3d   : > { %16239 = vmatprep.subr.bf16.mxu1 %v16238_v18 }
 0xd3f   : > { %15730 = vmatmul.mubr.msk.f32.gmra.mrb[100].mxu1 %vm23712_vm8, %v10928_v6  ;;  %vm23718_vm8 = vnez %v23717_v39  ;;  %v23722_v6 = vld [vmem:[#allocation100_spill] sm:$0xff] }
 0xd40   : > { %15732 = vmatprep.mubr.msk.f32.mxu1 %vm23666_vm1, %v21609_v35  ;;  %16241 = vmatpush3.bf16.msra.mxu1 %v16238_v18  ;;  %v16250_v35 = vpack.c.bf16 %v13563_v30, %v13562_v21  ;;  %v23716_v18 = vld [vmem:[#allocation52_spill] sm:$0xff]  ;;  %v23731_v30 = vld [vmem:[#allocation90_spill] sm:$0xff] }
 0xd41   : > { %16243 = vmatprep.subr.bf16.mxu1 %v16242_v33  ;;  %v10932_v53 = vsel %vm23718_vm8, %v23716_v18, 0.0  ;;  %vm23730_vm8 = vmmov %vm23666_vm1 }
 0xd43   : > { %15733 = vmatmul.mubr.msk.f32.gmra.mrb[102].mxu1 %vm23714_vm15, %v10930_v49  ;;  %vm23723_vm15 = vnez %v23722_v6  ;;  %v23728_v49 = vld [vmem:[#allocation64_spill] sm:$0xff] }
 0xd44   : > { %15735 = vmatprep.mubr.msk.f32.mxu1 %vm23715_vm12, %v21621_v12  ;;  %16245 = vmatpush3.bf16.msra.mxu1 %v16242_v33  ;;  %v10934_v50 = vsel %vm23723_vm15, %v23721_v45, 0.0  ;;  %v23725_v12 = vld [vmem:[#allocation46_spill] sm:$0xff]  ;;  %vm23726_vm12 = vmmov %vm23666_vm1  ;;  %v23727_v33 = vld [vmem:[#allocation43_spill] sm:$0xff]  ;;  %vm23729_vm14 = vnez %v23728_v49 }
 0xd45   : > { %16247 = vmatprep.subr.bf16.mxu1 %v16246_v55  ;;  %v10936_v21 = vsel %vm23729_vm14, %v23727_v33, 0.0  ;;  %v23737_v45 = vld [vmem:[#allocation95_spill] sm:$0xff]  ;;  %vm23740_vm15 = vmmov %vm23666_vm1  ;;  %v23741_v33 = vld [vmem:[#allocation85_spill] sm:$0xff] }
 0xd47   : > { %15736 = vmatmul.mubr.msk.f32.gmra.mrb[104].mxu1 %vm23666_vm1, %v10932_v53 }
 0xd48   : > { %15738 = vmatprep.mubr.msk.f32.mxu1 %vm23720_vm4, %v23719_v42  ;;  %16249 = vmatpush3.bf16.msra.mxu1 %v16246_v55  ;;  %v23732_v55 = vld [vmem:[#allocation32_spill] sm:$0xff]  ;;  %vm23734_vm4 = vmmov %vm23666_vm1  ;;  %v23735_v42 = vld [vmem:[#allocation93_spill] sm:$0xff] }
 0xd49   : > { %16251 = vmatprep.subr.bf16.mxu1 %v16250_v35  ;;  %v10938_v53 = vsel %vm23562_vm7, %v23732_v55, 0.0  ;;  %vm23746_vm14 = vmmov %vm23734_vm4  ;;  %v23747_v55 = vld [vmem:[#allocation98_spill] sm:$0xff] }
 0xd4a   : > { %vm23751_vm7 = vmmov %vm23734_vm4 }
 0xd4b   : > { %15739 = vmatmul.mubr.msk.f32.gmra.mrb[106].mxu1 %vm23724_vm11, %v10934_v50  ;;  %vm23736_vm11 = vmmov %vm23666_vm1  ;;  %v23738_v50 = vld [vmem:[#allocation49_spill] sm:$0xff] }
 0xd4c   : > { %15741 = vmatprep.mubr.msk.f32.mxu1 %vm23726_vm12, %v23725_v12  ;;  %vm23739_vm12 = vnez %v23738_v50 }
 0xd4d   : > { %v10940_v12 = vsel %vm23739_vm12, %v23737_v45, 0.0  ;;  %v23752_v45 = vld [vmem:[#allocation88_spill] sm:$0xff]  ;;  %vm23757_vm12 = vmmov %vm23734_vm4 }
 0xd4f   : > { %15742 = vmatmul.mubr.msk.f32.gmra.mrb[108].mxu1 %vm23730_vm8, %v10936_v21  ;;  %vm23742_vm8 = vmmov %vm23666_vm1  ;;  %v23743_v21 = vld [vmem:[#allocation87_spill] sm:$0xff] }
 0xd50   : > { %15744 = vmatprep.mubr.msk.f32.mxu1 %vm23666_vm1, %v23731_v30  ;;  %v23744_v30 = vld [vmem:[#allocation22_spill] sm:$0xff] }
 0xd51   : > { %vm23745_vm1 = vnez %v23744_v30 }
 0xd52   : > { %v10942_v49 = vsel %vm23745_vm1, %v23743_v21, 0.0  ;;  %v23758_v21 = vld [vmem:[#allocation101_spill] sm:$0xff] }
 0xd53   : > { %15745 = vmatmul.mubr.msk.f32.gmra.mrb[110].mxu1 %vm23734_vm4, %v10938_v53  ;;  %v23748_v53 = vld [vmem:[#allocation99_spill] sm:$0xff] }
 0xd54   : > { %15747 = vmatprep.mubr.msk.f32.mxu1 %vm23736_vm11, %v23735_v42  ;;  %v23749_v42 = vld [vmem:[#allocation61_spill] sm:$0xff] }
 0xd55   : > { %vm23750_vm11 = vnez %v23749_v42 }
 0xd56   : > { %v10944_v18 = vsel %vm23750_vm11, %v23748_v53, 0.0  ;;  %v23762_v53 = vld [vmem:[#allocation44_spill] sm:$0xff]  ;;  %vm23766_vm11 = vmmov %vm23734_vm4 }
 0xd57   : > { %15748 = vmatmul.mubr.msk.f32.gmra.mrb[112].mxu1 %vm23740_vm15, %v10940_v12  ;;  %vm23753_vm15 = vmmov %vm23734_vm4  ;;  %v23754_v12 = vld [vmem:[#allocation92_spill] sm:$0xff] }
 0xd58   : > { %15750 = vmatprep.mubr.msk.f32.mxu1 %vm23742_vm8, %v23741_v33  ;;  %v23755_v33 = vld [vmem:[#allocation77_spill] sm:$0xff] }
 0xd59   : > { %vm23756_vm8 = vnez %v23755_v33  ;;  %v12165_v33 = vld [vmem:[#allocation2 + $0xf9] sm:$0xff] }
 0xd5a   : > { %v10946_v50 = vsel %vm23756_vm8, %v23754_v12, 0.0  ;;  %v23767_v12 = vld [vmem:[#allocation68_spill] sm:$0xff] }
 0xd5b   : > { %15751 = vmatmul.mubr.msk.f32.gmra.mrb[114].mxu1 %vm23746_vm14, %v10942_v49  ;;  %vm23759_vm14 = vmmov %vm23734_vm4  ;;  %v23760_v49 = vld [vmem:[#allocation28_spill] sm:$0xff] }
 0xd5c   : > { %15753 = vmatprep.mubr.msk.f32.mxu1 %vm23734_vm4, %v23747_v55  ;;  %v10948_v30 = vsel %vm23589_vm0, %v23760_v49, 0.0  ;;  %v23771_v49 = vld [vmem:[#allocation66_spill] sm:$0xff] }
 0xd5f   : > { %15754 = vmatmul.mubr.msk.f32.gmra.mrb[116].mxu1 %vm23751_vm7, %v10944_v18  ;;  %vm23763_vm7 = vmmov %vm23734_vm4  ;;  %v23764_v18 = vld [vmem:[#allocation27_spill] sm:$0xff] }
 0xd60   : > { %15756 = vmatprep.mubr.msk.f32.mxu1 %vm23753_vm15, %v23752_v45  ;;  %vm23765_vm15 = vnez %v23764_v18 }
 0xd61   : > { %v10950_v45 = vsel %vm23765_vm15, %v21716_v4, 0.0  ;;  %v22075_v4 = vld [vmem:[#allocation2 + $0x109] sm:$0xff] }
 0xd63   : > { %15757 = vmatmul.mubr.msk.f32.gmra.mrb[118].mxu1 %vm23757_vm12, %v10946_v50  ;;  %vm23768_vm12 = vmmov %vm23734_vm4 }
 0xd64   : > { %15759 = vmatprep.mubr.msk.f32.mxu1 %vm23759_vm14, %v23758_v21  ;;  %v10952_v21 = vsel %vm23601_vm6, %v21726_v10, 0.0  ;;  %vm23770_vm14 = vmmov %vm23734_vm4  ;;  %v13566_v10 = vld [vmem:[%s23400_s11 + $0x1e0] sm:$0xff] }
 0xd67   : > { %15760 = vmatmul.mubr.msk.f32.gmra.mrb[120].mxu1 %vm23734_vm4, %v10948_v30  ;;  %v23772_v30 = vld [vmem:[#allocation69_spill] sm:$0xff] }
 0xd68   : > { %15762 = vmatprep.mubr.msk.f32.mxu1 %vm23763_vm7, %v23762_v53  ;;  %v10954_v55 = vsel %vm23605_vm3, %v23772_v30, 0.0  ;;  %vm23774_vm7 = vmmov %vm23734_vm4  ;;  %v13567_v53 = vld [vmem:[%s23400_s11 + $0x1e8] sm:$0xff] }
 0xd69   : > { %v16258_v5 = vpack.c.bf16 %v13567_v53, %v13566_v10  ;;  %v11757_v53 = vld [vmem:[#allocation2 + $0x88] sm:$0xff]  ;;  %v11758_v10 = vld [vmem:[#allocation2 + $0x90] sm:$0xff] }
 0xd6b   : > { %15763 = vmatmul.mubr.msk.f32.gmra.mrb[122].mxu1 %vm23766_vm11, %v10950_v45  ;;  %v22077_v45 = vld [vmem:[#allocation2 + $0x111] sm:$0xff]  ;;  %vm23775_vm11 = vmmov %vm23734_vm4 }
 0xd6c   : > { %15765 = vmatprep.mubr.msk.f32.mxu1 %vm23768_vm12, %v23767_v12  ;;  %v10956_v12 = vsel %vm23611_vm2, %v22077_v45, 0.0  ;;  %vm23777_vm12 = vmmov %vm23734_vm4 }
 0xd6f   : > { %15766 = vmatmul.mubr.msk.f32.gmra.mrb[124].mxu1 %vm23770_vm14, %v10952_v21  ;;  %v13564_v21 = vld [vmem:[%s23400_s11 + $0x1d0] sm:$0xff]  ;;  %vm23778_vm14 = vmmov %vm23734_vm4 }
 0xd70   : > { %15768 = vmatprep.mubr.msk.f32.mxu1 %vm23734_vm4, %v23771_v49  ;;  %v13565_v49 = vld [vmem:[%s23400_s11 + $0x1d8] sm:$0xff] }
 0xd71   : > { %v16254_v30 = vpack.c.bf16 %v13565_v49, %v13564_v21  ;;  %v13569_v21 = vld [vmem:[%s23400_s11 + $0x1f8] sm:$0xff] }
 0xd72   : > { %v11759_v49 = vld [vmem:[#allocation2 + $0x98] sm:$0xff] }
 0xd73   : > { %15769 = vmatmul.mubr.msk.f32.gmra.mrb[126].mxu1 %vm23774_vm7, %v10954_v55  ;;  %v11351_v55 = vsel %vm19716_vm9, %v21401_v54, 0.0  ;;  %vm23779_vm9 = vmmov %vm23734_vm4  ;;  %v13568_v54 = vld [vmem:[%s23400_s11 + $0x1f0] sm:$0xff] }
 0xd74   : > { %15771 = vmatprep.mubr.msk.f32.mxu1 %vm23775_vm11, %v22075_v4  ;;  %vm23780_vm7 = vmmov %vm23734_vm4  ;;  %vm23781_vm11 = vnez %v23210_v20 }
 0xd75   : > { %v11355_v2 = vsel %vm23781_vm11, %v21433_v34, 0.0  ;;  %vm23787_vm11 = vmmov %vm23734_vm4 }
 0xd77   : > { %15772 = vmatmul.mubr.msk.f32.gmra.mrb[128].mxu1 %vm23777_vm12, %v10956_v12  ;;  %v11353_v12 = vsel %vm19735_vm10, %v21417_v14, 0.0  ;;  %vm23782_vm10 = vmmov %vm23734_vm4  ;;  %v16262_v14 = vpack.c.bf16 %v13569_v21, %v13568_v54  ;;  %v11764_v54 = vld [vmem:[#allocation2 + $0xc0] sm:$0xff]  ;;  %v11765_v21 = vld [vmem:[#allocation2 + $0xc8] sm:$0xff] }
 0xd78   : > { %15790 = vmatprep.mubr.msk.f32.mxu1 %vm23778_vm14, %v11351_v55  ;;  %vm23783_vm12 = vmmov %vm23734_vm4  ;;  %vm23784_vm14 = vnez %v23212_v22  ;;  %v11760_v55 = vld [vmem:[#allocation2 + $0xa0] sm:$0xff] }
 0xd79   : > { %v11357_v20 = vsel %vm23784_vm14, %v21445_v29, 0.0  ;;  %vm23790_vm14 = vmmov %vm23734_vm4  ;;  %v11751_v29 = vld [vmem:[#allocation2 + $0x58] sm:$0xff] }
 0xd7b   : > { %15791 = vmatmul.mubr.msk.f32.vlgmr.msra.gmra.mrb[34].mxu1 %vm23734_vm4, %v21419_v43  ;;  %v13602_v43 = vld [vmem:[%s23400_s11 + $0x200] sm:$0xff] }
 0xd7c   : > { %16253 = vmatpush3.bf16.msra.mxu1 %v16250_v35  ;;  %15793 = vmatprep.mubr.msk.f32.mxu1 %vm23779_vm9, %v11353_v12  ;;  %v13603_v35 = vld [vmem:[%s23400_s11 + $0x208] sm:$0xff]  ;;  %vm23785_vm9 = vmmov %vm23734_vm4  ;;  %v11762_v12 = vld [vmem:[#allocation2 + $0xb0] sm:$0xff] }
 0xd7d   : > { %16255 = vmatprep.subr.bf16.mxu1 %v16254_v30  ;;  %v16266_v34 = vpack.c.bf16 %v13603_v35, %v13602_v43  ;;  %v11768_v43 = vld [vmem:[#allocation2 + $0xe0] sm:$0xff]  ;;  %v11769_v35 = vld [vmem:[#allocation2 + $0xe8] sm:$0xff] }
 0xd7f   : > { %15794 = vmatmul.mubr.msk.f32.gmra.mrb[100].mxu1 %vm23780_vm7, %v21437_v62  ;;  %v11359_v62 = vsel %vm19800_vm13, %v21456_v7, 0.0  ;;  %vm23786_vm7 = vmmov %vm23734_vm4  ;;  %v11753_v7 = vld [vmem:[#allocation2 + $0x68] sm:$0xff] }
 0xd80   : > { %15796 = vmatprep.mubr.msk.f32.mxu1 %vm23782_vm10, %v11355_v2  ;;  %16257 = vmatpush3.bf16.msra.mxu1 %v16254_v30  ;;  %vm23788_vm10 = vnez %v23218_v44  ;;  %vm23792_vm13 = vmmov %vm23786_vm7  ;;  %v11761_v30 = vld [vmem:[#allocation2 + $0xa8] sm:$0xff]  ;;  %v11766_v2 = vld [vmem:[#allocation2 + $0xd0] sm:$0xff] }
 0xd81   : > { %16259 = vmatprep.subr.bf16.mxu1 %v16258_v5  ;;  %v11361_v22 = vsel %vm23788_vm10, %v21466_v28, 0.0  ;;  %v11755_v28 = vld [vmem:[#allocation2 + $0x78] sm:$0xff] }
 0xd83   : > { %15797 = vmatmul.mubr.msk.f32.gmra.mrb[102].mxu1 %vm23783_vm12, %v21448_v11  ;;  %vm23789_vm12 = vmmov %vm23734_vm4  ;;  %v11752_v11 = vld [vmem:[#allocation2 + $0x60] sm:$0xff] }
 0xd84   : > { %15799 = vmatprep.mubr.msk.f32.mxu1 %vm23734_vm4, %v11357_v20  ;;  %16261 = vmatpush3.bf16.msra.mxu1 %v16258_v5  ;;  %vm23791_vm4 = vnez %v23221_v38  ;;  %v11763_v5 = vld [vmem:[#allocation2 + $0xb8] sm:$0xff]  ;;  %v11770_v20 = vld [vmem:[#allocation2 + $0xf0] sm:$0xff] }
 0xd85   : > { %16263 = vmatprep.subr.bf16.mxu1 %v16262_v14  ;;  %v11363_v37 = vsel %vm23791_vm4, %v21476_v57, 0.0  ;;  %v11750_v57 = vld [vmem:[#allocation2 + $0x50] sm:$0xff] }
 0xd87   : > { %15800 = vmatmul.mubr.msk.f32.gmra.mrb[104].mxu1 %vm23785_vm9, %v21458_v8  ;;  %vm23793_vm9 = vmmov %vm23786_vm7  ;;  %v11754_v8 = vld [vmem:[#allocation2 + $0x70] sm:$0xff] }
 0xd88   : > { %15802 = vmatprep.mubr.msk.f32.mxu1 %vm23786_vm7, %v11359_v62  ;;  %16265 = vmatpush3.bf16.msra.mxu1 %v16262_v14  ;;  %vm23794_vm7 = vnez %v23223_v51  ;;  %vm23796_vm10 = vmmov %vm23793_vm9  ;;  %v11767_v14 = vld [vmem:[#allocation2 + $0xd8] sm:$0xff]  ;;  %v11772_v62 = vld [vmem:[#allocation2 + $0x100] sm:$0xff] }
 0xd89   : > { %16267 = vmatprep.subr.bf16.mxu1 %v16266_v34  ;;  %vm23799_vm4 = vmmov %vm23793_vm9 }
 0xd8b   : > { %15803 = vmatmul.mubr.msk.f32.gmra.mrb[106].mxu1 %vm23787_vm11, %v21468_v26  ;;  %v11365_v26 = vsel %vm23794_vm7, %v21486_v59, 0.0  ;;  %vm23795_vm11 = vmmov %vm23793_vm9  ;;  %v11749_v59 = vld [vmem:[#allocation2 + $0x48] sm:$0xff] }
 0xd8c   : > { %15805 = vmatprep.mubr.msk.f32.mxu1 %vm23789_vm12, %v11361_v22  ;;  %vm23797_vm12 = vnez %v23225_v16  ;;  %vm23802_vm7 = vmmov %vm23799_vm4  ;;  %v11775_v22 = vld [vmem:[#allocation2 + $0x118] sm:$0xff] }
 0xd8d   : > { %v11367_v44 = vsel %vm23797_vm12, %v21496_v61, 0.0  ;;  %vm23805_vm12 = vmmov %vm23799_vm4  ;;  %v13608_v61 = vld [vmem:[%s23400_s11 + $0x230] sm:$0xff] }
 0xd8f   : > { %15806 = vmatmul.mubr.msk.f32.gmra.mrb[108].mxu1 %vm23790_vm14, %v21478_v19  ;;  %vm23798_vm14 = vmmov %vm23793_vm9 }
 0xd90   : > { %15808 = vmatprep.mubr.msk.f32.mxu1 %vm23792_vm13, %v11363_v37  ;;  %vm23800_vm13 = vnez %v23227_v32  ;;  %v11375_v32 = vsel %vm23636_vm5, %v21536_v15, 0.0  ;;  %vm23815_vm5 = vmmov %vm23799_vm4  ;;  %v11776_v37 = vld [vmem:[#allocation2 + $0x120] sm:$0xff] }
 0xd91   : > { %v11369_v38 = vsel %vm23800_vm13, %v21506_v17, 0.0  ;;  %vm23807_vm13 = vmmov %vm23799_vm4 }
 0xd93   : > { %15809 = vmatmul.mubr.msk.f32.gmra.mrb[110].mxu1 %vm23793_vm9, %v21488_v1  ;;  %vm23801_vm9 = vmmov %vm23799_vm4  ;;  %v13609_v1 = vld [vmem:[%s23400_s11 + $0x238] sm:$0xff] }
 0xd94   : > { %15811 = vmatprep.mubr.msk.f32.mxu1 %vm23795_vm11, %v11365_v26  ;;  %vm23803_vm11 = vnez %v23229_v0  ;;  %v16278_v19 = vpack.c.bf16 %v13609_v1, %v13608_v61  ;;  %v12139_v26 = vld [vmem:[#allocation2 + $0x29] sm:$0xff]  ;;  %v12156_v61 = vld [vmem:[#allocation2 + $0xb1] sm:$0xff] }
 0xd95   : > { %v11371_v51 = vsel %vm23803_vm11, %v21516_v41, 0.0  ;;  %vm23810_vm11 = vnez %v23235_v46  ;;  %v11350_v46 = vld [vmem:[#allocation2 + $0x11f] sm:$0xff]  ;;  %v13607_v41 = vld [vmem:[%s23400_s11 + $0x228] sm:$0xff] }
 0xd96   : > { %v11377_v0 = vsel %vm23810_vm11, %v21546_v48, 0.0  ;;  %v11745_v48 = vld [vmem:[#allocation2 + $0x28] sm:$0xff]  ;;  %vm23820_vm11 = vmmov %vm23799_vm4 }
 0xd97   : > { %15812 = vmatmul.mubr.msk.f32.gmra.mrb[112].mxu1 %vm23796_vm10, %v21498_v31  ;;  %vm23804_vm10 = vmmov %vm23799_vm4  ;;  %v11748_v31 = vld [vmem:[#allocation2 + $0x40] sm:$0xff] }
 0xd98   : > { %15814 = vmatprep.mubr.msk.f32.mxu1 %vm23798_vm14, %v11367_v44  ;;  %vm23806_vm14 = vnez %v23231_v40  ;;  %v12140_v44 = vld [vmem:[#allocation2 + $0x31] sm:$0xff] }
 0xd99   : > { %v11373_v16 = vsel %vm23806_vm14, %v21526_v3, 0.0  ;;  %vm23813_vm14 = vnez %v23237_v47  ;;  %v13605_v47 = vld [vmem:[%s23400_s11 + $0x218] sm:$0xff]  ;;  %v11746_v3 = vld [vmem:[#allocation2 + $0x30] sm:$0xff] }
 0xd9a   : > { %v11379_v40 = vsel %vm23813_vm14, %v21857_v36, 0.0  ;;  %vm23823_vm14 = vmmov %vm23799_vm4  ;;  %v11756_v36 = vld [vmem:[#allocation2 + $0x80] sm:$0xff] }
 0xd9b   : > { %15815 = vmatmul.mubr.msk.f32.gmra.mrb[114].mxu1 %vm23799_vm4, %v21508_v23  ;;  %v11747_v23 = vld [vmem:[#allocation2 + $0x38] sm:$0xff] }
 0xd9c   : > { %15817 = vmatprep.mubr.msk.f32.mxu1 %vm23801_vm9, %v11369_v38  ;;  %vm23808_vm9 = vmmov %vm23799_vm4  ;;  %v23849_v38 = vld [vmem:[#allocation96_spill] sm:$0xff] }
 0xd9f   : > { %15818 = vmatmul.mubr.msk.f32.gmra.mrb[116].mxu1 %vm23802_vm7, %v21518_v56  ;;  %vm23809_vm7 = vmmov %vm23799_vm4  ;;  %v13606_v56 = vld [vmem:[%s23400_s11 + $0x220] sm:$0xff] }
 0xda0   : > { %15820 = vmatprep.mubr.msk.f32.mxu1 %vm23804_vm10, %v11371_v51  ;;  %vm23811_vm10 = vmmov %vm23799_vm4  ;;  %v16274_v17 = vpack.c.bf16 %v13607_v41, %v13606_v56  ;;  %v12154_v41 = vld [vmem:[#allocation2 + $0xa1] sm:$0xff] }
 0xda3   : > { %15821 = vmatmul.mubr.msk.f32.gmra.mrb[118].mxu1 %vm23805_vm12, %v21528_v9  ;;  %vm23812_vm12 = vmmov %vm23799_vm4 }
 0xda4   : > { %15823 = vmatprep.mubr.msk.f32.mxu1 %vm23799_vm4, %v11373_v16  ;;  %v12141_v16 = vld [vmem:[#allocation2 + $0x39] sm:$0xff] }
 0xda7   : > { %15824 = vmatmul.mubr.msk.f32.gmra.mrb[120].mxu1 %vm23807_vm13, %v21538_v63  ;;  %v23814_v63 = vld [vmem:[#allocation20_spill] sm:$0xff] }
 0xda8   : > { %15826 = vmatprep.mubr.msk.f32.mxu1 %vm23808_vm9, %v11375_v32  ;;  %vm23818_vm9 = vmmov %vm23799_vm4  ;;  %v12143_v32 = vld [vmem:[#allocation2 + $0x49] sm:$0xff] }
 0xdab   : > { %15827 = vmatmul.mubr.msk.f32.gmra.mrb[122].mxu1 %vm23809_vm7, %v21548_v58  ;;  %v23816_v58 = vld [vmem:[#allocation84_spill] sm:$0xff]  ;;  %vm23819_vm7 = vmmov %vm23799_vm4 }
 0xdac   : > { %15829 = vmatprep.mubr.msk.f32.mxu1 %vm23811_vm10, %v11377_v0  ;;  %vm23817_vm13 = vnez %v23816_v58  ;;  %vm23821_vm10 = vmmov %vm23799_vm4  ;;  %v12144_v0 = vld [vmem:[#allocation2 + $0x51] sm:$0xff] }
 0xdad   : > { %v11381_v15 = vsel %vm23817_vm13, %v11349_v52, 0.0  ;;  %vm23825_vm13 = vmmov %vm23799_vm4  ;;  %v12145_v52 = vld [vmem:[#allocation2 + $0x59] sm:$0xff] }
 0xdaf   : > { %15830 = vmatmul.mubr.msk.f32.gmra.mrb[124].mxu1 %vm23812_vm12, %v21556_v24  ;;  %v13604_v24 = vld [vmem:[%s23400_s11 + $0x210] sm:$0xff]  ;;  %vm23822_vm12 = vmmov %vm23799_vm4 }
 0xdb0   : > { %15832 = vmatprep.mubr.msk.f32.mxu1 %vm23799_vm4, %v11379_v40  ;;  %v16270_v9 = vpack.c.bf16 %v13605_v47, %v13604_v24  ;;  %v12150_v24 = vld [vmem:[#allocation2 + $0x81] sm:$0xff]  ;;  %v23864_v47 = vld [vmem:[#allocation64_spill] sm:$0xff] }
 0xdb3   : > { %15833 = vmatmul.mubr.msk.f32.gmra.mrb[126].mxu1 %vm23815_vm5, %v23814_v63  ;;  %vm23824_vm5 = vmmov %vm23799_vm4  ;;  %v12146_v63 = vld [vmem:[#allocation2 + $0x61] sm:$0xff] }
 0xdb4   : > { %15835 = vmatprep.mubr.msk.f32.mxu1 %vm23818_vm9, %v11381_v15  ;;  %vm23826_vm9 = vmmov %vm23799_vm4  ;;  %v12148_v15 = vld [vmem:[#allocation2 + $0x71] sm:$0xff] }
 0xdb7   : > { %15836 = vmatmul.mubr.msk.f32.gmra.mrb[128].mxu1 %vm23819_vm7, %v11350_v46  ;;  %vm23827_vm7 = vmmov %vm23799_vm4 }
 0xdb8   : > { %15854 = vmatprep.mubr.msk.f32.mxu1 %vm23820_vm11, %v11745_v48  ;;  %vm23828_vm11 = vmmov %vm23799_vm4 }
 0xdbb   : > { %15855 = vmatmul.mubr.msk.f32.vlgmr.msra.gmra.mrb[34].mxu1 %vm23821_vm10, %v11746_v3  ;;  %vm23829_vm10 = vmmov %vm23799_vm4  ;;  %v23867_v3 = vld [vmem:[#allocation31_spill] sm:$0xff] }
 0xdbc   : > { %16269 = vmatpush3.bf16.msra.mxu1 %v16266_v34  ;;  %15857 = vmatprep.mubr.msk.f32.mxu1 %vm23822_vm12, %v11747_v23  ;;  %vm23830_vm12 = vmmov %vm23799_vm4  ;;  %v11771_v34 = vld [vmem:[#allocation2 + $0xf8] sm:$0xff] }
 0xdbd   : > { %16271 = vmatprep.subr.bf16.mxu1 %v16270_v9  ;;  %v23871_v23 = vld [vmem:[#allocation49_spill] sm:$0xff] }
 0xdbf   : > { %15858 = vmatmul.mubr.msk.f32.gmra.mrb[100].mxu1 %vm23823_vm14, %v11748_v31  ;;  %vm23831_vm14 = vmmov %vm23799_vm4  ;;  %v12155_v31 = vld [vmem:[#allocation2 + $0xa9] sm:$0xff] }
 0xdc0   : > { %15860 = vmatprep.mubr.msk.f32.mxu1 %vm23799_vm4, %v11749_v59  ;;  %16273 = vmatpush3.bf16.msra.mxu1 %v16270_v9  ;;  %v12152_v9 = vld [vmem:[#allocation2 + $0x91] sm:$0xff]  ;;  %v12188_v59 = vsel %vm23745_vm1, %v12156_v61, 0.0  ;;  %vm23881_vm1 = vmmov %vm23799_vm4 }
 0xdc1   : > { %16275 = vmatprep.subr.bf16.mxu1 %v16274_v17 }
 0xdc3   : > { %15861 = vmatmul.mubr.msk.f32.gmra.mrb[102].mxu1 %vm23824_vm5, %v11750_v57  ;;  %vm23832_vm5 = vmmov %vm23799_vm4  ;;  %v12158_v57 = vld [vmem:[#allocation2 + $0xc1] sm:$0xff] }
 0xdc4   : > { %15863 = vmatprep.mubr.msk.f32.mxu1 %vm23825_vm13, %v11751_v29  ;;  %16277 = vmatpush3.bf16.msra.mxu1 %v16274_v17  ;;  %vm23833_vm13 = vmmov %vm23799_vm4 }
 0xdc5   : > { %16279 = vmatprep.subr.bf16.mxu1 %v16278_v19 }
 0xdc7   : > { %15864 = vmatmul.mubr.msk.f32.gmra.mrb[104].mxu1 %vm23826_vm9, %v11752_v11  ;;  %vm23834_vm9 = vmmov %vm23799_vm4  ;;  %v12159_v11 = vld [vmem:[#allocation2 + $0xc9] sm:$0xff] }
 0xdc8   : > { %15866 = vmatprep.mubr.msk.f32.mxu1 %vm23827_vm7, %v11753_v7  ;;  %16281 = vmatpush3.bf16.msra.mxu1 %v16278_v19  ;;  %vm23835_vm7 = vmmov %vm23799_vm4  ;;  %v12157_v19 = vld [vmem:[#allocation2 + $0xb9] sm:$0xff]  ;;  %v12160_v7 = vld [vmem:[#allocation2 + $0xd1] sm:$0xff] }
 0xdcb   : > { %15867 = vmatmul.mubr.msk.f32.gmra.mrb[106].mxu1 %vm23828_vm11, %v11754_v8  ;;  %vm23836_vm11 = vmmov %vm23799_vm4  ;;  %v12192_v8 = vsel %vm23756_vm8, %v12160_v7, 0.0 }
 0xdcc   : > { %15869 = vmatprep.mubr.msk.f32.mxu1 %vm23829_vm10, %v11755_v28  ;;  %vm23837_vm10 = vmmov %vm23799_vm4  ;;  %v12161_v28 = vld [vmem:[#allocation2 + $0xd9] sm:$0xff] }
 0xdcd   : > { %vm23886_vm8 = vmmov %vm23881_vm1 }
 0xdcf   : > { %15870 = vmatmul.mubr.msk.f32.gmra.mrb[108].mxu1 %vm23830_vm12, %v11756_v36  ;;  %vm23838_vm12 = vmmov %vm23799_vm4  ;;  %v12162_v36 = vld [vmem:[#allocation2 + $0xe1] sm:$0xff] }
 0xdd0   : > { %15872 = vmatprep.mubr.msk.f32.mxu1 %vm23831_vm14, %v11757_v53  ;;  %vm23839_vm14 = vmmov %vm23799_vm4 }
 0xdd3   : > { %15873 = vmatmul.mubr.msk.f32.gmra.mrb[110].mxu1 %vm23799_vm4, %v11758_v10  ;;  %v12194_v10 = vsel %vm23589_vm0, %v12162_v36, 0.0  ;;  %vm23888_vm0 = vmmov %vm23881_vm1 }
 0xdd4   : > { %15875 = vmatprep.mubr.msk.f32.mxu1 %vm23832_vm5, %v11759_v49  ;;  %vm23840_vm5 = vmmov %vm23799_vm4  ;;  %v12164_v49 = vld [vmem:[#allocation2 + $0xf1] sm:$0xff] }
 0xdd7   : > { %15876 = vmatmul.mubr.msk.f32.gmra.mrb[112].mxu1 %vm23833_vm13, %v11760_v55  ;;  %vm23841_vm13 = vmmov %vm23799_vm4  ;;  %v12196_v55 = vsel %vm23765_vm15, %v12164_v49, 0.0 }
 0xdd8   : > { %15878 = vmatprep.mubr.msk.f32.mxu1 %vm23834_vm9, %v11761_v30  ;;  %vm23842_vm9 = vmmov %vm23799_vm4  ;;  %v12166_v30 = vld [vmem:[#allocation2 + $0x101] sm:$0xff] }
 0xdd9   : > { %vm23890_vm15 = vmmov %vm23888_vm0 }
 0xddb   : > { %15879 = vmatmul.mubr.msk.f32.gmra.mrb[114].mxu1 %vm23835_vm7, %v11762_v12  ;;  %vm23843_vm7 = vmmov %vm23799_vm4  ;;  %v12198_v12 = vsel %vm23601_vm6, %v12166_v30, 0.0 }
 0xddc   : > { %15881 = vmatprep.mubr.msk.f32.mxu1 %vm23836_vm11, %v11763_v5  ;;  %vm23844_vm11 = vmmov %vm23799_vm4  ;;  %v12169_v5 = vld [vmem:[#allocation2 + $0x119] sm:$0xff] }
 0xddd   : > { %vm23893_vm6 = vmmov %vm23888_vm0 }
 0xddf   : > { %15882 = vmatmul.mubr.msk.f32.gmra.mrb[116].mxu1 %vm23837_vm10, %v11764_v54  ;;  %vm23845_vm10 = vmmov %vm23799_vm4  ;;  %v12170_v54 = vld [vmem:[#allocation2 + $0x121] sm:$0xff] }
 0xde0   : > { %15884 = vmatprep.mubr.msk.f32.mxu1 %vm23838_vm12, %v11765_v21  ;;  %vm23846_vm12 = vmmov %vm23799_vm4  ;;  %v12200_v21 = vsel %vm23605_vm3, %v22077_v45, 0.0  ;;  %v12202_v50 = vsel %vm23611_vm2, %v12170_v54, 0.0  ;;  %vm23895_vm3 = vcmask 261120  }
 0xde1   : > { %vm23896_vm2 = vmmov %vm23895_vm3 }
 0xde3   : > { %15885 = vmatmul.mubr.msk.f32.gmra.mrb[118].mxu1 %vm23839_vm14, %v11766_v2  ;;  %vm23847_vm14 = vmmov %vm23799_vm4 }
 0xde4   : > { %15887 = vmatprep.mubr.msk.f32.mxu1 %vm23799_vm4, %v11767_v14 }
 0xde7   : > { %15888 = vmatmul.mubr.msk.f32.gmra.mrb[120].mxu1 %vm23840_vm5, %v11768_v43  ;;  %vm23848_vm5 = vmmov %vm23799_vm4 }
 0xde8   : > { %15890 = vmatprep.mubr.msk.f32.mxu1 %vm23841_vm13, %v11769_v35  ;;  %vm23850_vm13 = vnez %v23849_v38 }
 0xde9   : > { %v12172_v51 = vsel %vm23850_vm13, %v12140_v44, 0.0  ;;  %vm23858_vm13 = vnez %v23717_v39  ;;  %v12151_v39 = vld [vmem:[#allocation2 + $0x89] sm:$0xff] }
 0xdea   : > { %v12178_v58 = vsel %vm23858_vm13, %v12146_v63, 0.0  ;;  %vm23868_vm13 = vnez %v23867_v3 }
 0xdeb   : > { %15891 = vmatmul.mubr.msk.f32.gmra.mrb[122].mxu1 %vm23842_vm9, %v11770_v20  ;;  %vm23851_vm9 = vmmov %vm23799_vm4  ;;  %v12184_v56 = vsel %vm23868_vm13, %v12152_v9, 0.0 }
 0xdec   : > { %15893 = vmatprep.mubr.msk.f32.mxu1 %vm23843_vm7, %v11771_v34  ;;  %vm23852_vm7 = vmmov %vm23799_vm4 }
 0xded   : > { %vm23878_vm13 = vmmov %vm23799_vm4 }
 0xdef   : > { %15894 = vmatmul.mubr.msk.f32.gmra.mrb[124].mxu1 %vm23844_vm11, %v11772_v62  ;;  %vm23853_vm11 = vnez %v23710_v60  ;;  %v12147_v60 = vld [vmem:[#allocation2 + $0x69] sm:$0xff] }
 0xdf0   : > { %15896 = vmatprep.mubr.msk.f32.mxu1 %vm23845_vm10, %v21953_v13  ;;  %v12142_v13 = vld [vmem:[#allocation2 + $0x41] sm:$0xff]  ;;  %vm23854_vm10 = vmmov %vm23799_vm4 }
 0xdf3   : > { %15897 = vmatmul.mubr.msk.f32.gmra.mrb[126].mxu1 %vm23846_vm12, %v21957_v27  ;;  %v12174_v27 = vsel %vm23853_vm11, %v12142_v13, 0.0  ;;  %vm23855_vm12 = vmmov %vm23799_vm4  ;;  %vm23861_vm11 = vnez %v23722_v6  ;;  %v12153_v6 = vld [vmem:[#allocation2 + $0x99] sm:$0xff] }
 0xdf4   : > { %15899 = vmatprep.mubr.msk.f32.mxu1 %vm23847_vm14, %v11775_v22  ;;  %vm23856_vm14 = vnez %v23330_v25  ;;  %v12180_v46 = vsel %vm23861_vm11, %v12148_v15, 0.0  ;;  %v12149_v25 = vld [vmem:[#allocation2 + $0x79] sm:$0xff]  ;;  %vm23872_vm11 = vnez %v23871_v23 }
 0xdf5   : > { %v12176_v40 = vsel %vm23856_vm14, %v12144_v0, 0.0  ;;  %vm23865_vm14 = vnez %v23864_v47  ;;  %v12186_v17 = vsel %vm23872_vm11, %v12154_v41, 0.0  ;;  %vm23883_vm11 = vmmov %vm23881_vm1 }
 0xdf6   : > { %v12182_v48 = vsel %vm23865_vm14, %v12150_v24, 0.0  ;;  %vm23876_vm14 = vmmov %vm23799_vm4 }
 0xdf7   : > { %15900 = vmatmul.mubr.msk.f32.gmra.mrb[128].mxu1 %vm23799_vm4, %v11776_v37 }
 0xdf8   : > { %15918 = vmatprep.mubr.msk.f32.mxu1 %vm23848_vm5, %v12139_v26  ;;  %vm23857_vm5 = vmmov %vm23799_vm4 }
 0xdfb   : > { %15919 = vmatmul.mubr.msk.f32.vlgmr.msra.gmra.mrb[34].mxu1 %vm23851_vm9, %v12172_v51  ;;  %vm23859_vm9 = vmmov %vm23799_vm4 }
 0xdfc   : > { %15921 = vmatprep.mubr.msk.f32.mxu1 %vm23852_vm7, %v12141_v16  ;;  %vm23860_vm7 = vmmov %vm23799_vm4 }
 0xdff   : > { %15922 = vmatmul.mubr.msk.f32.gmra.mrb[100].mxu1 %vm23854_vm10, %v12174_v27  ;;  %vm23862_vm10 = vmmov %vm23799_vm4 }
 0xe00   : > { %15924 = vmatprep.mubr.msk.f32.mxu1 %vm23855_vm12, %v12143_v32  ;;  %vm23863_vm12 = vmmov %vm23799_vm4 }
 0xe03   : > { %15925 = vmatmul.mubr.msk.f32.gmra.mrb[102].mxu1 %vm23799_vm4, %v12176_v40 }
 0xe04   : > { %15927 = vmatprep.mubr.msk.f32.mxu1 %vm23857_vm5, %v12145_v52  ;;  %vm23866_vm5 = vmmov %vm23799_vm4 }
 0xe07   : > { %15928 = vmatmul.mubr.msk.f32.gmra.mrb[104].mxu1 %vm23859_vm9, %v12178_v58  ;;  %vm23869_vm9 = vmmov %vm23799_vm4 }
 0xe08   : > { %15930 = vmatprep.mubr.msk.f32.mxu1 %vm23860_vm7, %v12147_v60  ;;  %vm23870_vm7 = vmmov %vm23799_vm4 }
 0xe0b   : > { %15931 = vmatmul.mubr.msk.f32.gmra.mrb[106].mxu1 %vm23862_vm10, %v12180_v46  ;;  %vm23873_vm10 = vmmov %vm23799_vm4 }
 0xe0c   : > { %15933 = vmatprep.mubr.msk.f32.mxu1 %vm23863_vm12, %v12149_v25  ;;  %vm23874_vm12 = vmmov %vm23799_vm4 }
 0xe0f   : > { %15934 = vmatmul.mubr.msk.f32.gmra.mrb[108].mxu1 %vm23799_vm4, %v12182_v48 }
 0xe10   : > { %15936 = vmatprep.mubr.msk.f32.mxu1 %vm23866_vm5, %v12151_v39  ;;  %vm23877_vm5 = vnez %v23749_v42  ;;  %v12163_v42 = vld [vmem:[#allocation2 + $0xe9] sm:$0xff] }
 0xe11   : > { %v12190_v29 = vsel %vm23877_vm5, %v12158_v57, 0.0  ;;  %vm23897_vm5 = vmmov %vm23896_vm2 }
 0xe13   : > { %15937 = vmatmul.mubr.msk.f32.gmra.mrb[110].mxu1 %vm23869_vm9, %v12184_v56  ;;  %vm23879_vm9 = vmmov %vm23799_vm4 }
 0xe14   : > { %15939 = vmatprep.mubr.msk.f32.mxu1 %vm23870_vm7, %v12153_v6  ;;  %vm23880_vm7 = vmmov %vm23799_vm4 }
 0xe17   : > { %15940 = vmatmul.mubr.msk.f32.gmra.mrb[112].mxu1 %vm23873_vm10, %v12186_v17  ;;  %vm23884_vm10 = vmmov %vm23881_vm1 }
 0xe18   : > { %15942 = vmatprep.mubr.msk.f32.mxu1 %vm23874_vm12, %v12155_v31  ;;  %vm23885_vm12 = vmmov %vm23881_vm1 }
 0xe1b   : > { %15943 = vmatmul.mubr.msk.f32.gmra.mrb[114].mxu1 %vm23876_vm14, %v12188_v59  ;;  %vm23887_vm14 = vmmov %vm23881_vm1 }
 0xe1c   : > { %15945 = vmatprep.mubr.msk.f32.mxu1 %vm23799_vm4, %v12157_v19  ;;  %vm23891_vm4 = vmmov %vm23888_vm0 }
 0xe1f   : > { %15946 = vmatmul.mubr.msk.f32.gmra.mrb[116].mxu1 %vm23878_vm13, %v12190_v29  ;;  %vm23898_vm13 = vmmov %vm23896_vm2 }
 0xe20   : > { %15948 = vmatprep.mubr.msk.f32.mxu1 %vm23879_vm9, %v12159_v11  ;;  %vm23899_vm9 = vmmov %vm23896_vm2 }
 0xe23   : > { %15949 = vmatmul.mubr.msk.f32.gmra.mrb[118].mxu1 %vm23880_vm7, %v12192_v8  ;;  %vm23900_vm7 = vmmov %vm23896_vm2 }
 0xe24   : > { %15951 = vmatprep.mubr.msk.f32.mxu1 %vm23881_vm1, %v12161_v28  ;;  %vm23901_vm1 = vmmov %vm23896_vm2 }
 0xe27   : > { %15952 = vmatmul.mubr.msk.f32.gmra.mrb[120].mxu1 %vm23883_vm11, %v12194_v10  ;;  %vm23902_vm11 = vmmov %vm23901_vm1 }
 0xe28   : > { %15954 = vmatprep.mubr.msk.f32.mxu1 %vm23884_vm10, %v12163_v42  ;;  %vm23903_vm10 = vmmov %vm23901_vm1 }
 0xe2b   : > { %15955 = vmatmul.mubr.msk.f32.gmra.mrb[122].mxu1 %vm23885_vm12, %v12196_v55  ;;  %vm23904_vm12 = vmmov %vm23901_vm1 }
 0xe2c   : > { %15957 = vmatprep.mubr.msk.f32.mxu1 %vm23886_vm8, %v12165_v33  ;;  %vm23905_vm8 = vmmov %vm23901_vm1 }
 0xe2f   : > { %15958 = vmatmul.mubr.msk.f32.gmra.mrb[124].mxu1 %vm23887_vm14, %v12198_v12  ;;  %vm23906_vm14 = vmmov %vm23901_vm1 }
 0xe30   : > { %15960 = vmatprep.mubr.msk.f32.mxu1 %vm23888_vm0, %v22075_v4  ;;  %v22324_v4 = vld [vmem:[%s23894_s30] ss:$0 sm:$0xff]  ;;  %vm23907_vm0 = vmmov %vm23901_vm1 }
 0xe33   : > { %15961 = vmatmul.mubr.msk.f32.gmra.mrb[126].mxu1 %vm23890_vm15, %v12200_v21  ;;  %vm23908_vm15 = vmmov %vm23907_vm0 }
 0xe34   : > { %15963 = vmatprep.mubr.msk.f32.mxu1 %vm23891_vm4, %v12169_v5  ;;  %vm23909_vm4 = vmmov %vm23907_vm0 }
 0xe37   : > { %15964 = vmatmul.mubr.msk.f32.gmra.mrb[128].mxu1 %vm23893_vm6, %v12202_v50  ;;  %vm23910_vm6 = vmmov %vm23907_vm0 }
 0xece   : > { %v15920_v14 = vpop.f32.mrb[34].mxu1 }
 0xecf   : > { %v12573_v43 = vadd.f32 %v15920_v14, %v22324_v4  ;;  %v12374_v35 = vpop.f32.mrb[35].mxu1 }
 0xed0   : > { %v12572_v45 = vadd.f32 %v22324_v4, %v12374_v35 }
 0xed1   : > { %v12605_v20 = vmax.f32 %v12573_v43, 0.0 }
 0xed2   : > { %v12604_v34 = vmax.f32 %v12572_v45, 0.0  ;;  %v15923_v62 = vpop.f32.mrb[100].mxu1 }
 0xed3   : > { %12637 = vst.msk [vmem:[%s22329_s0 + $0x8] sm:$0xff] %vm23895_vm3, %v12605_v20  ;;  %v12575_v22 = vadd.f32 %v15923_v62, %v22324_v4  ;;  %v12384_v37 = vpop.f32.mrb[101].mxu1  ;;  %vm23911_vm3 = vmmov %vm23907_vm0 }
 0xed4   : > { %12636 = vst.msk [vmem:[%s22329_s0] sm:$0xff] %vm23896_vm2, %v12604_v34  ;;  %v12574_v26 = vadd.f32 %v22324_v4, %v12384_v37  ;;  %vm23912_vm2 = vmmov %vm23907_vm0 }
 0xed5   : > { %v12607_v44 = vmax.f32 %v12575_v22, 0.0 }
 0xed6   : > { %v12606_v38 = vmax.f32 %v12574_v26, 0.0  ;;  %v15926_v51 = vpop.f32.mrb[102].mxu1 }
 0xed7   : > { %12639 = vst.msk [vmem:[%s22329_s0 + $0x18] sm:$0xff] %vm23897_vm5, %v12607_v44  ;;  %v12577_v16 = vadd.f32 %v15926_v51, %v22324_v4  ;;  %v12394_v13 = vpop.f32.mrb[103].mxu1  ;;  %vm23913_vm5 = vmmov %vm23907_vm0 }
 0xed8   : > { %12638 = vst.msk [vmem:[%s22329_s0 + $0x10] sm:$0xff] %vm23898_vm13, %v12606_v38  ;;  %v12576_v27 = vadd.f32 %v22324_v4, %v12394_v13  ;;  %vm23914_vm13 = vmmov %vm23907_vm0 }
 0xed9   : > { %v12609_v32 = vmax.f32 %v12577_v16, 0.0 }
 0xeda   : > { %v12608_v0 = vmax.f32 %v12576_v27, 0.0  ;;  %v15929_v40 = vpop.f32.mrb[104].mxu1 }
 0xedb   : > { %12641 = vst.msk [vmem:[%s22329_s0 + $0x28] sm:$0xff] %vm23899_vm9, %v12609_v32  ;;  %v12579_v52 = vadd.f32 %v15929_v40, %v22324_v4  ;;  %v12404_v63 = vpop.f32.mrb[105].mxu1  ;;  %vm23915_vm9 = vmmov %vm23907_vm0 }
 0xedc   : > { %12640 = vst.msk [vmem:[%s22329_s0 + $0x20] sm:$0xff] %vm23900_vm7, %v12608_v0  ;;  %v12578_v58 = vadd.f32 %v22324_v4, %v12404_v63  ;;  %vm23916_vm7 = vmmov %vm23907_vm0 }
 0xedd   : > { %v12611_v60 = vmax.f32 %v12579_v52, 0.0 }
 0xede   : > { %v12610_v15 = vmax.f32 %v12578_v58, 0.0  ;;  %v15932_v46 = vpop.f32.mrb[106].mxu1 }
 0xedf   : > { %12643 = vst.msk [vmem:[%s22329_s0 + $0x38] sm:$0xff] %vm23901_vm1, %v12611_v60  ;;  %v12581_v25 = vadd.f32 %v15932_v46, %v22324_v4  ;;  %v12414_v24 = vpop.f32.mrb[107].mxu1  ;;  %vm23917_vm1 = vmmov %vm23907_vm0 }
 0xee0   : > { %12642 = vst.msk [vmem:[%s22329_s0 + $0x30] sm:$0xff] %vm23902_vm11, %v12610_v15  ;;  %v12580_v47 = vadd.f32 %v22324_v4, %v12414_v24  ;;  %vm23918_vm11 = vmmov %vm23907_vm0 }
 0xee1   : > { %v12613_v48 = vmax.f32 %v12581_v25, 0.0 }
 0xee2   : > { %v12612_v39 = vmax.f32 %v12580_v47, 0.0  ;;  %v15935_v9 = vpop.f32.mrb[108].mxu1 }
 0xee3   : > { %12645 = vst.msk [vmem:[%s22329_s0 + $0x48] sm:$0xff] %vm23903_vm10, %v12613_v48  ;;  %v12583_v3 = vadd.f32 %v15935_v9, %v22324_v4  ;;  %v12424_v56 = vpop.f32.mrb[109].mxu1  ;;  %vm23919_vm10 = vmmov %vm23907_vm0 }
 0xee4   : > { %12644 = vst.msk [vmem:[%s22329_s0 + $0x40] sm:$0xff] %vm23904_vm12, %v12612_v39  ;;  %v12582_v6 = vadd.f32 %v22324_v4, %v12424_v56  ;;  %vm23920_vm12 = vmmov %vm23907_vm0 }
 0xee5   : > { %v12615_v41 = vmax.f32 %v12583_v3, 0.0 }
 0xee6   : > { %v12614_v23 = vmax.f32 %v12582_v6, 0.0  ;;  %v15938_v17 = vpop.f32.mrb[110].mxu1 }
 0xee7   : > { %12647 = vst.msk [vmem:[%s22329_s0 + $0x58] sm:$0xff] %vm23905_vm8, %v12615_v41  ;;  %v12585_v31 = vadd.f32 %v15938_v17, %v22324_v4  ;;  %v12434_v61 = vpop.f32.mrb[111].mxu1  ;;  %vm23921_vm8 = vmmov %vm23907_vm0 }
 0xee8   : > { %12646 = vst.msk [vmem:[%s22329_s0 + $0x50] sm:$0xff] %vm23906_vm14, %v12614_v23  ;;  %v12584_v1 = vadd.f32 %v22324_v4, %v12434_v61  ;;  %vm23922_vm14 = vmmov %vm23907_vm0 }
 0xee9   : > { %v12617_v59 = vmax.f32 %v12585_v31, 0.0 }
 0xeea   : > { %v12616_v19 = vmax.f32 %v12584_v1, 0.0  ;;  %v15941_v57 = vpop.f32.mrb[112].mxu1 }
 0xeeb   : > { %12649 = vst.msk [vmem:[%s22329_s0 + $0x68] sm:$0xff] %vm23907_vm0, %v12617_v59  ;;  %v12587_v29 = vadd.f32 %v15941_v57, %v22324_v4  ;;  %v12444_v11 = vpop.f32.mrb[113].mxu1 }
 0xeec   : > { %12648 = vst.msk [vmem:[%s22329_s0 + $0x60] sm:$0xff] %vm23908_vm15, %v12616_v19  ;;  %v12586_v7 = vadd.f32 %v22324_v4, %v12444_v11  ;;  %vm23924_vm15 = vmmov %vm23907_vm0 }
 0xeed   : > { %v12619_v8 = vmax.f32 %v12587_v29, 0.0 }
 0xeee   : > { %v12618_v28 = vmax.f32 %v12586_v7, 0.0  ;;  %v15944_v36 = vpop.f32.mrb[114].mxu1 }
 0xeef   : > { %12651 = vst.msk [vmem:[%s22329_s0 + $0x78] sm:$0xff] %vm23909_vm4, %v12619_v8  ;;  %v12589_v53 = vadd.f32 %v15944_v36, %v22324_v4  ;;  %v12454_v10 = vpop.f32.mrb[115].mxu1  ;;  %vm23926_vm4 = vmmov %vm23907_vm0 }
 0xef0   : > { %12650 = vst.msk [vmem:[%s22329_s0 + $0x70] sm:$0xff] %vm23910_vm6, %v12618_v28  ;;  %v12588_v42 = vadd.f32 %v22324_v4, %v12454_v10  ;;  %vm23927_vm6 = vmmov %vm23907_vm0 }
 0xef1   : > { %v12621_v49 = vmax.f32 %v12589_v53, 0.0 }
 0xef2   : > { %v12620_v55 = vmax.f32 %v12588_v42, 0.0  ;;  %v15947_v33 = vpop.f32.mrb[116].mxu1 }
 0xef3   : > { %12653 = vst.msk [vmem:[%s22329_s0 + $0x88] sm:$0xff] %vm23911_vm3, %v12621_v49  ;;  %v12591_v30 = vadd.f32 %v15947_v33, %v22324_v4  ;;  %v12464_v12 = vpop.f32.mrb[117].mxu1 }
 0xef4   : > { %12652 = vst.msk [vmem:[%s22329_s0 + $0x80] sm:$0xff] %vm23912_vm2, %v12620_v55  ;;  %v12590_v5 = vadd.f32 %v22324_v4, %v12464_v12 }
 0xef5   : > { %v12623_v54 = vmax.f32 %v12591_v30, 0.0 }
 0xef6   : > { %v12622_v18 = vmax.f32 %v12590_v5, 0.0  ;;  %v15950_v21 = vpop.f32.mrb[118].mxu1 }
 0xef7   : > { %12655 = vst.msk [vmem:[%s22329_s0 + $0x98] sm:$0xff] %vm23913_vm5, %v12623_v54  ;;  %v12593_v2 = vadd.f32 %v15950_v21, %v22324_v4  ;;  %v12474_v50 = vpop.f32.mrb[119].mxu1 }
 0xef8   : > { %12654 = vst.msk [vmem:[%s22329_s0 + $0x90] sm:$0xff] %vm23914_vm13, %v12622_v18  ;;  %v12592_v14 = vadd.f32 %v22324_v4, %v12474_v50 }
 0xef9   : > { %v12625_v43 = vmax.f32 %v12593_v2, 0.0 }
 0xefa   : > { %v12624_v35 = vmax.f32 %v12592_v14, 0.0  ;;  %v15953_v45 = vpop.f32.mrb[120].mxu1 }
 0xefb   : > { %12657 = vst.msk [vmem:[%s22329_s0 + $0xa8] sm:$0xff] %vm23915_vm9, %v12625_v43  ;;  %v12595_v20 = vadd.f32 %v15953_v45, %v22324_v4  ;;  %v12484_v34 = vpop.f32.mrb[121].mxu1 }
 0xefc   : > { %12656 = vst.msk [vmem:[%s22329_s0 + $0xa0] sm:$0xff] %vm23916_vm7, %v12624_v35  ;;  %v12594_v62 = vadd.f32 %v22324_v4, %v12484_v34 }
 0xefd   : > { %v12627_v22 = vmax.f32 %v12595_v20, 0.0 }
 0xefe   : > { %v12626_v37 = vmax.f32 %v12594_v62, 0.0  ;;  %v15956_v26 = vpop.f32.mrb[122].mxu1 }
 0xeff   : > { %12659 = vst.msk [vmem:[%s22329_s0 + $0xb8] sm:$0xff] %vm23917_vm1, %v12627_v22  ;;  %v12597_v44 = vadd.f32 %v15956_v26, %v22324_v4  ;;  %v12494_v38 = vpop.f32.mrb[123].mxu1 }
 0xf00   : > { %12658 = vst.msk [vmem:[%s22329_s0 + $0xb0] sm:$0xff] %vm23918_vm11, %v12626_v37  ;;  %v12596_v51 = vadd.f32 %v22324_v4, %v12494_v38 }
 0xf01   : > { %v12629_v16 = vmax.f32 %v12597_v44, 0.0 }
 0xf02   : > { %v12628_v13 = vmax.f32 %v12596_v51, 0.0  ;;  %v15959_v27 = vpop.f32.mrb[124].mxu1 }
 0xf03   : > { %12661 = vst.msk [vmem:[%s22329_s0 + $0xc8] sm:$0xff] %vm23919_vm10, %v12629_v16  ;;  %v12599_v32 = vadd.f32 %v15959_v27, %v22324_v4  ;;  %v12504_v0 = vpop.f32.mrb[125].mxu1 }
 0xf04   : > { %12660 = vst.msk [vmem:[%s22329_s0 + $0xc0] sm:$0xff] %vm23920_vm12, %v12628_v13  ;;  %v12598_v40 = vadd.f32 %v22324_v4, %v12504_v0 }
 0xf05   : > { %v12631_v52 = vmax.f32 %v12599_v32, 0.0 }
 0xf06   : > { %v12630_v63 = vmax.f32 %v12598_v40, 0.0  ;;  %v15962_v58 = vpop.f32.mrb[126].mxu1 }
 0xf07   : > { %12663 = vst.msk [vmem:[%s22329_s0 + $0xd8] sm:$0xff] %vm23921_vm8, %v12631_v52  ;;  %v12601_v60 = vadd.f32 %v15962_v58, %v22324_v4  ;;  %v12514_v15 = vpop.f32.mrb[127].mxu1 }
 0xf08   : > { %12662 = vst.msk [vmem:[%s22329_s0 + $0xd0] sm:$0xff] %vm23922_vm14, %v12630_v63  ;;  %v12600_v46 = vadd.f32 %v22324_v4, %v12514_v15 }
 0xf09   : > { %v12633_v25 = vmax.f32 %v12601_v60, 0.0 }
 0xf0a   : > { %v12632_v24 = vmax.f32 %v12600_v46, 0.0  ;;  %v15965_v47 = vpop.f32.mrb[128].mxu1 }
 0xf0b   : > { %12665 = vst.msk [vmem:[%s22329_s0 + $0xe8] sm:$0xff] %vm23907_vm0, %v12633_v25  ;;  %v12603_v48 = vadd.f32 %v15965_v47, %v22324_v4  ;;  %v12524_v39 = vpop.f32.mrb[129].mxu1 }
 0xf0c   : > { %12664 = vst.msk [vmem:[%s22329_s0 + $0xe0] sm:$0xff] %vm23924_vm15, %v12632_v24  ;;  %v12602_v9 = vadd.f32 %v22324_v4, %v12524_v39 }
 0xf0d   : > { %v12635_v3 = vmax.f32 %v12603_v48, 0.0 }
 0xf0e   : > { %v12634_v56 = vmax.f32 %v12602_v9, 0.0 }
 0xf0f   : > { %12667 = vst.msk [vmem:[%s22329_s0 + $0xf8] sm:$0xff] %vm23926_vm4, %v12635_v3 }
 0xf10   : > { %12666 = vst.msk [vmem:[%s22329_s0 + $0xf0] sm:$0xff] %vm23927_vm6, %v12634_v56 }
 0xf11   : > { %17245 = shalt.err (!%p17242_p6)
}
 0xf12   : > { %s17246_s18 = scalar_lea.hbm %s22426_s23, 4096  ;;  %s17250_s30 = scalar_lea.hbm %s23925_s12, 8192 }
 0xf13   : > { %p17247_p8 = scmp.ne.s32.totalorder %s22426_s23, %s17246_s18  ;;  %p17251_p4 = scmp.lt.u32.totalorder %s22426_s23, %s23925_s12 }
 0xf14   : > { %p17252_p11 = scmp.lt.u32.totalorder %s17250_s30, %s17246_s18  ;;  %p17254_p3 = scmp.lt.u32.totalorder %s17246_s18, %s22426_s23 }
 0xf15   : > { %p17248_p10 = pnand %p17247_p8, %p17502_p12 }
 0xf16   : > { %p17253_p13 = por %p17252_p11, %p17251_p4 }
 0xf17   : > { %p17249_p0 = pneg %p17248_p10 }
 0xf18   : > { %p17255_p7 = por %p17254_p3, %p17253_p13 }
 0xf1a   : > { %p17256_p9 = pnand %p17255_p7, %p17249_p0 }
 0xf1c   : > { %17259 = shalt.err (!%p17256_p9)
}
 0xf1d   : > { %s17321_s21 = smov 128   ;;  %s17322_s29 = smov 8  }
 0xf1e   : > { %16802 = dma.vmem_to_hbm [thread:$0]  (%p17502_p12), %s22428_s16, 4096, %s22426_s23, %s12669_s25, %s17321_s21, %s17321_s21, %s17322_s29  }
 0xf1f PF: > { %s23928_s26 = sld [smem:[#allocation14_spill]]  ;;  %s23929_s19 = sld [smem:[#allocation16_spill]] }
 0xf20   : > { %p23931_p5 = scmp.ge.s32.totalorder %s17306_s24, 2 }
 0xf25   : > { %s12697_s10 = sand.u32 1, %s23928_s26   ;;  %p23930_p1 = scmp.ne.s32.totalorder %s23929_s19, 0 }
 0xf26   : > { %s12698_s13 = scalar_lea.sflag [#allocation5], %s12697_s10 }
 0xf27   : > { %p16816_p2 = pnand %p23931_p5, %p23930_p1 }
 0xf29   : > { %17289 = dma.done.wait (!%p16816_p2), %s12698_s13, 4096  }
 0xf2a   : > { %17291 = vsyncadd (!%p16816_p2), %s12698_s13, 4294963200  ;;  %s23932_s24 = sld [smem:[#allocation17_spill]]  ;;  %s23933_s18 = sld [smem:[#allocation15_spill]] }
 0xf2b   : > { %s23934_s23 = sld [smem:[#allocation18_spill]]  ;;  %s23935_s21 = smov %s17298_s22 }
 0xf30   : > { %p32_p6 = scmp.ge.s32.totalorder %s23932_s24, 4   ;;  %s23936_s22 = smov %s23933_s18 }
 0xf32   :  { %34 = sbr.rel (!%p32_p6) target bundleno = 17 (0x11), region = 162 }
 0xf39   :  { %12703 = vsyncpa [#allocation4], 1 }
 0xf3a   :  { %12705 = vsyncpa [#allocation4 + $0x1], 1 }
 0xf3b   :  { %12706 = vsyncpa [#allocation7], 1 }
 0xf3c   :  { %12708 = vsyncpa [#allocation7 + $0x1], 1 }
 0xf3d   :  { %12709 = vsyncpa [#allocation5], 1 }
 0xf3e   :  { %12711 = vsyncpa [#allocation5 + $0x1], 1 }

</bundles_post_ra>
